<compile_context>
chip_gen: v7x
topology: tpu7x:2x2x1
jax: 0.10.0
libtpu: 0.0.40
codegen_flags: <defaults>
</compile_context>

<pallas_src>
import functools

import jax
import jax.numpy as jnp
from jax.experimental import pallas as pl
from jax.experimental.pallas import tpu as pltpu


def _round_up(x, m):
    return (x + m - 1) // m * m


# ---------------------------------------------------------------------------
# Matmul kernel: tiled MXU, bf16 inputs, f32 accumulate, fused bias (+tanh)
# ---------------------------------------------------------------------------
def _matmul_bias_kernel(a_ref, b_ref, bias_ref, o_ref, acc_ref, *, activation, tk):
    k = pl.program_id(2)

    @pl.when(k == 0)
    def _():
        acc_ref[...] = jnp.zeros_like(acc_ref)

    koff = pl.multiple_of(k * tk, tk)
    acc_ref[...] += jnp.dot(
        a_ref[...], b_ref[pl.ds(koff, tk), :], preferred_element_type=jnp.float32
    )

    @pl.when(k == pl.num_programs(2) - 1)
    def _():
        out = acc_ref[...] + bias_ref[...]
        if activation == "tanh":
            out = jnp.tanh(out)
        o_ref[...] = out.astype(o_ref.dtype)


def _choose_tk(K):
    """Largest TK in {512,384,256,128} whose K zero-padding is <= 20%."""
    base = _round_up(K, 128)
    for cand in (512, 384, 256, 128):
        kp = _round_up(K, cand)
        if kp * 5 <= base * 6:  # <= 20% padding overhead
            return cand, kp
    return 128, base


def pallas_matmul_bias(a, b, bias, activation=None, out_dtype=jnp.bfloat16):
    """act(a @ b + bias); bf16 MXU inputs, f32 accumulation, weight VMEM-resident."""
    M, K = a.shape
    K2, N = b.shape
    assert K == K2

    Np = _round_up(N, 128)
    TN = 256 if Np % 256 == 0 else 128
    TK, Kp = _choose_tk(K)
    # bf16 packs 2 rows / sublane -> TM multiple of 16.  Cap TM at 256 when the
    # N axis has a single block so the second TensorCore (v7x) still gets work.
    TMr = _round_up(M, 16)
    TM = min(512 if Np // TN >= 2 else 256, TMr)
    Mp = _round_up(M, TM)

    a = a.astype(jnp.bfloat16)
    b = b.astype(jnp.bfloat16)
    if Mp != M or Kp != K:
        a = jnp.pad(a, ((0, Mp - M), (0, Kp - K)))
    if Kp != K or Np != N:
        b = jnp.pad(b, ((0, Kp - K), (0, Np - N)))
    bias_p = bias.astype(jnp.float32).reshape(1, N)
    if Np != N:
        bias_p = jnp.pad(bias_p, ((0, 0), (0, Np - N)))

    grid = (Mp // TM, Np // TN, Kp // TK)

    out = pl.pallas_call(
        functools.partial(_matmul_bias_kernel, activation=activation, tk=TK),
        out_shape=jax.ShapeDtypeStruct((Mp, Np), out_dtype),
        grid_spec=pltpu.PrefetchScalarGridSpec(
            num_scalar_prefetch=0,
            grid=grid,
            in_specs=[
                pl.BlockSpec((TM, TK), lambda i, j, k: (i, k)),
                pl.BlockSpec((Kp, TN), lambda i, j, k: (0, j)),  # weight resident
                pl.BlockSpec((1, TN), lambda i, j, k: (0, j)),
            ],
            out_specs=pl.BlockSpec((TM, TN), lambda i, j, k: (i, j)),
            scratch_shapes=[pltpu.VMEM((TM, TN), jnp.float32)],
        ),
        compiler_params=pltpu.CompilerParams(
            dimension_semantics=("parallel", "parallel", "arbitrary")
        ),
    )(a, b, bias_p)

    if Mp != M or Np != N:
        out = out[:M, :N]
    return out


# ---------------------------------------------------------------------------
# InstanceNorm: HW-tiled stats pass + fused normalize/ReLU/residual pass
# ---------------------------------------------------------------------------
def _in_stats_kernel(x_ref, sum_ref, sq_ref, sum_acc, sq_acc):
    h = pl.program_id(2)

    @pl.when(h == 0)
    def _():
        sum_acc[...] = jnp.zeros_like(sum_acc)
        sq_acc[...] = jnp.zeros_like(sq_acc)

    x = x_ref[...].astype(jnp.float32)
    sum_acc[...] += jnp.sum(x, axis=1, keepdims=True)
    sq_acc[...] += jnp.sum(x * x, axis=1, keepdims=True)

    @pl.when(h == pl.num_programs(2) - 1)
    def _():
        sum_ref[...] = sum_acc[...]
        sq_ref[...] = sq_acc[...]


def _in_norm_kernel(x_ref, mean_ref, rstd_ref, o_ref, *, relu):
    y = (x_ref[...].astype(jnp.float32) - mean_ref[...]) * rstd_ref[...]
    if relu:
        y = jnp.maximum(y, 0.0)
    o_ref[...] = y.astype(o_ref.dtype)


def _in_norm_add_kernel(x_ref, mean_ref, rstd_ref, skip_ref, o_ref):
    y = (x_ref[...].astype(jnp.float32) - mean_ref[...]) * rstd_ref[...]
    o_ref[...] = (skip_ref[...].astype(jnp.float32) + y).astype(o_ref.dtype)


def _pick_hw_tile(hw, max_tile=2048):
    if hw <= max_tile:
        return hw
    for cand in range(max_tile, 7, -8):
        if hw % cand == 0:
            return cand
    return hw


def pallas_instance_norm(x, *, relu, skip=None, eps=1e-5):
    """InstanceNorm2d (affine=False, eps=1e-5), fused ReLU or residual add.

    Two tiled passes over HW so block VMEM is resolution-independent.  When
    C < 128, spatial rows are folded into the lane dimension so every load /
    store is 128-lane dense.
    """
    N, H, W, C = x.shape
    HW = H * W
    if C % 128 != 0 and 128 % C == 0 and HW % (128 // C) == 0:
        fold = 128 // C
    else:
        fold = 1
    Cf = C * fold
    HWf = HW // fold
    cb = 128 if Cf % 128 == 0 else Cf
    hb = _pick_hw_tile(HWf)
    grid = (N, Cf // cb, HWf // hb)

    xr = x.reshape(N, HWf, Cf)
    x_spec = pl.BlockSpec((1, hb, cb), lambda n, c, h: (n, h, c))
    s_spec = pl.BlockSpec((1, 1, cb), lambda n, c, h: (n, 0, c))

    # Pass 1: per-(sample, lane) sum / sum-of-squares, reduced over HW tiles.
    ssum, ssq = pl.pallas_call(
        _in_stats_kernel,
        out_shape=(
            jax.ShapeDtypeStruct((N, 1, Cf), jnp.float32),
            jax.ShapeDtypeStruct((N, 1, Cf), jnp.float32),
        ),
        grid=grid,
        in_specs=[x_spec],
        out_specs=[s_spec, s_spec],
        scratch_shapes=[
            pltpu.VMEM((1, 1, cb), jnp.float32),
            pltpu.VMEM((1, 1, cb), jnp.float32),
        ],
        compiler_params=pltpu.CompilerParams(
            dimension_semantics=("parallel", "parallel", "arbitrary")
        ),
    )(xr)

    # Tiny finalize on (N, C) scalars: combine fold groups, biased var, rsqrt.
    ssum = ssum.reshape(N, fold, C).sum(axis=1)
    ssq = ssq.reshape(N, fold, C).sum(axis=1)
    mean = ssum / HW
    var = jnp.maximum(ssq / HW - mean * mean, 0.0)
    rstd = jax.lax.rsqrt(var + eps)
    mean_f = jnp.tile(mean, (1, fold)).reshape(N, 1, Cf)
    rstd_f = jnp.tile(rstd, (1, fold)).reshape(N, 1, Cf)

    # Pass 2: normalize (+ReLU or +residual add), fully parallel tiles.
    cparams = pltpu.CompilerParams(
        dimension_semantics=("parallel", "parallel", "parallel")
    )
    out_shape = jax.ShapeDtypeStruct((N, HWf, Cf), x.dtype)
    if skip is None:
        out = pl.pallas_call(
            functools.partial(_in_norm_kernel, relu=relu),
            out_shape=out_shape,
            grid=grid,
            in_specs=[x_spec, s_spec, s_spec],
            out_specs=x_spec,
            compiler_params=cparams,
        )(xr, mean_f, rstd_f)
    else:
        out = pl.pallas_call(
            _in_norm_add_kernel,
            out_shape=out_shape,
            grid=grid,
            in_specs=[x_spec, s_spec, s_spec, x_spec],
            out_specs=x_spec,
            compiler_params=cparams,
        )(xr, mean_f, rstd_f, skip.reshape(N, HWf, Cf))
    return out.reshape(N, H, W, C)


# ---------------------------------------------------------------------------
# Conv = im2col (JAX glue, bf16, K pre-padded) + tiled Pallas matmul
# ---------------------------------------------------------------------------
def _im2col(xp, kh, kw, stride, k_pad_to):
    N, Hp, Wp, C = xp.shape
    OH = (Hp - kh) // stride + 1
    OW = (Wp - kw) // stride + 1
    cols = []
    for i in range(kh):
        for j in range(kw):
            cols.append(
                xp[:, i:i + stride * (OH - 1) + 1:stride,
                      j:j + stride * (OW - 1) + 1:stride, :]
            )
    K = kh * kw * C
    if k_pad_to > K:
        cols.append(jnp.zeros((N, OH, OW, k_pad_to - K), xp.dtype))
    patches = jnp.concatenate(cols, axis=-1)  # (N, OH, OW, k_pad_to)
    return patches.reshape(N * OH * OW, k_pad_to), (N, OH, OW)


def conv2d(x, w, b, *, stride=1, padding=0, pad_mode="zeros", activation=None,
           out_dtype=jnp.bfloat16):
    # x: (N, H, W, C) NHWC ; w: (OC, IC, KH, KW) torch layout ; b: (OC,)
    if padding > 0:
        mode = "reflect" if pad_mode == "reflect" else "constant"
        x = jnp.pad(
            x, ((0, 0), (padding, padding), (padding, padding), (0, 0)), mode=mode
        )
    OC, IC, KH, KW = w.shape
    K = KH * KW * IC
    _, Kp = _choose_tk(K)  # fold the matmul K padding into the im2col concat
    patches, (N, OH, OW) = _im2col(x.astype(jnp.bfloat16), KH, KW, stride, Kp)
    wmat = jnp.transpose(w, (2, 3, 1, 0)).reshape(K, OC).astype(jnp.bfloat16)
    if Kp > K:
        wmat = jnp.pad(wmat, ((0, Kp - K), (0, 0)))
    out = pallas_matmul_bias(patches, wmat, b, activation=activation,
                             out_dtype=out_dtype)
    return out.reshape(N, OH, OW, OC)


def upsample_nearest_2x(x):
    # nn.Upsample(scale_factor=2), default mode='nearest'
    return jnp.repeat(jnp.repeat(x, 2, axis=1), 2, axis=2)


# ---------------------------------------------------------------------------
# Generator parameters + forward
# ---------------------------------------------------------------------------
def init_generator_params(key, input_channels=3):
    def conv_init(k, oc, ic, ksz):
        kw_key, kb_key = jax.random.split(k)
        w = jax.random.normal(kw_key, (oc, ic, ksz, ksz), jnp.float32) * 0.05
        b = jax.random.normal(kb_key, (oc,), jnp.float32) * 0.01
        return w, b

    keys = iter(jax.random.split(key, 32))
    params = {}
    params["c0"] = conv_init(next(keys), 64, input_channels, 7)
    params["d1"] = conv_init(next(keys), 128, 64, 3)
    params["d2"] = conv_init(next(keys), 256, 128, 3)
    for r in range(6):
        params[f"r{r}a"] = conv_init(next(keys), 256, 256, 3)
        params[f"r{r}b"] = conv_init(next(keys), 256, 256, 3)
    params["u1"] = conv_init(next(keys), 128, 256, 3)
    params["u2"] = conv_init(next(keys), 64, 128, 3)
    params["co"] = conv_init(next(keys), 3, 64, 7)
    return params


def generator_forward(params, x_nchw, input_channels=3):
    x = jnp.transpose(x_nchw, (0, 2, 3, 1)).astype(jnp.bfloat16)  # NCHW -> NHWC

    # Stem: ReflectionPad2d(input_channels) + Conv 7x7 + IN + ReLU
    w, b = params["c0"]
    y = conv2d(x, w, b, stride=1, padding=input_channels, pad_mode="reflect")
    y = pallas_instance_norm(y, relu=True)

    # Two stride-2 downsampling blocks
    w, b = params["d1"]
    y = conv2d(y, w, b, stride=2, padding=1)
    y = pallas_instance_norm(y, relu=True)
    w, b = params["d2"]
    y = conv2d(y, w, b, stride=2, padding=1)
    y = pallas_instance_norm(y, relu=True)

    # 6 residual blocks (second IN fused with the residual add)
    for r in range(6):
        skip = y
        w, b = params[f"r{r}a"]
        y = conv2d(y, w, b, padding=1, pad_mode="reflect")
        y = pallas_instance_norm(y, relu=True)
        w, b = params[f"r{r}b"]
        y = conv2d(y, w, b, padding=1, pad_mode="reflect")
        y = pallas_instance_norm(y, relu=False, skip=skip)

    # Two nearest-upsample + conv blocks
    y = upsample_nearest_2x(y)
    w, b = params["u1"]
    y = conv2d(y, w, b, padding=1)
    y = pallas_instance_norm(y, relu=True)
    y = upsample_nearest_2x(y)
    w, b = params["u2"]
    y = conv2d(y, w, b, padding=1)
    y = pallas_instance_norm(y, relu=True)

    # Output head: ReflectionPad2d(input_channels) + Conv 7x7 + Tanh
    # (tanh fused into the matmul epilogue, stored bf16)
    w, b = params["co"]
    y = conv2d(y, w, b, padding=input_channels, pad_mode="reflect",
               activation="tanh")

    return jnp.transpose(y, (0, 3, 1, 2)).astype(jnp.float32)  # back to NCHW f32


if __name__ == "__main__":
    input_channels = 3
    key = jax.random.PRNGKey(0)
    pkey, xkey = jax.random.split(key)

    params = init_generator_params(pkey, input_channels)
    x = jax.random.normal(xkey, (2, input_channels, 16, 16), jnp.float32)

    fwd = jax.jit(functools.partial(generator_forward, input_channels=input_channels))
    y = jax.block_until_ready(fwd(params, x))

    assert y.shape == (2, 3, 16, 16), y.shape
    assert bool(jnp.all(jnp.isfinite(y)))
    assert bool(jnp.all(jnp.abs(y) <= 1.0))  # tanh output range
    print("KERNEL_OK")
</pallas_src>

<mosaic_0001>
module attributes {stable_mosaic.version = 11 : i64} {
  func.func @_matmul_bias_kernel(%arg0: i32, %arg1: i32, %arg2: i32, %arg3: memref<256x256xbf16, #tpu.memory_space<vmem>>, %arg4: memref<256x128xbf16, #tpu.memory_space<vmem>>, %arg5: memref<1x128xf32, #tpu.memory_space<vmem>>, %arg6: memref<256x128xbf16, #tpu.memory_space<vmem>>, %arg7: memref<256x128xf32, #tpu.memory_space<vmem>>) attributes {dimension_semantics = [#tpu.dimension_semantics<parallel>, #tpu.dimension_semantics<parallel>, #tpu.dimension_semantics<arbitrary>], iteration_bounds = array<i64: 2, 1, 1>, scalar_prefetch = 0 : i64, scratch_operands = 1 : i64, tpu.core_type = #tpu.core_type<tc>, window_params = [{transform_indices = @transform_0, window_bounds = array<i64: 256, 256>}, {transform_indices = @transform_1, window_bounds = array<i64: 256, 128>}, {transform_indices = @transform_2, window_bounds = array<i64: 1, 128>}, {transform_indices = @transform_3, window_bounds = array<i64: 256, 128>}]} {
    %c0_i32 = arith.constant 0 : i32
    %0 = arith.cmpi eq, %arg2, %c0_i32 : i32
    %1 = arith.extui %0 : i1 to i32
    %c0_i32_0 = arith.constant 0 : i32
    %2 = arith.cmpi ne, %1, %c0_i32_0 : i32
    scf.if %2 {
      %cst_9 = arith.constant 0.000000e+00 : f32
      %15 = vector.broadcast %cst_9 : f32 to vector<256x128xf32>
      %c0_10 = arith.constant 0 : index
      %c0_11 = arith.constant 0 : index
      %16 = vector.load %arg7[%c0_10, %c0_11] : memref<256x128xf32, #tpu.memory_space<vmem>>, vector<256x128xf32>
      tpu.vector_store %arg7[%c0_10, %c0_11], %15 {strides = array<i32>} : memref<256x128xf32, #tpu.memory_space<vmem>>, vector<256x128xf32>,
    } else {
    }
    %c256_i32 = arith.constant 256 : i32
    %3 = arith.muli %arg2, %c256_i32 : i32
    %4 = tpu.assume_multiple %3, 256 : i32
    %c0 = arith.constant 0 : index
    %c0_1 = arith.constant 0 : index
    %5 = vector.load %arg7[%c0, %c0_1] : memref<256x128xf32, #tpu.memory_space<vmem>>, vector<256x128xf32>
    %c0_2 = arith.constant 0 : index
    %c0_3 = arith.constant 0 : index
    %6 = vector.load %arg3[%c0_2, %c0_3] : memref<256x256xbf16, #tpu.memory_space<vmem>>, vector<256x256xbf16>
    %7 = arith.index_cast %4 : i32 to index
    %c0_4 = arith.constant 0 : index
    %8 = vector.load %arg4[%7, %c0_4] : memref<256x128xbf16, #tpu.memory_space<vmem>>, vector<256x128xbf16>
    %cst = arith.constant dense<0.000000e+00> : vector<256x128xf32>
    %9 = tpu.matmul %6, %8, %cst {dimension_numbers = #tpu.dot_dimension_numbers<[1], [0], [0], [1], [0, 0, 1, 1], [], []>} : vector<256x256xbf16>, vector<256x128xbf16>, vector<256x128xf32> -> vector<256x128xf32>
    %10 = arith.addf %5, %9 : vector<256x128xf32>
    %c0_5 = arith.constant 0 : index
    %c0_6 = arith.constant 0 : index
    %11 = vector.load %arg7[%c0_5, %c0_6] : memref<256x128xf32, #tpu.memory_space<vmem>>, vector<256x128xf32>
    tpu.vector_store %arg7[%c0_5, %c0_6], %10 {strides = array<i32>} : memref<256x128xf32, #tpu.memory_space<vmem>>, vector<256x128xf32>,
    %c0_i32_7 = arith.constant 0 : i32
    %12 = arith.cmpi eq, %arg2, %c0_i32_7 : i32
    %13 = arith.extui %12 : i1 to i32
    %c0_i32_8 = arith.constant 0 : i32
    %14 = arith.cmpi ne, %13, %c0_i32_8 : i32
    scf.if %14 {
      %c0_9 = arith.constant 0 : index
      %c0_10 = arith.constant 0 : index
      %15 = vector.load %arg7[%c0_9, %c0_10] : memref<256x128xf32, #tpu.memory_space<vmem>>, vector<256x128xf32>
      %c0_11 = arith.constant 0 : index
      %c0_12 = arith.constant 0 : index
      %16 = vector.load %arg5[%c0_11, %c0_12] : memref<1x128xf32, #tpu.memory_space<vmem>>, vector<1x128xf32>
      %17 = vector.broadcast %16 : vector<1x128xf32> to vector<256x128xf32>
      %18 = arith.addf %15, %17 : vector<256x128xf32>
      %19 = arith.truncf %18 : vector<256x128xf32> to vector<256x128xbf16>
      %c0_13 = arith.constant 0 : index
      %c0_14 = arith.constant 0 : index
      %20 = vector.load %arg6[%c0_13, %c0_14] : memref<256x128xbf16, #tpu.memory_space<vmem>>, vector<256x128xbf16>
      tpu.vector_store %arg6[%c0_13, %c0_14], %19 {strides = array<i32>} : memref<256x128xbf16, #tpu.memory_space<vmem>>, vector<256x128xbf16>,
    } else {
    }
    return
  }
  func.func @transform_0(%arg0: i32, %arg1: i32, %arg2: i32) -> (i32, i32) {
    %c0_i32 = arith.constant 0 : i32
    return %arg0, %arg2 : i32, i32
  }
  func.func @transform_1(%arg0: i32, %arg1: i32, %arg2: i32) -> (i32, i32) {
    %c0_i32 = arith.constant 0 : i32
    %c0_i32_0 = arith.constant 0 : i32
    return %c0_i32, %arg1 : i32, i32
  }
  func.func @transform_2(%arg0: i32, %arg1: i32, %arg2: i32) -> (i32, i32) {
    %c0_i32 = arith.constant 0 : i32
    %c0_i32_0 = arith.constant 0 : i32
    return %c0_i32, %arg1 : i32, i32
  }
  func.func @transform_3(%arg0: i32, %arg1: i32, %arg2: i32) -> (i32, i32) {
    %c0_i32 = arith.constant 0 : i32
    return %arg0, %arg1 : i32, i32
  }
}

module attributes {stable_mosaic.version = 11 : i64} {
  func.func @_in_stats_kernel(%arg0: i32, %arg1: i32, %arg2: i32, %arg3: memref<1x128x128xbf16, #tpu.memory_space<vmem>>, %arg4: memref<1x1x128xf32, #tpu.memory_space<vmem>>, %arg5: memref<1x1x128xf32, #tpu.memory_space<vmem>>, %arg6: memref<1x1x128xf32, #tpu.memory_space<vmem>>, %arg7: memref<1x1x128xf32, #tpu.memory_space<vmem>>) attributes {dimension_semantics = [#tpu.dimension_semantics<parallel>, #tpu.dimension_semantics<parallel>, #tpu.dimension_semantics<arbitrary>], iteration_bounds = array<i64: 2, 1, 1>, scalar_prefetch = 0 : i64, scratch_operands = 2 : i64, tpu.core_type = #tpu.core_type<tc>, window_params = [{transform_indices = @transform_0, window_bounds = array<i64: 1, 128, 128>}, {transform_indices = @transform_1, window_bounds = array<i64: 1, 1, 128>}, {transform_indices = @transform_2, window_bounds = array<i64: 1, 1, 128>}]} {
    %c0_i32 = arith.constant 0 : i32
    %0 = arith.cmpi eq, %arg2, %c0_i32 : i32
    %1 = arith.extui %0 : i1 to i32
    %c0_i32_0 = arith.constant 0 : i32
    %2 = arith.cmpi ne, %1, %c0_i32_0 : i32
    scf.if %2 {
      %cst_18 = arith.constant 0.000000e+00 : f32
      %19 = vector.broadcast %cst_18 : f32 to vector<1x1x128xf32>
      %c0_19 = arith.constant 0 : index
      %c0_20 = arith.constant 0 : index
      %c0_21 = arith.constant 0 : index
      %20 = vector.load %arg6[%c0_19, %c0_20, %c0_21] : memref<1x1x128xf32, #tpu.memory_space<vmem>>, vector<1x1x128xf32>
      tpu.vector_store %arg6[%c0_19, %c0_20, %c0_21], %19 {strides = array<i32>} : memref<1x1x128xf32, #tpu.memory_space<vmem>>, vector<1x1x128xf32>,
      %cst_22 = arith.constant 0.000000e+00 : f32
      %21 = vector.broadcast %cst_22 : f32 to vector<1x1x128xf32>
      %c0_23 = arith.constant 0 : index
      %c0_24 = arith.constant 0 : index
      %c0_25 = arith.constant 0 : index
      %22 = vector.load %arg7[%c0_23, %c0_24, %c0_25] : memref<1x1x128xf32, #tpu.memory_space<vmem>>, vector<1x1x128xf32>
      tpu.vector_store %arg7[%c0_23, %c0_24, %c0_25], %21 {strides = array<i32>} : memref<1x1x128xf32, #tpu.memory_space<vmem>>, vector<1x1x128xf32>,
    } else {
    }
    %c0 = arith.constant 0 : index
    %c0_1 = arith.constant 0 : index
    %c0_2 = arith.constant 0 : index
    %3 = vector.load %arg3[%c0, %c0_1, %c0_2] : memref<1x128x128xbf16, #tpu.memory_space<vmem>>, vector<1x128x128xbf16>
    %4 = arith.extf %3 : vector<1x128x128xbf16> to vector<1x128x128xf32>
    %c0_3 = arith.constant 0 : index
    %c0_4 = arith.constant 0 : index
    %c0_5 = arith.constant 0 : index
    %5 = vector.load %arg6[%c0_3, %c0_4, %c0_5] : memref<1x1x128xf32, #tpu.memory_space<vmem>>, vector<1x1x128xf32>
    %cst = arith.constant dense<0.000000e+00> : vector<1x128xf32>
    %6 = vector.multi_reduction <add>, %4, %cst [1] : vector<1x128x128xf32> to vector<1x128xf32>
    %7 = vector.shape_cast %6 : vector<1x128xf32> to vector<1x1x128xf32>
    %8 = arith.addf %5, %7 : vector<1x1x128xf32>
    %c0_6 = arith.constant 0 : index
    %c0_7 = arith.constant 0 : index
    %c0_8 = arith.constant 0 : index
    %9 = vector.load %arg6[%c0_6, %c0_7, %c0_8] : memref<1x1x128xf32, #tpu.memory_space<vmem>>, vector<1x1x128xf32>
    tpu.vector_store %arg6[%c0_6, %c0_7, %c0_8], %8 {strides = array<i32>} : memref<1x1x128xf32, #tpu.memory_space<vmem>>, vector<1x1x128xf32>,
    %c0_9 = arith.constant 0 : index
    %c0_10 = arith.constant 0 : index
    %c0_11 = arith.constant 0 : index
    %10 = vector.load %arg7[%c0_9, %c0_10, %c0_11] : memref<1x1x128xf32, #tpu.memory_space<vmem>>, vector<1x1x128xf32>
    %11 = arith.mulf %4, %4 : vector<1x128x128xf32>
    %cst_12 = arith.constant dense<0.000000e+00> : vector<1x128xf32>
    %12 = vector.multi_reduction <add>, %11, %cst_12 [1] : vector<1x128x128xf32> to vector<1x128xf32>
    %13 = vector.shape_cast %12 : vector<1x128xf32> to vector<1x1x128xf32>
    %14 = arith.addf %10, %13 : vector<1x1x128xf32>
    %c0_13 = arith.constant 0 : index
    %c0_14 = arith.constant 0 : index
    %c0_15 = arith.constant 0 : index
    %15 = vector.load %arg7[%c0_13, %c0_14, %c0_15] : memref<1x1x128xf32, #tpu.memory_space<vmem>>, vector<1x1x128xf32>
    tpu.vector_store %arg7[%c0_13, %c0_14, %c0_15], %14 {strides = array<i32>} : memref<1x1x128xf32, #tpu.memory_space<vmem>>, vector<1x1x128xf32>,
    %c0_i32_16 = arith.constant 0 : i32
    %16 = arith.cmpi eq, %arg2, %c0_i32_16 : i32
    %17 = arith.extui %16 : i1 to i32
    %c0_i32_17 = arith.constant 0 : i32
    %18 = arith.cmpi ne, %17, %c0_i32_17 : i32
    scf.if %18 {
      %c0_18 = arith.constant 0 : index
      %c0_19 = arith.constant 0 : index
      %c0_20 = arith.constant 0 : index
      %19 = vector.load %arg6[%c0_18, %c0_19, %c0_20] : memref<1x1x128xf32, #tpu.memory_space<vmem>>, vector<1x1x128xf32>
      %c0_21 = arith.constant 0 : index
      %c0_22 = arith.constant 0 : index
      %c0_23 = arith.constant 0 : index
      %20 = vector.load %arg4[%c0_21, %c0_22, %c0_23] : memref<1x1x128xf32, #tpu.memory_space<vmem>>, vector<1x1x128xf32>
      tpu.vector_store %arg4[%c0_21, %c0_22, %c0_23], %19 {strides = array<i32>} : memref<1x1x128xf32, #tpu.memory_space<vmem>>, vector<1x1x128xf32>,
      %c0_24 = arith.constant 0 : index
      %c0_25 = arith.constant 0 : index
      %c0_26 = arith.constant 0 : index
      %21 = vector.load %arg7[%c0_24, %c0_25, %c0_26] : memref<1x1x128xf32, #tpu.memory_space<vmem>>, vector<1x1x128xf32>
      %c0_27 = arith.constant 0 : index
      %c0_28 = arith.constant 0 : index
      %c0_29 = arith.constant 0 : index
      %22 = vector.load %arg5[%c0_27, %c0_28, %c0_29] : memref<1x1x128xf32, #tpu.memory_space<vmem>>, vector<1x1x128xf32>
      tpu.vector_store %arg5[%c0_27, %c0_28, %c0_29], %21 {strides = array<i32>} : memref<1x1x128xf32, #tpu.memory_space<vmem>>, vector<1x1x128xf32>,
    } else {
    }
    return
  }
  func.func @transform_0(%arg0: i32, %arg1: i32, %arg2: i32) -> (i32, i32, i32) {
    %c0_i32 = arith.constant 0 : i32
    return %arg0, %arg2, %arg1 : i32, i32, i32
  }
  func.func @transform_1(%arg0: i32, %arg1: i32, %arg2: i32) -> (i32, i32, i32) {
    %c0_i32 = arith.constant 0 : i32
    %c0_i32_0 = arith.constant 0 : i32
    return %arg0, %c0_i32, %arg1 : i32, i32, i32
  }
  func.func @transform_2(%arg0: i32, %arg1: i32, %arg2: i32) -> (i32, i32, i32) {
    %c0_i32 = arith.constant 0 : i32
    %c0_i32_0 = arith.constant 0 : i32
    return %arg0, %c0_i32, %arg1 : i32, i32, i32
  }
}

module attributes {stable_mosaic.version = 11 : i64} {
  func.func @_in_norm_kernel(%arg0: i32, %arg1: i32, %arg2: i32, %arg3: memref<1x128x128xbf16, #tpu.memory_space<vmem>>, %arg4: memref<1x1x128xf32, #tpu.memory_space<vmem>>, %arg5: memref<1x1x128xf32, #tpu.memory_space<vmem>>, %arg6: memref<1x128x128xbf16, #tpu.memory_space<vmem>>) attributes {dimension_semantics = [#tpu.dimension_semantics<parallel>, #tpu.dimension_semantics<parallel>, #tpu.dimension_semantics<parallel>], iteration_bounds = array<i64: 2, 1, 1>, scalar_prefetch = 0 : i64, scratch_operands = 0 : i64, tpu.core_type = #tpu.core_type<tc>, window_params = [{transform_indices = @transform_0, window_bounds = array<i64: 1, 128, 128>}, {transform_indices = @transform_1, window_bounds = array<i64: 1, 1, 128>}, {transform_indices = @transform_2, window_bounds = array<i64: 1, 1, 128>}, {transform_indices = @transform_3, window_bounds = array<i64: 1, 128, 128>}]} {
    %c0 = arith.constant 0 : index
    %c0_0 = arith.constant 0 : index
    %c0_1 = arith.constant 0 : index
    %0 = vector.load %arg3[%c0, %c0_0, %c0_1] : memref<1x128x128xbf16, #tpu.memory_space<vmem>>, vector<1x128x128xbf16>
    %1 = arith.extf %0 : vector<1x128x128xbf16> to vector<1x128x128xf32>
    %c0_2 = arith.constant 0 : index
    %c0_3 = arith.constant 0 : index
    %c0_4 = arith.constant 0 : index
    %2 = vector.load %arg4[%c0_2, %c0_3, %c0_4] : memref<1x1x128xf32, #tpu.memory_space<vmem>>, vector<1x1x128xf32>
    %3 = vector.broadcast %2 : vector<1x1x128xf32> to vector<1x128x128xf32>
    %4 = arith.subf %1, %3 : vector<1x128x128xf32>
    %c0_5 = arith.constant 0 : index
    %c0_6 = arith.constant 0 : index
    %c0_7 = arith.constant 0 : index
    %5 = vector.load %arg5[%c0_5, %c0_6, %c0_7] : memref<1x1x128xf32, #tpu.memory_space<vmem>>, vector<1x1x128xf32>
    %6 = vector.broadcast %5 : vector<1x1x128xf32> to vector<1x128x128xf32>
    %7 = arith.mulf %4, %6 : vector<1x128x128xf32>
    %cst = arith.constant 0.000000e+00 : f32
    %8 = vector.broadcast %cst : f32 to vector<1x128x128xf32>
    %9 = arith.maximumf %7, %8 : vector<1x128x128xf32>
    %10 = arith.truncf %9 : vector<1x128x128xf32> to vector<1x128x128xbf16>
    %c0_8 = arith.constant 0 : index
    %c0_9 = arith.constant 0 : index
    %c0_10 = arith.constant 0 : index
    %11 = vector.load %arg6[%c0_8, %c0_9, %c0_10] : memref<1x128x128xbf16, #tpu.memory_space<vmem>>, vector<1x128x128xbf16>
    tpu.vector_store %arg6[%c0_8, %c0_9, %c0_10], %10 {strides = array<i32>} : memref<1x128x128xbf16, #tpu.memory_space<vmem>>, vector<1x128x128xbf16>,
    return
  }
  func.func @transform_0(%arg0: i32, %arg1: i32, %arg2: i32) -> (i32, i32, i32) {
    %c0_i32 = arith.constant 0 : i32
    return %arg0, %arg2, %arg1 : i32, i32, i32
  }
  func.func @transform_1(%arg0: i32, %arg1: i32, %arg2: i32) -> (i32, i32, i32) {
    %c0_i32 = arith.constant 0 : i32
    %c0_i32_0 = arith.constant 0 : i32
    return %arg0, %c0_i32, %arg1 : i32, i32, i32
  }
  func.func @transform_2(%arg0: i32, %arg1: i32, %arg2: i32) -> (i32, i32, i32) {
    %c0_i32 = arith.constant 0 : i32
    %c0_i32_0 = arith.constant 0 : i32
    return %arg0, %c0_i32, %arg1 : i32, i32, i32
  }
  func.func @transform_3(%arg0: i32, %arg1: i32, %arg2: i32) -> (i32, i32, i32) {
    %c0_i32 = arith.constant 0 : i32
    return %arg0, %arg2, %arg1 : i32, i32, i32
  }
}

module attributes {stable_mosaic.version = 11 : i64} {
  func.func @_in_stats_kernel(%arg0: i32, %arg1: i32, %arg2: i32, %arg3: memref<1x64x128xbf16, #tpu.memory_space<vmem>>, %arg4: memref<1x1x128xf32, #tpu.memory_space<vmem>>, %arg5: memref<1x1x128xf32, #tpu.memory_space<vmem>>, %arg6: memref<1x1x128xf32, #tpu.memory_space<vmem>>, %arg7: memref<1x1x128xf32, #tpu.memory_space<vmem>>) attributes {dimension_semantics = [#tpu.dimension_semantics<parallel>, #tpu.dimension_semantics<parallel>, #tpu.dimension_semantics<arbitrary>], iteration_bounds = array<i64: 2, 1, 1>, scalar_prefetch = 0 : i64, scratch_operands = 2 : i64, tpu.core_type = #tpu.core_type<tc>, window_params = [{transform_indices = @transform_0, window_bounds = array<i64: 1, 64, 128>}, {transform_indices = @transform_1, window_bounds = array<i64: 1, 1, 128>}, {transform_indices = @transform_2, window_bounds = array<i64: 1, 1, 128>}]} {
    %c0_i32 = arith.constant 0 : i32
    %0 = arith.cmpi eq, %arg2, %c0_i32 : i32
    %1 = arith.extui %0 : i1 to i32
    %c0_i32_0 = arith.constant 0 : i32
    %2 = arith.cmpi ne, %1, %c0_i32_0 : i32
    scf.if %2 {
      %cst_18 = arith.constant 0.000000e+00 : f32
      %19 = vector.broadcast %cst_18 : f32 to vector<1x1x128xf32>
      %c0_19 = arith.constant 0 : index
      %c0_20 = arith.constant 0 : index
      %c0_21 = arith.constant 0 : index
      %20 = vector.load %arg6[%c0_19, %c0_20, %c0_21] : memref<1x1x128xf32, #tpu.memory_space<vmem>>, vector<1x1x128xf32>
      tpu.vector_store %arg6[%c0_19, %c0_20, %c0_21], %19 {strides = array<i32>} : memref<1x1x128xf32, #tpu.memory_space<vmem>>, vector<1x1x128xf32>,
      %cst_22 = arith.constant 0.000000e+00 : f32
      %21 = vector.broadcast %cst_22 : f32 to vector<1x1x128xf32>
      %c0_23 = arith.constant 0 : index
      %c0_24 = arith.constant 0 : index
      %c0_25 = arith.constant 0 : index
      %22 = vector.load %arg7[%c0_23, %c0_24, %c0_25] : memref<1x1x128xf32, #tpu.memory_space<vmem>>, vector<1x1x128xf32>
      tpu.vector_store %arg7[%c0_23, %c0_24, %c0_25], %21 {strides = array<i32>} : memref<1x1x128xf32, #tpu.memory_space<vmem>>, vector<1x1x128xf32>,
    } else {
    }
    %c0 = arith.constant 0 : index
    %c0_1 = arith.constant 0 : index
    %c0_2 = arith.constant 0 : index
    %3 = vector.load %arg3[%c0, %c0_1, %c0_2] : memref<1x64x128xbf16, #tpu.memory_space<vmem>>, vector<1x64x128xbf16>
    %4 = arith.extf %3 : vector<1x64x128xbf16> to vector<1x64x128xf32>
    %c0_3 = arith.constant 0 : index
    %c0_4 = arith.constant 0 : index
    %c0_5 = arith.constant 0 : index
    %5 = vector.load %arg6[%c0_3, %c0_4, %c0_5] : memref<1x1x128xf32, #tpu.memory_space<vmem>>, vector<1x1x128xf32>
    %cst = arith.constant dense<0.000000e+00> : vector<1x128xf32>
    %6 = vector.multi_reduction <add>, %4, %cst [1] : vector<1x64x128xf32> to vector<1x128xf32>
    %7 = vector.shape_cast %6 : vector<1x128xf32> to vector<1x1x128xf32>
    %8 = arith.addf %5, %7 : vector<1x1x128xf32>
    %c0_6 = arith.constant 0 : index
    %c0_7 = arith.constant 0 : index
    %c0_8 = arith.constant 0 : index
    %9 = vector.load %arg6[%c0_6, %c0_7, %c0_8] : memref<1x1x128xf32, #tpu.memory_space<vmem>>, vector<1x1x128xf32>
    tpu.vector_store %arg6[%c0_6, %c0_7, %c0_8], %8 {strides = array<i32>} : memref<1x1x128xf32, #tpu.memory_space<vmem>>, vector<1x1x128xf32>,
    %c0_9 = arith.constant 0 : index
    %c0_10 = arith.constant 0 : index
    %c0_11 = arith.constant 0 : index
    %10 = vector.load %arg7[%c0_9, %c0_10, %c0_11] : memref<1x1x128xf32, #tpu.memory_space<vmem>>, vector<1x1x128xf32>
    %11 = arith.mulf %4, %4 : vector<1x64x128xf32>
    %cst_12 = arith.constant dense<0.000000e+00> : vector<1x128xf32>
    %12 = vector.multi_reduction <add>, %11, %cst_12 [1] : vector<1x64x128xf32> to vector<1x128xf32>
    %13 = vector.shape_cast %12 : vector<1x128xf32> to vector<1x1x128xf32>
    %14 = arith.addf %10, %13 : vector<1x1x128xf32>
    %c0_13 = arith.constant 0 : index
    %c0_14 = arith.constant 0 : index
    %c0_15 = arith.constant 0 : index
    %15 = vector.load %arg7[%c0_13, %c0_14, %c0_15] : memref<1x1x128xf32, #tpu.memory_space<vmem>>, vector<1x1x128xf32>
    tpu.vector_store %arg7[%c0_13, %c0_14, %c0_15], %14 {strides = array<i32>} : memref<1x1x128xf32, #tpu.memory_space<vmem>>, vector<1x1x128xf32>,
    %c0_i32_16 = arith.constant 0 : i32
    %16 = arith.cmpi eq, %arg2, %c0_i32_16 : i32
    %17 = arith.extui %16 : i1 to i32
    %c0_i32_17 = arith.constant 0 : i32
    %18 = arith.cmpi ne, %17, %c0_i32_17 : i32
    scf.if %18 {
      %c0_18 = arith.constant 0 : index
      %c0_19 = arith.constant 0 : index
      %c0_20 = arith.constant 0 : index
      %19 = vector.load %arg6[%c0_18, %c0_19, %c0_20] : memref<1x1x128xf32, #tpu.memory_space<vmem>>, vector<1x1x128xf32>
      %c0_21 = arith.constant 0 : index
      %c0_22 = arith.constant 0 : index
      %c0_23 = arith.constant 0 : index
      %20 = vector.load %arg4[%c0_21, %c0_22, %c0_23] : memref<1x1x128xf32, #tpu.memory_space<vmem>>, vector<1x1x128xf32>
      tpu.vector_store %arg4[%c0_21, %c0_22, %c0_23], %19 {strides = array<i32>} : memref<1x1x128xf32, #tpu.memory_space<vmem>>, vector<1x1x128xf32>,
      %c0_24 = arith.constant 0 : index
      %c0_25 = arith.constant 0 : index
      %c0_26 = arith.constant 0 : index
      %21 = vector.load %arg7[%c0_24, %c0_25, %c0_26] : memref<1x1x128xf32, #tpu.memory_space<vmem>>, vector<1x1x128xf32>
      %c0_27 = arith.constant 0 : index
      %c0_28 = arith.constant 0 : index
      %c0_29 = arith.constant 0 : index
      %22 = vector.load %arg5[%c0_27, %c0_28, %c0_29] : memref<1x1x128xf32, #tpu.memory_space<vmem>>, vector<1x1x128xf32>
      tpu.vector_store %arg5[%c0_27, %c0_28, %c0_29], %21 {strides = array<i32>} : memref<1x1x128xf32, #tpu.memory_space<vmem>>, vector<1x1x128xf32>,
    } else {
    }
    return
  }
  func.func @transform_0(%arg0: i32, %arg1: i32, %arg2: i32) -> (i32, i32, i32) {
    %c0_i32 = arith.constant 0 : i32
    return %arg0, %arg2, %arg1 : i32, i32, i32
  }
  func.func @transform_1(%arg0: i32, %arg1: i32, %arg2: i32) -> (i32, i32, i32) {
    %c0_i32 = arith.constant 0 : i32
    %c0_i32_0 = arith.constant 0 : i32
    return %arg0, %c0_i32, %arg1 : i32, i32, i32
  }
  func.func @transform_2(%arg0: i32, %arg1: i32, %arg2: i32) -> (i32, i32, i32) {
    %c0_i32 = arith.constant 0 : i32
    %c0_i32_0 = arith.constant 0 : i32
    return %arg0, %c0_i32, %arg1 : i32, i32, i32
  }
}

module attributes {stable_mosaic.version = 11 : i64} {
  func.func @_matmul_bias_kernel(%arg0: i32, %arg1: i32, %arg2: i32, %arg3: memref<128x384xbf16, #tpu.memory_space<vmem>>, %arg4: memref<768x128xbf16, #tpu.memory_space<vmem>>, %arg5: memref<1x128xf32, #tpu.memory_space<vmem>>, %arg6: memref<128x128xbf16, #tpu.memory_space<vmem>>, %arg7: memref<128x128xf32, #tpu.memory_space<vmem>>) attributes {dimension_semantics = [#tpu.dimension_semantics<parallel>, #tpu.dimension_semantics<parallel>, #tpu.dimension_semantics<arbitrary>], iteration_bounds = array<i64: 1, 1, 2>, scalar_prefetch = 0 : i64, scratch_operands = 1 : i64, tpu.core_type = #tpu.core_type<tc>, window_params = [{transform_indices = @transform_0, window_bounds = array<i64: 128, 384>}, {transform_indices = @transform_1, window_bounds = array<i64: 768, 128>}, {transform_indices = @transform_2, window_bounds = array<i64: 1, 128>}, {transform_indices = @transform_3, window_bounds = array<i64: 128, 128>}]} {
    %c0_i32 = arith.constant 0 : i32
    %0 = arith.cmpi eq, %arg2, %c0_i32 : i32
    %1 = arith.extui %0 : i1 to i32
    %c0_i32_0 = arith.constant 0 : i32
    %2 = arith.cmpi ne, %1, %c0_i32_0 : i32
    scf.if %2 {
      %cst_8 = arith.constant 0.000000e+00 : f32
      %15 = vector.broadcast %cst_8 : f32 to vector<128x128xf32>
      %c0_9 = arith.constant 0 : index
      %c0_10 = arith.constant 0 : index
      %16 = vector.load %arg7[%c0_9, %c0_10] : memref<128x128xf32, #tpu.memory_space<vmem>>, vector<128x128xf32>
      tpu.vector_store %arg7[%c0_9, %c0_10], %15 {strides = array<i32>} : memref<128x128xf32, #tpu.memory_space<vmem>>, vector<128x128xf32>,
    } else {
    }
    %c384_i32 = arith.constant 384 : i32
    %3 = arith.muli %arg2, %c384_i32 : i32
    %4 = tpu.assume_multiple %3, 384 : i32
    %c0 = arith.constant 0 : index
    %c0_1 = arith.constant 0 : index
    %5 = vector.load %arg7[%c0, %c0_1] : memref<128x128xf32, #tpu.memory_space<vmem>>, vector<128x128xf32>
    %c0_2 = arith.constant 0 : index
    %c0_3 = arith.constant 0 : index
    %6 = vector.load %arg3[%c0_2, %c0_3] : memref<128x384xbf16, #tpu.memory_space<vmem>>, vector<128x384xbf16>
    %7 = arith.index_cast %4 : i32 to index
    %c0_4 = arith.constant 0 : index
    %8 = vector.load %arg4[%7, %c0_4] : memref<768x128xbf16, #tpu.memory_space<vmem>>, vector<384x128xbf16>
    %cst = arith.constant dense<0.000000e+00> : vector<128x128xf32>
    %9 = tpu.matmul %6, %8, %cst {dimension_numbers = #tpu.dot_dimension_numbers<[1], [0], [0], [1], [0, 0, 1, 1], [], []>} : vector<128x384xbf16>, vector<384x128xbf16>, vector<128x128xf32> -> vector<128x128xf32>
    %10 = arith.addf %5, %9 : vector<128x128xf32>
    %c0_5 = arith.constant 0 : index
    %c0_6 = arith.constant 0 : index
    %11 = vector.load %arg7[%c0_5, %c0_6] : memref<128x128xf32, #tpu.memory_space<vmem>>, vector<128x128xf32>
    tpu.vector_store %arg7[%c0_5, %c0_6], %10 {strides = array<i32>} : memref<128x128xf32, #tpu.memory_space<vmem>>, vector<128x128xf32>,
    %c1_i32 = arith.constant 1 : i32
    %12 = arith.cmpi eq, %arg2, %c1_i32 : i32
    %13 = arith.extui %12 : i1 to i32
    %c0_i32_7 = arith.constant 0 : i32
    %14 = arith.cmpi ne, %13, %c0_i32_7 : i32
    scf.if %14 {
      %c0_8 = arith.constant 0 : index
      %c0_9 = arith.constant 0 : index
      %15 = vector.load %arg7[%c0_8, %c0_9] : memref<128x128xf32, #tpu.memory_space<vmem>>, vector<128x128xf32>
      %c0_10 = arith.constant 0 : index
      %c0_11 = arith.constant 0 : index
      %16 = vector.load %arg5[%c0_10, %c0_11] : memref<1x128xf32, #tpu.memory_space<vmem>>, vector<1x128xf32>
      %17 = vector.broadcast %16 : vector<1x128xf32> to vector<128x128xf32>
      %18 = arith.addf %15, %17 : vector<128x128xf32>
      %19 = arith.truncf %18 : vector<128x128xf32> to vector<128x128xbf16>
      %c0_12 = arith.constant 0 : index
      %c0_13 = arith.constant 0 : index
      %20 = vector.load %arg6[%c0_12, %c0_13] : memref<128x128xbf16, #tpu.memory_space<vmem>>, vector<128x128xbf16>
      tpu.vector_store %arg6[%c0_12, %c0_13], %19 {strides = array<i32>} : memref<128x128xbf16, #tpu.memory_space<vmem>>, vector<128x128xbf16>,
    } else {
    }
    return
  }
  func.func @transform_0(%arg0: i32, %arg1: i32, %arg2: i32) -> (i32, i32) {
    %c0_i32 = arith.constant 0 : i32
    return %arg0, %arg2 : i32, i32
  }
  func.func @transform_1(%arg0: i32, %arg1: i32, %arg2: i32) -> (i32, i32) {
    %c0_i32 = arith.constant 0 : i32
    %c0_i32_0 = arith.constant 0 : i32
    return %c0_i32, %arg1 : i32, i32
  }
  func.func @transform_2(%arg0: i32, %arg1: i32, %arg2: i32) -> (i32, i32) {
    %c0_i32 = arith.constant 0 : i32
    %c0_i32_0 = arith.constant 0 : i32
    return %c0_i32, %arg1 : i32, i32
  }
  func.func @transform_3(%arg0: i32, %arg1: i32, %arg2: i32) -> (i32, i32) {
    %c0_i32 = arith.constant 0 : i32
    return %arg0, %arg1 : i32, i32
  }
}

module attributes {stable_mosaic.version = 11 : i64} {
  func.func @_in_norm_kernel(%arg0: i32, %arg1: i32, %arg2: i32, %arg3: memref<1x64x128xbf16, #tpu.memory_space<vmem>>, %arg4: memref<1x1x128xf32, #tpu.memory_space<vmem>>, %arg5: memref<1x1x128xf32, #tpu.memory_space<vmem>>, %arg6: memref<1x64x128xbf16, #tpu.memory_space<vmem>>) attributes {dimension_semantics = [#tpu.dimension_semantics<parallel>, #tpu.dimension_semantics<parallel>, #tpu.dimension_semantics<parallel>], iteration_bounds = array<i64: 2, 1, 1>, scalar_prefetch = 0 : i64, scratch_operands = 0 : i64, tpu.core_type = #tpu.core_type<tc>, window_params = [{transform_indices = @transform_0, window_bounds = array<i64: 1, 64, 128>}, {transform_indices = @transform_1, window_bounds = array<i64: 1, 1, 128>}, {transform_indices = @transform_2, window_bounds = array<i64: 1, 1, 128>}, {transform_indices = @transform_3, window_bounds = array<i64: 1, 64, 128>}]} {
    %c0 = arith.constant 0 : index
    %c0_0 = arith.constant 0 : index
    %c0_1 = arith.constant 0 : index
    %0 = vector.load %arg3[%c0, %c0_0, %c0_1] : memref<1x64x128xbf16, #tpu.memory_space<vmem>>, vector<1x64x128xbf16>
    %1 = arith.extf %0 : vector<1x64x128xbf16> to vector<1x64x128xf32>
    %c0_2 = arith.constant 0 : index
    %c0_3 = arith.constant 0 : index
    %c0_4 = arith.constant 0 : index
    %2 = vector.load %arg4[%c0_2, %c0_3, %c0_4] : memref<1x1x128xf32, #tpu.memory_space<vmem>>, vector<1x1x128xf32>
    %3 = vector.broadcast %2 : vector<1x1x128xf32> to vector<1x64x128xf32>
    %4 = arith.subf %1, %3 : vector<1x64x128xf32>
    %c0_5 = arith.constant 0 : index
    %c0_6 = arith.constant 0 : index
    %c0_7 = arith.constant 0 : index
    %5 = vector.load %arg5[%c0_5, %c0_6, %c0_7] : memref<1x1x128xf32, #tpu.memory_space<vmem>>, vector<1x1x128xf32>
    %6 = vector.broadcast %5 : vector<1x1x128xf32> to vector<1x64x128xf32>
    %7 = arith.mulf %4, %6 : vector<1x64x128xf32>
    %cst = arith.constant 0.000000e+00 : f32
    %8 = vector.broadcast %cst : f32 to vector<1x64x128xf32>
    %9 = arith.maximumf %7, %8 : vector<1x64x128xf32>
    %10 = arith.truncf %9 : vector<1x64x128xf32> to vector<1x64x128xbf16>
    %c0_8 = arith.constant 0 : index
    %c0_9 = arith.constant 0 : index
    %c0_10 = arith.constant 0 : index
    %11 = vector.load %arg6[%c0_8, %c0_9, %c0_10] : memref<1x64x128xbf16, #tpu.memory_space<vmem>>, vector<1x64x128xbf16>
    tpu.vector_store %arg6[%c0_8, %c0_9, %c0_10], %10 {strides = array<i32>} : memref<1x64x128xbf16, #tpu.memory_space<vmem>>, vector<1x64x128xbf16>,
    return
  }
  func.func @transform_0(%arg0: i32, %arg1: i32, %arg2: i32) -> (i32, i32, i32) {
    %c0_i32 = arith.constant 0 : i32
    return %arg0, %arg2, %arg1 : i32, i32, i32
  }
  func.func @transform_1(%arg0: i32, %arg1: i32, %arg2: i32) -> (i32, i32, i32) {
    %c0_i32 = arith.constant 0 : i32
    %c0_i32_0 = arith.constant 0 : i32
    return %arg0, %c0_i32, %arg1 : i32, i32, i32
  }
  func.func @transform_2(%arg0: i32, %arg1: i32, %arg2: i32) -> (i32, i32, i32) {
    %c0_i32 = arith.constant 0 : i32
    %c0_i32_0 = arith.constant 0 : i32
    return %arg0, %c0_i32, %arg1 : i32, i32, i32
  }
  func.func @transform_3(%arg0: i32, %arg1: i32, %arg2: i32) -> (i32, i32, i32) {
    %c0_i32 = arith.constant 0 : i32
    return %arg0, %arg2, %arg1 : i32, i32, i32
  }
}

module attributes {stable_mosaic.version = 11 : i64} {
  func.func @_matmul_bias_kernel(%arg0: i32, %arg1: i32, %arg2: i32, %arg3: memref<32x384xbf16, #tpu.memory_space<vmem>>, %arg4: memref<1152x256xbf16, #tpu.memory_space<vmem>>, %arg5: memref<1x256xf32, #tpu.memory_space<vmem>>, %arg6: memref<32x256xbf16, #tpu.memory_space<vmem>>, %arg7: memref<32x256xf32, #tpu.memory_space<vmem>>) attributes {dimension_semantics = [#tpu.dimension_semantics<parallel>, #tpu.dimension_semantics<parallel>, #tpu.dimension_semantics<arbitrary>], iteration_bounds = array<i64: 1, 1, 3>, scalar_prefetch = 0 : i64, scratch_operands = 1 : i64, tpu.core_type = #tpu.core_type<tc>, window_params = [{transform_indices = @transform_0, window_bounds = array<i64: 32, 384>}, {transform_indices = @transform_1, window_bounds = array<i64: 1152, 256>}, {transform_indices = @transform_2, window_bounds = array<i64: 1, 256>}, {transform_indices = @transform_3, window_bounds = array<i64: 32, 256>}]} {
    %c0_i32 = arith.constant 0 : i32
    %0 = arith.cmpi eq, %arg2, %c0_i32 : i32
    %1 = arith.extui %0 : i1 to i32
    %c0_i32_0 = arith.constant 0 : i32
    %2 = arith.cmpi ne, %1, %c0_i32_0 : i32
    scf.if %2 {
      %cst_8 = arith.constant 0.000000e+00 : f32
      %15 = vector.broadcast %cst_8 : f32 to vector<32x256xf32>
      %c0_9 = arith.constant 0 : index
      %c0_10 = arith.constant 0 : index
      %16 = vector.load %arg7[%c0_9, %c0_10] : memref<32x256xf32, #tpu.memory_space<vmem>>, vector<32x256xf32>
      tpu.vector_store %arg7[%c0_9, %c0_10], %15 {strides = array<i32>} : memref<32x256xf32, #tpu.memory_space<vmem>>, vector<32x256xf32>,
    } else {
    }
    %c384_i32 = arith.constant 384 : i32
    %3 = arith.muli %arg2, %c384_i32 : i32
    %4 = tpu.assume_multiple %3, 384 : i32
    %c0 = arith.constant 0 : index
    %c0_1 = arith.constant 0 : index
    %5 = vector.load %arg7[%c0, %c0_1] : memref<32x256xf32, #tpu.memory_space<vmem>>, vector<32x256xf32>
    %c0_2 = arith.constant 0 : index
    %c0_3 = arith.constant 0 : index
    %6 = vector.load %arg3[%c0_2, %c0_3] : memref<32x384xbf16, #tpu.memory_space<vmem>>, vector<32x384xbf16>
    %7 = arith.index_cast %4 : i32 to index
    %c0_4 = arith.constant 0 : index
    %8 = vector.load %arg4[%7, %c0_4] : memref<1152x256xbf16, #tpu.memory_space<vmem>>, vector<384x256xbf16>
    %cst = arith.constant dense<0.000000e+00> : vector<32x256xf32>
    %9 = tpu.matmul %6, %8, %cst {dimension_numbers = #tpu.dot_dimension_numbers<[1], [0], [0], [1], [0, 0, 1, 1], [], []>} : vector<32x384xbf16>, vector<384x256xbf16>, vector<32x256xf32> -> vector<32x256xf32>
    %10 = arith.addf %5, %9 : vector<32x256xf32>
    %c0_5 = arith.constant 0 : index
    %c0_6 = arith.constant 0 : index
    %11 = vector.load %arg7[%c0_5, %c0_6] : memref<32x256xf32, #tpu.memory_space<vmem>>, vector<32x256xf32>
    tpu.vector_store %arg7[%c0_5, %c0_6], %10 {strides = array<i32>} : memref<32x256xf32, #tpu.memory_space<vmem>>, vector<32x256xf32>,
    %c2_i32 = arith.constant 2 : i32
    %12 = arith.cmpi eq, %arg2, %c2_i32 : i32
    %13 = arith.extui %12 : i1 to i32
    %c0_i32_7 = arith.constant 0 : i32
    %14 = arith.cmpi ne, %13, %c0_i32_7 : i32
    scf.if %14 {
      %c0_8 = arith.constant 0 : index
      %c0_9 = arith.constant 0 : index
      %15 = vector.load %arg7[%c0_8, %c0_9] : memref<32x256xf32, #tpu.memory_space<vmem>>, vector<32x256xf32>
      %c0_10 = arith.constant 0 : index
      %c0_11 = arith.constant 0 : index
      %16 = vector.load %arg5[%c0_10, %c0_11] : memref<1x256xf32, #tpu.memory_space<vmem>>, vector<1x256xf32>
      %17 = vector.broadcast %16 : vector<1x256xf32> to vector<32x256xf32>
      %18 = arith.addf %15, %17 : vector<32x256xf32>
      %19 = arith.truncf %18 : vector<32x256xf32> to vector<32x256xbf16>
      %c0_12 = arith.constant 0 : index
      %c0_13 = arith.constant 0 : index
      %20 = vector.load %arg6[%c0_12, %c0_13] : memref<32x256xbf16, #tpu.memory_space<vmem>>, vector<32x256xbf16>
      tpu.vector_store %arg6[%c0_12, %c0_13], %19 {strides = array<i32>} : memref<32x256xbf16, #tpu.memory_space<vmem>>, vector<32x256xbf16>,
    } else {
    }
    return
  }
  func.func @transform_0(%arg0: i32, %arg1: i32, %arg2: i32) -> (i32, i32) {
    %c0_i32 = arith.constant 0 : i32
    return %arg0, %arg2 : i32, i32
  }
  func.func @transform_1(%arg0: i32, %arg1: i32, %arg2: i32) -> (i32, i32) {
    %c0_i32 = arith.constant 0 : i32
    %c0_i32_0 = arith.constant 0 : i32
    return %c0_i32, %arg1 : i32, i32
  }
  func.func @transform_2(%arg0: i32, %arg1: i32, %arg2: i32) -> (i32, i32) {
    %c0_i32 = arith.constant 0 : i32
    %c0_i32_0 = arith.constant 0 : i32
    return %c0_i32, %arg1 : i32, i32
  }
  func.func @transform_3(%arg0: i32, %arg1: i32, %arg2: i32) -> (i32, i32) {
    %c0_i32 = arith.constant 0 : i32
    return %arg0, %arg1 : i32, i32
  }
}

module attributes {stable_mosaic.version = 11 : i64} {
  func.func @_in_stats_kernel(%arg0: i32, %arg1: i32, %arg2: i32, %arg3: memref<1x16x128xbf16, #tpu.memory_space<vmem>>, %arg4: memref<1x1x128xf32, #tpu.memory_space<vmem>>, %arg5: memref<1x1x128xf32, #tpu.memory_space<vmem>>, %arg6: memref<1x1x128xf32, #tpu.memory_space<vmem>>, %arg7: memref<1x1x128xf32, #tpu.memory_space<vmem>>) attributes {dimension_semantics = [#tpu.dimension_semantics<parallel>, #tpu.dimension_semantics<parallel>, #tpu.dimension_semantics<arbitrary>], iteration_bounds = array<i64: 2, 2, 1>, scalar_prefetch = 0 : i64, scratch_operands = 2 : i64, tpu.core_type = #tpu.core_type<tc>, window_params = [{transform_indices = @transform_0, window_bounds = array<i64: 1, 16, 128>}, {transform_indices = @transform_1, window_bounds = array<i64: 1, 1, 128>}, {transform_indices = @transform_2, window_bounds = array<i64: 1, 1, 128>}]} {
    %c0_i32 = arith.constant 0 : i32
    %0 = arith.cmpi eq, %arg2, %c0_i32 : i32
    %1 = arith.extui %0 : i1 to i32
    %c0_i32_0 = arith.constant 0 : i32
    %2 = arith.cmpi ne, %1, %c0_i32_0 : i32
    scf.if %2 {
      %cst_18 = arith.constant 0.000000e+00 : f32
      %19 = vector.broadcast %cst_18 : f32 to vector<1x1x128xf32>
      %c0_19 = arith.constant 0 : index
      %c0_20 = arith.constant 0 : index
      %c0_21 = arith.constant 0 : index
      %20 = vector.load %arg6[%c0_19, %c0_20, %c0_21] : memref<1x1x128xf32, #tpu.memory_space<vmem>>, vector<1x1x128xf32>
      tpu.vector_store %arg6[%c0_19, %c0_20, %c0_21], %19 {strides = array<i32>} : memref<1x1x128xf32, #tpu.memory_space<vmem>>, vector<1x1x128xf32>,
      %cst_22 = arith.constant 0.000000e+00 : f32
      %21 = vector.broadcast %cst_22 : f32 to vector<1x1x128xf32>
      %c0_23 = arith.constant 0 : index
      %c0_24 = arith.constant 0 : index
      %c0_25 = arith.constant 0 : index
      %22 = vector.load %arg7[%c0_23, %c0_24, %c0_25] : memref<1x1x128xf32, #tpu.memory_space<vmem>>, vector<1x1x128xf32>
      tpu.vector_store %arg7[%c0_23, %c0_24, %c0_25], %21 {strides = array<i32>} : memref<1x1x128xf32, #tpu.memory_space<vmem>>, vector<1x1x128xf32>,
    } else {
    }
    %c0 = arith.constant 0 : index
    %c0_1 = arith.constant 0 : index
    %c0_2 = arith.constant 0 : index
    %3 = vector.load %arg3[%c0, %c0_1, %c0_2] : memref<1x16x128xbf16, #tpu.memory_space<vmem>>, vector<1x16x128xbf16>
    %4 = arith.extf %3 : vector<1x16x128xbf16> to vector<1x16x128xf32>
    %c0_3 = arith.constant 0 : index
    %c0_4 = arith.constant 0 : index
    %c0_5 = arith.constant 0 : index
    %5 = vector.load %arg6[%c0_3, %c0_4, %c0_5] : memref<1x1x128xf32, #tpu.memory_space<vmem>>, vector<1x1x128xf32>
    %cst = arith.constant dense<0.000000e+00> : vector<1x128xf32>
    %6 = vector.multi_reduction <add>, %4, %cst [1] : vector<1x16x128xf32> to vector<1x128xf32>
    %7 = vector.shape_cast %6 : vector<1x128xf32> to vector<1x1x128xf32>
    %8 = arith.addf %5, %7 : vector<1x1x128xf32>
    %c0_6 = arith.constant 0 : index
    %c0_7 = arith.constant 0 : index
    %c0_8 = arith.constant 0 : index
    %9 = vector.load %arg6[%c0_6, %c0_7, %c0_8] : memref<1x1x128xf32, #tpu.memory_space<vmem>>, vector<1x1x128xf32>
    tpu.vector_store %arg6[%c0_6, %c0_7, %c0_8], %8 {strides = array<i32>} : memref<1x1x128xf32, #tpu.memory_space<vmem>>, vector<1x1x128xf32>,
    %c0_9 = arith.constant 0 : index
    %c0_10 = arith.constant 0 : index
    %c0_11 = arith.constant 0 : index
    %10 = vector.load %arg7[%c0_9, %c0_10, %c0_11] : memref<1x1x128xf32, #tpu.memory_space<vmem>>, vector<1x1x128xf32>
    %11 = arith.mulf %4, %4 : vector<1x16x128xf32>
    %cst_12 = arith.constant dense<0.000000e+00> : vector<1x128xf32>
    %12 = vector.multi_reduction <add>, %11, %cst_12 [1] : vector<1x16x128xf32> to vector<1x128xf32>
    %13 = vector.shape_cast %12 : vector<1x128xf32> to vector<1x1x128xf32>
    %14 = arith.addf %10, %13 : vector<1x1x128xf32>
    %c0_13 = arith.constant 0 : index
    %c0_14 = arith.constant 0 : index
    %c0_15 = arith.constant 0 : index
    %15 = vector.load %arg7[%c0_13, %c0_14, %c0_15] : memref<1x1x128xf32, #tpu.memory_space<vmem>>, vector<1x1x128xf32>
    tpu.vector_store %arg7[%c0_13, %c0_14, %c0_15], %14 {strides = array<i32>} : memref<1x1x128xf32, #tpu.memory_space<vmem>>, vector<1x1x128xf32>,
    %c0_i32_16 = arith.constant 0 : i32
    %16 = arith.cmpi eq, %arg2, %c0_i32_16 : i32
    %17 = arith.extui %16 : i1 to i32
    %c0_i32_17 = arith.constant 0 : i32
    %18 = arith.cmpi ne, %17, %c0_i32_17 : i32
    scf.if %18 {
      %c0_18 = arith.constant 0 : index
      %c0_19 = arith.constant 0 : index
      %c0_20 = arith.constant 0 : index
      %19 = vector.load %arg6[%c0_18, %c0_19, %c0_20] : memref<1x1x128xf32, #tpu.memory_space<vmem>>, vector<1x1x128xf32>
      %c0_21 = arith.constant 0 : index
      %c0_22 = arith.constant 0 : index
      %c0_23 = arith.constant 0 : index
      %20 = vector.load %arg4[%c0_21, %c0_22, %c0_23] : memref<1x1x128xf32, #tpu.memory_space<vmem>>, vector<1x1x128xf32>
      tpu.vector_store %arg4[%c0_21, %c0_22, %c0_23], %19 {strides = array<i32>} : memref<1x1x128xf32, #tpu.memory_space<vmem>>, vector<1x1x128xf32>,
      %c0_24 = arith.constant 0 : index
      %c0_25 = arith.constant 0 : index
      %c0_26 = arith.constant 0 : index
      %21 = vector.load %arg7[%c0_24, %c0_25, %c0_26] : memref<1x1x128xf32, #tpu.memory_space<vmem>>, vector<1x1x128xf32>
      %c0_27 = arith.constant 0 : index
      %c0_28 = arith.constant 0 : index
      %c0_29 = arith.constant 0 : index
      %22 = vector.load %arg5[%c0_27, %c0_28, %c0_29] : memref<1x1x128xf32, #tpu.memory_space<vmem>>, vector<1x1x128xf32>
      tpu.vector_store %arg5[%c0_27, %c0_28, %c0_29], %21 {strides = array<i32>} : memref<1x1x128xf32, #tpu.memory_space<vmem>>, vector<1x1x128xf32>,
    } else {
    }
    return
  }
  func.func @transform_0(%arg0: i32, %arg1: i32, %arg2: i32) -> (i32, i32, i32) {
    %c0_i32 = arith.constant 0 : i32
    return %arg0, %arg2, %arg1 : i32, i32, i32
  }
  func.func @transform_1(%arg0: i32, %arg1: i32, %arg2: i32) -> (i32, i32, i32) {
    %c0_i32 = arith.constant 0 : i32
    %c0_i32_0 = arith.constant 0 : i32
    return %arg0, %c0_i32, %arg1 : i32, i32, i32
  }
  func.func @transform_2(%arg0: i32, %arg1: i32, %arg2: i32) -> (i32, i32, i32) {
    %c0_i32 = arith.constant 0 : i32
    %c0_i32_0 = arith.constant 0 : i32
    return %arg0, %c0_i32, %arg1 : i32, i32, i32
  }
}

module attributes {stable_mosaic.version = 11 : i64} {
  func.func @_in_norm_kernel(%arg0: i32, %arg1: i32, %arg2: i32, %arg3: memref<1x16x128xbf16, #tpu.memory_space<vmem>>, %arg4: memref<1x1x128xf32, #tpu.memory_space<vmem>>, %arg5: memref<1x1x128xf32, #tpu.memory_space<vmem>>, %arg6: memref<1x16x128xbf16, #tpu.memory_space<vmem>>) attributes {dimension_semantics = [#tpu.dimension_semantics<parallel>, #tpu.dimension_semantics<parallel>, #tpu.dimension_semantics<parallel>], iteration_bounds = array<i64: 2, 2, 1>, scalar_prefetch = 0 : i64, scratch_operands = 0 : i64, tpu.core_type = #tpu.core_type<tc>, window_params = [{transform_indices = @transform_0, window_bounds = array<i64: 1, 16, 128>}, {transform_indices = @transform_1, window_bounds = array<i64: 1, 1, 128>}, {transform_indices = @transform_2, window_bounds = array<i64: 1, 1, 128>}, {transform_indices = @transform_3, window_bounds = array<i64: 1, 16, 128>}]} {
    %c0 = arith.constant 0 : index
    %c0_0 = arith.constant 0 : index
    %c0_1 = arith.constant 0 : index
    %0 = vector.load %arg3[%c0, %c0_0, %c0_1] : memref<1x16x128xbf16, #tpu.memory_space<vmem>>, vector<1x16x128xbf16>
    %1 = arith.extf %0 : vector<1x16x128xbf16> to vector<1x16x128xf32>
    %c0_2 = arith.constant 0 : index
    %c0_3 = arith.constant 0 : index
    %c0_4 = arith.constant 0 : index
    %2 = vector.load %arg4[%c0_2, %c0_3, %c0_4] : memref<1x1x128xf32, #tpu.memory_space<vmem>>, vector<1x1x128xf32>
    %3 = vector.broadcast %2 : vector<1x1x128xf32> to vector<1x16x128xf32>
    %4 = arith.subf %1, %3 : vector<1x16x128xf32>
    %c0_5 = arith.constant 0 : index
    %c0_6 = arith.constant 0 : index
    %c0_7 = arith.constant 0 : index
    %5 = vector.load %arg5[%c0_5, %c0_6, %c0_7] : memref<1x1x128xf32, #tpu.memory_space<vmem>>, vector<1x1x128xf32>
    %6 = vector.broadcast %5 : vector<1x1x128xf32> to vector<1x16x128xf32>
    %7 = arith.mulf %4, %6 : vector<1x16x128xf32>
    %cst = arith.constant 0.000000e+00 : f32
    %8 = vector.broadcast %cst : f32 to vector<1x16x128xf32>
    %9 = arith.maximumf %7, %8 : vector<1x16x128xf32>
    %10 = arith.truncf %9 : vector<1x16x128xf32> to vector<1x16x128xbf16>
    %c0_8 = arith.constant 0 : index
    %c0_9 = arith.constant 0 : index
    %c0_10 = arith.constant 0 : index
    %11 = vector.load %arg6[%c0_8, %c0_9, %c0_10] : memref<1x16x128xbf16, #tpu.memory_space<vmem>>, vector<1x16x128xbf16>
    tpu.vector_store %arg6[%c0_8, %c0_9, %c0_10], %10 {strides = array<i32>} : memref<1x16x128xbf16, #tpu.memory_space<vmem>>, vector<1x16x128xbf16>,
    return
  }
  func.func @transform_0(%arg0: i32, %arg1: i32, %arg2: i32) -> (i32, i32, i32) {
    %c0_i32 = arith.constant 0 : i32
    return %arg0, %arg2, %arg1 : i32, i32, i32
  }
  func.func @transform_1(%arg0: i32, %arg1: i32, %arg2: i32) -> (i32, i32, i32) {
    %c0_i32 = arith.constant 0 : i32
    %c0_i32_0 = arith.constant 0 : i32
    return %arg0, %c0_i32, %arg1 : i32, i32, i32
  }
  func.func @transform_2(%arg0: i32, %arg1: i32, %arg2: i32) -> (i32, i32, i32) {
    %c0_i32 = arith.constant 0 : i32
    %c0_i32_0 = arith.constant 0 : i32
    return %arg0, %c0_i32, %arg1 : i32, i32, i32
  }
  func.func @transform_3(%arg0: i32, %arg1: i32, %arg2: i32) -> (i32, i32, i32) {
    %c0_i32 = arith.constant 0 : i32
    return %arg0, %arg2, %arg1 : i32, i32, i32
  }
}

module attributes {stable_mosaic.version = 11 : i64} {
  func.func @_matmul_bias_kernel(%arg0: i32, %arg1: i32, %arg2: i32, %arg3: memref<32x512xbf16, #tpu.memory_space<vmem>>, %arg4: memref<2560x256xbf16, #tpu.memory_space<vmem>>, %arg5: memref<1x256xf32, #tpu.memory_space<vmem>>, %arg6: memref<32x256xbf16, #tpu.memory_space<vmem>>, %arg7: memref<32x256xf32, #tpu.memory_space<vmem>>) attributes {dimension_semantics = [#tpu.dimension_semantics<parallel>, #tpu.dimension_semantics<parallel>, #tpu.dimension_semantics<arbitrary>], iteration_bounds = array<i64: 1, 1, 5>, scalar_prefetch = 0 : i64, scratch_operands = 1 : i64, tpu.core_type = #tpu.core_type<tc>, window_params = [{transform_indices = @transform_0, window_bounds = array<i64: 32, 512>}, {transform_indices = @transform_1, window_bounds = array<i64: 2560, 256>}, {transform_indices = @transform_2, window_bounds = array<i64: 1, 256>}, {transform_indices = @transform_3, window_bounds = array<i64: 32, 256>}]} {
    %c0_i32 = arith.constant 0 : i32
    %0 = arith.cmpi eq, %arg2, %c0_i32 : i32
    %1 = arith.extui %0 : i1 to i32
    %c0_i32_0 = arith.constant 0 : i32
    %2 = arith.cmpi ne, %1, %c0_i32_0 : i32
    scf.if %2 {
      %cst_8 = arith.constant 0.000000e+00 : f32
      %15 = vector.broadcast %cst_8 : f32 to vector<32x256xf32>
      %c0_9 = arith.constant 0 : index
      %c0_10 = arith.constant 0 : index
      %16 = vector.load %arg7[%c0_9, %c0_10] : memref<32x256xf32, #tpu.memory_space<vmem>>, vector<32x256xf32>
      tpu.vector_store %arg7[%c0_9, %c0_10], %15 {strides = array<i32>} : memref<32x256xf32, #tpu.memory_space<vmem>>, vector<32x256xf32>,
    } else {
    }
    %c512_i32 = arith.constant 512 : i32
    %3 = arith.muli %arg2, %c512_i32 : i32
    %4 = tpu.assume_multiple %3, 512 : i32
    %c0 = arith.constant 0 : index
    %c0_1 = arith.constant 0 : index
    %5 = vector.load %arg7[%c0, %c0_1] : memref<32x256xf32, #tpu.memory_space<vmem>>, vector<32x256xf32>
    %c0_2 = arith.constant 0 : index
    %c0_3 = arith.constant 0 : index
    %6 = vector.load %arg3[%c0_2, %c0_3] : memref<32x512xbf16, #tpu.memory_space<vmem>>, vector<32x512xbf16>
    %7 = arith.index_cast %4 : i32 to index
    %c0_4 = arith.constant 0 : index
    %8 = vector.load %arg4[%7, %c0_4] : memref<2560x256xbf16, #tpu.memory_space<vmem>>, vector<512x256xbf16>
    %cst = arith.constant dense<0.000000e+00> : vector<32x256xf32>
    %9 = tpu.matmul %6, %8, %cst {dimension_numbers = #tpu.dot_dimension_numbers<[1], [0], [0], [1], [0, 0, 1, 1], [], []>} : vector<32x512xbf16>, vector<512x256xbf16>, vector<32x256xf32> -> vector<32x256xf32>
    %10 = arith.addf %5, %9 : vector<32x256xf32>
    %c0_5 = arith.constant 0 : index
    %c0_6 = arith.constant 0 : index
    %11 = vector.load %arg7[%c0_5, %c0_6] : memref<32x256xf32, #tpu.memory_space<vmem>>, vector<32x256xf32>
    tpu.vector_store %arg7[%c0_5, %c0_6], %10 {strides = array<i32>} : memref<32x256xf32, #tpu.memory_space<vmem>>, vector<32x256xf32>,
    %c4_i32 = arith.constant 4 : i32
    %12 = arith.cmpi eq, %arg2, %c4_i32 : i32
    %13 = arith.extui %12 : i1 to i32
    %c0_i32_7 = arith.constant 0 : i32
    %14 = arith.cmpi ne, %13, %c0_i32_7 : i32
    scf.if %14 {
      %c0_8 = arith.constant 0 : index
      %c0_9 = arith.constant 0 : index
      %15 = vector.load %arg7[%c0_8, %c0_9] : memref<32x256xf32, #tpu.memory_space<vmem>>, vector<32x256xf32>
      %c0_10 = arith.constant 0 : index
      %c0_11 = arith.constant 0 : index
      %16 = vector.load %arg5[%c0_10, %c0_11] : memref<1x256xf32, #tpu.memory_space<vmem>>, vector<1x256xf32>
      %17 = vector.broadcast %16 : vector<1x256xf32> to vector<32x256xf32>
      %18 = arith.addf %15, %17 : vector<32x256xf32>
      %19 = arith.truncf %18 : vector<32x256xf32> to vector<32x256xbf16>
      %c0_12 = arith.constant 0 : index
      %c0_13 = arith.constant 0 : index
      %20 = vector.load %arg6[%c0_12, %c0_13] : memref<32x256xbf16, #tpu.memory_space<vmem>>, vector<32x256xbf16>
      tpu.vector_store %arg6[%c0_12, %c0_13], %19 {strides = array<i32>} : memref<32x256xbf16, #tpu.memory_space<vmem>>, vector<32x256xbf16>,
    } else {
    }
    return
  }
  func.func @transform_0(%arg0: i32, %arg1: i32, %arg2: i32) -> (i32, i32) {
    %c0_i32 = arith.constant 0 : i32
    return %arg0, %arg2 : i32, i32
  }
  func.func @transform_1(%arg0: i32, %arg1: i32, %arg2: i32) -> (i32, i32) {
    %c0_i32 = arith.constant 0 : i32
    %c0_i32_0 = arith.constant 0 : i32
    return %c0_i32, %arg1 : i32, i32
  }
  func.func @transform_2(%arg0: i32, %arg1: i32, %arg2: i32) -> (i32, i32) {
    %c0_i32 = arith.constant 0 : i32
    %c0_i32_0 = arith.constant 0 : i32
    return %c0_i32, %arg1 : i32, i32
  }
  func.func @transform_3(%arg0: i32, %arg1: i32, %arg2: i32) -> (i32, i32) {
    %c0_i32 = arith.constant 0 : i32
    return %arg0, %arg1 : i32, i32
  }
}

module attributes {stable_mosaic.version = 11 : i64} {
  func.func @_in_norm_add_kernel(%arg0: i32, %arg1: i32, %arg2: i32, %arg3: memref<1x16x128xbf16, #tpu.memory_space<vmem>>, %arg4: memref<1x1x128xf32, #tpu.memory_space<vmem>>, %arg5: memref<1x1x128xf32, #tpu.memory_space<vmem>>, %arg6: memref<1x16x128xbf16, #tpu.memory_space<vmem>>, %arg7: memref<1x16x128xbf16, #tpu.memory_space<vmem>>) attributes {dimension_semantics = [#tpu.dimension_semantics<parallel>, #tpu.dimension_semantics<parallel>, #tpu.dimension_semantics<parallel>], iteration_bounds = array<i64: 2, 2, 1>, scalar_prefetch = 0 : i64, scratch_operands = 0 : i64, tpu.core_type = #tpu.core_type<tc>, window_params = [{transform_indices = @transform_0, window_bounds = array<i64: 1, 16, 128>}, {transform_indices = @transform_1, window_bounds = array<i64: 1, 1, 128>}, {transform_indices = @transform_2, window_bounds = array<i64: 1, 1, 128>}, {transform_indices = @transform_3, window_bounds = array<i64: 1, 16, 128>}, {transform_indices = @transform_4, window_bounds = array<i64: 1, 16, 128>}]} {
    %c0 = arith.constant 0 : index
    %c0_0 = arith.constant 0 : index
    %c0_1 = arith.constant 0 : index
    %0 = vector.load %arg3[%c0, %c0_0, %c0_1] : memref<1x16x128xbf16, #tpu.memory_space<vmem>>, vector<1x16x128xbf16>
    %1 = arith.extf %0 : vector<1x16x128xbf16> to vector<1x16x128xf32>
    %c0_2 = arith.constant 0 : index
    %c0_3 = arith.constant 0 : index
    %c0_4 = arith.constant 0 : index
    %2 = vector.load %arg4[%c0_2, %c0_3, %c0_4] : memref<1x1x128xf32, #tpu.memory_space<vmem>>, vector<1x1x128xf32>
    %3 = vector.broadcast %2 : vector<1x1x128xf32> to vector<1x16x128xf32>
    %4 = arith.subf %1, %3 : vector<1x16x128xf32>
    %c0_5 = arith.constant 0 : index
    %c0_6 = arith.constant 0 : index
    %c0_7 = arith.constant 0 : index
    %5 = vector.load %arg5[%c0_5, %c0_6, %c0_7] : memref<1x1x128xf32, #tpu.memory_space<vmem>>, vector<1x1x128xf32>
    %6 = vector.broadcast %5 : vector<1x1x128xf32> to vector<1x16x128xf32>
    %7 = arith.mulf %4, %6 : vector<1x16x128xf32>
    %c0_8 = arith.constant 0 : index
    %c0_9 = arith.constant 0 : index
    %c0_10 = arith.constant 0 : index
    %8 = vector.load %arg6[%c0_8, %c0_9, %c0_10] : memref<1x16x128xbf16, #tpu.memory_space<vmem>>, vector<1x16x128xbf16>
    %9 = arith.extf %8 : vector<1x16x128xbf16> to vector<1x16x128xf32>
    %10 = arith.addf %9, %7 : vector<1x16x128xf32>
    %11 = arith.truncf %10 : vector<1x16x128xf32> to vector<1x16x128xbf16>
    %c0_11 = arith.constant 0 : index
    %c0_12 = arith.constant 0 : index
    %c0_13 = arith.constant 0 : index
    %12 = vector.load %arg7[%c0_11, %c0_12, %c0_13] : memref<1x16x128xbf16, #tpu.memory_space<vmem>>, vector<1x16x128xbf16>
    tpu.vector_store %arg7[%c0_11, %c0_12, %c0_13], %11 {strides = array<i32>} : memref<1x16x128xbf16, #tpu.memory_space<vmem>>, vector<1x16x128xbf16>,
    return
  }
  func.func @transform_0(%arg0: i32, %arg1: i32, %arg2: i32) -> (i32, i32, i32) {
    %c0_i32 = arith.constant 0 : i32
    return %arg0, %arg2, %arg1 : i32, i32, i32
  }
  func.func @transform_1(%arg0: i32, %arg1: i32, %arg2: i32) -> (i32, i32, i32) {
    %c0_i32 = arith.constant 0 : i32
    %c0_i32_0 = arith.constant 0 : i32
    return %arg0, %c0_i32, %arg1 : i32, i32, i32
  }
  func.func @transform_2(%arg0: i32, %arg1: i32, %arg2: i32) -> (i32, i32, i32) {
    %c0_i32 = arith.constant 0 : i32
    %c0_i32_0 = arith.constant 0 : i32
    return %arg0, %c0_i32, %arg1 : i32, i32, i32
  }
  func.func @transform_3(%arg0: i32, %arg1: i32, %arg2: i32) -> (i32, i32, i32) {
    %c0_i32 = arith.constant 0 : i32
    return %arg0, %arg2, %arg1 : i32, i32, i32
  }
  func.func @transform_4(%arg0: i32, %arg1: i32, %arg2: i32) -> (i32, i32, i32) {
    %c0_i32 = arith.constant 0 : i32
    return %arg0, %arg2, %arg1 : i32, i32, i32
  }
}

module attributes {stable_mosaic.version = 11 : i64} {
  func.func @_matmul_bias_kernel(%arg0: i32, %arg1: i32, %arg2: i32, %arg3: memref<128x512xbf16, #tpu.memory_space<vmem>>, %arg4: memref<2560x128xbf16, #tpu.memory_space<vmem>>, %arg5: memref<1x128xf32, #tpu.memory_space<vmem>>, %arg6: memref<128x128xbf16, #tpu.memory_space<vmem>>, %arg7: memref<128x128xf32, #tpu.memory_space<vmem>>) attributes {dimension_semantics = [#tpu.dimension_semantics<parallel>, #tpu.dimension_semantics<parallel>, #tpu.dimension_semantics<arbitrary>], iteration_bounds = array<i64: 1, 1, 5>, scalar_prefetch = 0 : i64, scratch_operands = 1 : i64, tpu.core_type = #tpu.core_type<tc>, window_params = [{transform_indices = @transform_0, window_bounds = array<i64: 128, 512>}, {transform_indices = @transform_1, window_bounds = array<i64: 2560, 128>}, {transform_indices = @transform_2, window_bounds = array<i64: 1, 128>}, {transform_indices = @transform_3, window_bounds = array<i64: 128, 128>}]} {
    %c0_i32 = arith.constant 0 : i32
    %0 = arith.cmpi eq, %arg2, %c0_i32 : i32
    %1 = arith.extui %0 : i1 to i32
    %c0_i32_0 = arith.constant 0 : i32
    %2 = arith.cmpi ne, %1, %c0_i32_0 : i32
    scf.if %2 {
      %cst_8 = arith.constant 0.000000e+00 : f32
      %15 = vector.broadcast %cst_8 : f32 to vector<128x128xf32>
      %c0_9 = arith.constant 0 : index
      %c0_10 = arith.constant 0 : index
      %16 = vector.load %arg7[%c0_9, %c0_10] : memref<128x128xf32, #tpu.memory_space<vmem>>, vector<128x128xf32>
      tpu.vector_store %arg7[%c0_9, %c0_10], %15 {strides = array<i32>} : memref<128x128xf32, #tpu.memory_space<vmem>>, vector<128x128xf32>,
    } else {
    }
    %c512_i32 = arith.constant 512 : i32
    %3 = arith.muli %arg2, %c512_i32 : i32
    %4 = tpu.assume_multiple %3, 512 : i32
    %c0 = arith.constant 0 : index
    %c0_1 = arith.constant 0 : index
    %5 = vector.load %arg7[%c0, %c0_1] : memref<128x128xf32, #tpu.memory_space<vmem>>, vector<128x128xf32>
    %c0_2 = arith.constant 0 : index
    %c0_3 = arith.constant 0 : index
    %6 = vector.load %arg3[%c0_2, %c0_3] : memref<128x512xbf16, #tpu.memory_space<vmem>>, vector<128x512xbf16>
    %7 = arith.index_cast %4 : i32 to index
    %c0_4 = arith.constant 0 : index
    %8 = vector.load %arg4[%7, %c0_4] : memref<2560x128xbf16, #tpu.memory_space<vmem>>, vector<512x128xbf16>
    %cst = arith.constant dense<0.000000e+00> : vector<128x128xf32>
    %9 = tpu.matmul %6, %8, %cst {dimension_numbers = #tpu.dot_dimension_numbers<[1], [0], [0], [1], [0, 0, 1, 1], [], []>} : vector<128x512xbf16>, vector<512x128xbf16>, vector<128x128xf32> -> vector<128x128xf32>
    %10 = arith.addf %5, %9 : vector<128x128xf32>
    %c0_5 = arith.constant 0 : index
    %c0_6 = arith.constant 0 : index
    %11 = vector.load %arg7[%c0_5, %c0_6] : memref<128x128xf32, #tpu.memory_space<vmem>>, vector<128x128xf32>
    tpu.vector_store %arg7[%c0_5, %c0_6], %10 {strides = array<i32>} : memref<128x128xf32, #tpu.memory_space<vmem>>, vector<128x128xf32>,
    %c4_i32 = arith.constant 4 : i32
    %12 = arith.cmpi eq, %arg2, %c4_i32 : i32
    %13 = arith.extui %12 : i1 to i32
    %c0_i32_7 = arith.constant 0 : i32
    %14 = arith.cmpi ne, %13, %c0_i32_7 : i32
    scf.if %14 {
      %c0_8 = arith.constant 0 : index
      %c0_9 = arith.constant 0 : index
      %15 = vector.load %arg7[%c0_8, %c0_9] : memref<128x128xf32, #tpu.memory_space<vmem>>, vector<128x128xf32>
      %c0_10 = arith.constant 0 : index
      %c0_11 = arith.constant 0 : index
      %16 = vector.load %arg5[%c0_10, %c0_11] : memref<1x128xf32, #tpu.memory_space<vmem>>, vector<1x128xf32>
      %17 = vector.broadcast %16 : vector<1x128xf32> to vector<128x128xf32>
      %18 = arith.addf %15, %17 : vector<128x128xf32>
      %19 = arith.truncf %18 : vector<128x128xf32> to vector<128x128xbf16>
      %c0_12 = arith.constant 0 : index
      %c0_13 = arith.constant 0 : index
      %20 = vector.load %arg6[%c0_12, %c0_13] : memref<128x128xbf16, #tpu.memory_space<vmem>>, vector<128x128xbf16>
      tpu.vector_store %arg6[%c0_12, %c0_13], %19 {strides = array<i32>} : memref<128x128xbf16, #tpu.memory_space<vmem>>, vector<128x128xbf16>,
    } else {
    }
    return
  }
  func.func @transform_0(%arg0: i32, %arg1: i32, %arg2: i32) -> (i32, i32) {
    %c0_i32 = arith.constant 0 : i32
    return %arg0, %arg2 : i32, i32
  }
  func.func @transform_1(%arg0: i32, %arg1: i32, %arg2: i32) -> (i32, i32) {
    %c0_i32 = arith.constant 0 : i32
    %c0_i32_0 = arith.constant 0 : i32
    return %c0_i32, %arg1 : i32, i32
  }
  func.func @transform_2(%arg0: i32, %arg1: i32, %arg2: i32) -> (i32, i32) {
    %c0_i32 = arith.constant 0 : i32
    %c0_i32_0 = arith.constant 0 : i32
    return %c0_i32, %arg1 : i32, i32
  }
  func.func @transform_3(%arg0: i32, %arg1: i32, %arg2: i32) -> (i32, i32) {
    %c0_i32 = arith.constant 0 : i32
    return %arg0, %arg1 : i32, i32
  }
}

module attributes {stable_mosaic.version = 11 : i64} {
  func.func @_matmul_bias_kernel(%arg0: i32, %arg1: i32, %arg2: i32, %arg3: memref<256x384xbf16, #tpu.memory_space<vmem>>, %arg4: memref<1152x128xbf16, #tpu.memory_space<vmem>>, %arg5: memref<1x128xf32, #tpu.memory_space<vmem>>, %arg6: memref<256x128xbf16, #tpu.memory_space<vmem>>, %arg7: memref<256x128xf32, #tpu.memory_space<vmem>>) attributes {dimension_semantics = [#tpu.dimension_semantics<parallel>, #tpu.dimension_semantics<parallel>, #tpu.dimension_semantics<arbitrary>], iteration_bounds = array<i64: 2, 1, 3>, scalar_prefetch = 0 : i64, scratch_operands = 1 : i64, tpu.core_type = #tpu.core_type<tc>, window_params = [{transform_indices = @transform_0, window_bounds = array<i64: 256, 384>}, {transform_indices = @transform_1, window_bounds = array<i64: 1152, 128>}, {transform_indices = @transform_2, window_bounds = array<i64: 1, 128>}, {transform_indices = @transform_3, window_bounds = array<i64: 256, 128>}]} {
    %c0_i32 = arith.constant 0 : i32
    %0 = arith.cmpi eq, %arg2, %c0_i32 : i32
    %1 = arith.extui %0 : i1 to i32
    %c0_i32_0 = arith.constant 0 : i32
    %2 = arith.cmpi ne, %1, %c0_i32_0 : i32
    scf.if %2 {
      %cst_8 = arith.constant 0.000000e+00 : f32
      %15 = vector.broadcast %cst_8 : f32 to vector<256x128xf32>
      %c0_9 = arith.constant 0 : index
      %c0_10 = arith.constant 0 : index
      %16 = vector.load %arg7[%c0_9, %c0_10] : memref<256x128xf32, #tpu.memory_space<vmem>>, vector<256x128xf32>
      tpu.vector_store %arg7[%c0_9, %c0_10], %15 {strides = array<i32>} : memref<256x128xf32, #tpu.memory_space<vmem>>, vector<256x128xf32>,
    } else {
    }
    %c384_i32 = arith.constant 384 : i32
    %3 = arith.muli %arg2, %c384_i32 : i32
    %4 = tpu.assume_multiple %3, 384 : i32
    %c0 = arith.constant 0 : index
    %c0_1 = arith.constant 0 : index
    %5 = vector.load %arg7[%c0, %c0_1] : memref<256x128xf32, #tpu.memory_space<vmem>>, vector<256x128xf32>
    %c0_2 = arith.constant 0 : index
    %c0_3 = arith.constant 0 : index
    %6 = vector.load %arg3[%c0_2, %c0_3] : memref<256x384xbf16, #tpu.memory_space<vmem>>, vector<256x384xbf16>
    %7 = arith.index_cast %4 : i32 to index
    %c0_4 = arith.constant 0 : index
    %8 = vector.load %arg4[%7, %c0_4] : memref<1152x128xbf16, #tpu.memory_space<vmem>>, vector<384x128xbf16>
    %cst = arith.constant dense<0.000000e+00> : vector<256x128xf32>
    %9 = tpu.matmul %6, %8, %cst {dimension_numbers = #tpu.dot_dimension_numbers<[1], [0], [0], [1], [0, 0, 1, 1], [], []>} : vector<256x384xbf16>, vector<384x128xbf16>, vector<256x128xf32> -> vector<256x128xf32>
    %10 = arith.addf %5, %9 : vector<256x128xf32>
    %c0_5 = arith.constant 0 : index
    %c0_6 = arith.constant 0 : index
    %11 = vector.load %arg7[%c0_5, %c0_6] : memref<256x128xf32, #tpu.memory_space<vmem>>, vector<256x128xf32>
    tpu.vector_store %arg7[%c0_5, %c0_6], %10 {strides = array<i32>} : memref<256x128xf32, #tpu.memory_space<vmem>>, vector<256x128xf32>,
    %c2_i32 = arith.constant 2 : i32
    %12 = arith.cmpi eq, %arg2, %c2_i32 : i32
    %13 = arith.extui %12 : i1 to i32
    %c0_i32_7 = arith.constant 0 : i32
    %14 = arith.cmpi ne, %13, %c0_i32_7 : i32
    scf.if %14 {
      %c0_8 = arith.constant 0 : index
      %c0_9 = arith.constant 0 : index
      %15 = vector.load %arg7[%c0_8, %c0_9] : memref<256x128xf32, #tpu.memory_space<vmem>>, vector<256x128xf32>
      %c0_10 = arith.constant 0 : index
      %c0_11 = arith.constant 0 : index
      %16 = vector.load %arg5[%c0_10, %c0_11] : memref<1x128xf32, #tpu.memory_space<vmem>>, vector<1x128xf32>
      %17 = vector.broadcast %16 : vector<1x128xf32> to vector<256x128xf32>
      %18 = arith.addf %15, %17 : vector<256x128xf32>
      %19 = arith.truncf %18 : vector<256x128xf32> to vector<256x128xbf16>
      %c0_12 = arith.constant 0 : index
      %c0_13 = arith.constant 0 : index
      %20 = vector.load %arg6[%c0_12, %c0_13] : memref<256x128xbf16, #tpu.memory_space<vmem>>, vector<256x128xbf16>
      tpu.vector_store %arg6[%c0_12, %c0_13], %19 {strides = array<i32>} : memref<256x128xbf16, #tpu.memory_space<vmem>>, vector<256x128xbf16>,
    } else {
    }
    return
  }
  func.func @transform_0(%arg0: i32, %arg1: i32, %arg2: i32) -> (i32, i32) {
    %c0_i32 = arith.constant 0 : i32
    return %arg0, %arg2 : i32, i32
  }
  func.func @transform_1(%arg0: i32, %arg1: i32, %arg2: i32) -> (i32, i32) {
    %c0_i32 = arith.constant 0 : i32
    %c0_i32_0 = arith.constant 0 : i32
    return %c0_i32, %arg1 : i32, i32
  }
  func.func @transform_2(%arg0: i32, %arg1: i32, %arg2: i32) -> (i32, i32) {
    %c0_i32 = arith.constant 0 : i32
    %c0_i32_0 = arith.constant 0 : i32
    return %c0_i32, %arg1 : i32, i32
  }
  func.func @transform_3(%arg0: i32, %arg1: i32, %arg2: i32) -> (i32, i32) {
    %c0_i32 = arith.constant 0 : i32
    return %arg0, %arg1 : i32, i32
  }
}

module attributes {stable_mosaic.version = 11 : i64} {
  func.func @_matmul_bias_kernel(%arg0: i32, %arg1: i32, %arg2: i32, %arg3: memref<256x512xbf16, #tpu.memory_space<vmem>>, %arg4: memref<3584x128xbf16, #tpu.memory_space<vmem>>, %arg5: memref<1x128xf32, #tpu.memory_space<vmem>>, %arg6: memref<256x128xbf16, #tpu.memory_space<vmem>>, %arg7: memref<256x128xf32, #tpu.memory_space<vmem>>) attributes {dimension_semantics = [#tpu.dimension_semantics<parallel>, #tpu.dimension_semantics<parallel>, #tpu.dimension_semantics<arbitrary>], iteration_bounds = array<i64: 2, 1, 7>, scalar_prefetch = 0 : i64, scratch_operands = 1 : i64, tpu.core_type = #tpu.core_type<tc>, window_params = [{transform_indices = @transform_0, window_bounds = array<i64: 256, 512>}, {transform_indices = @transform_1, window_bounds = array<i64: 3584, 128>}, {transform_indices = @transform_2, window_bounds = array<i64: 1, 128>}, {transform_indices = @transform_3, window_bounds = array<i64: 256, 128>}]} {
    %c0_i32 = arith.constant 0 : i32
    %0 = arith.cmpi eq, %arg2, %c0_i32 : i32
    %1 = arith.extui %0 : i1 to i32
    %c0_i32_0 = arith.constant 0 : i32
    %2 = arith.cmpi ne, %1, %c0_i32_0 : i32
    scf.if %2 {
      %cst_8 = arith.constant 0.000000e+00 : f32
      %15 = vector.broadcast %cst_8 : f32 to vector<256x128xf32>
      %c0_9 = arith.constant 0 : index
      %c0_10 = arith.constant 0 : index
      %16 = vector.load %arg7[%c0_9, %c0_10] : memref<256x128xf32, #tpu.memory_space<vmem>>, vector<256x128xf32>
      tpu.vector_store %arg7[%c0_9, %c0_10], %15 {strides = array<i32>} : memref<256x128xf32, #tpu.memory_space<vmem>>, vector<256x128xf32>,
    } else {
    }
    %c512_i32 = arith.constant 512 : i32
    %3 = arith.muli %arg2, %c512_i32 : i32
    %4 = tpu.assume_multiple %3, 512 : i32
    %c0 = arith.constant 0 : index
    %c0_1 = arith.constant 0 : index
    %5 = vector.load %arg7[%c0, %c0_1] : memref<256x128xf32, #tpu.memory_space<vmem>>, vector<256x128xf32>
    %c0_2 = arith.constant 0 : index
    %c0_3 = arith.constant 0 : index
    %6 = vector.load %arg3[%c0_2, %c0_3] : memref<256x512xbf16, #tpu.memory_space<vmem>>, vector<256x512xbf16>
    %7 = arith.index_cast %4 : i32 to index
    %c0_4 = arith.constant 0 : index
    %8 = vector.load %arg4[%7, %c0_4] : memref<3584x128xbf16, #tpu.memory_space<vmem>>, vector<512x128xbf16>
    %cst = arith.constant dense<0.000000e+00> : vector<256x128xf32>
    %9 = tpu.matmul %6, %8, %cst {dimension_numbers = #tpu.dot_dimension_numbers<[1], [0], [0], [1], [0, 0, 1, 1], [], []>} : vector<256x512xbf16>, vector<512x128xbf16>, vector<256x128xf32> -> vector<256x128xf32>
    %10 = arith.addf %5, %9 : vector<256x128xf32>
    %c0_5 = arith.constant 0 : index
    %c0_6 = arith.constant 0 : index
    %11 = vector.load %arg7[%c0_5, %c0_6] : memref<256x128xf32, #tpu.memory_space<vmem>>, vector<256x128xf32>
    tpu.vector_store %arg7[%c0_5, %c0_6], %10 {strides = array<i32>} : memref<256x128xf32, #tpu.memory_space<vmem>>, vector<256x128xf32>,
    %c6_i32 = arith.constant 6 : i32
    %12 = arith.cmpi eq, %arg2, %c6_i32 : i32
    %13 = arith.extui %12 : i1 to i32
    %c0_i32_7 = arith.constant 0 : i32
    %14 = arith.cmpi ne, %13, %c0_i32_7 : i32
    scf.if %14 {
      %c0_8 = arith.constant 0 : index
      %c0_9 = arith.constant 0 : index
      %15 = vector.load %arg7[%c0_8, %c0_9] : memref<256x128xf32, #tpu.memory_space<vmem>>, vector<256x128xf32>
      %c0_10 = arith.constant 0 : index
      %c0_11 = arith.constant 0 : index
      %16 = vector.load %arg5[%c0_10, %c0_11] : memref<1x128xf32, #tpu.memory_space<vmem>>, vector<1x128xf32>
      %17 = vector.broadcast %16 : vector<1x128xf32> to vector<256x128xf32>
      %18 = arith.addf %15, %17 : vector<256x128xf32>
      %19 = math.tanh %18 : vector<256x128xf32>
      %20 = arith.truncf %19 : vector<256x128xf32> to vector<256x128xbf16>
      %c0_12 = arith.constant 0 : index
      %c0_13 = arith.constant 0 : index
      %21 = vector.load %arg6[%c0_12, %c0_13] : memref<256x128xbf16, #tpu.memory_space<vmem>>, vector<256x128xbf16>
      tpu.vector_store %arg6[%c0_12, %c0_13], %20 {strides = array<i32>} : memref<256x128xbf16, #tpu.memory_space<vmem>>, vector<256x128xbf16>,
    } else {
    }
    return
  }
  func.func @transform_0(%arg0: i32, %arg1: i32, %arg2: i32) -> (i32, i32) {
    %c0_i32 = arith.constant 0 : i32
    return %arg0, %arg2 : i32, i32
  }
  func.func @transform_1(%arg0: i32, %arg1: i32, %arg2: i32) -> (i32, i32) {
    %c0_i32 = arith.constant 0 : i32
    %c0_i32_0 = arith.constant 0 : i32
    return %c0_i32, %arg1 : i32, i32
  }
  func.func @transform_2(%arg0: i32, %arg1: i32, %arg2: i32) -> (i32, i32) {
    %c0_i32 = arith.constant 0 : i32
    %c0_i32_0 = arith.constant 0 : i32
    return %c0_i32, %arg1 : i32, i32
  }
  func.func @transform_3(%arg0: i32, %arg1: i32, %arg2: i32) -> (i32, i32) {
    %c0_i32 = arith.constant 0 : i32
    return %arg0, %arg1 : i32, i32
  }
}

</mosaic_0001>

<bundles_post_ra>
// kernel: generator_forward.53
= control target key start
LH: loop header
LB: loop body
LE: loop exit
PB: predicated region body
PF: predicated region fallthrough
CT: control target
= control target key end

     0   :  { %s546_s9 = smov 0   ;;  %s548_s10 = smov 0   ;;  %s597_s0 = inlined_call_operand.vmem [shape: bf16[2,128,128], index: 0, kind: input, shape index: {}]   ;;  %s598_s1 = inlined_call_operand.vmem [shape: f32[2,1,128], index: 1, kind: output, shape index: {0}]   ;;  %s599_s2 = inlined_call_operand.vmem [shape: f32[2,1,128], index: 2, kind: output, shape index: {1}]  }
   0x1   :  { %s550_s11 = smov 0  }
   0x2 LB: > { %s32_s12 = sadd.s32 1, %s524_s10  ;;  %p436_p0 = scmp.ge.s32.totalorder %s528_s11, 1  ;;  %s528_s11 = sphi %s550_s11, %s13_s11   ;;  %s524_s10 = sphi %s548_s10, %s601_s10   ;;  %s520_s9 = sphi %s546_s9, %s600_s9  }
   0x3   : > { %p34_p1 = scmp.ge.s32.totalorder %s32_s12, 2  ;;  %p150_p2 = scmp.lt.s32.totalorder %s528_s11, 3 }
   0x5   : > { %s603_s12 = smov (%p34_p1, %s32_s12), 0  ;;  %p151_p3 = pnand %p436_p0, %p150_p2 }
   0x6   : > { %p187_p4 = scmp.lt.s32.totalorder (!%p151_p3), %s520_s9, 1  ;;  %v530_v0 = vmov (!%p151_p3), 0.0  }
   0x7   : > { %154 = sbr.rel (%p151_p3) target bundleno = 75 (0x4b), region = 24  ;;  %215 = vst [vmem:[#allocation2] sm:$0x1] (!%p151_p3), %v530_v0  ;;  %216 = vst [vmem:[#allocation3] sm:$0x1] (!%p151_p3), %v530_v0 }
   0xe   : > { %s605_s9 = smov (!%p187_p4, %s520_s9), 1 }
   0xf   : > { %s441_s13 = sshll.u32 %s605_s9, 6  ;;  %s204_s19 = scalar_lea.vmem %s598_s1, %s605_s9 }
  0x10   : > { %s570_s16 = scalar_lea.vmem %s597_s0, %s441_s13  ;;  %s210_s22 = scalar_lea.vmem %s599_s2, %s605_s9 }
  0x11   : > { %v443_v1 = vld [vmem:[%s570_s16] sm:$0xff]   ;;  %v474_v2 = vld [vmem:[%s570_s16 + $0x8] sm:$0xff]   ;;  %v475_v6 = vld [vmem:[%s570_s16 + $0x10] sm:$0xff]  }
  0x12   : > { %v444_v3 = vunpack.c.l.bf16 %v443_v1  ;;  %v445_v4 = vunpack.c.h.bf16 %v443_v1  ;;  %v448_v5 = vunpack.c.l.bf16 %v474_v2  ;;  %v449_v7 = vunpack.c.h.bf16 %v474_v2  ;;  %v476_v14 = vld [vmem:[%s570_s16 + $0x18] sm:$0xff]   ;;  %v477_v23 = vld [vmem:[%s570_s16 + $0x20] sm:$0xff]   ;;  %v478_v32 = vld [vmem:[%s570_s16 + $0x28] sm:$0xff]  }
  0x13   : > { %v452_v11 = vunpack.c.l.bf16 %v475_v6  ;;  %v453_v15 = vunpack.c.h.bf16 %v475_v6  ;;  %v456_v19 = vunpack.c.l.bf16 %v476_v14  ;;  %v457_v24 = vunpack.c.h.bf16 %v476_v14  ;;  %v479_v41 = vld [vmem:[%s570_s16 + $0x30] sm:$0xff]   ;;  %v480_v50 = vld [vmem:[%s570_s16 + $0x38] sm:$0xff]  }
  0x14   : > { %v250_v8 = vadd.f32 %v445_v4, %v444_v3  ;;  %v274_v9 = vmul.f32 %v444_v3, %v444_v3  ;;  %v275_v10 = vmul.f32 %v445_v4, %v445_v4  ;;  %v276_v13 = vmul.f32 %v448_v5, %v448_v5 }
  0x15   : > { %v277_v17 = vmul.f32 %v449_v7, %v449_v7  ;;  %v278_v21 = vmul.f32 %v452_v11, %v452_v11  ;;  %v279_v26 = vmul.f32 %v453_v15, %v453_v15  ;;  %v460_v28 = vunpack.c.l.bf16 %v477_v23 }
  0x16   : > { %v251_v12 = vadd.f32 %v448_v5, %v250_v8  ;;  %v290_v18 = vadd.f32 %v275_v10, %v274_v9  ;;  %v280_v30 = vmul.f32 %v456_v19, %v456_v19  ;;  %v461_v33 = vunpack.c.h.bf16 %v477_v23 }
  0x17   : > { %v281_v35 = vmul.f32 %v457_v24, %v457_v24  ;;  %v464_v37 = vunpack.c.l.bf16 %v478_v32  ;;  %v282_v39 = vmul.f32 %v460_v28, %v460_v28  ;;  %v465_v42 = vunpack.c.h.bf16 %v478_v32 }
  0x18   : > { %v252_v16 = vadd.f32 %v449_v7, %v251_v12  ;;  %v291_v22 = vadd.f32 %v290_v18, %v276_v13  ;;  %v283_v44 = vmul.f32 %v461_v33, %v461_v33  ;;  %v468_v46 = vunpack.c.l.bf16 %v479_v41 }
  0x19   : > { %v284_v48 = vmul.f32 %v464_v37, %v464_v37  ;;  %v469_v51 = vunpack.c.h.bf16 %v479_v41  ;;  %v285_v53 = vmul.f32 %v465_v42, %v465_v42  ;;  %v472_v55 = vunpack.c.l.bf16 %v480_v50 }
  0x1a   : > { %v253_v20 = vadd.f32 %v452_v11, %v252_v16  ;;  %v292_v27 = vadd.f32 %v291_v22, %v277_v17  ;;  %v286_v57 = vmul.f32 %v468_v46, %v468_v46  ;;  %v473_v59 = vunpack.c.h.bf16 %v480_v50 }
  0x1b   : > { %v287_v61 = vmul.f32 %v469_v51, %v469_v51  ;;  %v288_v0 = vmul.f32 %v472_v55, %v472_v55 }
  0x1c   : > { %v254_v25 = vadd.f32 %v453_v15, %v253_v20  ;;  %v293_v31 = vadd.f32 %v292_v27, %v278_v21  ;;  %v289_v3 = vmul.f32 %v473_v59, %v473_v59  ;;  %v249_v15 = vld [vmem:[#allocation2] sm:$0x1]  ;;  %v273_v20 = vld [vmem:[#allocation3] sm:$0x1] }
  0x1e   : > { %v255_v29 = vadd.f32 %v456_v19, %v254_v25  ;;  %v294_v36 = vadd.f32 %v293_v31, %v279_v26 }
  0x20   : > { %v256_v34 = vadd.f32 %v457_v24, %v255_v29  ;;  %v295_v40 = vadd.f32 %v294_v36, %v280_v30 }
  0x22   : > { %v257_v38 = vadd.f32 %v460_v28, %v256_v34  ;;  %v296_v45 = vadd.f32 %v295_v40, %v281_v35 }
  0x24   : > { %v258_v43 = vadd.f32 %v461_v33, %v257_v38  ;;  %v297_v49 = vadd.f32 %v296_v45, %v282_v39 }
  0x26   : > { %v259_v47 = vadd.f32 %v464_v37, %v258_v43  ;;  %v298_v54 = vadd.f32 %v297_v49, %v283_v44 }
  0x28   : > { %v260_v52 = vadd.f32 %v465_v42, %v259_v47  ;;  %v299_v58 = vadd.f32 %v298_v54, %v284_v48 }
  0x2a   : > { %v261_v56 = vadd.f32 %v468_v46, %v260_v52  ;;  %v300_v62 = vadd.f32 %v299_v58, %v285_v53 }
  0x2c   : > { %v262_v60 = vadd.f32 %v469_v51, %v261_v56  ;;  %v301_v1 = vadd.f32 %v300_v62, %v286_v57 }
  0x2e   : > { %v263_v63 = vadd.f32 %v472_v55, %v262_v60  ;;  %v302_v4 = vadd.f32 %v301_v1, %v287_v61 }
  0x30   : > { %v264_v2 = vadd.f32 %v473_v59, %v263_v63  ;;  %v303_v6 = vadd.f32 %v302_v4, %v288_v0 }
  0x32   : > { %v265_v5 = vrot.slane %v264_v2, 4  ;;  %v304_v8 = vadd.f32 %v303_v6, %v289_v3 }
  0x34   : > { %v266_v7 = vadd.f32 %v265_v5, %v264_v2  ;;  %v305_v10 = vrot.slane %v304_v8, 4 }
  0x36   : > { %v267_v9 = vrot.slane %v266_v7, 2  ;;  %v306_v12 = vadd.f32 %v305_v10, %v304_v8 }
  0x38   : > { %v268_v11 = vadd.f32 %v267_v9, %v266_v7  ;;  %v307_v14 = vrot.slane %v306_v12, 2 }
  0x3a   : > { %v269_v13 = vrot.slane %v268_v11, 1  ;;  %v308_v17 = vadd.f32 %v307_v14, %v306_v12 }
  0x3c   : > { %v270_v16 = vadd.f32 %v269_v13, %v268_v11  ;;  %v309_v19 = vrot.slane %v308_v17, 1 }
  0x3e   : > { %v271_v18 = vadd.f32 %v270_v16, %v249_v15  ;;  %v310_v21 = vadd.f32 %v309_v19, %v308_v17 }
  0x40   : > { %272 = vst [vmem:[#allocation2] sm:$0x1] %v271_v18  ;;  %v311_v22 = vadd.f32 %v310_v21, %v273_v20 }
  0x42   : > { %312 = vst [vmem:[#allocation3] sm:$0x1] %v311_v22 }
  0x47   : > { %v316_v23 = vld [vmem:[#allocation2] sm:$0x1] }
  0x48   : > { %317 = vst [vmem:[%s204_s19] sm:$0x1] %v316_v23 }
  0x49   : > { %v318_v24 = vld [vmem:[#allocation3] sm:$0x1] }
  0x4a   : > { %319 = vst [vmem:[%s210_s22] sm:$0x1] %v318_v24 }
  0x4b PF: > { %s13_s11 = sadd.s32 1, %s528_s11   ;;  %s600_s9 = smov %s524_s10 }
  0x4c   : > { %p10_p5 = scmp.ge.s32.totalorder %s13_s11, 4   ;;  %s601_s10 = smov %s603_s12 }
  0x4e   :  { %12 = sbr.rel (!%p10_p5) target bundleno = 2 (0x2), region = 74 }

// kernel: generator_forward.54
= control target key start
LH: loop header
LB: loop body
LE: loop exit
PB: predicated region body
PF: predicated region fallthrough
CT: control target
= control target key end

     0   :  { %s788_s12 = smov 0   ;;  %s790_s13 = smov 0   ;;  %s892_s0 = inlined_call_operand.vmem [shape: bf16[2,128,128], index: 0, kind: input, shape index: {}]   ;;  %s893_s1 = inlined_call_operand.vmem [shape: f32[2,1,128], index: 1, kind: input, shape index: {}]   ;;  %s894_s2 = inlined_call_operand.vmem [shape: f32[2,1,128], index: 2, kind: input, shape index: {}]   ;;  %s895_s3 = inlined_call_operand.vmem [shape: bf16[2,128,128], index: 3, kind: output, shape index: {}]  }
   0x1   :  { %s792_s14 = smov 0  }
   0x2 LB: > { %s32_s15 = sadd.s32 1, %s762_s13  ;;  %p591_p0 = scmp.ge.s32.totalorder %s766_s14, 1  ;;  %s766_s14 = sphi %s792_s14, %s13_s14   ;;  %s762_s13 = sphi %s790_s13, %s897_s13   ;;  %s758_s12 = sphi %s788_s12, %s896_s12  }
   0x3   : > { %p34_p1 = scmp.ge.s32.totalorder %s32_s15, 2  ;;  %p198_p2 = scmp.lt.s32.totalorder %s766_s14, 3 }
   0x5   : > { %s899_s15 = smov (%p34_p1, %s32_s15), 0  ;;  %p199_p3 = pnand %p591_p0, %p198_p2 }
   0x6   : > { %p249_p4 = scmp.lt.s32.totalorder (!%p199_p3), %s758_s12, 1 }
   0x7   : > { %202 = sbr.rel (%p199_p3) target bundleno = 40 (0x28), region = 32 }
   0xe   : > { %s901_s12 = smov (!%p249_p4, %s758_s12), 1 }
   0xf   : > { %s616_s16 = sshll.u32 %s901_s12, 6  ;;  %s266_s19 = scalar_lea.vmem %s893_s1, %s901_s12 }
  0x10   : > { %s818_s22 = scalar_lea.vmem %s892_s0, %s616_s16  ;;  %s272_s25 = scalar_lea.vmem %s894_s2, %s901_s12  ;;  %v825_v1 = vld [vmem:[%s266_s19] ss:$0 sm:$0xff] }
  0x11   : > { %v635_v0 = vld [vmem:[%s818_s22] sm:$0xff]   ;;  %v706_v2 = vld [vmem:[%s818_s22 + $0x8] sm:$0xff]   ;;  %v707_v7 = vld [vmem:[%s818_s22 + $0x10] sm:$0xff]   ;;  %s855_s28 = scalar_lea.vmem %s895_s3, %s616_s16 }
  0x12   : > { %v636_v3 = vunpack.c.l.bf16 %v635_v0  ;;  %v637_v4 = vunpack.c.h.bf16 %v635_v0  ;;  %v640_v5 = vunpack.c.l.bf16 %v706_v2  ;;  %v641_v6 = vunpack.c.h.bf16 %v706_v2  ;;  %v708_v8 = vld [vmem:[%s818_s22 + $0x18] sm:$0xff]   ;;  %v830_v9 = vld [vmem:[%s272_s25] ss:$0 sm:$0xff]  ;;  %v710_v35 = vld [vmem:[%s818_s22 + $0x28] sm:$0xff]  }
  0x13   : > { %v644_v10 = vunpack.c.l.bf16 %v707_v7  ;;  %v645_v11 = vunpack.c.h.bf16 %v707_v7  ;;  %v648_v12 = vunpack.c.l.bf16 %v708_v8  ;;  %v649_v13 = vunpack.c.h.bf16 %v708_v8  ;;  %v709_v30 = vld [vmem:[%s818_s22 + $0x20] sm:$0xff]   ;;  %v711_v40 = vld [vmem:[%s818_s22 + $0x30] sm:$0xff]   ;;  %v712_v45 = vld [vmem:[%s818_s22 + $0x38] sm:$0xff]  }
  0x14   : > { %v325_v14 = vsub.f32 %v636_v3, %v825_v1  ;;  %v326_v15 = vsub.f32 %v637_v4, %v825_v1  ;;  %v327_v16 = vsub.f32 %v640_v5, %v825_v1  ;;  %v328_v17 = vsub.f32 %v641_v6, %v825_v1 }
  0x15   : > { %v329_v18 = vsub.f32 %v644_v10, %v825_v1  ;;  %v330_v19 = vsub.f32 %v645_v11, %v825_v1  ;;  %v331_v20 = vsub.f32 %v648_v12, %v825_v1  ;;  %v332_v21 = vsub.f32 %v649_v13, %v825_v1 }
  0x16   : > { %v348_v22 = vmul.f32 %v830_v9, %v325_v14  ;;  %v349_v23 = vmul.f32 %v830_v9, %v326_v15  ;;  %v350_v24 = vmul.f32 %v830_v9, %v327_v16  ;;  %v351_v25 = vmul.f32 %v830_v9, %v328_v17 }
  0x17   : > { %v352_v26 = vmul.f32 %v830_v9, %v329_v18  ;;  %v353_v27 = vmul.f32 %v830_v9, %v330_v19  ;;  %v354_v28 = vmul.f32 %v830_v9, %v331_v20  ;;  %v355_v29 = vmul.f32 %v830_v9, %v332_v21 }
  0x18   : > { %v364_v31 = vmax.f32 %v348_v22, 0.0  ;;  %v365_v32 = vmax.f32 %v349_v23, 0.0  ;;  %v366_v33 = vmax.f32 %v350_v24, 0.0  ;;  %v367_v34 = vmax.f32 %v351_v25, 0.0 }
  0x19   : > { %v368_v36 = vmax.f32 %v352_v26, 0.0  ;;  %v369_v37 = vmax.f32 %v353_v27, 0.0  ;;  %v370_v38 = vmax.f32 %v354_v28, 0.0  ;;  %v371_v39 = vmax.f32 %v355_v29, 0.0 }
  0x1a   : > { %v669_v41 = vpack.c.bf16 %v365_v32, %v364_v31  ;;  %v674_v42 = vpack.c.bf16 %v367_v34, %v366_v33  ;;  %v652_v43 = vunpack.c.l.bf16 %v709_v30  ;;  %v653_v44 = vunpack.c.h.bf16 %v709_v30 }
  0x1b   : > { %v679_v46 = vpack.c.bf16 %v369_v37, %v368_v36  ;;  %v684_v47 = vpack.c.bf16 %v371_v39, %v370_v38  ;;  %v656_v48 = vunpack.c.l.bf16 %v710_v35  ;;  %v657_v49 = vunpack.c.h.bf16 %v710_v35 }
  0x1c   : > { %670 = vst [vmem:[%s855_s28] sm:$0xff] %v669_v41   ;;  %713 = vst [vmem:[%s855_s28 + $0x8] sm:$0xff] %v674_v42   ;;  %v333_v50 = vsub.f32 %v652_v43, %v825_v1  ;;  %v334_v51 = vsub.f32 %v653_v44, %v825_v1  ;;  %v660_v52 = vunpack.c.l.bf16 %v711_v40  ;;  %v661_v53 = vunpack.c.h.bf16 %v711_v40 }
  0x1d   : > { %714 = vst [vmem:[%s855_s28 + $0x10] sm:$0xff] %v679_v46   ;;  %715 = vst [vmem:[%s855_s28 + $0x18] sm:$0xff] %v684_v47   ;;  %v335_v54 = vsub.f32 %v656_v48, %v825_v1  ;;  %v336_v55 = vsub.f32 %v657_v49, %v825_v1  ;;  %v664_v56 = vunpack.c.l.bf16 %v712_v45  ;;  %v665_v57 = vunpack.c.h.bf16 %v712_v45 }
  0x1e   : > { %v356_v58 = vmul.f32 %v830_v9, %v333_v50  ;;  %v357_v59 = vmul.f32 %v830_v9, %v334_v51  ;;  %v337_v60 = vsub.f32 %v660_v52, %v825_v1  ;;  %v338_v61 = vsub.f32 %v661_v53, %v825_v1 }
  0x1f   : > { %v358_v62 = vmul.f32 %v830_v9, %v335_v54  ;;  %v359_v63 = vmul.f32 %v830_v9, %v336_v55  ;;  %v339_v0 = vsub.f32 %v664_v56, %v825_v1  ;;  %v340_v2 = vsub.f32 %v665_v57, %v825_v1 }
  0x20   : > { %v372_v3 = vmax.f32 %v356_v58, 0.0  ;;  %v373_v4 = vmax.f32 %v357_v59, 0.0  ;;  %v360_v5 = vmul.f32 %v830_v9, %v337_v60  ;;  %v361_v6 = vmul.f32 %v830_v9, %v338_v61 }
  0x21   : > { %v374_v7 = vmax.f32 %v358_v62, 0.0  ;;  %v375_v8 = vmax.f32 %v359_v63, 0.0  ;;  %v362_v10 = vmul.f32 %v830_v9, %v339_v0  ;;  %v363_v11 = vmul.f32 %v830_v9, %v340_v2 }
  0x22   : > { %v689_v12 = vpack.c.bf16 %v373_v4, %v372_v3  ;;  %v376_v13 = vmax.f32 %v360_v5, 0.0  ;;  %v377_v14 = vmax.f32 %v361_v6, 0.0 }
  0x23   : > { %v694_v15 = vpack.c.bf16 %v375_v8, %v374_v7  ;;  %v378_v1 = vmax.f32 %v362_v10, 0.0  ;;  %v379_v16 = vmax.f32 %v363_v11, 0.0 }
  0x24   : > { %716 = vst [vmem:[%s855_s28 + $0x20] sm:$0xff] %v689_v12   ;;  %v699_v17 = vpack.c.bf16 %v377_v14, %v376_v13 }
  0x25   : > { %717 = vst [vmem:[%s855_s28 + $0x28] sm:$0xff] %v694_v15   ;;  %v704_v18 = vpack.c.bf16 %v379_v16, %v378_v1 }
  0x26   : > { %718 = vst [vmem:[%s855_s28 + $0x30] sm:$0xff] %v699_v17  }
  0x27   : > { %719 = vst [vmem:[%s855_s28 + $0x38] sm:$0xff] %v704_v18  }
  0x28 PF: > { %s13_s14 = sadd.s32 1, %s766_s14   ;;  %s896_s12 = smov %s762_s13 }
  0x29   : > { %p10_p5 = scmp.ge.s32.totalorder %s13_s14, 4   ;;  %s897_s13 = smov %s899_s15 }
  0x2b   :  { %12 = sbr.rel (!%p10_p5) target bundleno = 2 (0x2), region = 68 }

// kernel: generator_forward.52
= control target key start
LH: loop header
LB: loop body
LE: loop exit
PB: predicated region body
PF: predicated region fallthrough
CT: control target
= control target key end

     0   :  { %s1700_s12 = smov 0   ;;  %s1702_s13 = smov 0   ;;  %s1874_s0 = inlined_call_operand.vmem [shape: bf16[512,256], index: 0, kind: input, shape index: {}]   ;;  %s1875_s1 = inlined_call_operand.vmem [shape: bf16[256,128], index: 1, kind: input, shape index: {}]   ;;  %s1876_s2 = inlined_call_operand.vmem [shape: f32[1,128], index: 2, kind: input, shape index: {}]   ;;  %s1877_s3 = inlined_call_operand.vmem [shape: bf16[512,128], index: 3, kind: output, shape index: {}]  }
   0x1   :  { %s1704_s14 = smov 0  }
   0x2 LB: > { %s32_s15 = sadd.s32 1, %s1674_s13  ;;  %p1223_p0 = scmp.ge.s32.totalorder %s1678_s14, 1  ;;  %s1678_s14 = sphi %s1704_s14, %s13_s14   ;;  %s1674_s13 = sphi %s1702_s13, %s1879_s13   ;;  %s1670_s12 = sphi %s1700_s12, %s1878_s12  }
   0x3   : > { %p34_p1 = scmp.ge.s32.totalorder %s32_s15, 2  ;;  %p184_p2 = scmp.lt.s32.totalorder %s1678_s14, 3 }
   0x5   : > { %s1881_s15 = smov (%p34_p1, %s32_s15), 0  ;;  %p185_p3 = pnand %p1223_p0, %p184_p2 }
   0x6   : > { %v1592_v0 = vld [vmem:[%s1875_s1 + $0x40] sm:$0xff] (!%p185_p3)   ;;  %s1224_s18 = sshll.u32 (!%p185_p3), %s1670_s12, 5  ;;  %v1594_v2 = vld [vmem:[%s1875_s1 + $0x48] sm:$0xff] (!%p185_p3)   ;;  %v1596_v4 = vld [vmem:[%s1875_s1 + $0x50] sm:$0xff] (!%p185_p3)  }
   0x7   : > { %188 = sbr.rel (%p185_p3) target bundleno = 317 (0x13d), region = 32  ;;  %v1593_v1 = vld [vmem:[%s1875_s1] sm:$0xff] (!%p185_p3)   ;;  %1440 = vmatprep.subr.bf16.mxu0 (!%p185_p3), %v1592_v0  ;;  %1552 = vmatprep.subr.bf16.mxu1 (!%p185_p3), %v1592_v0  ;;  %v1595_v3 = vld [vmem:[%s1875_s1 + $0x8] sm:$0xff] (!%p185_p3)   ;;  %p225_p4 = scmp.lt.s32.totalorder (!%p185_p3), %s1224_s18, 63  ;;  %v1597_v5 = vld [vmem:[%s1875_s1 + $0x10] sm:$0xff] (!%p185_p3)  }
   0x8   : > { %1441 = vmatpush3.bf16.msra.mxu0 (!%p185_p3), %v1593_v1  ;;  %1560 = vmatpush3.bf16.msra.mxu1 (!%p185_p3), %v1593_v1  ;;  %v1598_v6 = vld [vmem:[%s1875_s1 + $0x58] sm:$0xff] (!%p185_p3)   ;;  %v1600_v8 = vld [vmem:[%s1875_s1 + $0x60] sm:$0xff] (!%p185_p3)   ;;  %v1602_v10 = vld [vmem:[%s1875_s1 + $0x68] sm:$0xff] (!%p185_p3)  }
   0x9   : > { %1442 = vmatprep.subr.bf16.mxu0 (!%p185_p3), %v1594_v2  ;;  %1553 = vmatprep.subr.bf16.mxu1 (!%p185_p3), %v1594_v2  ;;  %v1599_v7 = vld [vmem:[%s1875_s1 + $0x18] sm:$0xff] (!%p185_p3)   ;;  %v1601_v9 = vld [vmem:[%s1875_s1 + $0x20] sm:$0xff] (!%p185_p3)   ;;  %v1603_v13 = vld [vmem:[%s1875_s1 + $0x28] sm:$0xff] (!%p185_p3)  }
   0xa   : > { %v1604_v14 = vld [vmem:[%s1875_s1 + $0x70] sm:$0xff] (!%p185_p3)   ;;  %v1606_v16 = vld [vmem:[%s1875_s1 + $0x78] sm:$0xff] (!%p185_p3)   ;;  %v1809_v56 = vld [vmem:[%s1876_s2] ss:$0 sm:$0xff] (!%p185_p3) }
   0xb   : > { %v1605_v15 = vld [vmem:[%s1875_s1 + $0x30] sm:$0xff] (!%p185_p3)   ;;  %v1607_v17 = vld [vmem:[%s1875_s1 + $0x38] sm:$0xff] (!%p185_p3)  }
   0xc   : > { %1443 = vmatpush3.bf16.msra.mxu0 (!%p185_p3), %v1595_v3  ;;  %1561 = vmatpush3.bf16.msra.mxu1 (!%p185_p3), %v1595_v3 }
   0xd   : > { %1444 = vmatprep.subr.bf16.mxu0 (!%p185_p3), %v1596_v4  ;;  %1554 = vmatprep.subr.bf16.mxu1 (!%p185_p3), %v1596_v4 }
   0xe   : > { %s1883_s18 = smov (!%p225_p4, %s1224_s18), 63 }
   0xf   : > { %s1312_s6 = sshll.u32 %s1883_s18, 3  ;;  %s1228_s5 = sshll.u32 %s1883_s18, 2 }
  0x10   : > { %1445 = vmatpush3.bf16.msra.mxu0 %v1597_v5  ;;  %1562 = vmatpush3.bf16.msra.mxu1 %v1597_v5  ;;  %s1751_s11 = scalar_lea.vmem %s1874_s0, %s1312_s6  ;;  %s1819_s8 = scalar_lea.vmem %s1877_s3, %s1228_s5 }
  0x11   : > { %1446 = vmatprep.subr.bf16.mxu0 %v1598_v6  ;;  %1555 = vmatprep.subr.bf16.mxu1 %v1598_v6  ;;  %v1610_v11 = vld [vmem:[%s1751_s11 + $0x4] ss:$8 sps:$4 sm:$0xff]   ;;  %v1608_v18 = vld [vmem:[%s1751_s11] ss:$8 sps:$4 sm:$0xff]   ;;  %v1614_v20 = vld [vmem:[%s1751_s11 + $0x14] ss:$8 sps:$4 sm:$0xff]  }
  0x12   : > { %v1613_v12 = vld [vmem:[%s1751_s11 + $0x84] ss:$8 sps:$4 sm:$0xff]   ;;  %677 = vmatprep.mubr.bf16.mxu0 %v1610_v11  ;;  %v1611_v19 = vld [vmem:[%s1751_s11 + $0x80] ss:$8 sps:$4 sm:$0xff]   ;;  %v1616_v21 = vld [vmem:[%s1751_s11 + $0x94] ss:$8 sps:$4 sm:$0xff]  }
  0x13   : > { %741 = vmatprep.mubr.bf16.mxu1 %v1613_v12  ;;  %v1618_v22 = vld [vmem:[%s1751_s11 + $0x10] ss:$8 sps:$4 sm:$0xff]   ;;  %v1620_v24 = vld [vmem:[%s1751_s11 + $0x24] ss:$8 sps:$4 sm:$0xff]   ;;  %v1624_v26 = vld [vmem:[%s1751_s11 + $0x20] ss:$8 sps:$4 sm:$0xff]  }
  0x14   : > { %1447 = vmatpush3.bf16.msra.mxu0 %v1599_v7  ;;  %1563 = vmatpush3.bf16.msra.mxu1 %v1599_v7  ;;  %v1619_v23 = vld [vmem:[%s1751_s11 + $0x90] ss:$8 sps:$4 sm:$0xff]   ;;  %v1622_v25 = vld [vmem:[%s1751_s11 + $0xa4] ss:$8 sps:$4 sm:$0xff]   ;;  %v1625_v27 = vld [vmem:[%s1751_s11 + $0xa0] ss:$8 sps:$4 sm:$0xff]  }
  0x15   : > { %1448 = vmatprep.subr.bf16.mxu0 %v1600_v8  ;;  %1556 = vmatprep.subr.bf16.mxu1 %v1600_v8  ;;  %v1626_v28 = vld [vmem:[%s1751_s11 + $0x34] ss:$8 sps:$4 sm:$0xff]   ;;  %v1630_v30 = vld [vmem:[%s1751_s11 + $0x30] ss:$8 sps:$4 sm:$0xff]   ;;  %v1632_v32 = vld [vmem:[%s1751_s11 + $0x44] ss:$8 sps:$4 sm:$0xff]  }
  0x16   : > { %v1628_v29 = vld [vmem:[%s1751_s11 + $0xb4] ss:$8 sps:$4 sm:$0xff]   ;;  %v1631_v31 = vld [vmem:[%s1751_s11 + $0xb0] ss:$8 sps:$4 sm:$0xff]   ;;  %v1634_v33 = vld [vmem:[%s1751_s11 + $0xc4] ss:$8 sps:$4 sm:$0xff]  }
  0x17   : > { %v1636_v34 = vld [vmem:[%s1751_s11 + $0x40] ss:$8 sps:$4 sm:$0xff]   ;;  %v1638_v36 = vld [vmem:[%s1751_s11 + $0x54] ss:$8 sps:$4 sm:$0xff]   ;;  %v1642_v38 = vld [vmem:[%s1751_s11 + $0x50] ss:$8 sps:$4 sm:$0xff]  }
  0x18   : > { %1449 = vmatpush3.bf16.msra.mxu0 %v1601_v9  ;;  %1564 = vmatpush3.bf16.msra.mxu1 %v1601_v9  ;;  %v1637_v35 = vld [vmem:[%s1751_s11 + $0xc0] ss:$8 sps:$4 sm:$0xff]   ;;  %v1640_v37 = vld [vmem:[%s1751_s11 + $0xd4] ss:$8 sps:$4 sm:$0xff]   ;;  %v1643_v39 = vld [vmem:[%s1751_s11 + $0xd0] ss:$8 sps:$4 sm:$0xff]  }
  0x19   : > { %1450 = vmatprep.subr.bf16.mxu0 %v1602_v10  ;;  %1557 = vmatprep.subr.bf16.mxu1 %v1602_v10  ;;  %v1644_v40 = vld [vmem:[%s1751_s11 + $0x64] ss:$8 sps:$4 sm:$0xff]   ;;  %v1648_v42 = vld [vmem:[%s1751_s11 + $0x60] ss:$8 sps:$4 sm:$0xff]   ;;  %v1650_v44 = vld [vmem:[%s1751_s11 + $0x74] ss:$8 sps:$4 sm:$0xff]  }
  0x1a   : > { %v1646_v41 = vld [vmem:[%s1751_s11 + $0xe4] ss:$8 sps:$4 sm:$0xff]   ;;  %v1649_v43 = vld [vmem:[%s1751_s11 + $0xe0] ss:$8 sps:$4 sm:$0xff]   ;;  %v1652_v45 = vld [vmem:[%s1751_s11 + $0xf4] ss:$8 sps:$4 sm:$0xff]  }
  0x1b   : > { %v1654_v46 = vld [vmem:[%s1751_s11 + $0x70] ss:$8 sps:$4 sm:$0xff]  }
  0x1c   : > { %1451 = vmatpush3.bf16.msra.mxu0 %v1603_v13  ;;  %1565 = vmatpush3.bf16.msra.mxu1 %v1603_v13  ;;  %v1655_v47 = vld [vmem:[%s1751_s11 + $0xf0] ss:$8 sps:$4 sm:$0xff]  }
  0x1d   : > { %1452 = vmatprep.subr.bf16.mxu0 %v1604_v14  ;;  %1558 = vmatprep.subr.bf16.mxu1 %v1604_v14 }
  0x20   : > { %1453 = vmatpush3.bf16.msra.mxu0 %v1605_v15  ;;  %1566 = vmatpush3.bf16.msra.mxu1 %v1605_v15 }
  0x21   : > { %1454 = vmatprep.subr.bf16.mxu0 %v1606_v16  ;;  %1559 = vmatprep.subr.bf16.mxu1 %v1606_v16 }
  0x24   : > { %1455 = vmatpush3.bf16.msra.mxu0 %v1607_v17  ;;  %1567 = vmatpush3.bf16.msra.mxu1 %v1607_v17 }
  0x27   : > { %678 = vmatmul.mubr.bf16.vlgmr.msra.gmra.mrb[0].mxu0 %v1608_v18  ;;  %742 = vmatmul.mubr.bf16.vlgmr.msra.gmra.mrb[0].mxu1 %v1611_v19 }
  0x28   : > { %685 = vmatprep.mubr.bf16.mxu0 %v1614_v20  ;;  %749 = vmatprep.mubr.bf16.mxu1 %v1616_v21 }
  0x2f   : > { %686 = vmatmul.mubr.bf16.gmra.mrb[4].mxu0 %v1618_v22  ;;  %750 = vmatmul.mubr.bf16.gmra.mrb[4].mxu1 %v1619_v23 }
  0x30   : > { %693 = vmatprep.mubr.bf16.mxu0 %v1620_v24  ;;  %757 = vmatprep.mubr.bf16.mxu1 %v1622_v25 }
  0x37   : > { %694 = vmatmul.mubr.bf16.gmra.mrb[8].mxu0 %v1624_v26  ;;  %758 = vmatmul.mubr.bf16.gmra.mrb[8].mxu1 %v1625_v27 }
  0x38   : > { %701 = vmatprep.mubr.bf16.mxu0 %v1626_v28  ;;  %765 = vmatprep.mubr.bf16.mxu1 %v1628_v29 }
  0x3f   : > { %702 = vmatmul.mubr.bf16.gmra.mrb[12].mxu0 %v1630_v30  ;;  %766 = vmatmul.mubr.bf16.gmra.mrb[12].mxu1 %v1631_v31 }
  0x40   : > { %709 = vmatprep.mubr.bf16.mxu0 %v1632_v32  ;;  %773 = vmatprep.mubr.bf16.mxu1 %v1634_v33 }
  0x47   : > { %710 = vmatmul.mubr.bf16.gmra.mrb[16].mxu0 %v1636_v34  ;;  %774 = vmatmul.mubr.bf16.gmra.mrb[16].mxu1 %v1637_v35 }
  0x48   : > { %717 = vmatprep.mubr.bf16.mxu0 %v1638_v36  ;;  %781 = vmatprep.mubr.bf16.mxu1 %v1640_v37 }
  0x4f   : > { %718 = vmatmul.mubr.bf16.gmra.mrb[20].mxu0 %v1642_v38  ;;  %782 = vmatmul.mubr.bf16.gmra.mrb[20].mxu1 %v1643_v39 }
  0x50   : > { %725 = vmatprep.mubr.bf16.mxu0 %v1644_v40  ;;  %789 = vmatprep.mubr.bf16.mxu1 %v1646_v41 }
  0x57   : > { %726 = vmatmul.mubr.bf16.gmra.mrb[24].mxu0 %v1648_v42  ;;  %790 = vmatmul.mubr.bf16.gmra.mrb[24].mxu1 %v1649_v43 }
  0x58   : > { %733 = vmatprep.mubr.bf16.mxu0 %v1650_v44  ;;  %797 = vmatprep.mubr.bf16.mxu1 %v1652_v45 }
  0x5f   : > { %734 = vmatmul.mubr.bf16.gmra.mrb[28].mxu0 %v1654_v46  ;;  %798 = vmatmul.mubr.bf16.gmra.mrb[28].mxu1 %v1655_v47 }
  0xfa   : > { %v1456_v48 = vpop.f32.mrb[0].mxu0  ;;  %v1504_v49 = vpop.f32.mrb[0].mxu1 }
  0xfb   : > { %v1457_v50 = vpop.f32.mrb[1].mxu0  ;;  %v1505_v51 = vpop.f32.mrb[1].mxu1 }
  0xfc   : > { %v1458_v52 = vadd.f32 %v1457_v50, %v1456_v48  ;;  %v1506_v53 = vadd.f32 %v1505_v51, %v1504_v49  ;;  %v1459_v54 = vpop.f32.mrb[2].mxu0  ;;  %v1507_v55 = vpop.f32.mrb[2].mxu1 }
  0xfd   : > { %v1460_v57 = vpop.f32.mrb[3].mxu0  ;;  %v1508_v58 = vpop.f32.mrb[3].mxu1 }
  0xfe   : > { %v1461_v59 = vadd.f32 %v1460_v57, %v1459_v54  ;;  %v1509_v60 = vadd.f32 %v1508_v58, %v1507_v55  ;;  %v912_v61 = vadd.f32 %v1458_v52, %v1809_v56  ;;  %v928_v62 = vadd.f32 %v1506_v53, %v1809_v56 }
 0x100   : > { %v913_v63 = vadd.f32 %v1461_v59, %v1809_v56  ;;  %v929_v0 = vadd.f32 %v1509_v60, %v1809_v56 }
 0x102   : > { %v1348_v1 = vpack.c.bf16 %v913_v63, %v912_v61  ;;  %v1388_v2 = vpack.c.bf16 %v929_v0, %v928_v62  ;;  %v1462_v3 = vpop.f32.mrb[4].mxu0  ;;  %v1510_v4 = vpop.f32.mrb[4].mxu1 }
 0x103   : > { %v1463_v5 = vpop.f32.mrb[5].mxu0  ;;  %v1511_v6 = vpop.f32.mrb[5].mxu1 }
 0x104   : > { %1349 = vst [vmem:[%s1819_s8] sm:$0xff] %v1348_v1   ;;  %1432 = vst [vmem:[%s1819_s8 + $0x40] sm:$0xff] %v1388_v2   ;;  %v1464_v7 = vadd.f32 %v1463_v5, %v1462_v3  ;;  %v1512_v8 = vadd.f32 %v1511_v6, %v1510_v4  ;;  %v1465_v9 = vpop.f32.mrb[6].mxu0  ;;  %v1513_v10 = vpop.f32.mrb[6].mxu1 }
 0x105   : > { %v1466_v11 = vpop.f32.mrb[7].mxu0  ;;  %v1514_v12 = vpop.f32.mrb[7].mxu1 }
 0x106   : > { %v1467_v13 = vadd.f32 %v1466_v11, %v1465_v9  ;;  %v1515_v14 = vadd.f32 %v1514_v12, %v1513_v10  ;;  %v914_v15 = vadd.f32 %v1464_v7, %v1809_v56  ;;  %v930_v16 = vadd.f32 %v1512_v8, %v1809_v56 }
 0x108   : > { %v915_v17 = vadd.f32 %v1467_v13, %v1809_v56  ;;  %v931_v18 = vadd.f32 %v1515_v14, %v1809_v56 }
 0x10a   : > { %v1353_v19 = vpack.c.bf16 %v915_v17, %v914_v15  ;;  %v1393_v20 = vpack.c.bf16 %v931_v18, %v930_v16  ;;  %v1468_v21 = vpop.f32.mrb[8].mxu0  ;;  %v1516_v22 = vpop.f32.mrb[8].mxu1 }
 0x10b   : > { %v1469_v23 = vpop.f32.mrb[9].mxu0  ;;  %v1517_v24 = vpop.f32.mrb[9].mxu1 }
 0x10c   : > { %1425 = vst [vmem:[%s1819_s8 + $0x8] sm:$0xff] %v1353_v19   ;;  %1433 = vst [vmem:[%s1819_s8 + $0x48] sm:$0xff] %v1393_v20   ;;  %v1470_v25 = vadd.f32 %v1469_v23, %v1468_v21  ;;  %v1518_v26 = vadd.f32 %v1517_v24, %v1516_v22  ;;  %v1471_v27 = vpop.f32.mrb[10].mxu0  ;;  %v1519_v28 = vpop.f32.mrb[10].mxu1 }
 0x10d   : > { %v1472_v29 = vpop.f32.mrb[11].mxu0  ;;  %v1520_v30 = vpop.f32.mrb[11].mxu1 }
 0x10e   : > { %v1473_v31 = vadd.f32 %v1472_v29, %v1471_v27  ;;  %v1521_v32 = vadd.f32 %v1520_v30, %v1519_v28  ;;  %v916_v33 = vadd.f32 %v1470_v25, %v1809_v56  ;;  %v932_v34 = vadd.f32 %v1518_v26, %v1809_v56 }
 0x110   : > { %v917_v35 = vadd.f32 %v1473_v31, %v1809_v56  ;;  %v933_v36 = vadd.f32 %v1521_v32, %v1809_v56 }
 0x112   : > { %v1358_v37 = vpack.c.bf16 %v917_v35, %v916_v33  ;;  %v1398_v38 = vpack.c.bf16 %v933_v36, %v932_v34  ;;  %v1474_v39 = vpop.f32.mrb[12].mxu0  ;;  %v1522_v40 = vpop.f32.mrb[12].mxu1 }
 0x113   : > { %v1475_v41 = vpop.f32.mrb[13].mxu0  ;;  %v1523_v42 = vpop.f32.mrb[13].mxu1 }
 0x114   : > { %1426 = vst [vmem:[%s1819_s8 + $0x10] sm:$0xff] %v1358_v37   ;;  %1434 = vst [vmem:[%s1819_s8 + $0x50] sm:$0xff] %v1398_v38   ;;  %v1476_v43 = vadd.f32 %v1475_v41, %v1474_v39  ;;  %v1524_v44 = vadd.f32 %v1523_v42, %v1522_v40  ;;  %v1477_v45 = vpop.f32.mrb[14].mxu0  ;;  %v1525_v46 = vpop.f32.mrb[14].mxu1 }
 0x115   : > { %v1478_v47 = vpop.f32.mrb[15].mxu0  ;;  %v1526_v48 = vpop.f32.mrb[15].mxu1 }
 0x116   : > { %v1479_v49 = vadd.f32 %v1478_v47, %v1477_v45  ;;  %v1527_v50 = vadd.f32 %v1526_v48, %v1525_v46  ;;  %v918_v51 = vadd.f32 %v1476_v43, %v1809_v56  ;;  %v934_v52 = vadd.f32 %v1524_v44, %v1809_v56 }
 0x118   : > { %v919_v53 = vadd.f32 %v1479_v49, %v1809_v56  ;;  %v935_v54 = vadd.f32 %v1527_v50, %v1809_v56 }
 0x11a   : > { %v1363_v55 = vpack.c.bf16 %v919_v53, %v918_v51  ;;  %v1403_v57 = vpack.c.bf16 %v935_v54, %v934_v52  ;;  %v1480_v58 = vpop.f32.mrb[16].mxu0  ;;  %v1528_v59 = vpop.f32.mrb[16].mxu1 }
 0x11b   : > { %v1481_v60 = vpop.f32.mrb[17].mxu0  ;;  %v1529_v61 = vpop.f32.mrb[17].mxu1 }
 0x11c   : > { %1427 = vst [vmem:[%s1819_s8 + $0x18] sm:$0xff] %v1363_v55   ;;  %1435 = vst [vmem:[%s1819_s8 + $0x58] sm:$0xff] %v1403_v57   ;;  %v1482_v62 = vadd.f32 %v1481_v60, %v1480_v58  ;;  %v1530_v63 = vadd.f32 %v1529_v61, %v1528_v59  ;;  %v1483_v0 = vpop.f32.mrb[18].mxu0  ;;  %v1531_v1 = vpop.f32.mrb[18].mxu1 }
 0x11d   : > { %v1484_v2 = vpop.f32.mrb[19].mxu0  ;;  %v1532_v3 = vpop.f32.mrb[19].mxu1 }
 0x11e   : > { %v1485_v4 = vadd.f32 %v1484_v2, %v1483_v0  ;;  %v1533_v5 = vadd.f32 %v1532_v3, %v1531_v1  ;;  %v920_v6 = vadd.f32 %v1482_v62, %v1809_v56  ;;  %v936_v7 = vadd.f32 %v1530_v63, %v1809_v56 }
 0x120   : > { %v921_v8 = vadd.f32 %v1485_v4, %v1809_v56  ;;  %v937_v9 = vadd.f32 %v1533_v5, %v1809_v56 }
 0x122   : > { %v1368_v10 = vpack.c.bf16 %v921_v8, %v920_v6  ;;  %v1408_v11 = vpack.c.bf16 %v937_v9, %v936_v7  ;;  %v1486_v12 = vpop.f32.mrb[20].mxu0  ;;  %v1534_v13 = vpop.f32.mrb[20].mxu1 }
 0x123   : > { %v1487_v14 = vpop.f32.mrb[21].mxu0  ;;  %v1535_v15 = vpop.f32.mrb[21].mxu1 }
 0x124   : > { %1428 = vst [vmem:[%s1819_s8 + $0x20] sm:$0xff] %v1368_v10   ;;  %1436 = vst [vmem:[%s1819_s8 + $0x60] sm:$0xff] %v1408_v11   ;;  %v1488_v16 = vadd.f32 %v1487_v14, %v1486_v12  ;;  %v1536_v17 = vadd.f32 %v1535_v15, %v1534_v13  ;;  %v1489_v18 = vpop.f32.mrb[22].mxu0  ;;  %v1537_v19 = vpop.f32.mrb[22].mxu1 }
 0x125   : > { %v1490_v20 = vpop.f32.mrb[23].mxu0  ;;  %v1538_v21 = vpop.f32.mrb[23].mxu1 }
 0x126   : > { %v1491_v22 = vadd.f32 %v1490_v20, %v1489_v18  ;;  %v1539_v23 = vadd.f32 %v1538_v21, %v1537_v19  ;;  %v922_v24 = vadd.f32 %v1488_v16, %v1809_v56  ;;  %v938_v25 = vadd.f32 %v1536_v17, %v1809_v56 }
 0x128   : > { %v923_v26 = vadd.f32 %v1491_v22, %v1809_v56  ;;  %v939_v27 = vadd.f32 %v1539_v23, %v1809_v56 }
 0x12a   : > { %v1373_v28 = vpack.c.bf16 %v923_v26, %v922_v24  ;;  %v1413_v29 = vpack.c.bf16 %v939_v27, %v938_v25  ;;  %v1492_v30 = vpop.f32.mrb[24].mxu0  ;;  %v1540_v31 = vpop.f32.mrb[24].mxu1 }
 0x12b   : > { %v1493_v32 = vpop.f32.mrb[25].mxu0  ;;  %v1541_v33 = vpop.f32.mrb[25].mxu1 }
 0x12c   : > { %1429 = vst [vmem:[%s1819_s8 + $0x28] sm:$0xff] %v1373_v28   ;;  %1437 = vst [vmem:[%s1819_s8 + $0x68] sm:$0xff] %v1413_v29   ;;  %v1494_v34 = vadd.f32 %v1493_v32, %v1492_v30  ;;  %v1542_v35 = vadd.f32 %v1541_v33, %v1540_v31  ;;  %v1495_v36 = vpop.f32.mrb[26].mxu0  ;;  %v1543_v37 = vpop.f32.mrb[26].mxu1 }
 0x12d   : > { %v1496_v38 = vpop.f32.mrb[27].mxu0  ;;  %v1544_v39 = vpop.f32.mrb[27].mxu1 }
 0x12e   : > { %v1497_v40 = vadd.f32 %v1496_v38, %v1495_v36  ;;  %v1545_v41 = vadd.f32 %v1544_v39, %v1543_v37  ;;  %v924_v42 = vadd.f32 %v1494_v34, %v1809_v56  ;;  %v940_v43 = vadd.f32 %v1542_v35, %v1809_v56 }
 0x130   : > { %v925_v44 = vadd.f32 %v1497_v40, %v1809_v56  ;;  %v941_v45 = vadd.f32 %v1545_v41, %v1809_v56 }
 0x132   : > { %v1378_v46 = vpack.c.bf16 %v925_v44, %v924_v42  ;;  %v1418_v47 = vpack.c.bf16 %v941_v45, %v940_v43  ;;  %v1498_v48 = vpop.f32.mrb[28].mxu0  ;;  %v1546_v49 = vpop.f32.mrb[28].mxu1 }
 0x133   : > { %v1499_v50 = vpop.f32.mrb[29].mxu0  ;;  %v1547_v51 = vpop.f32.mrb[29].mxu1 }
 0x134   : > { %1430 = vst [vmem:[%s1819_s8 + $0x30] sm:$0xff] %v1378_v46   ;;  %1438 = vst [vmem:[%s1819_s8 + $0x70] sm:$0xff] %v1418_v47   ;;  %v1500_v52 = vadd.f32 %v1499_v50, %v1498_v48  ;;  %v1548_v53 = vadd.f32 %v1547_v51, %v1546_v49  ;;  %v1501_v54 = vpop.f32.mrb[30].mxu0  ;;  %v1549_v55 = vpop.f32.mrb[30].mxu1 }
 0x135   : > { %v1502_v57 = vpop.f32.mrb[31].mxu0  ;;  %v1550_v58 = vpop.f32.mrb[31].mxu1 }
 0x136   : > { %v1503_v59 = vadd.f32 %v1502_v57, %v1501_v54  ;;  %v1551_v60 = vadd.f32 %v1550_v58, %v1549_v55  ;;  %v926_v61 = vadd.f32 %v1500_v52, %v1809_v56  ;;  %v942_v62 = vadd.f32 %v1548_v53, %v1809_v56 }
 0x138   : > { %v927_v63 = vadd.f32 %v1503_v59, %v1809_v56  ;;  %v943_v0 = vadd.f32 %v1551_v60, %v1809_v56 }
 0x13a   : > { %v1383_v1 = vpack.c.bf16 %v927_v63, %v926_v61  ;;  %v1423_v2 = vpack.c.bf16 %v943_v0, %v942_v62 }
 0x13c   : > { %1431 = vst [vmem:[%s1819_s8 + $0x38] sm:$0xff] %v1383_v1   ;;  %1439 = vst [vmem:[%s1819_s8 + $0x78] sm:$0xff] %v1423_v2  }
 0x13d PF: > { %s13_s14 = sadd.s32 1, %s1678_s14   ;;  %s1878_s12 = smov %s1674_s13 }
 0x13e   : > { %p10_p5 = scmp.ge.s32.totalorder %s13_s14, 4   ;;  %s1879_s13 = smov %s1881_s15 }
 0x140   :  { %12 = sbr.rel (!%p10_p5) target bundleno = 2 (0x2), region = 77 }

// kernel: generator_forward.56
= control target key start
LH: loop header
LB: loop body
LE: loop exit
PB: predicated region body
PF: predicated region fallthrough
CT: control target
= control target key end

     0   :  { %s486_s9 = smov 0   ;;  %s488_s10 = smov 0   ;;  %s527_s0 = inlined_call_operand.vmem [shape: bf16[2,64,128], index: 0, kind: input, shape index: {}]   ;;  %s528_s1 = inlined_call_operand.vmem [shape: f32[2,1,128], index: 1, kind: output, shape index: {0}]   ;;  %s529_s2 = inlined_call_operand.vmem [shape: f32[2,1,128], index: 2, kind: output, shape index: {1}]  }
   0x1   :  { %s490_s11 = smov 0  }
   0x2 LB: > { %s32_s12 = sadd.s32 1, %s464_s10  ;;  %p396_p0 = scmp.ge.s32.totalorder %s468_s11, 1  ;;  %s468_s11 = sphi %s490_s11, %s13_s11   ;;  %s464_s10 = sphi %s488_s10, %s531_s10   ;;  %s460_s9 = sphi %s486_s9, %s530_s9  }
   0x3   : > { %p34_p1 = scmp.ge.s32.totalorder %s32_s12, 2  ;;  %p150_p2 = scmp.lt.s32.totalorder %s468_s11, 3 }
   0x5   : > { %s533_s12 = smov (%p34_p1, %s32_s12), 0  ;;  %p151_p3 = pnand %p396_p0, %p150_p2 }
   0x6   : > { %p187_p4 = scmp.lt.s32.totalorder (!%p151_p3), %s460_s9, 1  ;;  %v470_v0 = vmov (!%p151_p3), 0.0  }
   0x7   : > { %154 = sbr.rel (%p151_p3) target bundleno = 59 (0x3b), region = 24  ;;  %215 = vst [vmem:[#allocation2] sm:$0x1] (!%p151_p3), %v470_v0  ;;  %216 = vst [vmem:[#allocation3] sm:$0x1] (!%p151_p3), %v470_v0 }
   0xe   : > { %s535_s9 = smov (!%p187_p4, %s460_s9), 1  ;;  %v233_v44 = vld [vmem:[#allocation2] sm:$0x1]  ;;  %v249_v47 = vld [vmem:[#allocation3] sm:$0x1] }
   0xf   : > { %s401_s13 = sshll.u32 %s535_s9, 5  ;;  %s204_s19 = scalar_lea.vmem %s528_s1, %s535_s9 }
  0x10   : > { %s197_s16 = scalar_lea.vmem %s527_s0, %s401_s13  ;;  %s210_s22 = scalar_lea.vmem %s529_s2, %s535_s9 }
  0x11   : > { %v403_v1 = vld [vmem:[%s197_s16] sm:$0xff]   ;;  %v418_v2 = vld [vmem:[%s197_s16 + $0x8] sm:$0xff]   ;;  %v419_v3 = vld [vmem:[%s197_s16 + $0x10] sm:$0xff]  }
  0x12   : > { %v404_v4 = vunpack.c.l.bf16 %v403_v1  ;;  %v405_v5 = vunpack.c.h.bf16 %v403_v1  ;;  %v408_v6 = vunpack.c.l.bf16 %v418_v2  ;;  %v409_v7 = vunpack.c.h.bf16 %v418_v2  ;;  %v420_v13 = vld [vmem:[%s197_s16 + $0x18] sm:$0xff]  }
  0x13   : > { %v412_v8 = vunpack.c.l.bf16 %v419_v3  ;;  %v413_v14 = vunpack.c.h.bf16 %v419_v3  ;;  %v416_v18 = vunpack.c.l.bf16 %v420_v13  ;;  %v417_v22 = vunpack.c.h.bf16 %v420_v13 }
  0x14   : > { %v234_v9 = vadd.f32 %v405_v5, %v404_v4  ;;  %v250_v10 = vmul.f32 %v404_v4, %v404_v4  ;;  %v251_v11 = vmul.f32 %v405_v5, %v405_v5  ;;  %v252_v12 = vmul.f32 %v408_v6, %v408_v6 }
  0x15   : > { %v253_v16 = vmul.f32 %v409_v7, %v409_v7  ;;  %v254_v20 = vmul.f32 %v412_v8, %v412_v8  ;;  %v255_v24 = vmul.f32 %v413_v14, %v413_v14  ;;  %v256_v27 = vmul.f32 %v416_v18, %v416_v18 }
  0x16   : > { %v235_v15 = vadd.f32 %v408_v6, %v234_v9  ;;  %v258_v17 = vadd.f32 %v251_v11, %v250_v10  ;;  %v257_v30 = vmul.f32 %v417_v22, %v417_v22 }
  0x18   : > { %v236_v19 = vadd.f32 %v409_v7, %v235_v15  ;;  %v259_v21 = vadd.f32 %v258_v17, %v252_v12 }
  0x1a   : > { %v237_v23 = vadd.f32 %v412_v8, %v236_v19  ;;  %v260_v25 = vadd.f32 %v259_v21, %v253_v16 }
  0x1c   : > { %v238_v26 = vadd.f32 %v413_v14, %v237_v23  ;;  %v261_v28 = vadd.f32 %v260_v25, %v254_v20 }
  0x1e   : > { %v239_v29 = vadd.f32 %v416_v18, %v238_v26  ;;  %v262_v31 = vadd.f32 %v261_v28, %v255_v24 }
  0x20   : > { %v240_v32 = vadd.f32 %v417_v22, %v239_v29  ;;  %v263_v33 = vadd.f32 %v262_v31, %v256_v27 }
  0x22   : > { %v241_v34 = vrot.slane %v240_v32, 4  ;;  %v264_v35 = vadd.f32 %v263_v33, %v257_v30 }
  0x24   : > { %v242_v36 = vadd.f32 %v241_v34, %v240_v32  ;;  %v265_v37 = vrot.slane %v264_v35, 4 }
  0x26   : > { %v243_v38 = vrot.slane %v242_v36, 2  ;;  %v266_v39 = vadd.f32 %v265_v37, %v264_v35 }
  0x28   : > { %v244_v40 = vadd.f32 %v243_v38, %v242_v36  ;;  %v267_v41 = vrot.slane %v266_v39, 2 }
  0x2a   : > { %v245_v42 = vrot.slane %v244_v40, 1  ;;  %v268_v43 = vadd.f32 %v267_v41, %v266_v39 }
  0x2c   : > { %v246_v45 = vadd.f32 %v245_v42, %v244_v40  ;;  %v269_v46 = vrot.slane %v268_v43, 1 }
  0x2e   : > { %v247_v48 = vadd.f32 %v246_v45, %v233_v44  ;;  %v270_v49 = vadd.f32 %v269_v46, %v268_v43 }
  0x30   : > { %248 = vst [vmem:[#allocation2] sm:$0x1] %v247_v48  ;;  %v271_v50 = vadd.f32 %v270_v49, %v249_v47 }
  0x32   : > { %272 = vst [vmem:[#allocation3] sm:$0x1] %v271_v50 }
  0x37   : > { %v276_v51 = vld [vmem:[#allocation2] sm:$0x1] }
  0x38   : > { %277 = vst [vmem:[%s204_s19] sm:$0x1] %v276_v51 }
  0x39   : > { %v278_v52 = vld [vmem:[#allocation3] sm:$0x1] }
  0x3a   : > { %279 = vst [vmem:[%s210_s22] sm:$0x1] %v278_v52 }
  0x3b PF: > { %s13_s11 = sadd.s32 1, %s468_s11   ;;  %s530_s9 = smov %s464_s10 }
  0x3c   : > { %p10_p5 = scmp.ge.s32.totalorder %s13_s11, 4   ;;  %s531_s10 = smov %s533_s12 }
  0x3e   :  { %12 = sbr.rel (!%p10_p5) target bundleno = 2 (0x2), region = 74 }

// kernel: generator_forward.57
= control target key start
LH: loop header
LB: loop body
LE: loop exit
PB: predicated region body
PF: predicated region fallthrough
CT: control target
= control target key end

     0   :  { %s648_s12 = smov 0   ;;  %s650_s13 = smov 0   ;;  %s696_s0 = inlined_call_operand.vmem [shape: bf16[2,64,128], index: 0, kind: input, shape index: {}]   ;;  %s697_s1 = inlined_call_operand.vmem [shape: f32[2,1,128], index: 1, kind: input, shape index: {}]   ;;  %s698_s2 = inlined_call_operand.vmem [shape: f32[2,1,128], index: 2, kind: input, shape index: {}]   ;;  %s699_s3 = inlined_call_operand.vmem [shape: bf16[2,64,128], index: 3, kind: output, shape index: {}]  }
   0x1   :  { %s652_s14 = smov 0  }
   0x2 LB: > { %s32_s15 = sadd.s32 1, %s622_s13  ;;  %p511_p0 = scmp.ge.s32.totalorder %s626_s14, 1  ;;  %s626_s14 = sphi %s652_s14, %s13_s14   ;;  %s622_s13 = sphi %s650_s13, %s701_s13   ;;  %s618_s12 = sphi %s648_s12, %s700_s12  }
   0x3   : > { %p34_p1 = scmp.ge.s32.totalorder %s32_s15, 2  ;;  %p198_p2 = scmp.lt.s32.totalorder %s626_s14, 3 }
   0x5   : > { %s703_s15 = smov (%p34_p1, %s32_s15), 0  ;;  %p199_p3 = pnand %p511_p0, %p198_p2 }
   0x6   : > { %p249_p4 = scmp.lt.s32.totalorder (!%p199_p3), %s618_s12, 1 }
   0x7   : > { %202 = sbr.rel (%p199_p3) target bundleno = 30 (0x1e), region = 32 }
   0xe   : > { %s705_s12 = smov (!%p249_p4, %s618_s12), 1 }
   0xf   : > { %s528_s16 = sshll.u32 %s705_s12, 5  ;;  %s266_s19 = scalar_lea.vmem %s697_s1, %s705_s12 }
  0x10   : > { %s259_s22 = scalar_lea.vmem %s696_s0, %s528_s16  ;;  %s272_s25 = scalar_lea.vmem %s698_s2, %s705_s12  ;;  %v516_v1 = vld [vmem:[%s266_s19] ss:$0 sm:$0xff] }
  0x11   : > { %v539_v0 = vld [vmem:[%s259_s22] sm:$0xff]   ;;  %v574_v2 = vld [vmem:[%s259_s22 + $0x8] sm:$0xff]   ;;  %v575_v7 = vld [vmem:[%s259_s22 + $0x10] sm:$0xff]   ;;  %s284_s28 = scalar_lea.vmem %s699_s3, %s528_s16 }
  0x12   : > { %v540_v3 = vunpack.c.l.bf16 %v539_v0  ;;  %v541_v4 = vunpack.c.h.bf16 %v539_v0  ;;  %v544_v5 = vunpack.c.l.bf16 %v574_v2  ;;  %v545_v6 = vunpack.c.h.bf16 %v574_v2  ;;  %v576_v8 = vld [vmem:[%s259_s22 + $0x18] sm:$0xff]   ;;  %v517_v9 = vld [vmem:[%s272_s25] ss:$0 sm:$0xff] }
  0x13   : > { %v548_v10 = vunpack.c.l.bf16 %v575_v7  ;;  %v549_v11 = vunpack.c.h.bf16 %v575_v7  ;;  %v552_v12 = vunpack.c.l.bf16 %v576_v8  ;;  %v553_v13 = vunpack.c.h.bf16 %v576_v8 }
  0x14   : > { %v309_v14 = vsub.f32 %v540_v3, %v516_v1  ;;  %v310_v15 = vsub.f32 %v541_v4, %v516_v1  ;;  %v311_v16 = vsub.f32 %v544_v5, %v516_v1  ;;  %v312_v17 = vsub.f32 %v545_v6, %v516_v1 }
  0x15   : > { %v313_v18 = vsub.f32 %v548_v10, %v516_v1  ;;  %v314_v19 = vsub.f32 %v549_v11, %v516_v1  ;;  %v315_v20 = vsub.f32 %v552_v12, %v516_v1  ;;  %v316_v21 = vsub.f32 %v553_v13, %v516_v1 }
  0x16   : > { %v324_v22 = vmul.f32 %v517_v9, %v309_v14  ;;  %v325_v23 = vmul.f32 %v517_v9, %v310_v15  ;;  %v326_v24 = vmul.f32 %v517_v9, %v311_v16  ;;  %v327_v25 = vmul.f32 %v517_v9, %v312_v17 }
  0x17   : > { %v328_v26 = vmul.f32 %v517_v9, %v313_v18  ;;  %v329_v27 = vmul.f32 %v517_v9, %v314_v19  ;;  %v330_v28 = vmul.f32 %v517_v9, %v315_v20  ;;  %v331_v29 = vmul.f32 %v517_v9, %v316_v21 }
  0x18   : > { %v332_v30 = vmax.f32 %v324_v22, 0.0  ;;  %v333_v31 = vmax.f32 %v325_v23, 0.0  ;;  %v334_v32 = vmax.f32 %v326_v24, 0.0  ;;  %v335_v33 = vmax.f32 %v327_v25, 0.0 }
  0x19   : > { %v336_v34 = vmax.f32 %v328_v26, 0.0  ;;  %v337_v35 = vmax.f32 %v329_v27, 0.0  ;;  %v338_v36 = vmax.f32 %v330_v28, 0.0  ;;  %v339_v37 = vmax.f32 %v331_v29, 0.0 }
  0x1a   : > { %v557_v38 = vpack.c.bf16 %v333_v31, %v332_v30  ;;  %v562_v39 = vpack.c.bf16 %v335_v33, %v334_v32 }
  0x1b   : > { %v567_v40 = vpack.c.bf16 %v337_v35, %v336_v34  ;;  %v572_v41 = vpack.c.bf16 %v339_v37, %v338_v36 }
  0x1c   : > { %558 = vst [vmem:[%s284_s28] sm:$0xff] %v557_v38   ;;  %577 = vst [vmem:[%s284_s28 + $0x8] sm:$0xff] %v562_v39  }
  0x1d   : > { %578 = vst [vmem:[%s284_s28 + $0x10] sm:$0xff] %v567_v40   ;;  %579 = vst [vmem:[%s284_s28 + $0x18] sm:$0xff] %v572_v41  }
  0x1e PF: > { %s13_s14 = sadd.s32 1, %s626_s14   ;;  %s700_s12 = smov %s622_s13 }
  0x1f   : > { %p10_p5 = scmp.ge.s32.totalorder %s13_s14, 4   ;;  %s701_s13 = smov %s703_s15 }
  0x21   :  { %12 = sbr.rel (!%p10_p5) target bundleno = 2 (0x2), region = 68 }

// kernel: generator_forward.55
= control target key start
LH: loop header
LB: loop body
LE: loop exit
PB: predicated region body
PF: predicated region fallthrough
CT: control target
= control target key end

     0   :  { %s1635_s12 = smov 0   ;;  %s1637_s13 = smov 0   ;;  %s1849_s0 = inlined_call_operand.vmem [shape: bf16[128,768], index: 0, kind: input, shape index: {}]   ;;  %s1850_s1 = inlined_call_operand.vmem [shape: bf16[768,128], index: 1, kind: input, shape index: {}]   ;;  %s1851_s2 = inlined_call_operand.vmem [shape: f32[1,128], index: 2, kind: input, shape index: {}]   ;;  %s1852_s3 = inlined_call_operand.vmem [shape: bf16[128,128], index: 3, kind: output, shape index: {}]  }
   0x1   :  { %s1639_s14 = smov 0   ;;  %s1641_s15 = smov 0  }
   0x2   :  { %s1643_s16 = smov 0  }
   0x3 LB: > { %s25_s17 = sadd.s32 1, %s1608_s15  ;;  %p48_p1 = scmp.ne.s32.totalorder %s1600_s13, %s1596_s12  ;;  %s1612_s16 = sphi %s1643_s16, %s13_s16   ;;  %s1608_s15 = sphi %s1641_s15, %s1856_s15   ;;  %s1604_s14 = sphi %s1639_s14, %s1855_s14   ;;  %s1600_s13 = sphi %s1637_s13, %s1854_s13   ;;  %s1596_s12 = sphi %s1635_s12, %s1853_s12  }
   0x4   : > { %p26_p0 = scmp.ge.s32.totalorder %s25_s17, 2  ;;  %p49_p2 = scmp.eq.s32.totalorder %s1612_s16, 0 }
   0x5   : > { %s41_s19 = sadd.s32 1, %s1600_s13  ;;  %p1192_p5 = scmp.ge.s32.totalorder %s1612_s16, 2 }
   0x6   : > { %s1858_s17 = smov (%p26_p0, %s25_s17), 0  ;;  %p50_p3 = por %p49_p2, %p48_p1 }
   0x7   : > { %s37_s18 = ssub.s32 %s1608_s15, %s1858_s17  ;;  %167 = sbr.rel (%p1192_p5) target bundleno = 37 (0x25), region = 24 }
   0x8   : > { %p39_p4 = scmp.eq.s32.totalorder %s37_s18, 0 }
   0xa   : > { %s1670_s20 = scalar_select %p39_p4, %s1600_s13, %s41_s19  }
   0xe   : > { %170 = sbr.rel (!%p50_p3) target bundleno = 37 (0x25), region = 28  ;;  %s172_s21 = sand.u32 (%p50_p3), 1, %s1600_s13  }
   0xf   : > { %s1299_s22 = smul.u32 (%p50_p3), 12, %s1608_s15 }
  0x10   : > { %s1475_s23 = smul.u32 (%p50_p3), 192, %s172_s21 }
  0x11   : > { %s1678_s26 = scalar_lea.vmem (%p50_p3), %s1849_s0, %s1299_s22 }
  0x12   : > { %v195_v0 = vld [vmem:[%s1678_s26] sm:$0xff] (%p50_p3)  ;;  %v197_v1 = vld [vmem:[%s1678_s26 + $0x18] sm:$0xff] (%p50_p3)  ;;  %v199_v2 = vld [vmem:[%s1678_s26 + $0x30] sm:$0xff] (%p50_p3)  ;;  %s1683_s27 = scalar_lea.vmem (%p50_p3), [#allocation3], %s1475_s23 }
  0x13   : > { %196 = vst [vmem:[%s1683_s27] sm:$0xff] (%p50_p3), %v195_v0  ;;  %198 = vst [vmem:[%s1683_s27 + $0xc] sm:$0xff] (%p50_p3), %v197_v1  ;;  %v201_v3 = vld [vmem:[%s1678_s26 + $0x48] sm:$0xff] (%p50_p3)  ;;  %v203_v4 = vld [vmem:[%s1678_s26 + $0x60] sm:$0xff] (%p50_p3) }
  0x14   : > { %200 = vst [vmem:[%s1683_s27 + $0x18] sm:$0xff] (%p50_p3), %v199_v2  ;;  %v205_v5 = vld [vmem:[%s1678_s26 + $0x78] sm:$0xff] (%p50_p3)  ;;  %202 = vst [vmem:[%s1683_s27 + $0x24] sm:$0xff] (%p50_p3), %v201_v3  ;;  %v207_v6 = vld [vmem:[%s1678_s26 + $0x90] sm:$0xff] (%p50_p3) }
  0x15   : > { %204 = vst [vmem:[%s1683_s27 + $0x30] sm:$0xff] %v203_v4  ;;  %206 = vst [vmem:[%s1683_s27 + $0x3c] sm:$0xff] %v205_v5  ;;  %v209_v7 = vld [vmem:[%s1678_s26 + $0xa8] sm:$0xff]  ;;  %v211_v8 = vld [vmem:[%s1678_s26 + $0xc0] sm:$0xff] }
  0x16   : > { %208 = vst [vmem:[%s1683_s27 + $0x48] sm:$0xff] %v207_v6  ;;  %210 = vst [vmem:[%s1683_s27 + $0x54] sm:$0xff] %v209_v7  ;;  %v213_v9 = vld [vmem:[%s1678_s26 + $0xd8] sm:$0xff]  ;;  %v215_v10 = vld [vmem:[%s1678_s26 + $0xf0] sm:$0xff] }
  0x17   : > { %212 = vst [vmem:[%s1683_s27 + $0x60] sm:$0xff] %v211_v8  ;;  %v217_v11 = vld [vmem:[%s1678_s26 + $0x108] sm:$0xff]  ;;  %214 = vst [vmem:[%s1683_s27 + $0x6c] sm:$0xff] %v213_v9  ;;  %v219_v12 = vld [vmem:[%s1678_s26 + $0x120] sm:$0xff] }
  0x18   : > { %216 = vst [vmem:[%s1683_s27 + $0x78] sm:$0xff] %v215_v10  ;;  %218 = vst [vmem:[%s1683_s27 + $0x84] sm:$0xff] %v217_v11  ;;  %v221_v13 = vld [vmem:[%s1678_s26 + $0x138] sm:$0xff]  ;;  %v223_v14 = vld [vmem:[%s1678_s26 + $0x150] sm:$0xff] }
  0x19   : > { %220 = vst [vmem:[%s1683_s27 + $0x90] sm:$0xff] %v219_v12  ;;  %222 = vst [vmem:[%s1683_s27 + $0x9c] sm:$0xff] %v221_v13  ;;  %v225_v15 = vld [vmem:[%s1678_s26 + $0x168] sm:$0xff]  ;;  %v1196_v17 = vld [vmem:[%s1678_s26 + $0x20] sm:$0xf] }
  0x1a   : > { %224 = vst [vmem:[%s1683_s27 + $0xa8] sm:$0xff] %v223_v14  ;;  %v1194_v16 = vld [vmem:[%s1678_s26 + $0x8] sm:$0xf]  ;;  %226 = vst [vmem:[%s1683_s27 + $0xb4] sm:$0xff] %v225_v15  ;;  %v1198_v18 = vld [vmem:[%s1678_s26 + $0x38] sm:$0xf] }
  0x1b   : > { %1195 = vst [vmem:[%s1683_s27 + $0x8] sm:$0xf] %v1194_v16  ;;  %1197 = vst [vmem:[%s1683_s27 + $0x14] sm:$0xf] %v1196_v17  ;;  %v1200_v19 = vld [vmem:[%s1678_s26 + $0x50] sm:$0xf] }
  0x1c   : > { %v1202_v20 = vld [vmem:[%s1678_s26 + $0x68] sm:$0xf]  ;;  %1199 = vst [vmem:[%s1683_s27 + $0x20] sm:$0xf] %v1198_v18  ;;  %1201 = vst [vmem:[%s1683_s27 + $0x2c] sm:$0xf] %v1200_v19 }
  0x1d   : > { %1203 = vst [vmem:[%s1683_s27 + $0x38] sm:$0xf] %v1202_v20  ;;  %v1204_v21 = vld [vmem:[%s1678_s26 + $0x80] sm:$0xf]  ;;  %v1206_v22 = vld [vmem:[%s1678_s26 + $0x98] sm:$0xf] }
  0x1e   : > { %v1208_v23 = vld [vmem:[%s1678_s26 + $0xb0] sm:$0xf]  ;;  %1205 = vst [vmem:[%s1683_s27 + $0x44] sm:$0xf] %v1204_v21  ;;  %1207 = vst [vmem:[%s1683_s27 + $0x50] sm:$0xf] %v1206_v22 }
  0x1f   : > { %1209 = vst [vmem:[%s1683_s27 + $0x5c] sm:$0xf] %v1208_v23  ;;  %v1210_v24 = vld [vmem:[%s1678_s26 + $0xc8] sm:$0xf]  ;;  %v1212_v25 = vld [vmem:[%s1678_s26 + $0xe0] sm:$0xf] }
  0x20   : > { %v1214_v26 = vld [vmem:[%s1678_s26 + $0xf8] sm:$0xf]  ;;  %1211 = vst [vmem:[%s1683_s27 + $0x68] sm:$0xf] %v1210_v24  ;;  %1213 = vst [vmem:[%s1683_s27 + $0x74] sm:$0xf] %v1212_v25 }
  0x21   : > { %1215 = vst [vmem:[%s1683_s27 + $0x80] sm:$0xf] %v1214_v26  ;;  %v1216_v27 = vld [vmem:[%s1678_s26 + $0x110] sm:$0xf]  ;;  %v1218_v28 = vld [vmem:[%s1678_s26 + $0x128] sm:$0xf] }
  0x22   : > { %v1220_v29 = vld [vmem:[%s1678_s26 + $0x140] sm:$0xf]  ;;  %1217 = vst [vmem:[%s1683_s27 + $0x8c] sm:$0xf] %v1216_v27  ;;  %1219 = vst [vmem:[%s1683_s27 + $0x98] sm:$0xf] %v1218_v28 }
  0x23   : > { %1221 = vst [vmem:[%s1683_s27 + $0xa4] sm:$0xf] %v1220_v29  ;;  %v1222_v30 = vld [vmem:[%s1678_s26 + $0x158] sm:$0xf]  ;;  %v1224_v31 = vld [vmem:[%s1678_s26 + $0x170] sm:$0xf] }
  0x24   : > { %1223 = vst [vmem:[%s1683_s27 + $0xb0] sm:$0xf] %v1222_v30  ;;  %1225 = vst [vmem:[%s1683_s27 + $0xbc] sm:$0xf] %v1224_v31 }
  0x25 PF: > { %p1226_p6 = scmp.ge.s32.totalorder %s1612_s16, 1  ;;  %p270_p7 = scmp.lt.s32.totalorder %s1612_s16, 3 }
  0x27   : > { %p271_p8 = pnand %p1226_p6, %p270_p7 }
  0x28   : > { %s277_s28 = sand.u32 (!%p271_p8), 1, %s1596_s12   ;;  %p1227_p9 = scmp.ne.s32.totalorder (!%p271_p8), %s1604_s14, 0 }
  0x29   : > { %274 = sbr.rel (%p271_p8) target bundleno = 385 (0x181), region = 54 }
  0x2a   : > { %s1476_s29 = smul.u32 (!%p271_p8), 192, %s277_s28 }
  0x2c   : > { %s1749_s30 = scalar_lea.vmem (!%p271_p8), [#allocation3], %s1476_s29 }
  0x30   : > { %332 = sbr.rel (%p1227_p9) target bundleno = 57 (0x39), region = 62  ;;  %v1614_v32 = vmov (!%p1227_p9), 0.0  }
  0x31   : > { %333 = vst [vmem:[#allocation2] sm:$0xff] (!%p1227_p9), %v1614_v32  ;;  %334 = vst [vmem:[#allocation2 + $0x8] sm:$0xff] (!%p1227_p9), %v1614_v32 }
  0x32   : > { %335 = vst [vmem:[#allocation2 + $0x10] sm:$0xff] (!%p1227_p9), %v1614_v32  ;;  %336 = vst [vmem:[#allocation2 + $0x18] sm:$0xff] (!%p1227_p9), %v1614_v32 }
  0x33   : > { %337 = vst [vmem:[#allocation2 + $0x20] sm:$0xff] (!%p1227_p9), %v1614_v32  ;;  %338 = vst [vmem:[#allocation2 + $0x28] sm:$0xff] (!%p1227_p9), %v1614_v32 }
  0x34   : > { %339 = vst [vmem:[#allocation2 + $0x30] sm:$0xff] (!%p1227_p9), %v1614_v32  ;;  %340 = vst [vmem:[#allocation2 + $0x38] sm:$0xff] (!%p1227_p9), %v1614_v32 }
  0x35   : > { %341 = vst [vmem:[#allocation2 + $0x40] sm:$0xff] (!%p1227_p9), %v1614_v32  ;;  %342 = vst [vmem:[#allocation2 + $0x48] sm:$0xff] (!%p1227_p9), %v1614_v32 }
  0x36   : > { %343 = vst [vmem:[#allocation2 + $0x50] sm:$0xff] (!%p1227_p9), %v1614_v32  ;;  %344 = vst [vmem:[#allocation2 + $0x58] sm:$0xff] (!%p1227_p9), %v1614_v32 }
  0x37   : > { %345 = vst [vmem:[#allocation2 + $0x60] sm:$0xff] %v1614_v32  ;;  %346 = vst [vmem:[#allocation2 + $0x68] sm:$0xff] %v1614_v32 }
  0x38   : > { %347 = vst [vmem:[#allocation2 + $0x70] sm:$0xff] %v1614_v32  ;;  %348 = vst [vmem:[#allocation2 + $0x78] sm:$0xff] %v1614_v32 }
  0x39 PF: > { %s349_s4 = smul.u32 384, %s1604_s14  ;;  %v1544_v33 = vld [vmem:[%s1749_s30 + $0x4] ss:$12 sps:$4 sm:$0xff]   ;;  %v1545_v34 = vld [vmem:[%s1749_s30 + $0x8] ss:$12 sps:$4 sm:$0xff]   ;;  %p1277_p10 = scmp.ne.s32.totalorder %s1604_s14, 1 }
  0x3a   : > { %754 = vmatprep.mubr.bf16.mxu0 %v1544_v33  ;;  %1459 = vmatprep.mubr.bf16.mxu1 %v1545_v34  ;;  %v1542_v59 = vld [vmem:[%s1749_s30] ss:$12 sps:$4 sm:$0xff]   ;;  %v1547_v60 = vld [vmem:[%s1749_s30 + $0x1c] ss:$12 sps:$4 sm:$0xff]   ;;  %v1553_v62 = vld [vmem:[%s1749_s30 + $0x38] ss:$12 sps:$4 sm:$0xff]  }
  0x3b   : > { %s398_s5 = sshra.s32 %s349_s4, 3  ;;  %v1546_v61 = vld [vmem:[%s1749_s30 + $0x20] ss:$12 sps:$4 sm:$0xff]   ;;  %v1549_v63 = vld [vmem:[%s1749_s30 + $0x18] ss:$12 sps:$4 sm:$0xff]  }
  0x3c   : > { %s1228_s6 = sshll.u32 %s398_s5, 2  ;;  %v1550_v0 = vld [vmem:[%s1749_s30 + $0x34] ss:$12 sps:$4 sm:$0xff]   ;;  %v1554_v1 = vld [vmem:[%s1749_s30 + $0x50] ss:$12 sps:$4 sm:$0xff]   ;;  %v351_v28 = vld [vmem:[#allocation2 + $0x8] sm:$0xff] }
  0x3d   : > { %s1758_s9 = scalar_lea.vmem %s1850_s1, %s1228_s6  ;;  %v1561_v2 = vld [vmem:[%s1749_s30 + $0x68] ss:$12 sps:$4 sm:$0xff]   ;;  %v1552_v3 = vld [vmem:[%s1749_s30 + $0x30] ss:$12 sps:$4 sm:$0xff]   ;;  %v1555_v4 = vld [vmem:[%s1749_s30 + $0x4c] ss:$12 sps:$4 sm:$0xff]  }
  0x3e   : > { %v1518_v35 = vld [vmem:[%s1758_s9 + $0x40] sm:$0xff]   ;;  %v1521_v38 = vld [vmem:[%s1758_s9 + $0x48] sm:$0xff]   ;;  %v1524_v41 = vld [vmem:[%s1758_s9 + $0x50] sm:$0xff]  }
  0x3f   : > { %v1519_v36 = vld [vmem:[%s1758_s9] sm:$0xff]   ;;  %1363 = vmatprep.subr.bf16.mxu0 %v1518_v35  ;;  %v1522_v39 = vld [vmem:[%s1758_s9 + $0x8] sm:$0xff]   ;;  %v1525_v42 = vld [vmem:[%s1758_s9 + $0x10] sm:$0xff]  }
  0x40   : > { %v1520_v37 = vld [vmem:[%s1758_s9 + $0x80] sm:$0xff]   ;;  %1364 = vmatpush3.bf16.msra.mxu0 %v1519_v36  ;;  %v1523_v40 = vld [vmem:[%s1758_s9 + $0x88] sm:$0xff]   ;;  %v1526_v43 = vld [vmem:[%s1758_s9 + $0x90] sm:$0xff]  }
  0x41   : > { %1443 = vmatprep.subr.bf16.mxu1 %v1520_v37  ;;  %1365 = vmatprep.subr.bf16.mxu0 %v1521_v38  ;;  %v1527_v44 = vld [vmem:[%s1758_s9 + $0x58] sm:$0xff]   ;;  %v1530_v47 = vld [vmem:[%s1758_s9 + $0x60] sm:$0xff]   ;;  %v1533_v50 = vld [vmem:[%s1758_s9 + $0x68] sm:$0xff]  }
  0x42   : > { %1444 = vmatpush3.bf16.msra.mxu1 %v1520_v37  ;;  %v1528_v45 = vld [vmem:[%s1758_s9 + $0x18] sm:$0xff]   ;;  %v1532_v48 = vld [vmem:[%s1758_s9 + $0xa0] sm:$0xff]   ;;  %v1535_v51 = vld [vmem:[%s1758_s9 + $0xa8] sm:$0xff]  }
  0x43   : > { %1445 = vmatprep.subr.bf16.mxu1 %v1523_v40  ;;  %v1529_v46 = vld [vmem:[%s1758_s9 + $0x98] sm:$0xff]   ;;  %v1531_v49 = vld [vmem:[%s1758_s9 + $0x20] sm:$0xff]   ;;  %v1534_v52 = vld [vmem:[%s1758_s9 + $0x28] sm:$0xff]  }
  0x44   : > { %1366 = vmatpush3.bf16.msra.mxu0 %v1522_v39  ;;  %v1536_v53 = vld [vmem:[%s1758_s9 + $0x70] sm:$0xff]   ;;  %v1539_v56 = vld [vmem:[%s1758_s9 + $0x78] sm:$0xff]   ;;  %v1562_v5 = vld [vmem:[%s1749_s30 + $0x80] ss:$12 sps:$4 sm:$0xff]  }
  0x45   : > { %1367 = vmatprep.subr.bf16.mxu0 %v1524_v41  ;;  %v1538_v54 = vld [vmem:[%s1758_s9 + $0xb0] sm:$0xff]   ;;  %v1541_v57 = vld [vmem:[%s1758_s9 + $0xb8] sm:$0xff]   ;;  %v1560_v10 = vld [vmem:[%s1749_s30 + $0x60] ss:$12 sps:$4 sm:$0xff]  }
  0x46   : > { %1446 = vmatpush3.bf16.msra.mxu1 %v1523_v40  ;;  %v1537_v55 = vld [vmem:[%s1758_s9 + $0x30] sm:$0xff]   ;;  %v1540_v58 = vld [vmem:[%s1758_s9 + $0x38] sm:$0xff]   ;;  %v350_v23 = vld [vmem:[#allocation2] sm:$0xff] }
  0x47   : > { %1447 = vmatprep.subr.bf16.mxu1 %v1526_v43  ;;  %v1569_v6 = vld [vmem:[%s1749_s30 + $0x98] ss:$12 sps:$4 sm:$0xff]   ;;  %v1557_v7 = vld [vmem:[%s1749_s30 + $0x48] ss:$12 sps:$4 sm:$0xff]   ;;  %v1570_v9 = vld [vmem:[%s1749_s30 + $0xb0] ss:$12 sps:$4 sm:$0xff]  }
  0x48   : > { %1368 = vmatpush3.bf16.msra.mxu0 %v1525_v42  ;;  %v1558_v8 = vld [vmem:[%s1749_s30 + $0x64] ss:$12 sps:$4 sm:$0xff]   ;;  %v1563_v11 = vld [vmem:[%s1749_s30 + $0x7c] ss:$12 sps:$4 sm:$0xff]   ;;  %v1566_v13 = vld [vmem:[%s1749_s30 + $0x94] ss:$12 sps:$4 sm:$0xff]  }
  0x49   : > { %1369 = vmatprep.subr.bf16.mxu0 %v1527_v44  ;;  %v1565_v12 = vld [vmem:[%s1749_s30 + $0x78] ss:$12 sps:$4 sm:$0xff]   ;;  %v1568_v14 = vld [vmem:[%s1749_s30 + $0x90] ss:$12 sps:$4 sm:$0xff]   ;;  %v1573_v16 = vld [vmem:[%s1749_s30 + $0xa8] ss:$12 sps:$4 sm:$0xff]  }
  0x4a   : > { %1448 = vmatpush3.bf16.msra.mxu1 %v1526_v43  ;;  %v1571_v15 = vld [vmem:[%s1749_s30 + $0xac] ss:$12 sps:$4 sm:$0xff]   ;;  %v352_v38 = vld [vmem:[#allocation2 + $0x10] sm:$0xff] }
  0x4b   : > { %1449 = vmatprep.subr.bf16.mxu1 %v1529_v46  ;;  %v353_v44 = vld [vmem:[#allocation2 + $0x18] sm:$0xff] }
  0x4c   : > { %1370 = vmatpush3.bf16.msra.mxu0 %v1528_v45 }
  0x4d   : > { %1371 = vmatprep.subr.bf16.mxu0 %v1530_v47 }
  0x4e   : > { %1450 = vmatpush3.bf16.msra.mxu1 %v1529_v46 }
  0x4f   : > { %1451 = vmatprep.subr.bf16.mxu1 %v1532_v48 }
  0x50   : > { %1372 = vmatpush3.bf16.msra.mxu0 %v1531_v49 }
  0x51   : > { %1373 = vmatprep.subr.bf16.mxu0 %v1533_v50 }
  0x52   : > { %1452 = vmatpush3.bf16.msra.mxu1 %v1532_v48 }
  0x53   : > { %1453 = vmatprep.subr.bf16.mxu1 %v1535_v51 }
  0x54   : > { %1374 = vmatpush3.bf16.msra.mxu0 %v1534_v52 }
  0x55   : > { %1375 = vmatprep.subr.bf16.mxu0 %v1536_v53 }
  0x56   : > { %1454 = vmatpush3.bf16.msra.mxu1 %v1535_v51 }
  0x57   : > { %1455 = vmatprep.subr.bf16.mxu1 %v1538_v54 }
  0x58   : > { %1376 = vmatpush3.bf16.msra.mxu0 %v1537_v55  ;;  %v354_v55 = vld [vmem:[#allocation2 + $0x20] sm:$0xff] }
  0x59   : > { %1377 = vmatprep.subr.bf16.mxu0 %v1539_v56 }
  0x5a   : > { %1456 = vmatpush3.bf16.msra.mxu1 %v1538_v54 }
  0x5b   : > { %1457 = vmatprep.subr.bf16.mxu1 %v1541_v57 }
  0x5c   : > { %1378 = vmatpush3.bf16.msra.mxu0 %v1540_v58 }
  0x5e   : > { %1458 = vmatpush3.bf16.msra.mxu1 %v1541_v57 }
  0x5f   : > { %755 = vmatmul.mubr.bf16.vlgmr.msra.gmra.mrb[0].mxu0 %v1542_v59 }
  0x60   : > { %762 = vmatprep.mubr.bf16.mxu0 %v1547_v60  ;;  %v355_v60 = vld [vmem:[#allocation2 + $0x28] sm:$0xff] }
  0x61   : > { %1460 = vmatmul.mubr.bf16.vlgmr.msra.gmra.mrb[0].mxu1 %v1546_v61 }
  0x62   : > { %1463 = vmatprep.mubr.bf16.mxu1 %v1553_v62 }
  0x67   : > { %763 = vmatmul.mubr.bf16.gmra.mrb[4].mxu0 %v1549_v63 }
  0x68   : > { %770 = vmatprep.mubr.bf16.mxu0 %v1550_v0 }
  0x69   : > { %1464 = vmatmul.mubr.bf16.gmra.mrb[4].mxu1 %v1554_v1 }
  0x6a   : > { %1467 = vmatprep.mubr.bf16.mxu1 %v1561_v2 }
  0x6f   : > { %771 = vmatmul.mubr.bf16.gmra.mrb[8].mxu0 %v1552_v3 }
  0x70   : > { %778 = vmatprep.mubr.bf16.mxu0 %v1555_v4 }
  0x71   : > { %1468 = vmatmul.mubr.bf16.gmra.mrb[8].mxu1 %v1562_v5 }
  0x72   : > { %1471 = vmatprep.mubr.bf16.mxu1 %v1569_v6  ;;  %v356_v6 = vld [vmem:[#allocation2 + $0x30] sm:$0xff] }
  0x77   : > { %779 = vmatmul.mubr.bf16.gmra.mrb[12].mxu0 %v1557_v7 }
  0x78   : > { %786 = vmatprep.mubr.bf16.mxu0 %v1558_v8 }
  0x79   : > { %1472 = vmatmul.mubr.bf16.gmra.mrb[12].mxu1 %v1570_v9 }
  0x7f   : > { %787 = vmatmul.mubr.bf16.gmra.mrb[16].mxu0 %v1560_v10 }
  0x80   : > { %794 = vmatprep.mubr.bf16.mxu0 %v1563_v11 }
  0x87   : > { %795 = vmatmul.mubr.bf16.gmra.mrb[20].mxu0 %v1565_v12  ;;  %v357_v12 = vld [vmem:[#allocation2 + $0x38] sm:$0xff] }
  0x88   : > { %802 = vmatprep.mubr.bf16.mxu0 %v1566_v13 }
  0x8f   : > { %803 = vmatmul.mubr.bf16.gmra.mrb[24].mxu0 %v1568_v14 }
  0x90   : > { %810 = vmatprep.mubr.bf16.mxu0 %v1571_v15 }
  0x97   : > { %811 = vmatmul.mubr.bf16.gmra.mrb[28].mxu0 %v1573_v16 }
 0x132   : > { %v1379_v17 = vpop.f32.mrb[0].mxu0 }
 0x133   : > { %v1380_v18 = vpop.f32.mrb[1].mxu0 }
 0x134   : > { %v1381_v19 = vadd.f32 %v1380_v18, %v1379_v17  ;;  %v1382_v20 = vpop.f32.mrb[2].mxu0  ;;  %v1461_v21 = vpop.f32.mrb[0].mxu1 }
 0x135   : > { %v1383_v22 = vpop.f32.mrb[3].mxu0  ;;  %v853_v24 = vpop.f32.mrb[1].mxu1 }
 0x136   : > { %v1384_v25 = vadd.f32 %v1383_v22, %v1382_v20  ;;  %v854_v26 = vadd.f32 %v1381_v19, %v853_v24  ;;  %v1462_v27 = vpop.f32.mrb[2].mxu1  ;;  %v358_v22 = vld [vmem:[#allocation2 + $0x40] sm:$0xff] }
 0x137   : > { %v856_v29 = vpop.f32.mrb[3].mxu1 }
 0x138   : > { %v916_v30 = vadd.f32 %v854_v26, %v350_v23  ;;  %v857_v31 = vadd.f32 %v1384_v25, %v856_v29  ;;  %v359_v25 = vld [vmem:[#allocation2 + $0x48] sm:$0xff] }
 0x13a   : > { %932 = vst [vmem:[#allocation2] sm:$0xff] %v916_v30  ;;  %v917_v32 = vadd.f32 %v857_v31, %v351_v28  ;;  %v1385_v33 = vpop.f32.mrb[4].mxu0 }
 0x13b   : > { %v1386_v34 = vpop.f32.mrb[5].mxu0 }
 0x13c   : > { %933 = vst [vmem:[#allocation2 + $0x8] sm:$0xff] %v917_v32  ;;  %v1387_v35 = vadd.f32 %v1386_v34, %v1385_v33  ;;  %v1388_v36 = vpop.f32.mrb[6].mxu0  ;;  %v1465_v37 = vpop.f32.mrb[4].mxu1  ;;  %v360_v33 = vld [vmem:[#allocation2 + $0x50] sm:$0xff] }
 0x13d   : > { %v1389_v39 = vpop.f32.mrb[7].mxu0  ;;  %v869_v40 = vpop.f32.mrb[5].mxu1 }
 0x13e   : > { %v862_v41 = vadd.f32 %v1461_v21, %v1387_v35  ;;  %v1390_v42 = vadd.f32 %v1389_v39, %v1388_v36  ;;  %v1466_v43 = vpop.f32.mrb[6].mxu1 }
 0x13f   : > { %v872_v45 = vpop.f32.mrb[7].mxu1 }
 0x140   : > { %v918_v46 = vadd.f32 %v862_v41, %v352_v38  ;;  %v865_v47 = vadd.f32 %v1462_v27, %v1390_v42 }
 0x142   : > { %934 = vst [vmem:[#allocation2 + $0x10] sm:$0xff] %v918_v46  ;;  %v919_v48 = vadd.f32 %v865_v47, %v353_v44  ;;  %v1391_v49 = vpop.f32.mrb[8].mxu0  ;;  %v362_v46 = vld [vmem:[#allocation2 + $0x60] sm:$0xff] }
 0x143   : > { %v1392_v50 = vpop.f32.mrb[9].mxu0 }
 0x144   : > { %935 = vst [vmem:[#allocation2 + $0x18] sm:$0xff] %v919_v48  ;;  %v1393_v51 = vadd.f32 %v1392_v50, %v1391_v49  ;;  %v1394_v52 = vpop.f32.mrb[10].mxu0  ;;  %v1469_v53 = vpop.f32.mrb[8].mxu1  ;;  %v363_v49 = vld [vmem:[#allocation2 + $0x68] sm:$0xff] }
 0x145   : > { %v1395_v54 = vpop.f32.mrb[11].mxu0  ;;  %v885_v56 = vpop.f32.mrb[9].mxu1 }
 0x146   : > { %v1396_v57 = vadd.f32 %v1395_v54, %v1394_v52  ;;  %v870_v58 = vadd.f32 %v1393_v51, %v869_v40  ;;  %v1470_v59 = vpop.f32.mrb[10].mxu1 }
 0x147   : > { %v888_v61 = vpop.f32.mrb[11].mxu1 }
 0x148   : > { %v920_v62 = vadd.f32 %v870_v58, %v354_v55  ;;  %v873_v63 = vadd.f32 %v1396_v57, %v872_v45  ;;  %v364_v57 = vld [vmem:[#allocation2 + $0x70] sm:$0xff] }
 0x14a   : > { %936 = vst [vmem:[#allocation2 + $0x20] sm:$0xff] %v920_v62  ;;  %v921_v0 = vadd.f32 %v873_v63, %v355_v60  ;;  %v1397_v1 = vpop.f32.mrb[12].mxu0 }
 0x14b   : > { %v1398_v2 = vpop.f32.mrb[13].mxu0 }
 0x14c   : > { %937 = vst [vmem:[#allocation2 + $0x28] sm:$0xff] %v921_v0  ;;  %v1399_v3 = vadd.f32 %v1398_v2, %v1397_v1  ;;  %v1400_v4 = vpop.f32.mrb[14].mxu0  ;;  %v1473_v5 = vpop.f32.mrb[12].mxu1  ;;  %v952_v1 = vld [vmem:[#allocation2] sm:$0xff] (!%p1277_p10)  ;;  %v953_v2 = vld [vmem:[#allocation2 + $0x8] sm:$0xff] (!%p1277_p10) }
 0x14d   : > { %v1401_v7 = vpop.f32.mrb[15].mxu0  ;;  %v901_v8 = vpop.f32.mrb[13].mxu1 }
 0x14e   : > { %v878_v9 = vadd.f32 %v1465_v37, %v1399_v3  ;;  %v1402_v10 = vadd.f32 %v1401_v7, %v1400_v4  ;;  %v1474_v11 = vpop.f32.mrb[14].mxu1  ;;  %v361_v37 = vld [vmem:[#allocation2 + $0x58] sm:$0xff]  ;;  %v1278_v3 = vld [vmem:[%s1851_s2] ss:$0 sm:$0xff] (!%p1277_p10)  ;;  %v954_v7 = vld [vmem:[#allocation2 + $0x10] sm:$0xff] (!%p1277_p10) }
 0x14f   : > { %v904_v13 = vpop.f32.mrb[15].mxu1  ;;  %v975_v4 = vadd.f32 (!%p1277_p10), %v1278_v3, %v952_v1 }
 0x150   : > { %v922_v14 = vadd.f32 %v878_v9, %v356_v6  ;;  %v881_v15 = vadd.f32 %v1466_v43, %v1402_v10  ;;  %v976_v6 = vadd.f32 (!%p1277_p10), %v1278_v3, %v953_v2  ;;  %v977_v9 = vadd.f32 (!%p1277_p10), %v1278_v3, %v954_v7 }
 0x152   : > { %938 = vst [vmem:[#allocation2 + $0x30] sm:$0xff] %v922_v14  ;;  %v923_v16 = vadd.f32 %v881_v15, %v357_v12  ;;  %v1403_v17 = vpop.f32.mrb[16].mxu0  ;;  %v1319_v15 = vpack.c.bf16 (!%p1277_p10), %v976_v6, %v975_v4 }
 0x153   : > { %v1404_v18 = vpop.f32.mrb[17].mxu0 }
 0x154   : > { %939 = vst [vmem:[#allocation2 + $0x38] sm:$0xff] %v923_v16  ;;  %v1405_v19 = vadd.f32 %v1404_v18, %v1403_v17  ;;  %v1406_v20 = vpop.f32.mrb[18].mxu0  ;;  %1320 = vst [vmem:[%s1852_s3] sm:$0xff] (!%p1277_p10), %v1319_v15  }
 0x155   : > { %v1407_v21 = vpop.f32.mrb[19].mxu0 }
 0x156   : > { %v1408_v23 = vadd.f32 %v1407_v21, %v1406_v20  ;;  %v886_v24 = vadd.f32 %v1405_v19, %v885_v56 }
 0x158   : > { %v924_v26 = vadd.f32 %v886_v24, %v358_v22  ;;  %v889_v27 = vadd.f32 %v1408_v23, %v888_v61  ;;  %v365_v61 = vld [vmem:[#allocation2 + $0x78] sm:$0xff] }
 0x15a   : > { %940 = vst [vmem:[#allocation2 + $0x40] sm:$0xff] %v924_v26  ;;  %v925_v28 = vadd.f32 %v889_v27, %v359_v25  ;;  %v1409_v29 = vpop.f32.mrb[20].mxu0 }
 0x15b   : > { %v1410_v30 = vpop.f32.mrb[21].mxu0  ;;  %v959_v14 = vld [vmem:[#allocation2 + $0x38] sm:$0xff] (!%p1277_p10) }
 0x15c   : > { %941 = vst [vmem:[#allocation2 + $0x48] sm:$0xff] %v925_v28  ;;  %v1411_v31 = vadd.f32 %v1410_v30, %v1409_v29  ;;  %v1412_v32 = vpop.f32.mrb[22].mxu0  ;;  %v982_v18 = vadd.f32 (!%p1277_p10), %v1278_v3, %v959_v14 }
 0x15d   : > { %v1413_v34 = vpop.f32.mrb[23].mxu0 }
 0x15e   : > { %v894_v35 = vadd.f32 %v1469_v53, %v1411_v31  ;;  %v1414_v36 = vadd.f32 %v1413_v34, %v1412_v32 }
 0x160   : > { %v926_v38 = vadd.f32 %v894_v35, %v360_v33  ;;  %v897_v39 = vadd.f32 %v1470_v59, %v1414_v36 }
 0x161   : > { %v960_v19 = vld [vmem:[#allocation2 + $0x40] sm:$0xff] (!%p1277_p10) }
 0x162   : > { %942 = vst [vmem:[#allocation2 + $0x50] sm:$0xff] %v926_v38  ;;  %v927_v40 = vadd.f32 %v897_v39, %v361_v37  ;;  %v1415_v41 = vpop.f32.mrb[24].mxu0  ;;  %v983_v23 = vadd.f32 (!%p1277_p10), %v1278_v3, %v960_v19 }
 0x163   : > { %v1416_v42 = vpop.f32.mrb[25].mxu0  ;;  %v961_v20 = vld [vmem:[#allocation2 + $0x48] sm:$0xff] (!%p1277_p10) }
 0x164   : > { %943 = vst [vmem:[#allocation2 + $0x58] sm:$0xff] %v927_v40  ;;  %v1417_v43 = vadd.f32 %v1416_v42, %v1415_v41  ;;  %v1418_v44 = vpop.f32.mrb[26].mxu0  ;;  %v984_v24 = vadd.f32 (!%p1277_p10), %v1278_v3, %v961_v20 }
 0x165   : > { %v1419_v45 = vpop.f32.mrb[27].mxu0 }
 0x166   : > { %v1420_v47 = vadd.f32 %v1419_v45, %v1418_v44  ;;  %v902_v48 = vadd.f32 %v1417_v43, %v901_v8  ;;  %v956_v8 = vld [vmem:[#allocation2 + $0x20] sm:$0xff] (!%p1277_p10)  ;;  %v1339_v35 = vpack.c.bf16 (!%p1277_p10), %v984_v24, %v983_v23 }
 0x167   : > { %v979_v12 = vadd.f32 (!%p1277_p10), %v1278_v3, %v956_v8 }
 0x168   : > { %v928_v50 = vadd.f32 %v902_v48, %v362_v46  ;;  %v905_v51 = vadd.f32 %v1420_v47, %v904_v13  ;;  %v958_v13 = vld [vmem:[#allocation2 + $0x30] sm:$0xff] (!%p1277_p10)  ;;  %1359 = vst [vmem:[%s1852_s3 + $0x20] sm:$0xff] (!%p1277_p10), %v1339_v35  }
 0x169   : > { %v981_v17 = vadd.f32 (!%p1277_p10), %v1278_v3, %v958_v13  ;;  %v962_v21 = vld [vmem:[#allocation2 + $0x50] sm:$0xff] (!%p1277_p10) }
 0x16a   : > { %944 = vst [vmem:[#allocation2 + $0x60] sm:$0xff] %v928_v50  ;;  %v929_v52 = vadd.f32 %v905_v51, %v363_v49  ;;  %v1421_v53 = vpop.f32.mrb[28].mxu0  ;;  %v985_v26 = vadd.f32 (!%p1277_p10), %v1278_v3, %v962_v21 }
 0x16b   : > { %v1422_v54 = vpop.f32.mrb[29].mxu0  ;;  %v963_v25 = vld [vmem:[#allocation2 + $0x58] sm:$0xff] (!%p1277_p10)  ;;  %v1334_v30 = vpack.c.bf16 (!%p1277_p10), %v982_v18, %v981_v17 }
 0x16c   : > { %945 = vst [vmem:[#allocation2 + $0x68] sm:$0xff] %v929_v52  ;;  %v1423_v55 = vadd.f32 %v1422_v54, %v1421_v53  ;;  %v1424_v56 = vpop.f32.mrb[30].mxu0  ;;  %v986_v31 = vadd.f32 (!%p1277_p10), %v1278_v3, %v963_v25 }
 0x16d   : > { %v1425_v58 = vpop.f32.mrb[31].mxu0  ;;  %1358 = vst [vmem:[%s1852_s3 + $0x18] sm:$0xff] (!%p1277_p10), %v1334_v30  }
 0x16e   : > { %v910_v59 = vadd.f32 %v1473_v5, %v1423_v55  ;;  %v1426_v60 = vadd.f32 %v1425_v58, %v1424_v56  ;;  %951 = sbr.rel (%p1277_p10) target bundleno = 385 (0x181), region = 66  ;;  %v955_v5 = vld [vmem:[#allocation2 + $0x18] sm:$0xff] (!%p1277_p10)  ;;  %v1344_v39 = vpack.c.bf16 (!%p1277_p10), %v986_v31, %v985_v26 }
 0x16f   : > { %v978_v10 = vadd.f32 (!%p1277_p10), %v1278_v3, %v955_v5 }
 0x170   : > { %v930_v62 = vadd.f32 %v910_v59, %v364_v57  ;;  %v913_v63 = vadd.f32 %v1474_v11, %v1426_v60  ;;  %v957_v11 = vld [vmem:[#allocation2 + $0x28] sm:$0xff] (!%p1277_p10)  ;;  %1360 = vst [vmem:[%s1852_s3 + $0x28] sm:$0xff] (!%p1277_p10), %v1344_v39  }
 0x171   : > { %v980_v16 = vadd.f32 (!%p1277_p10), %v1278_v3, %v957_v11  ;;  %v1324_v22 = vpack.c.bf16 (!%p1277_p10), %v978_v10, %v977_v9  ;;  %v964_v27 = vld [vmem:[#allocation2 + $0x60] sm:$0xff] (!%p1277_p10) }
 0x172   : > { %946 = vst [vmem:[#allocation2 + $0x70] sm:$0xff] %v930_v62  ;;  %v931_v0 = vadd.f32 %v913_v63, %v365_v61  ;;  %v987_v32 = vadd.f32 (!%p1277_p10), %v1278_v3, %v964_v27 }
 0x173   : > { %v965_v28 = vld [vmem:[#allocation2 + $0x68] sm:$0xff] (!%p1277_p10)  ;;  %v1329_v29 = vpack.c.bf16 (!%p1277_p10), %v980_v16, %v979_v12  ;;  %1356 = vst [vmem:[%s1852_s3 + $0x8] sm:$0xff] (!%p1277_p10), %v1324_v22  }
 0x174   : > { %947 = vst [vmem:[#allocation2 + $0x78] sm:$0xff] %v931_v0  ;;  %v988_v36 = vadd.f32 (!%p1277_p10), %v1278_v3, %v965_v28 }
 0x175   : > { %1357 = vst [vmem:[%s1852_s3 + $0x10] sm:$0xff] %v1329_v29  }
 0x176   : > { %v1349_v40 = vpack.c.bf16 %v988_v36, %v987_v32 }
 0x178   : > { %1361 = vst [vmem:[%s1852_s3 + $0x30] sm:$0xff] %v1349_v40  }
 0x179   : > { %v966_v33 = vld [vmem:[#allocation2 + $0x70] sm:$0xff] }
 0x17a   : > { %v989_v37 = vadd.f32 %v1278_v3, %v966_v33 }
 0x17b   : > { %v967_v34 = vld [vmem:[#allocation2 + $0x78] sm:$0xff] }
 0x17c   : > { %v990_v38 = vadd.f32 %v1278_v3, %v967_v34 }
 0x17e   : > { %v1354_v41 = vpack.c.bf16 %v990_v38, %v989_v37 }
 0x180   : > { %1362 = vst [vmem:[%s1852_s3 + $0x38] sm:$0xff] %v1354_v41  }
 0x181 PF: > { %s13_s16 = sadd.s32 1, %s1612_s16   ;;  %s1853_s12 = smov %s1600_s13 }
 0x182   : > { %p10_p11 = scmp.ge.s32.totalorder %s13_s16, 4   ;;  %s1854_s13 = smov %s1670_s20 }
 0x183   : > { %s1855_s14 = smov %s1608_s15  ;;  %s1856_s15 = smov %s1858_s17 }
 0x184   :  { %12 = sbr.rel (!%p10_p11) target bundleno = 3 (0x3), region = 114 }

// kernel: generator_forward.58
= control target key start
LH: loop header
LB: loop body
LE: loop exit
PB: predicated region body
PF: predicated region fallthrough
CT: control target
= control target key end

     0   :  { %s1239_s12 = smov 0   ;;  %s1241_s13 = smov 0   ;;  %s1381_s0 = inlined_call_operand.vmem [shape: bf16[32,1152], index: 0, kind: input, shape index: {}]   ;;  %s1382_s1 = inlined_call_operand.vmem [shape: bf16[1152,256], index: 1, kind: input, shape index: {}]   ;;  %s1383_s2 = inlined_call_operand.vmem [shape: f32[1,256], index: 2, kind: input, shape index: {}]   ;;  %s1384_s3 = inlined_call_operand.vmem [shape: bf16[32,256], index: 3, kind: output, shape index: {}]  }
   0x1   :  { %s1243_s14 = smov 0   ;;  %s1245_s15 = smov 0  }
   0x2   :  { %s1247_s16 = smov 0  }
   0x3 LB: > { %s25_s17 = sadd.s32 1, %s1211_s15  ;;  %p48_p1 = scmp.ne.s32.totalorder %s1203_s13, %s1199_s12  ;;  %s1215_s16 = sphi %s1247_s16, %s13_s16   ;;  %s1211_s15 = sphi %s1245_s15, %s1388_s15   ;;  %s1207_s14 = sphi %s1243_s14, %s1387_s14   ;;  %s1203_s13 = sphi %s1241_s13, %s1386_s13   ;;  %s1199_s12 = sphi %s1239_s12, %s1385_s12  }
   0x4   : > { %p26_p0 = scmp.ge.s32.totalorder %s25_s17, 3  ;;  %p49_p2 = scmp.eq.s32.totalorder %s1215_s16, 0 }
   0x5   : > { %s41_s19 = sadd.s32 1, %s1203_s13  ;;  %p962_p5 = scmp.ge.s32.totalorder %s1215_s16, 3 }
   0x6   : > { %s1390_s17 = smov (%p26_p0, %s25_s17), 0  ;;  %p50_p3 = por %p49_p2, %p48_p1 }
   0x7   : > { %s37_s18 = ssub.s32 %s1211_s15, %s1390_s17  ;;  %171 = sbr.rel (%p962_p5) target bundleno = 23 (0x17), region = 24 }
   0x8   : > { %p39_p4 = scmp.eq.s32.totalorder %s37_s18, 0 }
   0xa   : > { %s1274_s20 = scalar_select %p39_p4, %s1203_s13, %s41_s19  }
   0xe   : > { %174 = sbr.rel (!%p50_p3) target bundleno = 23 (0x17), region = 28  ;;  %s176_s21 = sand.u32 (%p50_p3), 1, %s1203_s13  }
   0xf   : > { %s1039_s22 = smul.u32 (%p50_p3), 12, %s1211_s15 }
  0x10   : > { %s1053_s23 = smul.u32 (%p50_p3), 48, %s176_s21 }
  0x11   : > { %s184_s26 = scalar_lea.vmem (%p50_p3), %s1381_s0, %s1039_s22 }
  0x12   : > { %v199_v0 = vld [vmem:[%s184_s26] sm:$0xff] (%p50_p3)  ;;  %v203_v2 = vld [vmem:[%s184_s26 + $0x48] sm:$0xff] (%p50_p3)  ;;  %s178_s27 = scalar_lea.vmem (%p50_p3), [#allocation3], %s1053_s23  ;;  %v968_v6 = vld [vmem:[%s184_s26 + $0x50] sm:$0xf] (%p50_p3) }
  0x13   : > { %v201_v1 = vld [vmem:[%s184_s26 + $0x24] sm:$0xff] (%p50_p3)  ;;  %200 = vst [vmem:[%s178_s27] sm:$0xff] (%p50_p3), %v199_v0  ;;  %204 = vst [vmem:[%s178_s27 + $0x18] sm:$0xff] (%p50_p3), %v203_v2  ;;  %v205_v3 = vld [vmem:[%s184_s26 + $0x6c] sm:$0xff] (%p50_p3) }
  0x14   : > { %202 = vst [vmem:[%s178_s27 + $0xc] sm:$0xff] (%p50_p3), %v201_v1  ;;  %v964_v4 = vld [vmem:[%s184_s26 + $0x8] sm:$0xf] (%p50_p3)  ;;  %v966_v5 = vld [vmem:[%s184_s26 + $0x2c] sm:$0xf] (%p50_p3)  ;;  %206 = vst [vmem:[%s178_s27 + $0x24] sm:$0xff] (%p50_p3), %v205_v3 }
  0x15   : > { %965 = vst [vmem:[%s178_s27 + $0x8] sm:$0xf] %v964_v4  ;;  %967 = vst [vmem:[%s178_s27 + $0x14] sm:$0xf] %v966_v5  ;;  %v970_v7 = vld [vmem:[%s184_s26 + $0x74] sm:$0xf] }
  0x16   : > { %969 = vst [vmem:[%s178_s27 + $0x20] sm:$0xf] %v968_v6  ;;  %971 = vst [vmem:[%s178_s27 + $0x2c] sm:$0xf] %v970_v7 }
  0x17 PF: > { %p972_p6 = scmp.ge.s32.totalorder %s1215_s16, 1  ;;  %p226_p7 = scmp.lt.s32.totalorder %s1215_s16, 4 }
  0x19   : > { %p227_p8 = pnand %p972_p6, %p226_p7 }
  0x1a   : > { %s233_s28 = sand.u32 (!%p227_p8), 1, %s1199_s12   ;;  %p973_p9 = scmp.ne.s32.totalorder (!%p227_p8), %s1207_s14, 0 }
  0x1b   : > { %230 = sbr.rel (%p227_p8) target bundleno = 351 (0x15f), region = 54 }
  0x1c   : > { %s1054_s29 = smul.u32 (!%p227_p8), 48, %s233_s28 }
  0x1e   : > { %s1285_s30 = scalar_lea.vmem (!%p227_p8), [#allocation3], %s1054_s29 }
  0x22   : > { %299 = sbr.rel (%p973_p9) target bundleno = 41 (0x29), region = 62  ;;  %v1217_v8 = vmov (!%p973_p9), 0.0  }
  0x23   : > { %300 = vst [vmem:[#allocation2] sm:$0xff] (!%p973_p9), %v1217_v8  ;;  %301 = vst [vmem:[#allocation2 + $0x8] sm:$0xff] (!%p973_p9), %v1217_v8 }
  0x24   : > { %302 = vst [vmem:[#allocation2 + $0x10] sm:$0xff] (!%p973_p9), %v1217_v8  ;;  %303 = vst [vmem:[#allocation2 + $0x18] sm:$0xff] (!%p973_p9), %v1217_v8 }
  0x25   : > { %304 = vst [vmem:[#allocation2 + $0x20] sm:$0xff] (!%p973_p9), %v1217_v8  ;;  %305 = vst [vmem:[#allocation2 + $0x28] sm:$0xff] (!%p973_p9), %v1217_v8 }
  0x26   : > { %306 = vst [vmem:[#allocation2 + $0x30] sm:$0xff] (!%p973_p9), %v1217_v8  ;;  %307 = vst [vmem:[#allocation2 + $0x38] sm:$0xff] (!%p973_p9), %v1217_v8 }
  0x29 PF: > { %s308_s4 = smul.u32 384, %s1207_s14  ;;  %v1218_v9 = vmov 0   ;;  %v1172_v10 = vld [vmem:[%s1285_s30 + $0x4] ss:$12 sps:$4 sm:$0xff]   ;;  %v1169_v50 = vld [vmem:[%s1285_s30 + $0x8] ss:$12 sps:$4 sm:$0xff]  }
  0x2a   : > { %735 = vmatprep.mubr.bf16.mxu0 %v1218_v9  ;;  %682 = vmatprep.mubr.bf16.mxu1 %v1172_v10  ;;  %v1173_v55 = vld [vmem:[%s1285_s30 + $0x20] ss:$12 sps:$4 sm:$0xff]   ;;  %v1174_v62 = vld [vmem:[%s1285_s30 + $0x1c] ss:$12 sps:$4 sm:$0xff]   ;;  %v1176_v63 = vld [vmem:[%s1285_s30 + $0x18] ss:$12 sps:$4 sm:$0xff]  }
  0x2b   : > { %s325_s5 = sshra.s32 %s308_s4, 3  ;;  %v1170_v61 = vld [vmem:[%s1285_s30] ss:$12 sps:$4 sm:$0xff]   ;;  %p1030_p10 = scmp.ne.s32.totalorder %s1207_s14, 2 }
  0x2c   : > { %s1040_s6 = sshll.u32 %s325_s5, 3  ;;  %v309_v8 = vld [vmem:[#allocation2] sm:$0xff] }
  0x2d   : > { %s1294_s9 = scalar_lea.vmem %s1382_s1, %s1040_s6 }
  0x2e   : > { %v1097_v11 = vld [vmem:[%s1294_s9 + $0x4] ss:$8 sps:$4 sm:$0xff]   ;;  %v1099_v12 = vld [vmem:[%s1294_s9] ss:$8 sps:$4 sm:$0xff]   ;;  %v1100_v13 = vld [vmem:[%s1294_s9 + $0x14] ss:$8 sps:$4 sm:$0xff]  }
  0x2f   : > { %650 = vmatprep.subr.bf16.mxu1 %v1097_v11  ;;  %v1102_v14 = vld [vmem:[%s1294_s9 + $0x10] ss:$8 sps:$4 sm:$0xff]   ;;  %v1103_v15 = vld [vmem:[%s1294_s9 + $0x24] ss:$8 sps:$4 sm:$0xff]   ;;  %v1105_v16 = vld [vmem:[%s1294_s9 + $0x20] ss:$8 sps:$4 sm:$0xff]  }
  0x30   : > { %651 = vmatpush1.bf16.msra.mxu1 %v1099_v12  ;;  %v1106_v17 = vld [vmem:[%s1294_s9 + $0x34] ss:$8 sps:$4 sm:$0xff]   ;;  %v1108_v18 = vld [vmem:[%s1294_s9 + $0x30] ss:$8 sps:$4 sm:$0xff]   ;;  %v1121_v19 = vld [vmem:[%s1294_s9 + $0x104] ss:$8 sps:$4 sm:$0xff]  }
  0x31   : > { %652 = vmatprep.subr.bf16.mxu1 %v1100_v13  ;;  %v1123_v20 = vld [vmem:[%s1294_s9 + $0x100] ss:$8 sps:$4 sm:$0xff]   ;;  %v1109_v21 = vld [vmem:[%s1294_s9 + $0x44] ss:$8 sps:$4 sm:$0xff]   ;;  %703 = vmatprep.subr.bf16.mxu0 %v1121_v19  ;;  %v1127_v22 = vld [vmem:[%s1294_s9 + $0x114] ss:$8 sps:$4 sm:$0xff]  }
  0x32   : > { %704 = vmatpush1.bf16.msra.mxu0 %v1123_v20  ;;  %v1129_v23 = vld [vmem:[%s1294_s9 + $0x110] ss:$8 sps:$4 sm:$0xff]   ;;  %v1111_v24 = vld [vmem:[%s1294_s9 + $0x40] ss:$8 sps:$4 sm:$0xff]   ;;  %v1112_v25 = vld [vmem:[%s1294_s9 + $0x54] ss:$8 sps:$4 sm:$0xff]  }
  0x33   : > { %705 = vmatprep.subr.bf16.mxu0 %v1127_v22  ;;  %v1133_v26 = vld [vmem:[%s1294_s9 + $0x124] ss:$8 sps:$4 sm:$0xff]   ;;  %v1135_v27 = vld [vmem:[%s1294_s9 + $0x120] ss:$8 sps:$4 sm:$0xff]   ;;  %v1114_v28 = vld [vmem:[%s1294_s9 + $0x50] ss:$8 sps:$4 sm:$0xff]  }
  0x34   : > { %653 = vmatpush1.bf16.msra.mxu1 %v1102_v14  ;;  %v1139_v29 = vld [vmem:[%s1294_s9 + $0x134] ss:$8 sps:$4 sm:$0xff]   ;;  %v1115_v30 = vld [vmem:[%s1294_s9 + $0x64] ss:$8 sps:$4 sm:$0xff]   ;;  %v1141_v31 = vld [vmem:[%s1294_s9 + $0x130] ss:$8 sps:$4 sm:$0xff]  }
  0x35   : > { %654 = vmatprep.subr.bf16.mxu1 %v1103_v15  ;;  %v1117_v32 = vld [vmem:[%s1294_s9 + $0x60] ss:$8 sps:$4 sm:$0xff]   ;;  %v1145_v33 = vld [vmem:[%s1294_s9 + $0x144] ss:$8 sps:$4 sm:$0xff]   ;;  %v1118_v34 = vld [vmem:[%s1294_s9 + $0x74] ss:$8 sps:$4 sm:$0xff]  }
  0x36   : > { %706 = vmatpush1.bf16.msra.mxu0 %v1129_v23  ;;  %v1147_v35 = vld [vmem:[%s1294_s9 + $0x140] ss:$8 sps:$4 sm:$0xff]   ;;  %v1120_v36 = vld [vmem:[%s1294_s9 + $0x70] ss:$8 sps:$4 sm:$0xff]   ;;  %v1151_v37 = vld [vmem:[%s1294_s9 + $0x154] ss:$8 sps:$4 sm:$0xff]  }
  0x37   : > { %707 = vmatprep.subr.bf16.mxu0 %v1133_v26  ;;  %v1124_v38 = vld [vmem:[%s1294_s9 + $0x84] ss:$8 sps:$4 sm:$0xff]   ;;  %v1153_v39 = vld [vmem:[%s1294_s9 + $0x150] ss:$8 sps:$4 sm:$0xff]   ;;  %v1126_v40 = vld [vmem:[%s1294_s9 + $0x80] ss:$8 sps:$4 sm:$0xff]  }
  0x38   : > { %655 = vmatpush1.bf16.msra.mxu1 %v1105_v16  ;;  %v1157_v41 = vld [vmem:[%s1294_s9 + $0x164] ss:$8 sps:$4 sm:$0xff]   ;;  %v1130_v42 = vld [vmem:[%s1294_s9 + $0x94] ss:$8 sps:$4 sm:$0xff]   ;;  %v1159_v43 = vld [vmem:[%s1294_s9 + $0x160] ss:$8 sps:$4 sm:$0xff]  }
  0x39   : > { %656 = vmatprep.subr.bf16.mxu1 %v1106_v17  ;;  %v1132_v44 = vld [vmem:[%s1294_s9 + $0x90] ss:$8 sps:$4 sm:$0xff]   ;;  %v1163_v45 = vld [vmem:[%s1294_s9 + $0x174] ss:$8 sps:$4 sm:$0xff]   ;;  %v1136_v46 = vld [vmem:[%s1294_s9 + $0xa4] ss:$8 sps:$4 sm:$0xff]  }
  0x3a   : > { %708 = vmatpush1.bf16.msra.mxu0 %v1135_v27  ;;  %v1165_v47 = vld [vmem:[%s1294_s9 + $0x170] ss:$8 sps:$4 sm:$0xff]   ;;  %v1138_v48 = vld [vmem:[%s1294_s9 + $0xa0] ss:$8 sps:$4 sm:$0xff]   ;;  %v1142_v49 = vld [vmem:[%s1294_s9 + $0xb4] ss:$8 sps:$4 sm:$0xff]  }
  0x3b   : > { %709 = vmatprep.subr.bf16.mxu0 %v1139_v29  ;;  %v1144_v51 = vld [vmem:[%s1294_s9 + $0xb0] ss:$8 sps:$4 sm:$0xff]   ;;  %v1148_v52 = vld [vmem:[%s1294_s9 + $0xc4] ss:$8 sps:$4 sm:$0xff]   ;;  %v1150_v53 = vld [vmem:[%s1294_s9 + $0xc0] ss:$8 sps:$4 sm:$0xff]  }
  0x3c   : > { %657 = vmatpush1.bf16.msra.mxu1 %v1108_v18  ;;  %v1154_v54 = vld [vmem:[%s1294_s9 + $0xd4] ss:$8 sps:$4 sm:$0xff]   ;;  %v1156_v56 = vld [vmem:[%s1294_s9 + $0xd0] ss:$8 sps:$4 sm:$0xff]   ;;  %v1160_v57 = vld [vmem:[%s1294_s9 + $0xe4] ss:$8 sps:$4 sm:$0xff]  }
  0x3d   : > { %658 = vmatprep.subr.bf16.mxu1 %v1109_v21  ;;  %v1162_v58 = vld [vmem:[%s1294_s9 + $0xe0] ss:$8 sps:$4 sm:$0xff]   ;;  %v1166_v59 = vld [vmem:[%s1294_s9 + $0xf4] ss:$8 sps:$4 sm:$0xff]   ;;  %v1168_v60 = vld [vmem:[%s1294_s9 + $0xf0] ss:$8 sps:$4 sm:$0xff]  }
  0x3e   : > { %710 = vmatpush1.bf16.msra.mxu0 %v1141_v31  ;;  %v310_v11 = vld [vmem:[#allocation2 + $0x8] sm:$0xff]  ;;  %v311_v14 = vld [vmem:[#allocation2 + $0x10] sm:$0xff]  ;;  %v312_v18 = vld [vmem:[#allocation2 + $0x18] sm:$0xff] }
  0x3f   : > { %711 = vmatprep.subr.bf16.mxu0 %v1145_v33  ;;  %v314_v27 = vld [vmem:[#allocation2 + $0x28] sm:$0xff] }
  0x40   : > { %659 = vmatpush1.bf16.msra.mxu1 %v1111_v24  ;;  %v313_v24 = vld [vmem:[#allocation2 + $0x20] sm:$0xff] }
  0x41   : > { %660 = vmatprep.subr.bf16.mxu1 %v1112_v25 }
  0x42   : > { %712 = vmatpush1.bf16.msra.mxu0 %v1147_v35 }
  0x43   : > { %713 = vmatprep.subr.bf16.mxu0 %v1151_v37 }
  0x44   : > { %661 = vmatpush1.bf16.msra.mxu1 %v1114_v28 }
  0x45   : > { %662 = vmatprep.subr.bf16.mxu1 %v1115_v30  ;;  %v315_v30 = vld [vmem:[#allocation2 + $0x30] sm:$0xff] }
  0x46   : > { %714 = vmatpush1.bf16.msra.mxu0 %v1153_v39 }
  0x47   : > { %715 = vmatprep.subr.bf16.mxu0 %v1157_v41 }
  0x48   : > { %663 = vmatpush1.bf16.msra.mxu1 %v1117_v32 }
  0x49   : > { %664 = vmatprep.subr.bf16.mxu1 %v1118_v34  ;;  %v316_v34 = vld [vmem:[#allocation2 + $0x38] sm:$0xff] }
  0x4a   : > { %716 = vmatpush1.bf16.msra.mxu0 %v1159_v43 }
  0x4b   : > { %717 = vmatprep.subr.bf16.mxu0 %v1163_v45 }
  0x4c   : > { %665 = vmatpush1.bf16.msra.mxu1 %v1120_v36 }
  0x4d   : > { %666 = vmatprep.subr.bf16.mxu1 %v1124_v38 }
  0x4e   : > { %718 = vmatpush1.bf16.msra.mxu0 %v1165_v47 }
  0x50   : > { %667 = vmatpush1.bf16.msra.mxu1 %v1126_v40  ;;  %v786_v40 = vlaneseq (!%p1030_p10) }
  0x51   : > { %668 = vmatprep.subr.bf16.mxu1 %v1130_v42  ;;  %736 = vmatmul.mubr.bf16.vlgmr.msra.gmra.mrb[0].mxu0 %v1169_v50  ;;  %v784_v42 = vld [vmem:[%s1383_s2] sm:$0x3] (!%p1030_p10) }
  0x52   : > { %745 = vmatprep.mubr.bf16.mxu0 %v1218_v9  ;;  %v787_v41 = vshrl.u32 (!%p1030_p10), %v786_v40, 7 }
  0x54   : > { %669 = vmatpush1.bf16.msra.mxu1 %v1132_v44  ;;  %v788_v45 = vsub.s32 (!%p1030_p10), 0, %v787_v41 }
  0x55   : > { %670 = vmatprep.subr.bf16.mxu1 %v1136_v46  ;;  %v792_v46 = vsub.s32 (!%p1030_p10), 1, %v787_v41 }
  0x56   : > { %v789_v50 = vrot.slane (!%p1030_p10), %v784_v42, %v788_v45 }
  0x58   : > { %671 = vmatpush1.bf16.msra.mxu1 %v1138_v48 }
  0x59   : > { %672 = vmatprep.subr.bf16.mxu1 %v1142_v49  ;;  %746 = vmatmul.mubr.bf16.gmra.mrb[4].mxu0 %v1173_v55 }
  0x5c   : > { %673 = vmatpush1.bf16.msra.mxu1 %v1144_v51  ;;  %v793_v51 = vrot.slane (!%p1030_p10), %v784_v42, %v792_v46 }
  0x5d   : > { %674 = vmatprep.subr.bf16.mxu1 %v1148_v52 }
  0x60   : > { %675 = vmatpush1.bf16.msra.mxu1 %v1150_v53 }
  0x61   : > { %676 = vmatprep.subr.bf16.mxu1 %v1154_v54 }
  0x64   : > { %677 = vmatpush1.bf16.msra.mxu1 %v1156_v56 }
  0x65   : > { %678 = vmatprep.subr.bf16.mxu1 %v1160_v57 }
  0x68   : > { %679 = vmatpush1.bf16.msra.mxu1 %v1162_v58 }
  0x69   : > { %680 = vmatprep.subr.bf16.mxu1 %v1166_v59 }
  0x6c   : > { %681 = vmatpush1.bf16.msra.mxu1 %v1168_v60 }
  0x6f   : > { %683 = vmatmul.mubr.bf16.vlgmr.msra.gmra.mrb[0].mxu1 %v1170_v61 }
  0x70   : > { %692 = vmatprep.mubr.bf16.mxu1 %v1174_v62 }
  0x77   : > { %693 = vmatmul.mubr.bf16.gmra.mrb[4].mxu1 %v1176_v63 }
 0x124   : > { %v737_v0 = vpop.f32.mrb[0].mxu0 }
 0x125   : > { %v739_v1 = vpop.f32.mrb[1].mxu0 }
 0x126   : > { %v741_v2 = vpop.f32.mrb[2].mxu0 }
 0x127   : > { %v743_v3 = vpop.f32.mrb[3].mxu0 }
 0x12c   : > { %v747_v4 = vpop.f32.mrb[4].mxu0 }
 0x12d   : > { %v749_v5 = vpop.f32.mrb[5].mxu0 }
 0x12e   : > { %v751_v6 = vpop.f32.mrb[6].mxu0 }
 0x12f   : > { %v753_v7 = vpop.f32.mrb[7].mxu0 }
 0x142   : > { %v684_v9 = vpop.f32.mrb[0].mxu1 }
 0x143   : > { %v738_v10 = vadd.f32 %v737_v0, %v684_v9  ;;  %v686_v12 = vpop.f32.mrb[1].mxu1 }
 0x144   : > { %v740_v13 = vadd.f32 %v739_v1, %v686_v12  ;;  %v688_v15 = vpop.f32.mrb[2].mxu1 }
 0x145   : > { %v756_v16 = vadd.f32 %v738_v10, %v309_v8  ;;  %v742_v17 = vadd.f32 %v741_v2, %v688_v15  ;;  %v690_v19 = vpop.f32.mrb[3].mxu1 }
 0x146   : > { %v757_v20 = vadd.f32 %v740_v13, %v310_v11  ;;  %v744_v21 = vadd.f32 %v743_v3, %v690_v19 }
 0x147   : > { %764 = vst [vmem:[#allocation2] sm:$0xff] %v756_v16  ;;  %v758_v22 = vadd.f32 %v742_v17, %v311_v14 }
 0x148   : > { %765 = vst [vmem:[#allocation2 + $0x8] sm:$0xff] %v757_v20  ;;  %v759_v23 = vadd.f32 %v744_v21, %v312_v18 }
 0x149   : > { %766 = vst [vmem:[#allocation2 + $0x10] sm:$0xff] %v758_v22 }
 0x14a   : > { %767 = vst [vmem:[#allocation2 + $0x18] sm:$0xff] %v759_v23  ;;  %v694_v25 = vpop.f32.mrb[4].mxu1 }
 0x14b   : > { %v748_v26 = vadd.f32 %v747_v4, %v694_v25  ;;  %v696_v28 = vpop.f32.mrb[5].mxu1 }
 0x14c   : > { %v750_v29 = vadd.f32 %v749_v5, %v696_v28  ;;  %v698_v31 = vpop.f32.mrb[6].mxu1  ;;  %775 = sbr.rel (%p1030_p10) target bundleno = 351 (0x15f), region = 66 }
 0x14d   : > { %v760_v32 = vadd.f32 %v748_v26, %v313_v24  ;;  %v752_v33 = vadd.f32 %v751_v6, %v698_v31  ;;  %v700_v35 = vpop.f32.mrb[7].mxu1 }
 0x14e   : > { %v761_v36 = vadd.f32 %v750_v29, %v314_v27  ;;  %v754_v37 = vadd.f32 %v753_v7, %v700_v35  ;;  %v776_v43 = vld [vmem:[#allocation2] sm:$0xff] (!%p1030_p10) }
 0x14f   : > { %768 = vst [vmem:[#allocation2 + $0x20] sm:$0xff] %v760_v32  ;;  %v762_v38 = vadd.f32 %v752_v33, %v315_v30  ;;  %v777_v44 = vld [vmem:[#allocation2 + $0x8] sm:$0xff] (!%p1030_p10)  ;;  %v796_v55 = vadd.f32 (!%p1030_p10), %v789_v50, %v776_v43 }
 0x150   : > { %769 = vst [vmem:[#allocation2 + $0x28] sm:$0xff] %v761_v36  ;;  %v763_v39 = vadd.f32 %v754_v37, %v316_v34  ;;  %v778_v47 = vld [vmem:[#allocation2 + $0x10] sm:$0xff] (!%p1030_p10)  ;;  %v797_v56 = vadd.f32 (!%p1030_p10), %v793_v51, %v777_v44 }
 0x151   : > { %770 = vst [vmem:[#allocation2 + $0x30] sm:$0xff] %v762_v38  ;;  %v779_v48 = vld [vmem:[#allocation2 + $0x18] sm:$0xff] (!%p1030_p10)  ;;  %v798_v57 = vadd.f32 (!%p1030_p10), %v789_v50, %v778_v47 }
 0x152   : > { %771 = vst [vmem:[#allocation2 + $0x38] sm:$0xff] %v763_v39  ;;  %v799_v58 = vadd.f32 (!%p1030_p10), %v793_v51, %v779_v48  ;;  %v1041_v63 = vpack.c.bf16 (!%p1030_p10), %v797_v56, %v796_v55 }
 0x154   : > { %v1042_v0 = vpack.c.bf16 %v799_v58, %v798_v57  ;;  %828 = vst [vmem:[%s1384_s3] sm:$0xff] %v1041_v63 }
 0x156   : > { %v780_v49 = vld [vmem:[#allocation2 + $0x20] sm:$0xff]  ;;  %829 = vst [vmem:[%s1384_s3 + $0x8] sm:$0xff] %v1042_v0 }
 0x157   : > { %v781_v52 = vld [vmem:[#allocation2 + $0x28] sm:$0xff]  ;;  %v800_v59 = vadd.f32 %v789_v50, %v780_v49 }
 0x158   : > { %v782_v53 = vld [vmem:[#allocation2 + $0x30] sm:$0xff]  ;;  %v801_v60 = vadd.f32 %v793_v51, %v781_v52 }
 0x159   : > { %v783_v54 = vld [vmem:[#allocation2 + $0x38] sm:$0xff]  ;;  %v802_v61 = vadd.f32 %v789_v50, %v782_v53 }
 0x15a   : > { %v803_v62 = vadd.f32 %v793_v51, %v783_v54  ;;  %v1043_v1 = vpack.c.bf16 %v801_v60, %v800_v59 }
 0x15c   : > { %v1044_v2 = vpack.c.bf16 %v803_v62, %v802_v61  ;;  %830 = vst [vmem:[%s1384_s3 + $0x10] sm:$0xff] %v1043_v1 }
 0x15e   : > { %831 = vst [vmem:[%s1384_s3 + $0x18] sm:$0xff] %v1044_v2 }
 0x15f PF: > { %s13_s16 = sadd.s32 1, %s1215_s16   ;;  %s1385_s12 = smov %s1203_s13 }
 0x160   : > { %p10_p11 = scmp.ge.s32.totalorder %s13_s16, 5   ;;  %s1386_s13 = smov %s1274_s20 }
 0x161   : > { %s1387_s14 = smov %s1211_s15  ;;  %s1388_s15 = smov %s1390_s17 }
 0x162   :  { %12 = sbr.rel (!%p10_p11) target bundleno = 3 (0x3), region = 114 }

// kernel: generator_forward.59
= control target key start
LH: loop header
LB: loop body
LE: loop exit
PB: predicated region body
PF: predicated region fallthrough
CT: control target
= control target key end

     0   :  { %s556_s9 = smov 0   ;;  %s558_s10 = smov 0   ;;  %s650_s0 = inlined_call_operand.vmem [shape: bf16[2,16,256], index: 0, kind: input, shape index: {}]   ;;  %s651_s1 = inlined_call_operand.vmem [shape: f32[2,1,256], index: 1, kind: output, shape index: {0}]   ;;  %s652_s2 = inlined_call_operand.vmem [shape: f32[2,1,256], index: 2, kind: output, shape index: {1}]  }
   0x1   :  { %s560_s11 = smov 0   ;;  %s562_s12 = smov 0  }
   0x2   :  { %s564_s13 = smov 0   ;;  %s566_s14 = smov 0  }
   0x3   :  { %s568_s15 = smov 0  }
   0x4 LB: > { %s28_s16 = sadd.s32 1, %s530_s13  ;;  %s32_s17 = sadd.s32 1, %s534_s14  ;;  %s538_s15 = sphi %s568_s15, %s13_s15   ;;  %s534_s14 = sphi %s566_s14, %s658_s14   ;;  %s530_s13 = sphi %s564_s13, %s657_s13   ;;  %s526_s12 = sphi %s562_s12, %s656_s12   ;;  %s522_s11 = sphi %s560_s11, %s655_s11   ;;  %s518_s10 = sphi %s558_s10, %s654_s10   ;;  %s514_s9 = sphi %s556_s9, %s653_s9  }
   0x5   : > { %p30_p0 = scmp.ge.s32.totalorder %s28_s16, 2  ;;  %p50_p1 = scmp.ne.s32.totalorder %s518_s10, %s514_s9 }
   0x6   : > { %p51_p2 = scmp.eq.s32.totalorder %s538_s15, 0  ;;  %s43_s21 = sadd.s32 1, %s518_s10 }
   0x7   : > { %s660_s16 = smov (%p30_p0, %s28_s16), 0  ;;  %s662_s17 = smov (!%p30_p0, %s32_s17), %s534_s14 }
   0x8   : > { %p52_p3 = por %p51_p2, %p50_p1  ;;  %p34_p4 = scmp.ge.s32.totalorder %s662_s17, 2 }
   0x9   : > { %s39_s18 = ssub.s32 %s530_s13, %s660_s16  ;;  %p413_p6 = scmp.ge.s32.totalorder %s538_s15, 4 }
   0xa   : > { %s664_s17 = smov (%p34_p4, %s662_s17), 0 }
   0xb   : > { %s36_s19 = ssub.s32 %s534_s14, %s664_s17  ;;  %132 = sbr.rel (%p413_p6) target bundleno = 25 (0x19), region = 16 }
   0xc   : > { %s40_s20 = sor.u32 %s39_s18, %s36_s19 }
   0xd   : > { %p41_p5 = scmp.eq.s32.totalorder %s40_s20, 0 }
   0xf   : > { %s607_s22 = scalar_select %p41_p5, %s518_s10, %s43_s21  }
  0x12   : > { %135 = sbr.rel (!%p52_p3) target bundleno = 25 (0x19), region = 20  ;;  %s137_s23 = sand.u32 (%p52_p3), 1, %s518_s10  }
  0x13   : > { %s415_s24 = sshll.u32 (%p52_p3), %s534_s14, 2  ;;  %s414_s25 = sshll.u32 (%p52_p3), %s137_s23, 3 }
  0x14   : > { %s144_s26 = sadd.s32 (%p52_p3), %s530_s13, %s415_s24  ;;  %s139_s3 = scalar_lea.vmem (%p52_p3), [#allocation4], %s414_s25 }
  0x15   : > { %s416_s27 = sshll.u32 (%p52_p3), %s144_s26, 2 }
  0x16   : > { %s146_s30 = scalar_lea.vmem (%p52_p3), %s650_s0, %s416_s27 }
  0x17   : > { %v162_v0 = vld [vmem:[%s146_s30] sm:$0xf] (%p52_p3)  ;;  %v164_v1 = vld [vmem:[%s146_s30 + $0x8] sm:$0xf] (%p52_p3) }
  0x18   : > { %163 = vst [vmem:[%s139_s3] sm:$0xf] (%p52_p3), %v162_v0  ;;  %165 = vst [vmem:[%s139_s3 + $0x4] sm:$0xf] (%p52_p3), %v164_v1 }
  0x19 PF: > { %p417_p7 = scmp.ge.s32.totalorder %s538_s15, 1  ;;  %p191_p8 = scmp.lt.s32.totalorder %s538_s15, 5 }
  0x1b   : > { %p192_p9 = pnand %p417_p7, %p191_p8 }
  0x1c   : > { %s198_s4 = sand.u32 (!%p192_p9), 1, %s514_s9   ;;  %v540_v2 = vmov (!%p192_p9), 0.0   ;;  %p229_p10 = scmp.lt.s32.totalorder (!%p192_p9), %s526_s12, 1 }
  0x1d   : > { %195 = sbr.rel (%p192_p9) target bundleno = 61 (0x3d), region = 61  ;;  %247 = vst [vmem:[#allocation2] sm:$0x1] (!%p192_p9), %v540_v2  ;;  %248 = vst [vmem:[#allocation3] sm:$0x1] (!%p192_p9), %v540_v2  ;;  %s418_s5 = sshll.u32 (!%p192_p9), %s198_s4, 3 }
  0x1e   : > { %s200_s6 = scalar_lea.vmem (!%p192_p9), [#allocation4], %s418_s5  ;;  %p231_p11 = scmp.lt.s32.totalorder (!%p192_p9), %s522_s11, 1 }
  0x1f   : > { %v424_v3 = vld [vmem:[%s200_s6] sm:$0xff] (!%p192_p9)  }
  0x20   : > { %v425_v4 = vunpack.c.l.bf16 (!%p192_p9), %v424_v3  ;;  %v426_v5 = vunpack.c.h.bf16 (!%p192_p9), %v424_v3 }
  0x22   : > { %v254_v6 = vadd.f32 (!%p192_p9), %v426_v5, %v425_v4  ;;  %v264_v7 = vmul.f32 (!%p192_p9), %v425_v4, %v425_v4  ;;  %v265_v8 = vmul.f32 (!%p192_p9), %v426_v5, %v426_v5 }
  0x24   : > { %v255_v9 = vrot.slane %v254_v6, 4  ;;  %v266_v10 = vadd.f32 %v265_v8, %v264_v7  ;;  %v253_v19 = vld [vmem:[#allocation2] sm:$0x1]  ;;  %s666_s12 = smov (!%p229_p10, %s526_s12), 1  ;;  %v263_v22 = vld [vmem:[#allocation3] sm:$0x1] }
  0x25   : > { %s668_s11 = smov (!%p231_p11, %s522_s11), 1  ;;  %s419_s7 = sshll.u32 %s666_s12, 1 }
  0x26   : > { %v256_v11 = vadd.f32 %v255_v9, %v254_v6  ;;  %v267_v12 = vrot.slane %v266_v10, 4  ;;  %s234_s8 = sadd.s32 %s419_s7, %s668_s11 }
  0x27   : > { %s235_s19 = scalar_lea.vmem %s651_s1, %s234_s8  ;;  %s242_s23 = scalar_lea.vmem %s652_s2, %s234_s8 }
  0x28   : > { %v257_v13 = vrot.slane %v256_v11, 2  ;;  %v268_v14 = vadd.f32 %v267_v12, %v266_v10 }
  0x2a   : > { %v258_v15 = vadd.f32 %v257_v13, %v256_v11  ;;  %v269_v16 = vrot.slane %v268_v14, 2 }
  0x2c   : > { %v259_v17 = vrot.slane %v258_v15, 1  ;;  %v270_v18 = vadd.f32 %v269_v16, %v268_v14 }
  0x2e   : > { %v260_v20 = vadd.f32 %v259_v17, %v258_v15  ;;  %v271_v21 = vrot.slane %v270_v18, 1 }
  0x30   : > { %v261_v23 = vadd.f32 %v260_v20, %v253_v19  ;;  %v272_v24 = vadd.f32 %v271_v21, %v270_v18 }
  0x32   : > { %262 = vst [vmem:[#allocation2] sm:$0x1] %v261_v23  ;;  %v273_v25 = vadd.f32 %v272_v24, %v263_v22 }
  0x34   : > { %274 = vst [vmem:[#allocation3] sm:$0x1] %v273_v25 }
  0x39   : > { %v278_v26 = vld [vmem:[#allocation2] sm:$0x1] }
  0x3a   : > { %279 = vst [vmem:[%s235_s19] sm:$0x1] %v278_v26 }
  0x3b   : > { %v280_v27 = vld [vmem:[#allocation3] sm:$0x1] }
  0x3c   : > { %281 = vst [vmem:[%s242_s23] sm:$0x1] %v280_v27 }
  0x3d PF: > { %s13_s15 = sadd.s32 1, %s538_s15   ;;  %s653_s9 = smov %s518_s10 }
  0x3e   : > { %p10_p12 = scmp.ge.s32.totalorder %s13_s15, 6   ;;  %s654_s10 = smov %s607_s22 }
  0x3f   : > { %s655_s11 = smov %s530_s13  ;;  %s656_s12 = smov %s534_s14 }
  0x40   : > { %s657_s13 = smov %s660_s16  ;;  %s658_s14 = smov %s664_s17 }
  0x41   :  { %12 = sbr.rel (!%p10_p12) target bundleno = 4 (0x4), region = 120 }

// kernel: generator_forward.60
= control target key start
LH: loop header
LB: loop body
LE: loop exit
PB: predicated region body
PF: predicated region fallthrough
CT: control target
= control target key end

     0   :  { %s664_s12 = smov 0   ;;  %s666_s13 = smov 0   ;;  %s770_s0 = inlined_call_operand.vmem [shape: bf16[2,16,256], index: 0, kind: input, shape index: {}]   ;;  %s771_s1 = inlined_call_operand.vmem [shape: f32[2,1,256], index: 1, kind: input, shape index: {}]   ;;  %s772_s2 = inlined_call_operand.vmem [shape: f32[2,1,256], index: 2, kind: input, shape index: {}]   ;;  %s773_s3 = inlined_call_operand.vmem [shape: bf16[2,16,256], index: 3, kind: output, shape index: {}]  }
   0x1   :  { %s668_s14 = smov 0   ;;  %s670_s15 = smov 0  }
   0x2   :  { %s672_s16 = smov 0   ;;  %s674_s17 = smov 0  }
   0x3   :  { %s676_s18 = smov 0  }
   0x4 LB: > { %s28_s19 = sadd.s32 1, %s634_s16  ;;  %s32_s20 = sadd.s32 1, %s638_s17  ;;  %s642_s18 = sphi %s676_s18, %s13_s18   ;;  %s638_s17 = sphi %s674_s17, %s780_s17   ;;  %s634_s16 = sphi %s672_s16, %s779_s16   ;;  %s630_s15 = sphi %s670_s15, %s778_s15   ;;  %s626_s14 = sphi %s668_s14, %s777_s14   ;;  %s622_s13 = sphi %s666_s13, %s776_s13   ;;  %s618_s12 = sphi %s664_s12, %s775_s12  }
   0x5   : > { %p30_p0 = scmp.ge.s32.totalorder %s28_s19, 2  ;;  %s500_s21 = sadd.s32 4294967295, %s642_s18  }
   0x6   : > { %p50_p1 = scmp.ne.s32.totalorder %s622_s13, %s618_s12  ;;  %p51_p2 = scmp.eq.s32.totalorder %s642_s18, 0 }
   0x7   : > { %s782_s19 = smov (%p30_p0, %s28_s19), 0  ;;  %s784_s20 = smov (!%p30_p0, %s32_s20), %s638_s17 }
   0x8   : > { %p34_p3 = scmp.ge.s32.totalorder %s784_s20, 2  ;;  %p140_p4 = scmp.eq.s32.totalorder %s500_s21, 3 }
   0x9   : > { %s39_s22 = ssub.s32 %s634_s16, %s782_s19  ;;  %p52_p5 = por %p51_p2, %p50_p1 }
   0xa   : > { %s786_s20 = smov (%p34_p3, %s784_s20), 0  ;;  %p712_p6 = por %p140_p4, %p50_p1 }
   0xb   : > { %s36_s24 = ssub.s32 %s638_s17, %s786_s20  ;;  %s43_s26 = sadd.s32 1, %s622_s13 }
   0xc   : > { %s40_s25 = sor.u32 %s39_s22, %s36_s24  ;;  %p503_p8 = scmp.ge.s32.totalorder %s642_s18, 4 }
   0xd   : > { %p41_p7 = scmp.eq.s32.totalorder %s40_s25, 0 }
   0xe   : > { %162 = sbr.rel (%p503_p8) target bundleno = 28 (0x1c), region = 16 }
   0xf   : > { %s720_s27 = scalar_select %p41_p7, %s622_s13, %s43_s26  }
  0x15   : > { %165 = sbr.rel (!%p52_p5) target bundleno = 28 (0x1c), region = 20  ;;  %s167_s28 = sand.u32 (%p52_p5), 1, %s622_s13  }
  0x16   : > { %s505_s29 = sshll.u32 (%p52_p5), %s638_s17, 2  ;;  %s504_s30 = sshll.u32 (%p52_p5), %s167_s28, 3 }
  0x17   : > { %s174_s4 = sadd.s32 (%p52_p5), %s634_s16, %s505_s29  ;;  %s169_s9 = scalar_lea.vmem (%p52_p5), [#allocation2], %s504_s30 }
  0x18   : > { %s506_s5 = sshll.u32 (%p52_p5), %s174_s4, 2 }
  0x19   : > { %s176_s8 = scalar_lea.vmem (%p52_p5), %s770_s0, %s506_s5 }
  0x1a   : > { %v192_v0 = vld [vmem:[%s176_s8] sm:$0xf] (%p52_p5)  ;;  %v194_v1 = vld [vmem:[%s176_s8 + $0x8] sm:$0xf] (%p52_p5) }
  0x1b   : > { %193 = vst [vmem:[%s169_s9] sm:$0xf] (%p52_p5), %v192_v0  ;;  %195 = vst [vmem:[%s169_s9 + $0x4] sm:$0xf] (%p52_p5), %v194_v1 }
  0x1c PF: > { %p507_p9 = scmp.ge.s32.totalorder %s642_s18, 1  ;;  %p241_p10 = scmp.lt.s32.totalorder %s642_s18, 5 }
  0x1e   : > { %p242_p11 = pnand %p507_p9, %p241_p10 }
  0x1f   : > { %s248_s10 = sand.u32 (!%p242_p11), 1, %s618_s12   ;;  %p285_p12 = scmp.lt.s32.totalorder (!%p242_p11), %s630_s15, 1 }
  0x20   : > { %245 = sbr.rel (%p242_p11) target bundleno = 62 (0x3e), region = 69  ;;  %s508_s11 = sshll.u32 (!%p242_p11), %s248_s10, 3 }
  0x21   : > { %p287_p13 = scmp.lt.s32.totalorder (!%p242_p11), %s626_s14, 1  ;;  %s250_s22 = scalar_lea.vmem (!%p242_p11), [#allocation2], %s508_s11 }
  0x22   : > { %v524_v2 = vld [vmem:[%s250_s22] sm:$0xff] (!%p242_p11)   ;;  %s283_s12 = scalar_lea.vmem (!%p242_p11), [#allocation3], %s508_s11 }
  0x23   : > { %v525_v3 = vunpack.c.l.bf16 (!%p242_p11), %v524_v2  ;;  %v526_v4 = vunpack.c.h.bf16 (!%p242_p11), %v524_v2 }
  0x27   : > { %s286_s21 = scalar_select %p285_p12, %s630_s15, 1 }
  0x28   : > { %s288_s24 = scalar_select %p287_p13, %s626_s14, 1 }
  0x29   : > { %s510_s25 = sshll.u32 %s286_s21, 1  ;;  %s517_s7 = sshll.u32 (%p712_p6), %s630_s15, 2 }
  0x2a   : > { %s290_s26 = sadd.s32 %s510_s25, %s288_s24  ;;  %s345_s8 = sadd.s32 (%p712_p6), %s626_s14, %s517_s7 }
  0x2b   : > { %s291_s30 = scalar_lea.vmem %s771_s1, %s290_s26  ;;  %s298_s6 = scalar_lea.vmem %s772_s2, %s290_s26 }
  0x2c   : > { %v512_v5 = vld [vmem:[%s291_s30] ss:$0 sm:$0xff]  ;;  %s518_s9 = sshll.u32 (%p712_p6), %s345_s8, 2 }
  0x2d   : > { %v513_v6 = vld [vmem:[%s298_s6] ss:$0 sm:$0xff]  ;;  %v311_v7 = vsub.f32 %v525_v3, %v512_v5  ;;  %v312_v8 = vsub.f32 %v526_v4, %v512_v5  ;;  %s347_s22 = scalar_lea.vmem (%p712_p6), %s773_s3, %s518_s9 }
  0x2f   : > { %v320_v9 = vmul.f32 %v513_v6, %v311_v7  ;;  %v321_v10 = vmul.f32 %v513_v6, %v312_v8  ;;  %340 = sbr.rel (!%p712_p6) target bundleno = 62 (0x3e), region = 77 }
  0x31   : > { %v322_v11 = vmax.f32 %v320_v9, 0.0  ;;  %v323_v12 = vmax.f32 %v321_v10, 0.0 }
  0x33   : > { %v530_v13 = vpack.c.bf16 %v323_v12, %v322_v11 }
  0x35   : > { %531 = vst [vmem:[%s283_s12] sm:$0xff] %v530_v13  }
  0x3c   : > { %v363_v14 = vld [vmem:[%s283_s12] sm:$0xf]  ;;  %v365_v15 = vld [vmem:[%s283_s12 + $0x4] sm:$0xf] }
  0x3d   : > { %364 = vst [vmem:[%s347_s22] sm:$0xf] %v363_v14  ;;  %366 = vst [vmem:[%s347_s22 + $0x8] sm:$0xf] %v365_v15 }
  0x3e PF: > { %s13_s18 = sadd.s32 1, %s642_s18   ;;  %s775_s12 = smov %s622_s13 }
  0x3f   : > { %p10_p0 = scmp.ge.s32.totalorder %s13_s18, 6   ;;  %s776_s13 = smov %s720_s27 }
  0x40   : > { %s777_s14 = smov %s634_s16  ;;  %s778_s15 = smov %s638_s17 }
  0x41   : > { %s779_s16 = smov %s782_s19  ;;  %s780_s17 = smov %s786_s20 }
  0x42   :  { %12 = sbr.rel (!%p10_p0) target bundleno = 4 (0x4), region = 155 }

// kernel: generator_forward.61
= control target key start
LH: loop header
LB: loop body
LE: loop exit
PB: predicated region body
PF: predicated region fallthrough
CT: control target
= control target key end

     0   :  { %8 = vsyncpa [#allocation4], 0  ;;  %s1640_s0 = inlined_call_operand.hbm [shape: bf16[32,2560], index: 0, kind: input, shape index: {}]   ;;  %s1641_s1 = inlined_call_operand.vmem [shape: bf16[2560,256], index: 1, kind: input, shape index: {}]   ;;  %s1642_s2 = inlined_call_operand.vmem [shape: f32[1,256], index: 2, kind: input, shape index: {}]   ;;  %s1643_s3 = inlined_call_operand.vmem [shape: bf16[32,256], index: 3, kind: output, shape index: {}]  }
   0x1   :  { %10 = vsyncpa [#allocation4 + $0x1], 0  ;;  %s1422_s12 = smov 0   ;;  %s1424_s13 = smov 0  }
   0x2   :  { %s1426_s14 = smov 0   ;;  %s1428_s15 = smov 0  }
   0x3   :  { %s1430_s16 = smov 0   ;;  %s1432_s17 = smov 0  }
   0x4 LB: > { %s1039_s18 = sadd.s32 4294967295, %s1395_s17   ;;  %s28_s19 = sadd.s32 1, %s1391_s16  ;;  %s1395_s17 = sphi %s1432_s17, %s16_s17   ;;  %s1391_s16 = sphi %s1430_s16, %s1652_s16   ;;  %s1387_s15 = sphi %s1428_s15, %s1651_s15   ;;  %s1383_s14 = sphi %s1426_s14, %s1650_s14   ;;  %s1379_s13 = sphi %s1424_s13, %s1649_s13   ;;  %s1375_s12 = sphi %s1422_s12, %s1648_s12  }
   0x5   : > { %p29_p0 = scmp.ge.s32.totalorder %s28_s19, 5  ;;  %s44_s20 = sadd.s32 1, %s1383_s14 }
   0x6   : > { %p51_p1 = scmp.ne.s32.totalorder %s1383_s14, %s1379_s13  ;;  %p52_p2 = scmp.eq.s32.totalorder %s1395_s17, 0 }
   0x7   : > { %s1654_s19 = smov (%p29_p0, %s28_s19), 0  ;;  %p57_p4 = scmp.ne.s32.totalorder %s1379_s13, %s1375_s12 }
   0x8   : > { %p1458_p3 = por %p52_p2, %p51_p1  ;;  %s40_s22 = ssub.s32 %s1391_s16, %s1654_s19 }
   0x9   : > { %p58_p5 = scmp.eq.s32.totalorder %s1039_s18, 0  ;;  %p42_p6 = scmp.eq.s32.totalorder %s40_s22, 0 }
   0xa   : > { %p1154_p8 = scmp.lt.s32.totalorder %s1395_s17, 5  ;;  %s178_s25 = sand.u32 1, %s1383_s14  }
   0xb   : > { %p1465_p7 = por %p58_p5, %p57_p4  ;;  %s1134_s26 = sshll.u32 %s1391_s16, 8 }
   0xc   : > { %s1471_s24 = scalar_select %p42_p6, %s1383_s14, %s44_s20  }
   0xd   : > { %s1044_s27 = sshll.u32 %s178_s25, 6  ;;  %s1478_s30 = scalar_lea.hbm %s1640_s0, %s1134_s26 }
   0xe   : > { %s182_s4 = scalar_lea.vmem [#allocation3], %s1044_s27  ;;  %p1482_p9 = pnand %p1154_p8, %p1458_p3 }
   0xf   : > { %s192_s5 = sshll.u32 %s182_s4, 4  ;;  %s1489_s7 = scalar_lea.sflag [#allocation4], %s178_s25  ;;  %s1486_s5 = int_to_ptr.vmem [resolvable:$true] %s192_s5 }
  0x10   : > { %s1315_s8 = scalar_lea.hbm %s1478_s30, 1024  ;;  %p1317_p12 = pneg %p1482_p9 }
  0x11   : > { %p1316_p11 = scmp.ne.s32.totalorder %s1478_s30, %s1315_s8  ;;  %s1320_s11 = scalar_lea.hbm %s1640_s0, 5120 }
  0x12   : > { %p1321_p1 = scmp.lt.u32.totalorder %s1478_s30, %s1640_s0  ;;  %p1322_p2 = scmp.lt.u32.totalorder %s1320_s11, %s1315_s8 }
  0x13   : > { %p1318_p13 = pnand %p1317_p12, %p1316_p11  ;;  %p1324_p4 = scmp.lt.u32.totalorder %s1315_s8, %s1478_s30 }
  0x14   : > { %p1323_p3 = por %p1322_p2, %p1321_p1 }
  0x15   : > { %p1319_p0 = pneg %p1318_p13 }
  0x16   : > { %p1325_p5 = por %p1324_p4, %p1323_p3 }
  0x18   : > { %p1326_p6 = pnand %p1325_p5, %p1319_p0 }
  0x1a   : > { %1329 = shalt.err (!%p1326_p6)
}
  0x1b   : > { %s1330_s20 = scalar_lea.vmem %s1486_s5, 1024  ;;  %s1397_s21 = smov [#allocation3]  }
  0x1c   : > { %p1331_p8 = scmp.ne.s32.totalorder %s1486_s5, %s1330_s20  ;;  %s1335_s22 = sshll.u32 %s1397_s21, 4  ;;  %s1336_s22 = int_to_ptr.vmem [resolvable:$false] %s1335_s22 }
  0x1d   : > { %s1337_s25 = scalar_lea.vmem %s1336_s22, 2048  ;;  %p1338_p10 = scmp.lt.s32.totalorder %s1486_s5, %s1336_s22 }
  0x1e   : > { %p1333_p11 = pnand %p1331_p8, %p1317_p12  ;;  %p1339_p1 = scmp.lt.s32.totalorder %s1337_s25, %s1330_s20 }
  0x20   : > { %p1334_p13 = pneg %p1333_p11  ;;  %p1340_p2 = por %p1339_p1, %p1338_p10 }
  0x22   : > { %p1341_p3 = pnand %p1340_p2, %p1334_p13 }
  0x24   : > { %1344 = shalt.err (!%p1341_p3)
}
  0x25   : > { %s1398_s26 = smov 1280   ;;  %s1399_s27 = smov 256  }
  0x26   : > { %s1400_s28 = smov 16   ;;  %p200_p12 = scmp.lt.s32.totalorder %s1395_s17, 6 }
  0x27   : > { %1153 = dma.hbm_to_vmem [thread:$0]  (!%p1482_p9), %s1478_s30, 1024, %s1486_s5, %s1489_s7, %s1398_s26, %s1399_s27, %s1400_s28  }
  0x28   : > { %p1647_p0 = scmp.ge.s32.totalorder %s1395_s17, 1 }
  0x2a   : > { %p201_p4 = pnand %p1647_p0, %p200_p12 }
  0x2b   : > { %s206_s29 = sand.u32 (!%p201_p4), 1, %s1379_s13  }
  0x2c   : > { %204 = sbr.rel (%p201_p4) target bundleno = 369 (0x171), region = 32  ;;  %s1048_s4 = sshll.u32 (!%p201_p4), %s206_s29, 6 }
  0x2d   : > { %s207_s8 = scalar_lea.sflag (!%p201_p4), [#allocation4], %s206_s29  ;;  %s1521_s9 = scalar_lea.vmem (!%p201_p4), [#allocation3], %s1048_s4 }
  0x33   : > { %1370 = dma.done.wait (%p1465_p7), %s207_s8, 1024  }
  0x34   : > { %1372 = vsyncadd (%p1465_p7), %s207_s8, 4294966272  ;;  %p1049_p10 = scmp.ne.s32.totalorder %s1387_s15, 0 }
  0x35   : > { %v1401_v0 = vmov (!%p1049_p10), 0.0  }
  0x36   : > { %275 = sbr.rel (%p1049_p10) target bundleno = 61 (0x3d), region = 40  ;;  %276 = vst [vmem:[#allocation2] sm:$0xff] (!%p1049_p10), %v1401_v0  ;;  %277 = vst [vmem:[#allocation2 + $0x8] sm:$0xff] (!%p1049_p10), %v1401_v0 }
  0x37   : > { %278 = vst [vmem:[#allocation2 + $0x10] sm:$0xff] (!%p1049_p10), %v1401_v0  ;;  %279 = vst [vmem:[#allocation2 + $0x18] sm:$0xff] (!%p1049_p10), %v1401_v0 }
  0x38   : > { %280 = vst [vmem:[#allocation2 + $0x20] sm:$0xff] (!%p1049_p10), %v1401_v0  ;;  %281 = vst [vmem:[#allocation2 + $0x28] sm:$0xff] (!%p1049_p10), %v1401_v0 }
  0x39   : > { %282 = vst [vmem:[#allocation2 + $0x30] sm:$0xff] (!%p1049_p10), %v1401_v0  ;;  %283 = vst [vmem:[#allocation2 + $0x38] sm:$0xff] (!%p1049_p10), %v1401_v0 }
  0x3d PF: > { %s1050_s30 = sshll.u32 %s1387_s15, 9  ;;  %v1305_v1 = vld [vmem:[%s1521_s9 + $0x4] ss:$16 sps:$4 sm:$0xff]   ;;  %v1308_v49 = vld [vmem:[%s1521_s9 + $0xc] ss:$16 sps:$4 sm:$0xff]   ;;  %p1125_p7 = scmp.ne.s32.totalorder %s1387_s15, 4 }
  0x3e   : > { %s1532_s23 = scalar_lea.vmem %s1641_s1, %s1050_s30  ;;  %762 = vmatprep.mubr.bf16.mxu1 %v1305_v1  ;;  %815 = vmatprep.mubr.bf16.mxu0 %v1308_v49  ;;  %v866_v49 = vlaneseq (!%p1125_p7) }
  0x3f   : > { %v1207_v2 = vld [vmem:[%s1532_s23 + $0x4] ss:$8 sps:$4 sm:$0xff]   ;;  %v1211_v4 = vld [vmem:[%s1532_s23] ss:$8 sps:$4 sm:$0xff]   ;;  %v1213_v6 = vld [vmem:[%s1532_s23 + $0x14] ss:$8 sps:$4 sm:$0xff]  }
  0x40   : > { %v1209_v3 = vld [vmem:[%s1532_s23 + $0x104] ss:$8 sps:$4 sm:$0xff]   ;;  %730 = vmatprep.subr.bf16.mxu1 %v1207_v2  ;;  %v1212_v5 = vld [vmem:[%s1532_s23 + $0x100] ss:$8 sps:$4 sm:$0xff]   ;;  %v1215_v7 = vld [vmem:[%s1532_s23 + $0x114] ss:$8 sps:$4 sm:$0xff]  }
  0x41   : > { %783 = vmatprep.subr.bf16.mxu0 %v1209_v3  ;;  %731 = vmatpush1.bf16.msra.mxu1 %v1211_v4  ;;  %v1217_v8 = vld [vmem:[%s1532_s23 + $0x10] ss:$8 sps:$4 sm:$0xff]   ;;  %v1219_v10 = vld [vmem:[%s1532_s23 + $0x24] ss:$8 sps:$4 sm:$0xff]   ;;  %v1223_v12 = vld [vmem:[%s1532_s23 + $0x20] ss:$8 sps:$4 sm:$0xff]  }
  0x42   : > { %784 = vmatpush1.bf16.msra.mxu0 %v1212_v5  ;;  %732 = vmatprep.subr.bf16.mxu1 %v1213_v6  ;;  %v1218_v9 = vld [vmem:[%s1532_s23 + $0x110] ss:$8 sps:$4 sm:$0xff]   ;;  %v1221_v11 = vld [vmem:[%s1532_s23 + $0x124] ss:$8 sps:$4 sm:$0xff]   ;;  %v1224_v13 = vld [vmem:[%s1532_s23 + $0x120] ss:$8 sps:$4 sm:$0xff]  }
  0x43   : > { %785 = vmatprep.subr.bf16.mxu0 %v1215_v7  ;;  %v1225_v14 = vld [vmem:[%s1532_s23 + $0x34] ss:$8 sps:$4 sm:$0xff]   ;;  %v1229_v16 = vld [vmem:[%s1532_s23 + $0x30] ss:$8 sps:$4 sm:$0xff]   ;;  %v1231_v18 = vld [vmem:[%s1532_s23 + $0x44] ss:$8 sps:$4 sm:$0xff]  }
  0x44   : > { %v1227_v15 = vld [vmem:[%s1532_s23 + $0x134] ss:$8 sps:$4 sm:$0xff]   ;;  %v1230_v17 = vld [vmem:[%s1532_s23 + $0x130] ss:$8 sps:$4 sm:$0xff]   ;;  %v1233_v19 = vld [vmem:[%s1532_s23 + $0x144] ss:$8 sps:$4 sm:$0xff]  }
  0x45   : > { %733 = vmatpush1.bf16.msra.mxu1 %v1217_v8  ;;  %v1235_v20 = vld [vmem:[%s1532_s23 + $0x40] ss:$8 sps:$4 sm:$0xff]   ;;  %v1237_v22 = vld [vmem:[%s1532_s23 + $0x54] ss:$8 sps:$4 sm:$0xff]   ;;  %v1241_v24 = vld [vmem:[%s1532_s23 + $0x50] ss:$8 sps:$4 sm:$0xff]  }
  0x46   : > { %786 = vmatpush1.bf16.msra.mxu0 %v1218_v9  ;;  %734 = vmatprep.subr.bf16.mxu1 %v1219_v10  ;;  %v1236_v21 = vld [vmem:[%s1532_s23 + $0x140] ss:$8 sps:$4 sm:$0xff]   ;;  %v1239_v23 = vld [vmem:[%s1532_s23 + $0x154] ss:$8 sps:$4 sm:$0xff]   ;;  %v1242_v25 = vld [vmem:[%s1532_s23 + $0x150] ss:$8 sps:$4 sm:$0xff]  }
  0x47   : > { %787 = vmatprep.subr.bf16.mxu0 %v1221_v11  ;;  %v1243_v26 = vld [vmem:[%s1532_s23 + $0x64] ss:$8 sps:$4 sm:$0xff]   ;;  %v1247_v28 = vld [vmem:[%s1532_s23 + $0x60] ss:$8 sps:$4 sm:$0xff]   ;;  %v1249_v30 = vld [vmem:[%s1532_s23 + $0x74] ss:$8 sps:$4 sm:$0xff]  }
  0x48   : > { %v1245_v27 = vld [vmem:[%s1532_s23 + $0x164] ss:$8 sps:$4 sm:$0xff]   ;;  %v1248_v29 = vld [vmem:[%s1532_s23 + $0x160] ss:$8 sps:$4 sm:$0xff]   ;;  %v1251_v31 = vld [vmem:[%s1532_s23 + $0x174] ss:$8 sps:$4 sm:$0xff]  }
  0x49   : > { %735 = vmatpush1.bf16.msra.mxu1 %v1223_v12  ;;  %v1253_v32 = vld [vmem:[%s1532_s23 + $0x70] ss:$8 sps:$4 sm:$0xff]   ;;  %v1255_v34 = vld [vmem:[%s1532_s23 + $0x84] ss:$8 sps:$4 sm:$0xff]   ;;  %v1259_v36 = vld [vmem:[%s1532_s23 + $0x80] ss:$8 sps:$4 sm:$0xff]  }
  0x4a   : > { %788 = vmatpush1.bf16.msra.mxu0 %v1224_v13  ;;  %736 = vmatprep.subr.bf16.mxu1 %v1225_v14  ;;  %v1254_v33 = vld [vmem:[%s1532_s23 + $0x170] ss:$8 sps:$4 sm:$0xff]   ;;  %v1257_v35 = vld [vmem:[%s1532_s23 + $0x184] ss:$8 sps:$4 sm:$0xff]   ;;  %v1260_v37 = vld [vmem:[%s1532_s23 + $0x180] ss:$8 sps:$4 sm:$0xff]  }
  0x4b   : > { %789 = vmatprep.subr.bf16.mxu0 %v1227_v15  ;;  %v1261_v38 = vld [vmem:[%s1532_s23 + $0x94] ss:$8 sps:$4 sm:$0xff]   ;;  %v1265_v40 = vld [vmem:[%s1532_s23 + $0x90] ss:$8 sps:$4 sm:$0xff]   ;;  %v1267_v42 = vld [vmem:[%s1532_s23 + $0xa4] ss:$8 sps:$4 sm:$0xff]  }
  0x4c   : > { %v1263_v39 = vld [vmem:[%s1532_s23 + $0x194] ss:$8 sps:$4 sm:$0xff]   ;;  %v1266_v41 = vld [vmem:[%s1532_s23 + $0x190] ss:$8 sps:$4 sm:$0xff]   ;;  %v1269_v43 = vld [vmem:[%s1532_s23 + $0x1a4] ss:$8 sps:$4 sm:$0xff]  }
  0x4d   : > { %737 = vmatpush1.bf16.msra.mxu1 %v1229_v16  ;;  %v1271_v44 = vld [vmem:[%s1532_s23 + $0xa0] ss:$8 sps:$4 sm:$0xff]   ;;  %v1273_v46 = vld [vmem:[%s1532_s23 + $0xb4] ss:$8 sps:$4 sm:$0xff]   ;;  %v1277_v48 = vld [vmem:[%s1532_s23 + $0xb0] ss:$8 sps:$4 sm:$0xff]  }
  0x4e   : > { %790 = vmatpush1.bf16.msra.mxu0 %v1230_v17  ;;  %738 = vmatprep.subr.bf16.mxu1 %v1231_v18  ;;  %v1272_v45 = vld [vmem:[%s1532_s23 + $0x1a0] ss:$8 sps:$4 sm:$0xff]   ;;  %v1275_v47 = vld [vmem:[%s1532_s23 + $0x1b4] ss:$8 sps:$4 sm:$0xff]   ;;  %v1278_v50 = vld [vmem:[%s1532_s23 + $0x1b0] ss:$8 sps:$4 sm:$0xff]  }
  0x4f   : > { %791 = vmatprep.subr.bf16.mxu0 %v1233_v19  ;;  %v1279_v51 = vld [vmem:[%s1532_s23 + $0xc4] ss:$8 sps:$4 sm:$0xff]   ;;  %v1283_v53 = vld [vmem:[%s1532_s23 + $0xc0] ss:$8 sps:$4 sm:$0xff]   ;;  %v1285_v55 = vld [vmem:[%s1532_s23 + $0xd4] ss:$8 sps:$4 sm:$0xff]  }
  0x50   : > { %v1281_v52 = vld [vmem:[%s1532_s23 + $0x1c4] ss:$8 sps:$4 sm:$0xff]   ;;  %v1284_v54 = vld [vmem:[%s1532_s23 + $0x1c0] ss:$8 sps:$4 sm:$0xff]   ;;  %v1287_v56 = vld [vmem:[%s1532_s23 + $0x1d4] ss:$8 sps:$4 sm:$0xff]  }
  0x51   : > { %739 = vmatpush1.bf16.msra.mxu1 %v1235_v20  ;;  %v1289_v57 = vld [vmem:[%s1532_s23 + $0xd0] ss:$8 sps:$4 sm:$0xff]   ;;  %v1291_v59 = vld [vmem:[%s1532_s23 + $0xe4] ss:$8 sps:$4 sm:$0xff]   ;;  %v1295_v61 = vld [vmem:[%s1532_s23 + $0xe0] ss:$8 sps:$4 sm:$0xff]  }
  0x52   : > { %792 = vmatpush1.bf16.msra.mxu0 %v1236_v21  ;;  %740 = vmatprep.subr.bf16.mxu1 %v1237_v22  ;;  %v1290_v58 = vld [vmem:[%s1532_s23 + $0x1d0] ss:$8 sps:$4 sm:$0xff]   ;;  %v1293_v60 = vld [vmem:[%s1532_s23 + $0x1e4] ss:$8 sps:$4 sm:$0xff]   ;;  %v1296_v62 = vld [vmem:[%s1532_s23 + $0x1e0] ss:$8 sps:$4 sm:$0xff]  }
  0x53   : > { %793 = vmatprep.subr.bf16.mxu0 %v1239_v23  ;;  %v1297_v63 = vld [vmem:[%s1532_s23 + $0xf4] ss:$8 sps:$4 sm:$0xff]   ;;  %v1301_v1 = vld [vmem:[%s1532_s23 + $0xf0] ss:$8 sps:$4 sm:$0xff]   ;;  %v285_v10 = vld [vmem:[#allocation2] sm:$0xff] }
  0x54   : > { %v1299_v0 = vld [vmem:[%s1532_s23 + $0x1f4] ss:$8 sps:$4 sm:$0xff]   ;;  %v1302_v2 = vld [vmem:[%s1532_s23 + $0x1f0] ss:$8 sps:$4 sm:$0xff]   ;;  %v286_v14 = vld [vmem:[#allocation2 + $0x8] sm:$0xff] }
  0x55   : > { %741 = vmatpush1.bf16.msra.mxu1 %v1241_v24  ;;  %v1303_v3 = vld [vmem:[%s1521_s9] ss:$16 sps:$4 sm:$0xff]   ;;  %v1306_v4 = vld [vmem:[%s1521_s9 + $0x8] ss:$16 sps:$4 sm:$0xff]   ;;  %v1309_v5 = vld [vmem:[%s1521_s9 + $0x24] ss:$16 sps:$4 sm:$0xff]  }
  0x56   : > { %794 = vmatpush1.bf16.msra.mxu0 %v1242_v25  ;;  %742 = vmatprep.subr.bf16.mxu1 %v1243_v26  ;;  %v1311_v6 = vld [vmem:[%s1521_s9 + $0x2c] ss:$16 sps:$4 sm:$0xff]   ;;  %v1313_v7 = vld [vmem:[%s1521_s9 + $0x20] ss:$16 sps:$4 sm:$0xff]   ;;  %v1314_v8 = vld [vmem:[%s1521_s9 + $0x28] ss:$16 sps:$4 sm:$0xff]  }
  0x57   : > { %795 = vmatprep.subr.bf16.mxu0 %v1245_v27  ;;  %v287_v18 = vld [vmem:[#allocation2 + $0x10] sm:$0xff]  ;;  %v288_v23 = vld [vmem:[#allocation2 + $0x18] sm:$0xff] }
  0x59   : > { %743 = vmatpush1.bf16.msra.mxu1 %v1247_v28 }
  0x5a   : > { %796 = vmatpush1.bf16.msra.mxu0 %v1248_v29  ;;  %744 = vmatprep.subr.bf16.mxu1 %v1249_v30  ;;  %v289_v30 = vld [vmem:[#allocation2 + $0x20] sm:$0xff] }
  0x5b   : > { %797 = vmatprep.subr.bf16.mxu0 %v1251_v31 }
  0x5d   : > { %745 = vmatpush1.bf16.msra.mxu1 %v1253_v32 }
  0x5e   : > { %798 = vmatpush1.bf16.msra.mxu0 %v1254_v33  ;;  %746 = vmatprep.subr.bf16.mxu1 %v1255_v34  ;;  %v290_v34 = vld [vmem:[#allocation2 + $0x28] sm:$0xff] }
  0x5f   : > { %799 = vmatprep.subr.bf16.mxu0 %v1257_v35 }
  0x61   : > { %747 = vmatpush1.bf16.msra.mxu1 %v1259_v36 }
  0x62   : > { %800 = vmatpush1.bf16.msra.mxu0 %v1260_v37  ;;  %748 = vmatprep.subr.bf16.mxu1 %v1261_v38  ;;  %v291_v38 = vld [vmem:[#allocation2 + $0x30] sm:$0xff] }
  0x63   : > { %801 = vmatprep.subr.bf16.mxu0 %v1263_v39 }
  0x65   : > { %749 = vmatpush1.bf16.msra.mxu1 %v1265_v40 }
  0x66   : > { %802 = vmatpush1.bf16.msra.mxu0 %v1266_v41  ;;  %750 = vmatprep.subr.bf16.mxu1 %v1267_v42 }
  0x67   : > { %803 = vmatprep.subr.bf16.mxu0 %v1269_v43  ;;  %v292_v43 = vld [vmem:[#allocation2 + $0x38] sm:$0xff] }
  0x69   : > { %751 = vmatpush1.bf16.msra.mxu1 %v1271_v44 }
  0x6a   : > { %804 = vmatpush1.bf16.msra.mxu0 %v1272_v45  ;;  %752 = vmatprep.subr.bf16.mxu1 %v1273_v46 }
  0x6b   : > { %805 = vmatprep.subr.bf16.mxu0 %v1275_v47 }
  0x6d   : > { %753 = vmatpush1.bf16.msra.mxu1 %v1277_v48 }
  0x6e   : > { %806 = vmatpush1.bf16.msra.mxu0 %v1278_v50  ;;  %754 = vmatprep.subr.bf16.mxu1 %v1279_v51  ;;  %v867_v50 = vshrl.u32 (!%p1125_p7), %v866_v49, 7  ;;  %v864_v51 = vld [vmem:[%s1642_s2] sm:$0x3] (!%p1125_p7) }
  0x6f   : > { %807 = vmatprep.subr.bf16.mxu0 %v1281_v52 }
  0x71   : > { %755 = vmatpush1.bf16.msra.mxu1 %v1283_v53 }
  0x72   : > { %808 = vmatpush1.bf16.msra.mxu0 %v1284_v54  ;;  %756 = vmatprep.subr.bf16.mxu1 %v1285_v55  ;;  %v868_v54 = vsub.s32 (!%p1125_p7), 0, %v867_v50  ;;  %v872_v55 = vsub.s32 (!%p1125_p7), 1, %v867_v50 }
  0x73   : > { %809 = vmatprep.subr.bf16.mxu0 %v1287_v56 }
  0x75   : > { %757 = vmatpush1.bf16.msra.mxu1 %v1289_v57 }
  0x76   : > { %810 = vmatpush1.bf16.msra.mxu0 %v1290_v58  ;;  %758 = vmatprep.subr.bf16.mxu1 %v1291_v59  ;;  %v869_v59 = vrot.slane (!%p1125_p7), %v864_v51, %v868_v54 }
  0x77   : > { %811 = vmatprep.subr.bf16.mxu0 %v1293_v60  ;;  %v873_v60 = vrot.slane (!%p1125_p7), %v864_v51, %v872_v55 }
  0x79   : > { %759 = vmatpush1.bf16.msra.mxu1 %v1295_v61 }
  0x7a   : > { %812 = vmatpush1.bf16.msra.mxu0 %v1296_v62  ;;  %760 = vmatprep.subr.bf16.mxu1 %v1297_v63 }
  0x7b   : > { %813 = vmatprep.subr.bf16.mxu0 %v1299_v0 }
  0x7d   : > { %761 = vmatpush1.bf16.msra.mxu1 %v1301_v1 }
  0x7e   : > { %814 = vmatpush1.bf16.msra.mxu0 %v1302_v2 }
  0x80   : > { %763 = vmatmul.mubr.bf16.vlgmr.msra.gmra.mrb[0].mxu1 %v1303_v3 }
  0x81   : > { %816 = vmatmul.mubr.bf16.vlgmr.msra.gmra.mrb[0].mxu0 %v1306_v4  ;;  %772 = vmatprep.mubr.bf16.mxu1 %v1309_v5 }
  0x82   : > { %825 = vmatprep.mubr.bf16.mxu0 %v1311_v6 }
  0x88   : > { %773 = vmatmul.mubr.bf16.gmra.mrb[4].mxu1 %v1313_v7 }
  0x89   : > { %826 = vmatmul.mubr.bf16.gmra.mrb[4].mxu0 %v1314_v8 }
 0x153   : > { %v764_v9 = vpop.f32.mrb[0].mxu1 }
 0x154   : > { %v817_v11 = vpop.f32.mrb[0].mxu0  ;;  %v766_v13 = vpop.f32.mrb[1].mxu1 }
 0x155   : > { %v818_v12 = vadd.f32 %v817_v11, %v764_v9  ;;  %v819_v15 = vpop.f32.mrb[1].mxu0  ;;  %v768_v17 = vpop.f32.mrb[2].mxu1 }
 0x156   : > { %v820_v16 = vadd.f32 %v819_v15, %v766_v13  ;;  %v821_v19 = vpop.f32.mrb[2].mxu0  ;;  %v770_v22 = vpop.f32.mrb[3].mxu1 }
 0x157   : > { %v836_v20 = vadd.f32 %v818_v12, %v285_v10  ;;  %v822_v21 = vadd.f32 %v821_v19, %v768_v17  ;;  %v823_v24 = vpop.f32.mrb[3].mxu0 }
 0x158   : > { %v837_v25 = vadd.f32 %v820_v16, %v286_v14  ;;  %v824_v26 = vadd.f32 %v823_v24, %v770_v22 }
 0x159   : > { %844 = vst [vmem:[#allocation2] sm:$0xff] %v836_v20  ;;  %v838_v27 = vadd.f32 %v822_v21, %v287_v18 }
 0x15a   : > { %845 = vst [vmem:[#allocation2 + $0x8] sm:$0xff] %v837_v25  ;;  %v839_v28 = vadd.f32 %v824_v26, %v288_v23 }
 0x15b   : > { %846 = vst [vmem:[#allocation2 + $0x10] sm:$0xff] %v838_v27  ;;  %v774_v29 = vpop.f32.mrb[4].mxu1 }
 0x15c   : > { %847 = vst [vmem:[#allocation2 + $0x18] sm:$0xff] %v839_v28  ;;  %v827_v31 = vpop.f32.mrb[4].mxu0  ;;  %v776_v33 = vpop.f32.mrb[5].mxu1 }
 0x15d   : > { %v828_v32 = vadd.f32 %v827_v31, %v774_v29  ;;  %v829_v35 = vpop.f32.mrb[5].mxu0  ;;  %v778_v37 = vpop.f32.mrb[6].mxu1 }
 0x15e   : > { %v830_v36 = vadd.f32 %v829_v35, %v776_v33  ;;  %v831_v39 = vpop.f32.mrb[6].mxu0  ;;  %v780_v42 = vpop.f32.mrb[7].mxu1  ;;  %855 = sbr.rel (%p1125_p7) target bundleno = 369 (0x171), region = 44 }
 0x15f   : > { %v840_v40 = vadd.f32 %v828_v32, %v289_v30  ;;  %v832_v41 = vadd.f32 %v831_v39, %v778_v37  ;;  %v833_v44 = vpop.f32.mrb[7].mxu0 }
 0x160   : > { %v841_v45 = vadd.f32 %v830_v36, %v290_v34  ;;  %v834_v46 = vadd.f32 %v833_v44, %v780_v42  ;;  %v856_v52 = vld [vmem:[#allocation2] sm:$0xff] (!%p1125_p7) }
 0x161   : > { %848 = vst [vmem:[#allocation2 + $0x20] sm:$0xff] %v840_v40  ;;  %v842_v47 = vadd.f32 %v832_v41, %v291_v38  ;;  %v857_v53 = vld [vmem:[#allocation2 + $0x8] sm:$0xff] (!%p1125_p7)  ;;  %v876_v0 = vadd.f32 (!%p1125_p7), %v869_v59, %v856_v52 }
 0x162   : > { %849 = vst [vmem:[#allocation2 + $0x28] sm:$0xff] %v841_v45  ;;  %v843_v48 = vadd.f32 %v834_v46, %v292_v43  ;;  %v858_v56 = vld [vmem:[#allocation2 + $0x10] sm:$0xff] (!%p1125_p7)  ;;  %v877_v1 = vadd.f32 (!%p1125_p7), %v873_v60, %v857_v53 }
 0x163   : > { %850 = vst [vmem:[#allocation2 + $0x30] sm:$0xff] %v842_v47  ;;  %v859_v57 = vld [vmem:[#allocation2 + $0x18] sm:$0xff] (!%p1125_p7)  ;;  %v878_v2 = vadd.f32 (!%p1125_p7), %v869_v59, %v858_v56 }
 0x164   : > { %851 = vst [vmem:[#allocation2 + $0x38] sm:$0xff] %v843_v48  ;;  %v879_v3 = vadd.f32 (!%p1125_p7), %v873_v60, %v859_v57  ;;  %v1136_v8 = vpack.c.bf16 (!%p1125_p7), %v877_v1, %v876_v0 }
 0x166   : > { %v1137_v9 = vpack.c.bf16 %v879_v3, %v878_v2  ;;  %908 = vst [vmem:[%s1643_s3] sm:$0xff] %v1136_v8 }
 0x168   : > { %v860_v58 = vld [vmem:[#allocation2 + $0x20] sm:$0xff]  ;;  %909 = vst [vmem:[%s1643_s3 + $0x8] sm:$0xff] %v1137_v9 }
 0x169   : > { %v861_v61 = vld [vmem:[#allocation2 + $0x28] sm:$0xff]  ;;  %v880_v4 = vadd.f32 %v869_v59, %v860_v58 }
 0x16a   : > { %v862_v62 = vld [vmem:[#allocation2 + $0x30] sm:$0xff]  ;;  %v881_v5 = vadd.f32 %v873_v60, %v861_v61 }
 0x16b   : > { %v863_v63 = vld [vmem:[#allocation2 + $0x38] sm:$0xff]  ;;  %v882_v6 = vadd.f32 %v869_v59, %v862_v62 }
 0x16c   : > { %v883_v7 = vadd.f32 %v873_v60, %v863_v63  ;;  %v1138_v10 = vpack.c.bf16 %v881_v5, %v880_v4 }
 0x16e   : > { %v1139_v11 = vpack.c.bf16 %v883_v7, %v882_v6  ;;  %910 = vst [vmem:[%s1643_s3 + $0x10] sm:$0xff] %v1138_v10 }
 0x170   : > { %911 = vst [vmem:[%s1643_s3 + $0x18] sm:$0xff] %v1139_v11 }
 0x171 PF: > { %s16_s17 = sadd.s32 1, %s1395_s17   ;;  %s1648_s12 = smov %s1379_s13 }
 0x172   : > { %p13_p9 = scmp.ge.s32.totalorder %s16_s17, 7   ;;  %s1649_s13 = smov %s1383_s14 }
 0x173   : > { %s1650_s14 = smov %s1471_s24  ;;  %s1651_s15 = smov %s1391_s16 }
 0x174   : > { %s1652_s16 = smov %s1654_s19  ;;  %15 = sbr.rel (!%p13_p9) target bundleno = 4 (0x4), region = 87 }
 0x17b   :  { %945 = vsyncpa [#allocation4], 1 }
 0x17c   :  { %947 = vsyncpa [#allocation4 + $0x1], 1 }

// kernel: generator_forward.66
= control target key start
LH: loop header
LB: loop body
LE: loop exit
PB: predicated region body
PF: predicated region fallthrough
CT: control target
= control target key end

     0   :  { %s805_s15 = smov 0   ;;  %s807_s16 = smov 0   ;;  %s925_s0 = inlined_call_operand.vmem [shape: bf16[2,16,256], index: 0, kind: input, shape index: {}]   ;;  %s926_s1 = inlined_call_operand.vmem [shape: f32[2,1,256], index: 1, kind: input, shape index: {}]   ;;  %s927_s2 = inlined_call_operand.vmem [shape: f32[2,1,256], index: 2, kind: input, shape index: {}]   ;;  %s928_s3 = inlined_call_operand.vmem [shape: bf16[2,16,256], index: 3, kind: input, shape index: {}]   ;;  %s929_s4 = inlined_call_operand.vmem [shape: bf16[2,16,256], index: 4, kind: output, shape index: {}]  }
   0x1   :  { %s809_s17 = smov 0   ;;  %s811_s18 = smov 0  }
   0x2   :  { %s813_s19 = smov 0   ;;  %s815_s20 = smov 0  }
   0x3   :  { %s817_s21 = smov 0  }
   0x4 LB: > { %s29_s22 = sadd.s32 1, %s770_s19  ;;  %s33_s23 = sadd.s32 1, %s774_s20  ;;  %s778_s21 = sphi %s817_s21, %s14_s21   ;;  %s774_s20 = sphi %s815_s20, %s937_s20   ;;  %s770_s19 = sphi %s813_s19, %s936_s19   ;;  %s766_s18 = sphi %s811_s18, %s935_s18   ;;  %s762_s17 = sphi %s809_s17, %s934_s17   ;;  %s758_s16 = sphi %s807_s16, %s933_s16   ;;  %s754_s15 = sphi %s805_s15, %s932_s15  }
   0x5   : > { %p31_p0 = scmp.ge.s32.totalorder %s29_s22, 2  ;;  %s628_s24 = sadd.s32 4294967295, %s778_s21  }
   0x6   : > { %p51_p1 = scmp.ne.s32.totalorder %s758_s16, %s754_s15  ;;  %p52_p2 = scmp.eq.s32.totalorder %s778_s21, 0 }
   0x7   : > { %s939_s22 = smov (%p31_p0, %s29_s22), 0  ;;  %s941_s23 = smov (!%p31_p0, %s33_s23), %s774_s20 }
   0x8   : > { %p35_p3 = scmp.ge.s32.totalorder %s941_s23, 2  ;;  %p171_p4 = scmp.eq.s32.totalorder %s628_s24, 3 }
   0x9   : > { %s40_s25 = ssub.s32 %s770_s19, %s939_s22  ;;  %p851_p5 = por %p52_p2, %p51_p1 }
   0xa   : > { %s943_s23 = smov (%p35_p3, %s941_s23), 0  ;;  %p857_p6 = por %p171_p4, %p51_p1 }
   0xb   : > { %s37_s28 = ssub.s32 %s774_s20, %s943_s23  ;;  %s44_s30 = sadd.s32 1, %s758_s16 }
   0xc   : > { %s41_s29 = sor.u32 %s40_s25, %s37_s28  ;;  %p631_p8 = scmp.ge.s32.totalorder %s778_s21, 4 }
   0xd   : > { %p42_p7 = scmp.eq.s32.totalorder %s41_s29, 0 }
   0xe   : > { %193 = sbr.rel (%p631_p8) target bundleno = 35 (0x23), region = 16 }
   0xf   : > { %s865_s5 = scalar_select %p42_p7, %s758_s16, %s44_s30  }
  0x15   : > { %196 = sbr.rel (!%p851_p5) target bundleno = 28 (0x1c), region = 20  ;;  %s198_s6 = sand.u32 (%p851_p5), 1, %s758_s16  }
  0x16   : > { %s633_s7 = sshll.u32 (%p851_p5), %s774_s20, 2  ;;  %s632_s8 = sshll.u32 (%p851_p5), %s198_s6, 3 }
  0x17   : > { %s205_s9 = sadd.s32 (%p851_p5), %s770_s19, %s633_s7  ;;  %s200_s14 = scalar_lea.vmem (%p851_p5), [#allocation2], %s632_s8 }
  0x18   : > { %s634_s10 = sshll.u32 (%p851_p5), %s205_s9, 2 }
  0x19   : > { %s207_s13 = scalar_lea.vmem (%p851_p5), %s925_s0, %s634_s10 }
  0x1a   : > { %v223_v0 = vld [vmem:[%s207_s13] sm:$0xf] (%p851_p5)  ;;  %v225_v1 = vld [vmem:[%s207_s13 + $0x8] sm:$0xf] (%p851_p5) }
  0x1b   : > { %224 = vst [vmem:[%s200_s14] sm:$0xf] (%p851_p5), %v223_v0  ;;  %226 = vst [vmem:[%s200_s14 + $0x4] sm:$0xf] (%p851_p5), %v225_v1 }
  0x1c PF: > { %273 = sbr.rel (!%p851_p5) target bundleno = 35 (0x23), region = 69  ;;  %s275_s24 = sand.u32 (%p851_p5), 1, %s758_s16  }
  0x1d   : > { %s636_s25 = sshll.u32 (%p851_p5), %s774_s20, 2  ;;  %s635_s28 = sshll.u32 (%p851_p5), %s275_s24, 3 }
  0x1e   : > { %s282_s29 = sadd.s32 (%p851_p5), %s770_s19, %s636_s25  ;;  %s277_s8 = scalar_lea.vmem (%p851_p5), [#allocation3], %s635_s28 }
  0x1f   : > { %s637_s30 = sshll.u32 (%p851_p5), %s282_s29, 2 }
  0x20   : > { %s284_s9 = scalar_lea.vmem (%p851_p5), %s928_s3, %s637_s30 }
  0x21   : > { %v300_v2 = vld [vmem:[%s284_s9] sm:$0xf] (%p851_p5)  ;;  %v302_v3 = vld [vmem:[%s284_s9 + $0x8] sm:$0xf] (%p851_p5) }
  0x22   : > { %301 = vst [vmem:[%s277_s8] sm:$0xf] (%p851_p5), %v300_v2  ;;  %303 = vst [vmem:[%s277_s8 + $0x4] sm:$0xf] (%p851_p5), %v302_v3 }
  0x23 PF: > { %p638_p9 = scmp.ge.s32.totalorder %s778_s21, 1  ;;  %p329_p10 = scmp.lt.s32.totalorder %s778_s21, 5 }
  0x25   : > { %p330_p11 = pnand %p638_p9, %p329_p10 }
  0x26   : > { %s336_s26 = sand.u32 (!%p330_p11), 1, %s754_s15   ;;  %p386_p12 = scmp.lt.s32.totalorder (!%p330_p11), %s766_s18, 1 }
  0x27   : > { %333 = sbr.rel (%p330_p11) target bundleno = 69 (0x45), region = 110  ;;  %s639_s10 = sshll.u32 (!%p330_p11), %s336_s26, 3 }
  0x28   : > { %p388_p13 = scmp.lt.s32.totalorder (!%p330_p11), %s762_s17, 1  ;;  %s338_s11 = scalar_lea.vmem (!%p330_p11), [#allocation2], %s639_s10 }
  0x29   : > { %v656_v4 = vld [vmem:[%s338_s11] sm:$0xff] (!%p330_p11)   ;;  %s345_s25 = scalar_lea.vmem (!%p330_p11), [#allocation3], %s639_s10  ;;  %s384_s9 = scalar_lea.vmem (!%p330_p11), [#allocation4], %s639_s10 }
  0x2a   : > { %v657_v5 = vunpack.c.l.bf16 (!%p330_p11), %v656_v4  ;;  %v658_v6 = vunpack.c.h.bf16 (!%p330_p11), %v656_v4  ;;  %v660_v7 = vld [vmem:[%s345_s25] sm:$0xff] (!%p330_p11)  }
  0x2b   : > { %v661_v12 = vunpack.c.l.bf16 (!%p330_p11), %v660_v7  ;;  %v662_v13 = vunpack.c.h.bf16 (!%p330_p11), %v660_v7 }
  0x2e   : > { %s387_s12 = scalar_select %p386_p12, %s766_s18, 1 }
  0x2f   : > { %s389_s13 = scalar_select %p388_p13, %s762_s17, 1 }
  0x30   : > { %s642_s14 = sshll.u32 %s387_s12, 1  ;;  %s649_s8 = sshll.u32 (%p857_p6), %s766_s18, 2 }
  0x31   : > { %s391_s24 = sadd.s32 %s642_s14, %s389_s13  ;;  %s451_s26 = sadd.s32 (%p857_p6), %s762_s17, %s649_s8 }
  0x32   : > { %s392_s30 = scalar_lea.vmem %s926_s1, %s391_s24  ;;  %s399_s15 = scalar_lea.vmem %s927_s2, %s391_s24 }
  0x33   : > { %v644_v8 = vld [vmem:[%s392_s30] ss:$0 sm:$0xff]  ;;  %s650_s11 = sshll.u32 (%p857_p6), %s451_s26, 2 }
  0x34   : > { %v645_v9 = vld [vmem:[%s399_s15] ss:$0 sm:$0xff]  ;;  %v413_v10 = vsub.f32 %v657_v5, %v644_v8  ;;  %v414_v11 = vsub.f32 %v658_v6, %v644_v8  ;;  %s453_s14 = scalar_lea.vmem (%p857_p6), %s929_s4, %s650_s11 }
  0x36   : > { %v422_v14 = vmul.f32 %v645_v9, %v413_v10  ;;  %v423_v15 = vmul.f32 %v645_v9, %v414_v11  ;;  %446 = sbr.rel (!%p857_p6) target bundleno = 69 (0x45), region = 122 }
  0x38   : > { %v428_v16 = vadd.f32 %v661_v12, %v422_v14  ;;  %v429_v17 = vadd.f32 %v662_v13, %v423_v15 }
  0x3a   : > { %v666_v18 = vpack.c.bf16 %v429_v17, %v428_v16 }
  0x3c   : > { %667 = vst [vmem:[%s384_s9] sm:$0xff] %v666_v18  }
  0x43   : > { %v469_v19 = vld [vmem:[%s384_s9] sm:$0xf]  ;;  %v471_v20 = vld [vmem:[%s384_s9 + $0x4] sm:$0xf] }
  0x44   : > { %470 = vst [vmem:[%s453_s14] sm:$0xf] %v469_v19  ;;  %472 = vst [vmem:[%s453_s14 + $0x8] sm:$0xf] %v471_v20 }
  0x45 PF: > { %s14_s21 = sadd.s32 1, %s778_s21   ;;  %s932_s15 = smov %s758_s16 }
  0x46   : > { %p11_p0 = scmp.ge.s32.totalorder %s14_s21, 6   ;;  %s933_s16 = smov %s865_s5 }
  0x47   : > { %s934_s17 = smov %s770_s19  ;;  %s935_s18 = smov %s774_s20 }
  0x48   : > { %s936_s19 = smov %s939_s22  ;;  %s937_s20 = smov %s943_s23 }
  0x49   :  { %13 = sbr.rel (!%p11_p0) target bundleno = 4 (0x4), region = 208 }

// kernel: generator_forward.97
= control target key start
LH: loop header
LB: loop body
LE: loop exit
PB: predicated region body
PF: predicated region fallthrough
CT: control target
= control target key end

     0   :  { %s1744_s12 = smov 0   ;;  %s1746_s13 = smov 0   ;;  %s1974_s0 = inlined_call_operand.vmem [shape: bf16[128,2560], index: 0, kind: input, shape index: {}]   ;;  %s1975_s1 = inlined_call_operand.vmem [shape: bf16[2560,128], index: 1, kind: input, shape index: {}]   ;;  %s1976_s2 = inlined_call_operand.vmem [shape: f32[1,128], index: 2, kind: input, shape index: {}]   ;;  %s1977_s3 = inlined_call_operand.vmem [shape: bf16[128,128], index: 3, kind: output, shape index: {}]  }
   0x1   :  { %s1748_s14 = smov 0   ;;  %s1750_s15 = smov 0  }
   0x2   :  { %s1752_s16 = smov 0  }
   0x3 LB: > { %s25_s17 = sadd.s32 1, %s1717_s15  ;;  %p48_p1 = scmp.ne.s32.totalorder %s1709_s13, %s1705_s12  ;;  %s1721_s16 = sphi %s1752_s16, %s13_s16   ;;  %s1717_s15 = sphi %s1750_s15, %s1981_s15   ;;  %s1713_s14 = sphi %s1748_s14, %s1980_s14   ;;  %s1709_s13 = sphi %s1746_s13, %s1979_s13   ;;  %s1705_s12 = sphi %s1744_s12, %s1978_s12  }
   0x4   : > { %p26_p0 = scmp.ge.s32.totalorder %s25_s17, 5  ;;  %p49_p2 = scmp.eq.s32.totalorder %s1721_s16, 0 }
   0x5   : > { %s41_s19 = sadd.s32 1, %s1709_s13  ;;  %p1275_p5 = scmp.ge.s32.totalorder %s1721_s16, 5 }
   0x6   : > { %s1983_s17 = smov (%p26_p0, %s25_s17), 0  ;;  %p50_p3 = por %p49_p2, %p48_p1 }
   0x7   : > { %s37_s18 = ssub.s32 %s1717_s15, %s1983_s17  ;;  %167 = sbr.rel (%p1275_p5) target bundleno = 34 (0x22), region = 24 }
   0x8   : > { %p39_p4 = scmp.eq.s32.totalorder %s37_s18, 0 }
   0xa   : > { %s1779_s20 = scalar_select %p39_p4, %s1709_s13, %s41_s19  }
   0xe   : > { %170 = sbr.rel (!%p50_p3) target bundleno = 34 (0x22), region = 28  ;;  %s172_s21 = sand.u32 (%p50_p3), 1, %s1709_s13  }
   0xf   : > { %s1370_s22 = sshll.u32 (%p50_p3), %s1717_s15, 4  ;;  %s1276_s23 = sshll.u32 (%p50_p3), %s172_s21, 8 }
  0x10   : > { %s1787_s26 = scalar_lea.vmem (%p50_p3), %s1974_s0, %s1370_s22  ;;  %s1792_s27 = scalar_lea.vmem (%p50_p3), [#allocation3], %s1276_s23 }
  0x11   : > { %v193_v0 = vld [vmem:[%s1787_s26] sm:$0xff] (%p50_p3)  ;;  %v195_v1 = vld [vmem:[%s1787_s26 + $0x8] sm:$0xff] (%p50_p3)  ;;  %v197_v2 = vld [vmem:[%s1787_s26 + $0x50] sm:$0xff] (%p50_p3) }
  0x12   : > { %194 = vst [vmem:[%s1792_s27] sm:$0xff] (%p50_p3), %v193_v0  ;;  %196 = vst [vmem:[%s1792_s27 + $0x8] sm:$0xff] (%p50_p3), %v195_v1  ;;  %v199_v3 = vld [vmem:[%s1787_s26 + $0x58] sm:$0xff] (%p50_p3)  ;;  %v201_v4 = vld [vmem:[%s1787_s26 + $0xa0] sm:$0xff] (%p50_p3) }
  0x13   : > { %198 = vst [vmem:[%s1792_s27 + $0x10] sm:$0xff] (%p50_p3), %v197_v2  ;;  %v203_v5 = vld [vmem:[%s1787_s26 + $0xa8] sm:$0xff] (%p50_p3)  ;;  %200 = vst [vmem:[%s1792_s27 + $0x18] sm:$0xff] (%p50_p3), %v199_v3  ;;  %v205_v6 = vld [vmem:[%s1787_s26 + $0xf0] sm:$0xff] (%p50_p3) }
  0x14   : > { %202 = vst [vmem:[%s1792_s27 + $0x20] sm:$0xff] (%p50_p3), %v201_v4  ;;  %204 = vst [vmem:[%s1792_s27 + $0x28] sm:$0xff] (%p50_p3), %v203_v5  ;;  %v207_v7 = vld [vmem:[%s1787_s26 + $0xf8] sm:$0xff] (%p50_p3)  ;;  %v209_v8 = vld [vmem:[%s1787_s26 + $0x140] sm:$0xff] (%p50_p3) }
  0x15   : > { %206 = vst [vmem:[%s1792_s27 + $0x30] sm:$0xff] %v205_v6  ;;  %208 = vst [vmem:[%s1792_s27 + $0x38] sm:$0xff] %v207_v7  ;;  %v211_v9 = vld [vmem:[%s1787_s26 + $0x148] sm:$0xff]  ;;  %v213_v10 = vld [vmem:[%s1787_s26 + $0x190] sm:$0xff] }
  0x16   : > { %210 = vst [vmem:[%s1792_s27 + $0x40] sm:$0xff] %v209_v8  ;;  %v215_v11 = vld [vmem:[%s1787_s26 + $0x198] sm:$0xff]  ;;  %212 = vst [vmem:[%s1792_s27 + $0x48] sm:$0xff] %v211_v9  ;;  %v217_v12 = vld [vmem:[%s1787_s26 + $0x1e0] sm:$0xff] }
  0x17   : > { %214 = vst [vmem:[%s1792_s27 + $0x50] sm:$0xff] %v213_v10  ;;  %216 = vst [vmem:[%s1792_s27 + $0x58] sm:$0xff] %v215_v11  ;;  %v219_v13 = vld [vmem:[%s1787_s26 + $0x1e8] sm:$0xff]  ;;  %v221_v14 = vld [vmem:[%s1787_s26 + $0x230] sm:$0xff] }
  0x18   : > { %218 = vst [vmem:[%s1792_s27 + $0x60] sm:$0xff] %v217_v12  ;;  %220 = vst [vmem:[%s1792_s27 + $0x68] sm:$0xff] %v219_v13  ;;  %v223_v15 = vld [vmem:[%s1787_s26 + $0x238] sm:$0xff]  ;;  %v225_v16 = vld [vmem:[%s1787_s26 + $0x280] sm:$0xff] }
  0x19   : > { %222 = vst [vmem:[%s1792_s27 + $0x70] sm:$0xff] %v221_v14  ;;  %v227_v17 = vld [vmem:[%s1787_s26 + $0x288] sm:$0xff]  ;;  %224 = vst [vmem:[%s1792_s27 + $0x78] sm:$0xff] %v223_v15  ;;  %v229_v18 = vld [vmem:[%s1787_s26 + $0x2d0] sm:$0xff] }
  0x1a   : > { %226 = vst [vmem:[%s1792_s27 + $0x80] sm:$0xff] %v225_v16  ;;  %228 = vst [vmem:[%s1792_s27 + $0x88] sm:$0xff] %v227_v17  ;;  %v231_v19 = vld [vmem:[%s1787_s26 + $0x2d8] sm:$0xff]  ;;  %v233_v20 = vld [vmem:[%s1787_s26 + $0x320] sm:$0xff] }
  0x1b   : > { %230 = vst [vmem:[%s1792_s27 + $0x90] sm:$0xff] %v229_v18  ;;  %232 = vst [vmem:[%s1792_s27 + $0x98] sm:$0xff] %v231_v19  ;;  %v235_v21 = vld [vmem:[%s1787_s26 + $0x328] sm:$0xff]  ;;  %v237_v22 = vld [vmem:[%s1787_s26 + $0x370] sm:$0xff] }
  0x1c   : > { %234 = vst [vmem:[%s1792_s27 + $0xa0] sm:$0xff] %v233_v20  ;;  %v239_v23 = vld [vmem:[%s1787_s26 + $0x378] sm:$0xff]  ;;  %236 = vst [vmem:[%s1792_s27 + $0xa8] sm:$0xff] %v235_v21  ;;  %v241_v24 = vld [vmem:[%s1787_s26 + $0x3c0] sm:$0xff] }
  0x1d   : > { %238 = vst [vmem:[%s1792_s27 + $0xb0] sm:$0xff] %v237_v22  ;;  %240 = vst [vmem:[%s1792_s27 + $0xb8] sm:$0xff] %v239_v23  ;;  %v243_v25 = vld [vmem:[%s1787_s26 + $0x3c8] sm:$0xff]  ;;  %v245_v26 = vld [vmem:[%s1787_s26 + $0x410] sm:$0xff] }
  0x1e   : > { %242 = vst [vmem:[%s1792_s27 + $0xc0] sm:$0xff] %v241_v24  ;;  %244 = vst [vmem:[%s1792_s27 + $0xc8] sm:$0xff] %v243_v25  ;;  %v247_v27 = vld [vmem:[%s1787_s26 + $0x418] sm:$0xff]  ;;  %v249_v28 = vld [vmem:[%s1787_s26 + $0x460] sm:$0xff] }
  0x1f   : > { %246 = vst [vmem:[%s1792_s27 + $0xd0] sm:$0xff] %v245_v26  ;;  %v251_v29 = vld [vmem:[%s1787_s26 + $0x468] sm:$0xff]  ;;  %248 = vst [vmem:[%s1792_s27 + $0xd8] sm:$0xff] %v247_v27  ;;  %v253_v30 = vld [vmem:[%s1787_s26 + $0x4b0] sm:$0xff] }
  0x20   : > { %250 = vst [vmem:[%s1792_s27 + $0xe0] sm:$0xff] %v249_v28  ;;  %252 = vst [vmem:[%s1792_s27 + $0xe8] sm:$0xff] %v251_v29  ;;  %v255_v31 = vld [vmem:[%s1787_s26 + $0x4b8] sm:$0xff] }
  0x21   : > { %254 = vst [vmem:[%s1792_s27 + $0xf0] sm:$0xff] %v253_v30  ;;  %256 = vst [vmem:[%s1792_s27 + $0xf8] sm:$0xff] %v255_v31 }
  0x22 PF: > { %p1279_p6 = scmp.ge.s32.totalorder %s1721_s16, 1  ;;  %p261_p7 = scmp.lt.s32.totalorder %s1721_s16, 6 }
  0x24   : > { %p262_p8 = pnand %p1279_p6, %p261_p7 }
  0x25   : > { %s268_s28 = sand.u32 (!%p262_p8), 1, %s1705_s12   ;;  %p1281_p9 = scmp.ne.s32.totalorder (!%p262_p8), %s1713_s14, 0 }
  0x26   : > { %265 = sbr.rel (%p262_p8) target bundleno = 383 (0x17f), region = 51  ;;  %s1280_s29 = sshll.u32 (!%p262_p8), %s268_s28, 8 }
  0x27   : > { %s1858_s30 = scalar_lea.vmem (!%p262_p8), [#allocation3], %s1280_s29 }
  0x2d   : > { %323 = sbr.rel (%p1281_p9) target bundleno = 54 (0x36), region = 59  ;;  %v1723_v32 = vmov (!%p1281_p9), 0.0  }
  0x2e   : > { %324 = vst [vmem:[#allocation2] sm:$0xff] (!%p1281_p9), %v1723_v32  ;;  %325 = vst [vmem:[#allocation2 + $0x8] sm:$0xff] (!%p1281_p9), %v1723_v32 }
  0x2f   : > { %326 = vst [vmem:[#allocation2 + $0x10] sm:$0xff] (!%p1281_p9), %v1723_v32  ;;  %327 = vst [vmem:[#allocation2 + $0x18] sm:$0xff] (!%p1281_p9), %v1723_v32 }
  0x30   : > { %328 = vst [vmem:[#allocation2 + $0x20] sm:$0xff] (!%p1281_p9), %v1723_v32  ;;  %329 = vst [vmem:[#allocation2 + $0x28] sm:$0xff] (!%p1281_p9), %v1723_v32 }
  0x31   : > { %330 = vst [vmem:[#allocation2 + $0x30] sm:$0xff] (!%p1281_p9), %v1723_v32  ;;  %331 = vst [vmem:[#allocation2 + $0x38] sm:$0xff] (!%p1281_p9), %v1723_v32 }
  0x32   : > { %332 = vst [vmem:[#allocation2 + $0x40] sm:$0xff] (!%p1281_p9), %v1723_v32  ;;  %333 = vst [vmem:[#allocation2 + $0x48] sm:$0xff] (!%p1281_p9), %v1723_v32 }
  0x33   : > { %334 = vst [vmem:[#allocation2 + $0x50] sm:$0xff] (!%p1281_p9), %v1723_v32  ;;  %335 = vst [vmem:[#allocation2 + $0x58] sm:$0xff] (!%p1281_p9), %v1723_v32 }
  0x34   : > { %336 = vst [vmem:[#allocation2 + $0x60] sm:$0xff] %v1723_v32  ;;  %337 = vst [vmem:[#allocation2 + $0x68] sm:$0xff] %v1723_v32 }
  0x35   : > { %338 = vst [vmem:[#allocation2 + $0x70] sm:$0xff] %v1723_v32  ;;  %339 = vst [vmem:[#allocation2 + $0x78] sm:$0xff] %v1723_v32 }
  0x36 PF: > { %s1282_s4 = sshll.u32 %s1713_s14, 9  ;;  %v1637_v33 = vld [vmem:[%s1858_s30 + $0x4] ss:$16 sps:$4 sm:$0xff]   ;;  %v1640_v34 = vld [vmem:[%s1858_s30 + $0xc] ss:$16 sps:$4 sm:$0xff]   ;;  %p1348_p10 = scmp.ne.s32.totalorder %s1713_s14, 4 }
  0x37   : > { %s389_s5 = sshra.s32 %s1282_s4, 3  ;;  %841 = vmatprep.mubr.bf16.mxu0 %v1637_v33  ;;  %938 = vmatprep.mubr.bf16.mxu1 %v1640_v34  ;;  %v1635_v1 = vld [vmem:[%s1858_s30] ss:$16 sps:$4 sm:$0xff]   ;;  %v1638_v4 = vld [vmem:[%s1858_s30 + $0x8] ss:$16 sps:$4 sm:$0xff]  }
  0x38   : > { %s1283_s6 = sshll.u32 %s389_s5, 2  ;;  %v1641_v5 = vld [vmem:[%s1858_s30 + $0x24] ss:$16 sps:$4 sm:$0xff]   ;;  %v1643_v6 = vld [vmem:[%s1858_s30 + $0x2c] ss:$16 sps:$4 sm:$0xff]  }
  0x39   : > { %s1867_s9 = scalar_lea.vmem %s1975_s1, %s1283_s6  ;;  %v1645_v7 = vld [vmem:[%s1858_s30 + $0x20] ss:$16 sps:$4 sm:$0xff]   ;;  %v1646_v8 = vld [vmem:[%s1858_s30 + $0x28] ss:$16 sps:$4 sm:$0xff]   ;;  %v1647_v9 = vld [vmem:[%s1858_s30 + $0x44] ss:$16 sps:$4 sm:$0xff]  }
  0x3a   : > { %v1603_v35 = vld [vmem:[%s1867_s9 + $0x40] sm:$0xff]   ;;  %v1607_v39 = vld [vmem:[%s1867_s9 + $0x48] sm:$0xff]   ;;  %v1611_v43 = vld [vmem:[%s1867_s9 + $0x50] sm:$0xff]  }
  0x3b   : > { %v1604_v36 = vld [vmem:[%s1867_s9 + $0xc0] sm:$0xff]   ;;  %1434 = vmatprep.subr.bf16.mxu0 %v1603_v35  ;;  %v1608_v40 = vld [vmem:[%s1867_s9 + $0xc8] sm:$0xff]   ;;  %v1612_v44 = vld [vmem:[%s1867_s9 + $0xd0] sm:$0xff]  }
  0x3c   : > { %v1605_v37 = vld [vmem:[%s1867_s9] sm:$0xff]   ;;  %1498 = vmatprep.subr.bf16.mxu1 %v1604_v36  ;;  %v1609_v41 = vld [vmem:[%s1867_s9 + $0x8] sm:$0xff]   ;;  %v1613_v45 = vld [vmem:[%s1867_s9 + $0x10] sm:$0xff]  }
  0x3d   : > { %v1606_v38 = vld [vmem:[%s1867_s9 + $0x80] sm:$0xff]   ;;  %1435 = vmatpush3.bf16.msra.mxu0 %v1605_v37  ;;  %v1610_v42 = vld [vmem:[%s1867_s9 + $0x88] sm:$0xff]   ;;  %v1614_v46 = vld [vmem:[%s1867_s9 + $0x90] sm:$0xff]  }
  0x3e   : > { %1499 = vmatpush3.bf16.msra.mxu1 %v1606_v38  ;;  %1436 = vmatprep.subr.bf16.mxu0 %v1607_v39  ;;  %v1615_v47 = vld [vmem:[%s1867_s9 + $0x58] sm:$0xff]   ;;  %v1619_v51 = vld [vmem:[%s1867_s9 + $0x60] sm:$0xff]   ;;  %v1623_v55 = vld [vmem:[%s1867_s9 + $0x68] sm:$0xff]  }
  0x3f   : > { %1500 = vmatprep.subr.bf16.mxu1 %v1608_v40  ;;  %v1616_v48 = vld [vmem:[%s1867_s9 + $0xd8] sm:$0xff]   ;;  %v1620_v52 = vld [vmem:[%s1867_s9 + $0xe0] sm:$0xff]   ;;  %v1624_v56 = vld [vmem:[%s1867_s9 + $0xe8] sm:$0xff]  }
  0x40   : > { %v1617_v49 = vld [vmem:[%s1867_s9 + $0x18] sm:$0xff]   ;;  %v1621_v53 = vld [vmem:[%s1867_s9 + $0x20] sm:$0xff]   ;;  %v1625_v57 = vld [vmem:[%s1867_s9 + $0x28] sm:$0xff]  }
  0x41   : > { %1437 = vmatpush3.bf16.msra.mxu0 %v1609_v41  ;;  %v1618_v50 = vld [vmem:[%s1867_s9 + $0x98] sm:$0xff]   ;;  %v1622_v54 = vld [vmem:[%s1867_s9 + $0xa0] sm:$0xff]   ;;  %v1626_v58 = vld [vmem:[%s1867_s9 + $0xa8] sm:$0xff]  }
  0x42   : > { %1501 = vmatpush3.bf16.msra.mxu1 %v1610_v42  ;;  %1438 = vmatprep.subr.bf16.mxu0 %v1611_v43  ;;  %v1627_v59 = vld [vmem:[%s1867_s9 + $0x70] sm:$0xff]   ;;  %v1631_v63 = vld [vmem:[%s1867_s9 + $0x78] sm:$0xff]   ;;  %v341_v42 = vld [vmem:[#allocation2] sm:$0xff] }
  0x43   : > { %1502 = vmatprep.subr.bf16.mxu1 %v1612_v44  ;;  %v1628_v60 = vld [vmem:[%s1867_s9 + $0xf0] sm:$0xff]   ;;  %v1632_v0 = vld [vmem:[%s1867_s9 + $0xf8] sm:$0xff]  }
  0x44   : > { %v1629_v61 = vld [vmem:[%s1867_s9 + $0x30] sm:$0xff]   ;;  %v1633_v2 = vld [vmem:[%s1867_s9 + $0x38] sm:$0xff]  }
  0x45   : > { %1439 = vmatpush3.bf16.msra.mxu0 %v1613_v45  ;;  %v1630_v62 = vld [vmem:[%s1867_s9 + $0xb0] sm:$0xff]   ;;  %v1634_v3 = vld [vmem:[%s1867_s9 + $0xb8] sm:$0xff]  }
  0x46   : > { %1503 = vmatpush3.bf16.msra.mxu1 %v1614_v46  ;;  %1440 = vmatprep.subr.bf16.mxu0 %v1615_v47  ;;  %v1649_v10 = vld [vmem:[%s1858_s30 + $0x4c] ss:$16 sps:$4 sm:$0xff]   ;;  %v1651_v11 = vld [vmem:[%s1858_s30 + $0x40] ss:$16 sps:$4 sm:$0xff]   ;;  %v1652_v12 = vld [vmem:[%s1858_s30 + $0x48] ss:$16 sps:$4 sm:$0xff]  }
  0x47   : > { %1504 = vmatprep.subr.bf16.mxu1 %v1616_v48  ;;  %v1653_v13 = vld [vmem:[%s1858_s30 + $0x64] ss:$16 sps:$4 sm:$0xff]   ;;  %v1655_v14 = vld [vmem:[%s1858_s30 + $0x6c] ss:$16 sps:$4 sm:$0xff]   ;;  %v1657_v15 = vld [vmem:[%s1858_s30 + $0x60] ss:$16 sps:$4 sm:$0xff]  }
  0x48   : > { %v1658_v16 = vld [vmem:[%s1858_s30 + $0x68] ss:$16 sps:$4 sm:$0xff]   ;;  %v1659_v17 = vld [vmem:[%s1858_s30 + $0x84] ss:$16 sps:$4 sm:$0xff]   ;;  %v1661_v18 = vld [vmem:[%s1858_s30 + $0x8c] ss:$16 sps:$4 sm:$0xff]  }
  0x49   : > { %1441 = vmatpush3.bf16.msra.mxu0 %v1617_v49  ;;  %v1663_v19 = vld [vmem:[%s1858_s30 + $0x80] ss:$16 sps:$4 sm:$0xff]   ;;  %v1664_v20 = vld [vmem:[%s1858_s30 + $0x88] ss:$16 sps:$4 sm:$0xff]   ;;  %v1665_v21 = vld [vmem:[%s1858_s30 + $0xa4] ss:$16 sps:$4 sm:$0xff]  }
  0x4a   : > { %1505 = vmatpush3.bf16.msra.mxu1 %v1618_v50  ;;  %1442 = vmatprep.subr.bf16.mxu0 %v1619_v51  ;;  %v1667_v22 = vld [vmem:[%s1858_s30 + $0xac] ss:$16 sps:$4 sm:$0xff]   ;;  %v1669_v23 = vld [vmem:[%s1858_s30 + $0xa0] ss:$16 sps:$4 sm:$0xff]   ;;  %v1670_v24 = vld [vmem:[%s1858_s30 + $0xa8] ss:$16 sps:$4 sm:$0xff]  }
  0x4b   : > { %1506 = vmatprep.subr.bf16.mxu1 %v1620_v52  ;;  %v1671_v25 = vld [vmem:[%s1858_s30 + $0xc4] ss:$16 sps:$4 sm:$0xff]   ;;  %v1673_v26 = vld [vmem:[%s1858_s30 + $0xcc] ss:$16 sps:$4 sm:$0xff]   ;;  %v1675_v27 = vld [vmem:[%s1858_s30 + $0xc0] ss:$16 sps:$4 sm:$0xff]  }
  0x4c   : > { %v1676_v28 = vld [vmem:[%s1858_s30 + $0xc8] ss:$16 sps:$4 sm:$0xff]   ;;  %v1677_v29 = vld [vmem:[%s1858_s30 + $0xe4] ss:$16 sps:$4 sm:$0xff]   ;;  %v1679_v30 = vld [vmem:[%s1858_s30 + $0xec] ss:$16 sps:$4 sm:$0xff]  }
  0x4d   : > { %1443 = vmatpush3.bf16.msra.mxu0 %v1621_v53  ;;  %v1681_v31 = vld [vmem:[%s1858_s30 + $0xe0] ss:$16 sps:$4 sm:$0xff]   ;;  %v1682_v32 = vld [vmem:[%s1858_s30 + $0xe8] ss:$16 sps:$4 sm:$0xff]  }
  0x4e   : > { %1507 = vmatpush3.bf16.msra.mxu1 %v1622_v54  ;;  %1444 = vmatprep.subr.bf16.mxu0 %v1623_v55  ;;  %v342_v47 = vld [vmem:[#allocation2 + $0x8] sm:$0xff] }
  0x4f   : > { %1508 = vmatprep.subr.bf16.mxu1 %v1624_v56 }
  0x51   : > { %1445 = vmatpush3.bf16.msra.mxu0 %v1625_v57 }
  0x52   : > { %1509 = vmatpush3.bf16.msra.mxu1 %v1626_v58  ;;  %1446 = vmatprep.subr.bf16.mxu0 %v1627_v59 }
  0x53   : > { %1510 = vmatprep.subr.bf16.mxu1 %v1628_v60  ;;  %v343_v60 = vld [vmem:[#allocation2 + $0x10] sm:$0xff] }
  0x55   : > { %1447 = vmatpush3.bf16.msra.mxu0 %v1629_v61 }
  0x56   : > { %1511 = vmatpush3.bf16.msra.mxu1 %v1630_v62  ;;  %1448 = vmatprep.subr.bf16.mxu0 %v1631_v63 }
  0x57   : > { %1512 = vmatprep.subr.bf16.mxu1 %v1632_v0 }
  0x59   : > { %1449 = vmatpush3.bf16.msra.mxu0 %v1633_v2 }
  0x5a   : > { %1513 = vmatpush3.bf16.msra.mxu1 %v1634_v3 }
  0x5c   : > { %842 = vmatmul.mubr.bf16.vlgmr.msra.gmra.mrb[0].mxu0 %v1635_v1  ;;  %v344_v1 = vld [vmem:[#allocation2 + $0x18] sm:$0xff] }
  0x5d   : > { %939 = vmatmul.mubr.bf16.vlgmr.msra.gmra.mrb[0].mxu1 %v1638_v4  ;;  %849 = vmatprep.mubr.bf16.mxu0 %v1641_v5 }
  0x5e   : > { %946 = vmatprep.mubr.bf16.mxu1 %v1643_v6 }
  0x64   : > { %850 = vmatmul.mubr.bf16.gmra.mrb[4].mxu0 %v1645_v7 }
  0x65   : > { %947 = vmatmul.mubr.bf16.gmra.mrb[4].mxu1 %v1646_v8  ;;  %857 = vmatprep.mubr.bf16.mxu0 %v1647_v9 }
  0x66   : > { %954 = vmatprep.mubr.bf16.mxu1 %v1649_v10 }
  0x6c   : > { %858 = vmatmul.mubr.bf16.gmra.mrb[8].mxu0 %v1651_v11 }
  0x6d   : > { %955 = vmatmul.mubr.bf16.gmra.mrb[8].mxu1 %v1652_v12  ;;  %865 = vmatprep.mubr.bf16.mxu0 %v1653_v13 }
  0x6e   : > { %962 = vmatprep.mubr.bf16.mxu1 %v1655_v14  ;;  %v345_v14 = vld [vmem:[#allocation2 + $0x20] sm:$0xff] }
  0x74   : > { %866 = vmatmul.mubr.bf16.gmra.mrb[12].mxu0 %v1657_v15 }
  0x75   : > { %963 = vmatmul.mubr.bf16.gmra.mrb[12].mxu1 %v1658_v16  ;;  %873 = vmatprep.mubr.bf16.mxu0 %v1659_v17 }
  0x76   : > { %970 = vmatprep.mubr.bf16.mxu1 %v1661_v18 }
  0x7c   : > { %874 = vmatmul.mubr.bf16.gmra.mrb[16].mxu0 %v1663_v19  ;;  %v346_v19 = vld [vmem:[#allocation2 + $0x28] sm:$0xff] }
  0x7d   : > { %971 = vmatmul.mubr.bf16.gmra.mrb[16].mxu1 %v1664_v20  ;;  %881 = vmatprep.mubr.bf16.mxu0 %v1665_v21 }
  0x7e   : > { %978 = vmatprep.mubr.bf16.mxu1 %v1667_v22 }
  0x84   : > { %882 = vmatmul.mubr.bf16.gmra.mrb[20].mxu0 %v1669_v23 }
  0x85   : > { %979 = vmatmul.mubr.bf16.gmra.mrb[20].mxu1 %v1670_v24  ;;  %889 = vmatprep.mubr.bf16.mxu0 %v1671_v25 }
  0x86   : > { %986 = vmatprep.mubr.bf16.mxu1 %v1673_v26 }
  0x8c   : > { %890 = vmatmul.mubr.bf16.gmra.mrb[24].mxu0 %v1675_v27 }
  0x8d   : > { %987 = vmatmul.mubr.bf16.gmra.mrb[24].mxu1 %v1676_v28  ;;  %897 = vmatprep.mubr.bf16.mxu0 %v1677_v29 }
  0x8e   : > { %994 = vmatprep.mubr.bf16.mxu1 %v1679_v30 }
  0x94   : > { %898 = vmatmul.mubr.bf16.gmra.mrb[28].mxu0 %v1681_v31 }
  0x95   : > { %995 = vmatmul.mubr.bf16.gmra.mrb[28].mxu1 %v1682_v32  ;;  %v347_v32 = vld [vmem:[#allocation2 + $0x30] sm:$0xff] }
 0x12f   : > { %v1450_v33 = vpop.f32.mrb[0].mxu0 }
 0x130   : > { %v1514_v34 = vpop.f32.mrb[0].mxu1  ;;  %v1451_v35 = vpop.f32.mrb[1].mxu0 }
 0x131   : > { %v1452_v36 = vadd.f32 %v1451_v35, %v1450_v33  ;;  %v1515_v37 = vpop.f32.mrb[1].mxu1  ;;  %v1453_v38 = vpop.f32.mrb[2].mxu0 }
 0x132   : > { %v1516_v39 = vadd.f32 %v1515_v37, %v1514_v34  ;;  %v1517_v40 = vpop.f32.mrb[2].mxu1  ;;  %v1454_v41 = vpop.f32.mrb[3].mxu0  ;;  %v348_v37 = vld [vmem:[#allocation2 + $0x38] sm:$0xff] }
 0x133   : > { %v1455_v43 = vadd.f32 %v1454_v41, %v1453_v38  ;;  %v1518_v44 = vpop.f32.mrb[3].mxu1 }
 0x134   : > { %v941_v45 = vadd.f32 %v1516_v39, %v1452_v36  ;;  %v1519_v46 = vadd.f32 %v1518_v44, %v1517_v40 }
 0x136   : > { %v1003_v48 = vadd.f32 %v941_v45, %v341_v42  ;;  %v944_v49 = vadd.f32 %v1519_v46, %v1455_v43 }
 0x137   : > { %v1456_v50 = vpop.f32.mrb[4].mxu0 }
 0x138   : > { %1019 = vst [vmem:[#allocation2] sm:$0xff] %v1003_v48  ;;  %v1004_v51 = vadd.f32 %v944_v49, %v342_v47  ;;  %v1520_v52 = vpop.f32.mrb[4].mxu1  ;;  %v1457_v53 = vpop.f32.mrb[5].mxu0 }
 0x139   : > { %v1458_v54 = vadd.f32 %v1457_v53, %v1456_v50  ;;  %v1521_v55 = vpop.f32.mrb[5].mxu1  ;;  %v1459_v56 = vpop.f32.mrb[6].mxu0  ;;  %v349_v50 = vld [vmem:[#allocation2 + $0x40] sm:$0xff] }
 0x13a   : > { %1020 = vst [vmem:[#allocation2 + $0x8] sm:$0xff] %v1004_v51  ;;  %v1522_v57 = vadd.f32 %v1521_v55, %v1520_v52  ;;  %v1523_v58 = vpop.f32.mrb[6].mxu1  ;;  %v1460_v59 = vpop.f32.mrb[7].mxu0  ;;  %v350_v55 = vld [vmem:[#allocation2 + $0x48] sm:$0xff] }
 0x13b   : > { %v1461_v61 = vadd.f32 %v1460_v59, %v1459_v56  ;;  %v1524_v62 = vpop.f32.mrb[7].mxu1 }
 0x13c   : > { %v949_v63 = vadd.f32 %v1522_v57, %v1458_v54  ;;  %v1525_v0 = vadd.f32 %v1524_v62, %v1523_v58 }
 0x13e   : > { %v1005_v2 = vadd.f32 %v949_v63, %v343_v60  ;;  %v952_v3 = vadd.f32 %v1525_v0, %v1461_v61 }
 0x13f   : > { %v1462_v4 = vpop.f32.mrb[8].mxu0 }
 0x140   : > { %1021 = vst [vmem:[#allocation2 + $0x10] sm:$0xff] %v1005_v2  ;;  %v1006_v5 = vadd.f32 %v952_v3, %v344_v1  ;;  %v1526_v6 = vpop.f32.mrb[8].mxu1  ;;  %v1463_v7 = vpop.f32.mrb[9].mxu0 }
 0x141   : > { %v1464_v8 = vadd.f32 %v1463_v7, %v1462_v4  ;;  %v1527_v9 = vpop.f32.mrb[9].mxu1  ;;  %v1465_v10 = vpop.f32.mrb[10].mxu0  ;;  %v351_v4 = vld [vmem:[#allocation2 + $0x50] sm:$0xff] }
 0x142   : > { %1022 = vst [vmem:[#allocation2 + $0x18] sm:$0xff] %v1006_v5  ;;  %v1528_v11 = vadd.f32 %v1527_v9, %v1526_v6  ;;  %v1529_v12 = vpop.f32.mrb[10].mxu1  ;;  %v1466_v13 = vpop.f32.mrb[11].mxu0  ;;  %v352_v9 = vld [vmem:[#allocation2 + $0x58] sm:$0xff] }
 0x143   : > { %v1467_v15 = vadd.f32 %v1466_v13, %v1465_v10  ;;  %v1530_v16 = vpop.f32.mrb[11].mxu1 }
 0x144   : > { %v957_v17 = vadd.f32 %v1528_v11, %v1464_v8  ;;  %v1531_v18 = vadd.f32 %v1530_v16, %v1529_v12 }
 0x146   : > { %v1007_v20 = vadd.f32 %v957_v17, %v345_v14  ;;  %v960_v21 = vadd.f32 %v1531_v18, %v1467_v15 }
 0x147   : > { %v1468_v22 = vpop.f32.mrb[12].mxu0 }
 0x148   : > { %1023 = vst [vmem:[#allocation2 + $0x20] sm:$0xff] %v1007_v20  ;;  %v1008_v23 = vadd.f32 %v960_v21, %v346_v19  ;;  %v1532_v24 = vpop.f32.mrb[12].mxu1  ;;  %v1469_v25 = vpop.f32.mrb[13].mxu0 }
 0x149   : > { %v1470_v26 = vadd.f32 %v1469_v25, %v1468_v22  ;;  %v1533_v27 = vpop.f32.mrb[13].mxu1  ;;  %v1471_v28 = vpop.f32.mrb[14].mxu0  ;;  %v353_v22 = vld [vmem:[#allocation2 + $0x60] sm:$0xff] }
 0x14a   : > { %1024 = vst [vmem:[#allocation2 + $0x28] sm:$0xff] %v1008_v23  ;;  %v1534_v29 = vadd.f32 %v1533_v27, %v1532_v24  ;;  %v1535_v30 = vpop.f32.mrb[14].mxu1  ;;  %v1472_v31 = vpop.f32.mrb[15].mxu0  ;;  %v354_v27 = vld [vmem:[#allocation2 + $0x68] sm:$0xff] }
 0x14b   : > { %v1473_v33 = vadd.f32 %v1472_v31, %v1471_v28  ;;  %v1536_v34 = vpop.f32.mrb[15].mxu1 }
 0x14c   : > { %v965_v35 = vadd.f32 %v1534_v29, %v1470_v26  ;;  %v1537_v36 = vadd.f32 %v1536_v34, %v1535_v30 }
 0x14e   : > { %v1009_v38 = vadd.f32 %v965_v35, %v347_v32  ;;  %v968_v39 = vadd.f32 %v1537_v36, %v1473_v33 }
 0x14f   : > { %v1474_v40 = vpop.f32.mrb[16].mxu0 }
 0x150   : > { %1025 = vst [vmem:[#allocation2 + $0x30] sm:$0xff] %v1009_v38  ;;  %v1010_v41 = vadd.f32 %v968_v39, %v348_v37  ;;  %v1538_v42 = vpop.f32.mrb[16].mxu1  ;;  %v1475_v43 = vpop.f32.mrb[17].mxu0 }
 0x151   : > { %v1476_v44 = vadd.f32 %v1475_v43, %v1474_v40  ;;  %v1539_v45 = vpop.f32.mrb[17].mxu1  ;;  %v1477_v46 = vpop.f32.mrb[18].mxu0  ;;  %v355_v40 = vld [vmem:[#allocation2 + $0x70] sm:$0xff] }
 0x152   : > { %1026 = vst [vmem:[#allocation2 + $0x38] sm:$0xff] %v1010_v41  ;;  %v1540_v47 = vadd.f32 %v1539_v45, %v1538_v42  ;;  %v1541_v48 = vpop.f32.mrb[18].mxu1  ;;  %v1478_v49 = vpop.f32.mrb[19].mxu0  ;;  %v356_v45 = vld [vmem:[#allocation2 + $0x78] sm:$0xff] }
 0x153   : > { %v1479_v51 = vadd.f32 %v1478_v49, %v1477_v46  ;;  %v1542_v52 = vpop.f32.mrb[19].mxu1  ;;  %v1039_v49 = vld [vmem:[#allocation2] sm:$0xff] (!%p1348_p10) }
 0x154   : > { %v973_v53 = vadd.f32 %v1540_v47, %v1476_v44  ;;  %v1543_v54 = vadd.f32 %v1542_v52, %v1541_v48 }
 0x156   : > { %v1011_v56 = vadd.f32 %v973_v53, %v349_v50  ;;  %v976_v57 = vadd.f32 %v1543_v54, %v1479_v51  ;;  %v1040_v50 = vld [vmem:[#allocation2 + $0x8] sm:$0xff] (!%p1348_p10)  ;;  %v1349_v51 = vld [vmem:[%s1976_s2] ss:$0 sm:$0xff] (!%p1348_p10)  ;;  %v1041_v54 = vld [vmem:[#allocation2 + $0x10] sm:$0xff] (!%p1348_p10) }
 0x157   : > { %v1480_v58 = vpop.f32.mrb[20].mxu0  ;;  %v1062_v52 = vadd.f32 (!%p1348_p10), %v1349_v51, %v1039_v49  ;;  %v1063_v53 = vadd.f32 (!%p1348_p10), %v1349_v51, %v1040_v50 }
 0x158   : > { %1027 = vst [vmem:[#allocation2 + $0x40] sm:$0xff] %v1011_v56  ;;  %v1012_v59 = vadd.f32 %v976_v57, %v350_v55  ;;  %v1544_v60 = vpop.f32.mrb[20].mxu1  ;;  %v1481_v61 = vpop.f32.mrb[21].mxu0  ;;  %v1042_v55 = vld [vmem:[#allocation2 + $0x18] sm:$0xff] (!%p1348_p10)  ;;  %v1043_v56 = vld [vmem:[#allocation2 + $0x20] sm:$0xff] (!%p1348_p10)  ;;  %v1064_v57 = vadd.f32 (!%p1348_p10), %v1349_v51, %v1041_v54 }
 0x159   : > { %v1482_v62 = vadd.f32 %v1481_v61, %v1480_v58  ;;  %v1545_v63 = vpop.f32.mrb[21].mxu1  ;;  %v1483_v0 = vpop.f32.mrb[22].mxu0  ;;  %v1065_v58 = vadd.f32 (!%p1348_p10), %v1349_v51, %v1042_v55  ;;  %v1045_v61 = vld [vmem:[#allocation2 + $0x30] sm:$0xff] (!%p1348_p10) }
 0x15a   : > { %1028 = vst [vmem:[#allocation2 + $0x48] sm:$0xff] %v1012_v59  ;;  %v1546_v1 = vadd.f32 %v1545_v63, %v1544_v60  ;;  %v1547_v2 = vpop.f32.mrb[22].mxu1  ;;  %v1484_v3 = vpop.f32.mrb[23].mxu0  ;;  %v1044_v59 = vld [vmem:[#allocation2 + $0x28] sm:$0xff] (!%p1348_p10)  ;;  %v1066_v60 = vadd.f32 (!%p1348_p10), %v1349_v51, %v1043_v56  ;;  %v1390_v63 = vpack.c.bf16 (!%p1348_p10), %v1063_v53, %v1062_v52 }
 0x15b   : > { %v1485_v5 = vadd.f32 %v1484_v3, %v1483_v0  ;;  %v1548_v6 = vpop.f32.mrb[23].mxu1  ;;  %v1067_v0 = vadd.f32 (!%p1348_p10), %v1349_v51, %v1044_v59 }
 0x15c   : > { %v981_v7 = vadd.f32 %v1546_v1, %v1482_v62  ;;  %v1549_v8 = vadd.f32 %v1548_v6, %v1547_v2  ;;  %v1046_v62 = vld [vmem:[#allocation2 + $0x38] sm:$0xff] (!%p1348_p10)  ;;  %v1068_v1 = vadd.f32 (!%p1348_p10), %v1349_v51, %v1045_v61  ;;  %v1395_v6 = vpack.c.bf16 (!%p1348_p10), %v1065_v58, %v1064_v57  ;;  %1391 = vst [vmem:[%s1977_s3] sm:$0xff] (!%p1348_p10), %v1390_v63  }
 0x15d   : > { %v1069_v2 = vadd.f32 (!%p1348_p10), %v1349_v51, %v1046_v62 }
 0x15e   : > { %v1013_v10 = vadd.f32 %v981_v7, %v351_v4  ;;  %v984_v11 = vadd.f32 %v1549_v8, %v1485_v5  ;;  %1427 = vst [vmem:[%s1977_s3 + $0x8] sm:$0xff] (!%p1348_p10), %v1395_v6  }
 0x15f   : > { %v1486_v12 = vpop.f32.mrb[24].mxu0  ;;  %v1047_v3 = vld [vmem:[#allocation2 + $0x40] sm:$0xff] (!%p1348_p10) }
 0x160   : > { %1029 = vst [vmem:[#allocation2 + $0x50] sm:$0xff] %v1013_v10  ;;  %v1014_v13 = vadd.f32 %v984_v11, %v352_v9  ;;  %v1550_v14 = vpop.f32.mrb[24].mxu1  ;;  %v1487_v15 = vpop.f32.mrb[25].mxu0  ;;  %v1070_v7 = vadd.f32 (!%p1348_p10), %v1349_v51, %v1047_v3 }
 0x161   : > { %v1488_v16 = vadd.f32 %v1487_v15, %v1486_v12  ;;  %v1551_v17 = vpop.f32.mrb[25].mxu1  ;;  %v1489_v18 = vpop.f32.mrb[26].mxu0  ;;  %v1048_v4 = vld [vmem:[#allocation2 + $0x48] sm:$0xff] (!%p1348_p10) }
 0x162   : > { %1030 = vst [vmem:[#allocation2 + $0x58] sm:$0xff] %v1014_v13  ;;  %v1552_v19 = vadd.f32 %v1551_v17, %v1550_v14  ;;  %v1553_v20 = vpop.f32.mrb[26].mxu1  ;;  %v1490_v21 = vpop.f32.mrb[27].mxu0  ;;  %v1071_v8 = vadd.f32 (!%p1348_p10), %v1349_v51, %v1048_v4  ;;  %v1400_v13 = vpack.c.bf16 (!%p1348_p10), %v1067_v0, %v1066_v60  ;;  %v1405_v14 = vpack.c.bf16 (!%p1348_p10), %v1069_v2, %v1068_v1 }
 0x163   : > { %v1491_v23 = vadd.f32 %v1490_v21, %v1489_v18  ;;  %v1554_v24 = vpop.f32.mrb[27].mxu1 }
 0x164   : > { %v989_v25 = vadd.f32 %v1552_v19, %v1488_v16  ;;  %v1555_v26 = vadd.f32 %v1554_v24, %v1553_v20  ;;  %v1410_v19 = vpack.c.bf16 (!%p1348_p10), %v1071_v8, %v1070_v7  ;;  %1428 = vst [vmem:[%s1977_s3 + $0x10] sm:$0xff] (!%p1348_p10), %v1400_v13   ;;  %1429 = vst [vmem:[%s1977_s3 + $0x18] sm:$0xff] (!%p1348_p10), %v1405_v14  }
 0x166   : > { %v1015_v28 = vadd.f32 %v989_v25, %v353_v22  ;;  %v992_v29 = vadd.f32 %v1555_v26, %v1491_v23  ;;  %1430 = vst [vmem:[%s1977_s3 + $0x20] sm:$0xff] (!%p1348_p10), %v1410_v19  }
 0x167   : > { %v1492_v30 = vpop.f32.mrb[28].mxu0  ;;  %v1049_v5 = vld [vmem:[#allocation2 + $0x50] sm:$0xff] (!%p1348_p10) }
 0x168   : > { %1031 = vst [vmem:[#allocation2 + $0x60] sm:$0xff] %v1015_v28  ;;  %v1016_v31 = vadd.f32 %v992_v29, %v354_v27  ;;  %v1556_v32 = vpop.f32.mrb[28].mxu1  ;;  %v1493_v33 = vpop.f32.mrb[29].mxu0  ;;  %v1072_v10 = vadd.f32 (!%p1348_p10), %v1349_v51, %v1049_v5 }
 0x169   : > { %v1494_v34 = vadd.f32 %v1493_v33, %v1492_v30  ;;  %v1557_v35 = vpop.f32.mrb[29].mxu1  ;;  %v1495_v36 = vpop.f32.mrb[30].mxu0  ;;  %v1050_v9 = vld [vmem:[#allocation2 + $0x58] sm:$0xff] (!%p1348_p10) }
 0x16a   : > { %1032 = vst [vmem:[#allocation2 + $0x68] sm:$0xff] %v1016_v31  ;;  %v1558_v37 = vadd.f32 %v1557_v35, %v1556_v32  ;;  %v1559_v38 = vpop.f32.mrb[30].mxu1  ;;  %v1496_v39 = vpop.f32.mrb[31].mxu0  ;;  %v1073_v15 = vadd.f32 (!%p1348_p10), %v1349_v51, %v1050_v9 }
 0x16b   : > { %v1497_v41 = vadd.f32 %v1496_v39, %v1495_v36  ;;  %v1560_v42 = vpop.f32.mrb[31].mxu1 }
 0x16c   : > { %v997_v43 = vadd.f32 %v1558_v37, %v1494_v34  ;;  %v1561_v44 = vadd.f32 %v1560_v42, %v1559_v38  ;;  %1038 = sbr.rel (%p1348_p10) target bundleno = 383 (0x17f), region = 63  ;;  %v1415_v23 = vpack.c.bf16 (!%p1348_p10), %v1073_v15, %v1072_v10 }
 0x16e   : > { %v1017_v46 = vadd.f32 %v997_v43, %v355_v40  ;;  %v1000_v47 = vadd.f32 %v1561_v44, %v1497_v41  ;;  %1431 = vst [vmem:[%s1977_s3 + $0x28] sm:$0xff] (!%p1348_p10), %v1415_v23  }
 0x16f   : > { %v1051_v11 = vld [vmem:[#allocation2 + $0x60] sm:$0xff] (!%p1348_p10) }
 0x170   : > { %1033 = vst [vmem:[#allocation2 + $0x70] sm:$0xff] %v1017_v46  ;;  %v1018_v48 = vadd.f32 %v1000_v47, %v356_v45  ;;  %v1074_v16 = vadd.f32 (!%p1348_p10), %v1349_v51, %v1051_v11 }
 0x171   : > { %v1052_v12 = vld [vmem:[#allocation2 + $0x68] sm:$0xff] (!%p1348_p10) }
 0x172   : > { %1034 = vst [vmem:[#allocation2 + $0x78] sm:$0xff] %v1018_v48  ;;  %v1075_v20 = vadd.f32 (!%p1348_p10), %v1349_v51, %v1052_v12 }
 0x174   : > { %v1420_v24 = vpack.c.bf16 %v1075_v20, %v1074_v16 }
 0x176   : > { %1432 = vst [vmem:[%s1977_s3 + $0x30] sm:$0xff] %v1420_v24  }
 0x177   : > { %v1053_v17 = vld [vmem:[#allocation2 + $0x70] sm:$0xff] }
 0x178   : > { %v1076_v21 = vadd.f32 %v1349_v51, %v1053_v17 }
 0x179   : > { %v1054_v18 = vld [vmem:[#allocation2 + $0x78] sm:$0xff] }
 0x17a   : > { %v1077_v22 = vadd.f32 %v1349_v51, %v1054_v18 }
 0x17c   : > { %v1425_v25 = vpack.c.bf16 %v1077_v22, %v1076_v21 }
 0x17e   : > { %1433 = vst [vmem:[%s1977_s3 + $0x38] sm:$0xff] %v1425_v25  }
 0x17f PF: > { %s13_s16 = sadd.s32 1, %s1721_s16   ;;  %s1978_s12 = smov %s1709_s13 }
 0x180   : > { %p10_p11 = scmp.ge.s32.totalorder %s13_s16, 7   ;;  %s1979_s13 = smov %s1779_s20 }
 0x181   : > { %s1980_s14 = smov %s1717_s15  ;;  %s1981_s15 = smov %s1983_s17 }
 0x182   :  { %12 = sbr.rel (!%p10_p11) target bundleno = 3 (0x3), region = 105 }

// kernel: generator_forward.100
= control target key start
LH: loop header
LB: loop body
LE: loop exit
PB: predicated region body
PF: predicated region fallthrough
CT: control target
= control target key end

     0   :  { %s2460_s12 = smov 0   ;;  %s2462_s13 = smov 0   ;;  %s2847_s0 = inlined_call_operand.vmem [shape: bf16[512,1152], index: 0, kind: input, shape index: {}]   ;;  %s2848_s1 = inlined_call_operand.vmem [shape: bf16[1152,128], index: 1, kind: input, shape index: {}]   ;;  %s2849_s2 = inlined_call_operand.vmem [shape: f32[1,128], index: 2, kind: input, shape index: {}]   ;;  %s2850_s3 = inlined_call_operand.vmem [shape: bf16[512,128], index: 3, kind: output, shape index: {}]  }
   0x1   :  { %s2464_s14 = smov 0   ;;  %s2466_s15 = smov 0  }
   0x2   :  { %s2468_s16 = smov 0   ;;  %s2470_s17 = smov 0  }
   0x3   :  { %s2472_s18 = smov 0  }
   0x4 LB: > { %s25_s19 = sadd.s32 1, %s2429_s16  ;;  %s32_s20 = sadd.s32 1, %s2433_s17  ;;  %s2437_s18 = sphi %s2472_s18, %s13_s18   ;;  %s2433_s17 = sphi %s2470_s17, %s2856_s17   ;;  %s2429_s16 = sphi %s2468_s16, %s2855_s16   ;;  %s2425_s15 = sphi %s2466_s15, %s2854_s15   ;;  %s2421_s14 = sphi %s2464_s14, %s2853_s14   ;;  %s2417_s13 = sphi %s2462_s13, %s2852_s13   ;;  %s2413_s12 = sphi %s2460_s12, %s2851_s12  }
   0x5   : > { %p26_p0 = scmp.ge.s32.totalorder %s25_s19, 3  ;;  %p48_p1 = scmp.ne.s32.totalorder %s2417_s13, %s2413_s12 }
   0x6   : > { %p49_p2 = scmp.eq.s32.totalorder %s2437_s18, 0  ;;  %s41_s24 = sadd.s32 1, %s2417_s13 }
   0x7   : > { %s2858_s19 = smov (%p26_p0, %s25_s19), 0  ;;  %s2860_s20 = smov (!%p26_p0, %s32_s20), %s2433_s17 }
   0x8   : > { %p50_p3 = por %p49_p2, %p48_p1  ;;  %p34_p4 = scmp.ge.s32.totalorder %s2860_s20, 2 }
   0x9   : > { %s37_s21 = ssub.s32 %s2429_s16, %s2858_s19  ;;  %p1727_p6 = scmp.ge.s32.totalorder %s2437_s18, 6 }
   0xa   : > { %s2862_s20 = smov (%p34_p4, %s2860_s20), 0 }
   0xb   : > { %s36_s22 = ssub.s32 %s2433_s17, %s2862_s20  ;;  %167 = sbr.rel (%p1727_p6) target bundleno = 64 (0x40), region = 24 }
   0xc   : > { %s38_s23 = sor.u32 %s37_s21, %s36_s22 }
   0xd   : > { %p39_p5 = scmp.eq.s32.totalorder %s38_s23, 0 }
   0xf   : > { %s2511_s25 = scalar_select %p39_p5, %s2417_s13, %s41_s24  }
  0x12   : > { %170 = sbr.rel (!%p50_p3) target bundleno = 64 (0x40), region = 28  ;;  %s172_s26 = sand.u32 (%p50_p3), 1, %s2417_s13  }
  0x13   : > { %s176_s27 = smul.u32 (%p50_p3), 3, %s2429_s16 }
  0x14   : > { %s2235_s28 = smul.u32 (%p50_p3), 384, %s172_s26 }
  0x15   : > { %s2236_s29 = smul.u32 (%p50_p3), 288, %s2433_s17 }
  0x16   : > { %s2525_s8 = scalar_lea.vmem (%p50_p3), [#allocation3], %s2235_s28 }
  0x17   : > { %s178_s30 = sadd.s32 (%p50_p3), %s2236_s29, %s176_s27 }
  0x18   : > { %s1730_s4 = sshll.u32 (%p50_p3), %s178_s30, 2 }
  0x19   : > { %s2520_s7 = scalar_lea.vmem %s2847_s0, %s1730_s4 }
  0x1a   : > { %v195_v0 = vld [vmem:[%s2520_s7] sm:$0xff]  ;;  %v199_v2 = vld [vmem:[%s2520_s7 + $0x48] sm:$0xff]  ;;  %v203_v4 = vld [vmem:[%s2520_s7 + $0x90] sm:$0xff] }
  0x1b   : > { %v197_v1 = vld [vmem:[%s2520_s7 + $0x24] sm:$0xff]  ;;  %196 = vst [vmem:[%s2525_s8] sm:$0xff] %v195_v0  ;;  %200 = vst [vmem:[%s2525_s8 + $0x18] sm:$0xff] %v199_v2  ;;  %v201_v3 = vld [vmem:[%s2520_s7 + $0x6c] sm:$0xff] }
  0x1c   : > { %198 = vst [vmem:[%s2525_s8 + $0xc] sm:$0xff] %v197_v1  ;;  %v205_v5 = vld [vmem:[%s2520_s7 + $0xb4] sm:$0xff]  ;;  %202 = vst [vmem:[%s2525_s8 + $0x24] sm:$0xff] %v201_v3  ;;  %v209_v7 = vld [vmem:[%s2520_s7 + $0xfc] sm:$0xff] }
  0x1d   : > { %204 = vst [vmem:[%s2525_s8 + $0x30] sm:$0xff] %v203_v4  ;;  %206 = vst [vmem:[%s2525_s8 + $0x3c] sm:$0xff] %v205_v5  ;;  %v207_v6 = vld [vmem:[%s2520_s7 + $0xd8] sm:$0xff]  ;;  %v211_v8 = vld [vmem:[%s2520_s7 + $0x120] sm:$0xff] }
  0x1e   : > { %208 = vst [vmem:[%s2525_s8 + $0x48] sm:$0xff] %v207_v6  ;;  %210 = vst [vmem:[%s2525_s8 + $0x54] sm:$0xff] %v209_v7  ;;  %v213_v9 = vld [vmem:[%s2520_s7 + $0x144] sm:$0xff]  ;;  %v217_v11 = vld [vmem:[%s2520_s7 + $0x18c] sm:$0xff] }
  0x1f   : > { %212 = vst [vmem:[%s2525_s8 + $0x60] sm:$0xff] %v211_v8  ;;  %v215_v10 = vld [vmem:[%s2520_s7 + $0x168] sm:$0xff]  ;;  %214 = vst [vmem:[%s2525_s8 + $0x6c] sm:$0xff] %v213_v9  ;;  %v219_v12 = vld [vmem:[%s2520_s7 + $0x1b0] sm:$0xff] }
  0x20   : > { %216 = vst [vmem:[%s2525_s8 + $0x78] sm:$0xff] %v215_v10  ;;  %218 = vst [vmem:[%s2525_s8 + $0x84] sm:$0xff] %v217_v11  ;;  %v221_v13 = vld [vmem:[%s2520_s7 + $0x1d4] sm:$0xff]  ;;  %v225_v15 = vld [vmem:[%s2520_s7 + $0x21c] sm:$0xff] }
  0x21   : > { %v223_v14 = vld [vmem:[%s2520_s7 + $0x1f8] sm:$0xff]  ;;  %220 = vst [vmem:[%s2525_s8 + $0x90] sm:$0xff] %v219_v12  ;;  %222 = vst [vmem:[%s2525_s8 + $0x9c] sm:$0xff] %v221_v13  ;;  %v227_v16 = vld [vmem:[%s2520_s7 + $0x240] sm:$0xff] }
  0x22   : > { %224 = vst [vmem:[%s2525_s8 + $0xa8] sm:$0xff] %v223_v14  ;;  %v229_v17 = vld [vmem:[%s2520_s7 + $0x264] sm:$0xff]  ;;  %226 = vst [vmem:[%s2525_s8 + $0xb4] sm:$0xff] %v225_v15  ;;  %v233_v19 = vld [vmem:[%s2520_s7 + $0x2ac] sm:$0xff] }
  0x23   : > { %228 = vst [vmem:[%s2525_s8 + $0xc0] sm:$0xff] %v227_v16  ;;  %230 = vst [vmem:[%s2525_s8 + $0xcc] sm:$0xff] %v229_v17  ;;  %v231_v18 = vld [vmem:[%s2520_s7 + $0x288] sm:$0xff]  ;;  %v235_v20 = vld [vmem:[%s2520_s7 + $0x2d0] sm:$0xff] }
  0x24   : > { %232 = vst [vmem:[%s2525_s8 + $0xd8] sm:$0xff] %v231_v18  ;;  %234 = vst [vmem:[%s2525_s8 + $0xe4] sm:$0xff] %v233_v19  ;;  %v237_v21 = vld [vmem:[%s2520_s7 + $0x2f4] sm:$0xff]  ;;  %v241_v23 = vld [vmem:[%s2520_s7 + $0x33c] sm:$0xff] }
  0x25   : > { %236 = vst [vmem:[%s2525_s8 + $0xf0] sm:$0xff] %v235_v20  ;;  %v239_v22 = vld [vmem:[%s2520_s7 + $0x318] sm:$0xff]  ;;  %238 = vst [vmem:[%s2525_s8 + $0xfc] sm:$0xff] %v237_v21  ;;  %v243_v24 = vld [vmem:[%s2520_s7 + $0x360] sm:$0xff] }
  0x26   : > { %240 = vst [vmem:[%s2525_s8 + $0x108] sm:$0xff] %v239_v22  ;;  %242 = vst [vmem:[%s2525_s8 + $0x114] sm:$0xff] %v241_v23  ;;  %v245_v25 = vld [vmem:[%s2520_s7 + $0x384] sm:$0xff]  ;;  %v249_v27 = vld [vmem:[%s2520_s7 + $0x3cc] sm:$0xff] }
  0x27   : > { %v247_v26 = vld [vmem:[%s2520_s7 + $0x3a8] sm:$0xff]  ;;  %244 = vst [vmem:[%s2525_s8 + $0x120] sm:$0xff] %v243_v24  ;;  %246 = vst [vmem:[%s2525_s8 + $0x12c] sm:$0xff] %v245_v25  ;;  %v251_v28 = vld [vmem:[%s2520_s7 + $0x3f0] sm:$0xff] }
  0x28   : > { %248 = vst [vmem:[%s2525_s8 + $0x138] sm:$0xff] %v247_v26  ;;  %v253_v29 = vld [vmem:[%s2520_s7 + $0x414] sm:$0xff]  ;;  %250 = vst [vmem:[%s2525_s8 + $0x144] sm:$0xff] %v249_v27  ;;  %v257_v31 = vld [vmem:[%s2520_s7 + $0x45c] sm:$0xff] }
  0x29   : > { %252 = vst [vmem:[%s2525_s8 + $0x150] sm:$0xff] %v251_v28  ;;  %254 = vst [vmem:[%s2525_s8 + $0x15c] sm:$0xff] %v253_v29  ;;  %v255_v30 = vld [vmem:[%s2520_s7 + $0x438] sm:$0xff]  ;;  %v1731_v32 = vld [vmem:[%s2520_s7 + $0x8] sm:$0xf] }
  0x2a   : > { %256 = vst [vmem:[%s2525_s8 + $0x168] sm:$0xff] %v255_v30  ;;  %258 = vst [vmem:[%s2525_s8 + $0x174] sm:$0xff] %v257_v31  ;;  %v1733_v33 = vld [vmem:[%s2520_s7 + $0x2c] sm:$0xf]  ;;  %v1735_v34 = vld [vmem:[%s2520_s7 + $0x50] sm:$0xf] }
  0x2b   : > { %1732 = vst [vmem:[%s2525_s8 + $0x8] sm:$0xf] %v1731_v32  ;;  %v1737_v35 = vld [vmem:[%s2520_s7 + $0x74] sm:$0xf]  ;;  %1734 = vst [vmem:[%s2525_s8 + $0x14] sm:$0xf] %v1733_v33 }
  0x2c   : > { %1736 = vst [vmem:[%s2525_s8 + $0x20] sm:$0xf] %v1735_v34  ;;  %1738 = vst [vmem:[%s2525_s8 + $0x2c] sm:$0xf] %v1737_v35  ;;  %v1739_v36 = vld [vmem:[%s2520_s7 + $0x98] sm:$0xf] }
  0x2d   : > { %v1741_v37 = vld [vmem:[%s2520_s7 + $0xbc] sm:$0xf]  ;;  %v1743_v38 = vld [vmem:[%s2520_s7 + $0xe0] sm:$0xf]  ;;  %1740 = vst [vmem:[%s2525_s8 + $0x38] sm:$0xf] %v1739_v36 }
  0x2e   : > { %1742 = vst [vmem:[%s2525_s8 + $0x44] sm:$0xf] %v1741_v37  ;;  %1744 = vst [vmem:[%s2525_s8 + $0x50] sm:$0xf] %v1743_v38  ;;  %v1745_v39 = vld [vmem:[%s2520_s7 + $0x104] sm:$0xf] }
  0x2f   : > { %v1747_v40 = vld [vmem:[%s2520_s7 + $0x128] sm:$0xf]  ;;  %v1749_v41 = vld [vmem:[%s2520_s7 + $0x14c] sm:$0xf]  ;;  %1746 = vst [vmem:[%s2525_s8 + $0x5c] sm:$0xf] %v1745_v39 }
  0x30   : > { %1748 = vst [vmem:[%s2525_s8 + $0x68] sm:$0xf] %v1747_v40  ;;  %1750 = vst [vmem:[%s2525_s8 + $0x74] sm:$0xf] %v1749_v41  ;;  %v1751_v42 = vld [vmem:[%s2520_s7 + $0x170] sm:$0xf] }
  0x31   : > { %v1753_v43 = vld [vmem:[%s2520_s7 + $0x194] sm:$0xf]  ;;  %v1755_v44 = vld [vmem:[%s2520_s7 + $0x1b8] sm:$0xf]  ;;  %1752 = vst [vmem:[%s2525_s8 + $0x80] sm:$0xf] %v1751_v42 }
  0x32   : > { %1754 = vst [vmem:[%s2525_s8 + $0x8c] sm:$0xf] %v1753_v43  ;;  %1756 = vst [vmem:[%s2525_s8 + $0x98] sm:$0xf] %v1755_v44  ;;  %v1757_v45 = vld [vmem:[%s2520_s7 + $0x1dc] sm:$0xf] }
  0x33   : > { %v1759_v46 = vld [vmem:[%s2520_s7 + $0x200] sm:$0xf]  ;;  %v1761_v47 = vld [vmem:[%s2520_s7 + $0x224] sm:$0xf]  ;;  %1758 = vst [vmem:[%s2525_s8 + $0xa4] sm:$0xf] %v1757_v45 }
  0x34   : > { %1760 = vst [vmem:[%s2525_s8 + $0xb0] sm:$0xf] %v1759_v46  ;;  %1762 = vst [vmem:[%s2525_s8 + $0xbc] sm:$0xf] %v1761_v47  ;;  %v1763_v48 = vld [vmem:[%s2520_s7 + $0x248] sm:$0xf] }
  0x35   : > { %v1765_v49 = vld [vmem:[%s2520_s7 + $0x26c] sm:$0xf]  ;;  %v1767_v50 = vld [vmem:[%s2520_s7 + $0x290] sm:$0xf]  ;;  %1764 = vst [vmem:[%s2525_s8 + $0xc8] sm:$0xf] %v1763_v48 }
  0x36   : > { %1766 = vst [vmem:[%s2525_s8 + $0xd4] sm:$0xf] %v1765_v49  ;;  %1768 = vst [vmem:[%s2525_s8 + $0xe0] sm:$0xf] %v1767_v50  ;;  %v1769_v51 = vld [vmem:[%s2520_s7 + $0x2b4] sm:$0xf] }
  0x37   : > { %v1771_v52 = vld [vmem:[%s2520_s7 + $0x2d8] sm:$0xf]  ;;  %v1773_v53 = vld [vmem:[%s2520_s7 + $0x2fc] sm:$0xf]  ;;  %1770 = vst [vmem:[%s2525_s8 + $0xec] sm:$0xf] %v1769_v51 }
  0x38   : > { %1772 = vst [vmem:[%s2525_s8 + $0xf8] sm:$0xf] %v1771_v52  ;;  %1774 = vst [vmem:[%s2525_s8 + $0x104] sm:$0xf] %v1773_v53  ;;  %v1775_v54 = vld [vmem:[%s2520_s7 + $0x320] sm:$0xf] }
  0x39   : > { %v1777_v55 = vld [vmem:[%s2520_s7 + $0x344] sm:$0xf]  ;;  %v1779_v56 = vld [vmem:[%s2520_s7 + $0x368] sm:$0xf]  ;;  %1776 = vst [vmem:[%s2525_s8 + $0x110] sm:$0xf] %v1775_v54 }
  0x3a   : > { %1778 = vst [vmem:[%s2525_s8 + $0x11c] sm:$0xf] %v1777_v55  ;;  %1780 = vst [vmem:[%s2525_s8 + $0x128] sm:$0xf] %v1779_v56  ;;  %v1781_v57 = vld [vmem:[%s2520_s7 + $0x38c] sm:$0xf] }
  0x3b   : > { %v1783_v58 = vld [vmem:[%s2520_s7 + $0x3b0] sm:$0xf]  ;;  %v1785_v59 = vld [vmem:[%s2520_s7 + $0x3d4] sm:$0xf]  ;;  %1782 = vst [vmem:[%s2525_s8 + $0x134] sm:$0xf] %v1781_v57 }
  0x3c   : > { %1784 = vst [vmem:[%s2525_s8 + $0x140] sm:$0xf] %v1783_v58  ;;  %1786 = vst [vmem:[%s2525_s8 + $0x14c] sm:$0xf] %v1785_v59  ;;  %v1787_v60 = vld [vmem:[%s2520_s7 + $0x3f8] sm:$0xf] }
  0x3d   : > { %v1789_v61 = vld [vmem:[%s2520_s7 + $0x41c] sm:$0xf]  ;;  %v1791_v62 = vld [vmem:[%s2520_s7 + $0x440] sm:$0xf]  ;;  %1788 = vst [vmem:[%s2525_s8 + $0x158] sm:$0xf] %v1787_v60 }
  0x3e   : > { %1790 = vst [vmem:[%s2525_s8 + $0x164] sm:$0xf] %v1789_v61  ;;  %1792 = vst [vmem:[%s2525_s8 + $0x170] sm:$0xf] %v1791_v62  ;;  %v1793_v63 = vld [vmem:[%s2520_s7 + $0x464] sm:$0xf] }
  0x3f   : > { %1794 = vst [vmem:[%s2525_s8 + $0x17c] sm:$0xf] %v1793_v63 }
  0x40 PF: > { %p1795_p7 = scmp.ge.s32.totalorder %s2437_s18, 1  ;;  %p334_p8 = scmp.lt.s32.totalorder %s2437_s18, 7 }
  0x42   : > { %p335_p9 = pnand %p1795_p7, %p334_p8 }
  0x43   : > { %s341_s9 = sand.u32 (!%p335_p9), 1, %s2413_s12   ;;  %s1796_s10 = sshll.u32 (!%p335_p9), %s2425_s15, 5 }
  0x44   : > { %338 = sbr.rel (%p335_p9) target bundleno = 453 (0x1c5), region = 54  ;;  %p384_p10 = scmp.lt.s32.totalorder (!%p335_p9), %s1796_s10, 63 }
  0x45   : > { %s2237_s11 = smul.u32 (!%p335_p9), 384, %s341_s9  ;;  %p1798_p11 = scmp.ne.s32.totalorder (!%p335_p9), %s2421_s14, 0 }
  0x47   : > { %s2661_s26 = scalar_lea.vmem (!%p335_p9), [#allocation3], %s2237_s11 }
  0x4b   : > { %s2864_s10 = smov (!%p384_p10, %s1796_s10), 63  ;;  %396 = sbr.rel (%p1798_p11) target bundleno = 93 (0x5d), region = 62 }
  0x4c   : > { %s1797_s21 = sshll.u32 %s2864_s10, 2  ;;  %v2439_v0 = vmov (!%p1798_p11), 0.0  }
  0x4d   : > { %s2659_s24 = scalar_lea.vmem %s2850_s3, %s1797_s21  ;;  %397 = vst [vmem:[#allocation2] sm:$0xff] (!%p1798_p11), %v2439_v0  ;;  %398 = vst [vmem:[#allocation2 + $0x8] sm:$0xff] (!%p1798_p11), %v2439_v0 }
  0x4e   : > { %399 = vst [vmem:[#allocation2 + $0x10] sm:$0xff] (!%p1798_p11), %v2439_v0  ;;  %400 = vst [vmem:[#allocation2 + $0x18] sm:$0xff] (!%p1798_p11), %v2439_v0 }
  0x4f   : > { %401 = vst [vmem:[#allocation2 + $0x20] sm:$0xff] (!%p1798_p11), %v2439_v0  ;;  %402 = vst [vmem:[#allocation2 + $0x28] sm:$0xff] (!%p1798_p11), %v2439_v0 }
  0x50   : > { %403 = vst [vmem:[#allocation2 + $0x30] sm:$0xff] (!%p1798_p11), %v2439_v0  ;;  %404 = vst [vmem:[#allocation2 + $0x38] sm:$0xff] (!%p1798_p11), %v2439_v0 }
  0x51   : > { %405 = vst [vmem:[#allocation2 + $0x40] sm:$0xff] (!%p1798_p11), %v2439_v0  ;;  %406 = vst [vmem:[#allocation2 + $0x48] sm:$0xff] (!%p1798_p11), %v2439_v0 }
  0x52   : > { %407 = vst [vmem:[#allocation2 + $0x50] sm:$0xff] %v2439_v0  ;;  %408 = vst [vmem:[#allocation2 + $0x58] sm:$0xff] %v2439_v0 }
  0x53   : > { %409 = vst [vmem:[#allocation2 + $0x60] sm:$0xff] %v2439_v0  ;;  %410 = vst [vmem:[#allocation2 + $0x68] sm:$0xff] %v2439_v0 }
  0x54   : > { %411 = vst [vmem:[#allocation2 + $0x70] sm:$0xff] %v2439_v0  ;;  %412 = vst [vmem:[#allocation2 + $0x78] sm:$0xff] %v2439_v0 }
  0x55   : > { %413 = vst [vmem:[#allocation2 + $0x80] sm:$0xff] %v2439_v0  ;;  %414 = vst [vmem:[#allocation2 + $0x88] sm:$0xff] %v2439_v0 }
  0x56   : > { %415 = vst [vmem:[#allocation2 + $0x90] sm:$0xff] %v2439_v0  ;;  %416 = vst [vmem:[#allocation2 + $0x98] sm:$0xff] %v2439_v0 }
  0x57   : > { %417 = vst [vmem:[#allocation2 + $0xa0] sm:$0xff] %v2439_v0  ;;  %418 = vst [vmem:[#allocation2 + $0xa8] sm:$0xff] %v2439_v0 }
  0x58   : > { %419 = vst [vmem:[#allocation2 + $0xb0] sm:$0xff] %v2439_v0  ;;  %420 = vst [vmem:[#allocation2 + $0xb8] sm:$0xff] %v2439_v0 }
  0x59   : > { %421 = vst [vmem:[#allocation2 + $0xc0] sm:$0xff] %v2439_v0  ;;  %422 = vst [vmem:[#allocation2 + $0xc8] sm:$0xff] %v2439_v0 }
  0x5a   : > { %423 = vst [vmem:[#allocation2 + $0xd0] sm:$0xff] %v2439_v0  ;;  %424 = vst [vmem:[#allocation2 + $0xd8] sm:$0xff] %v2439_v0 }
  0x5b   : > { %425 = vst [vmem:[#allocation2 + $0xe0] sm:$0xff] %v2439_v0  ;;  %426 = vst [vmem:[#allocation2 + $0xe8] sm:$0xff] %v2439_v0 }
  0x5c   : > { %427 = vst [vmem:[#allocation2 + $0xf0] sm:$0xff] %v2439_v0  ;;  %428 = vst [vmem:[#allocation2 + $0xf8] sm:$0xff] %v2439_v0 }
  0x5d PF: > { %s429_s12 = smul.u32 384, %s2421_s14  ;;  %v2313_v1 = vld [vmem:[%s2661_s26 + $0x4] ss:$12 sps:$4 sm:$0xff]   ;;  %v2311_v20 = vld [vmem:[%s2661_s26] ss:$12 sps:$4 sm:$0xff]   ;;  %p1872_p12 = scmp.ne.s32.totalorder %s2421_s14, 2 }
  0x5e   : > { %v2316_v2 = vld [vmem:[%s2661_s26 + $0x124] ss:$12 sps:$4 sm:$0xff]   ;;  %1010 = vmatprep.mubr.bf16.mxu0 %v2313_v1  ;;  %v2314_v21 = vld [vmem:[%s2661_s26 + $0x120] ss:$12 sps:$4 sm:$0xff]   ;;  %v2319_v22 = vld [vmem:[%s2661_s26 + $0x1c] ss:$12 sps:$4 sm:$0xff]  }
  0x5f   : > { %s526_s15 = sshra.s32 %s429_s12, 3  ;;  %1106 = vmatprep.mubr.bf16.mxu1 %v2316_v2  ;;  %v2321_v23 = vld [vmem:[%s2661_s26 + $0x13c] ss:$12 sps:$4 sm:$0xff]   ;;  %v2323_v26 = vld [vmem:[%s2661_s26 + $0x18] ss:$12 sps:$4 sm:$0xff]  }
  0x60   : > { %s1799_s27 = sshll.u32 %s526_s15, 2  ;;  %v2324_v27 = vld [vmem:[%s2661_s26 + $0x138] ss:$12 sps:$4 sm:$0xff]   ;;  %v2327_v29 = vld [vmem:[%s2661_s26 + $0x34] ss:$12 sps:$4 sm:$0xff]  }
  0x61   : > { %s2670_s30 = scalar_lea.vmem %s2848_s1, %s1799_s27  ;;  %v2329_v30 = vld [vmem:[%s2661_s26 + $0x154] ss:$12 sps:$4 sm:$0xff]   ;;  %v2331_v32 = vld [vmem:[%s2661_s26 + $0x30] ss:$12 sps:$4 sm:$0xff]   ;;  %v2335_v34 = vld [vmem:[%s2661_s26 + $0x4c] ss:$12 sps:$4 sm:$0xff]  }
  0x62   : > { %v2295_v3 = vld [vmem:[%s2670_s30 + $0x40] sm:$0xff]   ;;  %v2297_v5 = vld [vmem:[%s2670_s30 + $0x48] sm:$0xff]   ;;  %v2299_v7 = vld [vmem:[%s2670_s30 + $0x50] sm:$0xff]  }
  0x63   : > { %v2296_v4 = vld [vmem:[%s2670_s30] sm:$0xff]   ;;  %2035 = vmatprep.subr.bf16.mxu0 %v2295_v3  ;;  %2219 = vmatprep.subr.bf16.mxu1 %v2295_v3  ;;  %v2298_v6 = vld [vmem:[%s2670_s30 + $0x8] sm:$0xff]   ;;  %v2300_v8 = vld [vmem:[%s2670_s30 + $0x10] sm:$0xff]  }
  0x64   : > { %2036 = vmatpush3.bf16.msra.mxu0 %v2296_v4  ;;  %2227 = vmatpush3.bf16.msra.mxu1 %v2296_v4  ;;  %v2301_v9 = vld [vmem:[%s2670_s30 + $0x58] sm:$0xff]   ;;  %v2303_v11 = vld [vmem:[%s2670_s30 + $0x60] sm:$0xff]   ;;  %v2305_v13 = vld [vmem:[%s2670_s30 + $0x68] sm:$0xff]  }
  0x65   : > { %2037 = vmatprep.subr.bf16.mxu0 %v2297_v5  ;;  %2220 = vmatprep.subr.bf16.mxu1 %v2297_v5  ;;  %v2302_v10 = vld [vmem:[%s2670_s30 + $0x18] sm:$0xff]   ;;  %v2304_v12 = vld [vmem:[%s2670_s30 + $0x20] sm:$0xff]   ;;  %v2306_v14 = vld [vmem:[%s2670_s30 + $0x28] sm:$0xff]  }
  0x66   : > { %v2307_v15 = vld [vmem:[%s2670_s30 + $0x70] sm:$0xff]   ;;  %v2309_v17 = vld [vmem:[%s2670_s30 + $0x78] sm:$0xff]   ;;  %v2317_v19 = vld [vmem:[%s2670_s30 + $0x80] sm:$0xff]  }
  0x67   : > { %v2308_v16 = vld [vmem:[%s2670_s30 + $0x30] sm:$0xff]   ;;  %v2310_v18 = vld [vmem:[%s2670_s30 + $0x38] sm:$0xff]   ;;  %v2318_v24 = vld [vmem:[%s2670_s30 + $0x88] sm:$0xff]  }
  0x68   : > { %2038 = vmatpush3.bf16.msra.mxu0 %v2298_v6  ;;  %2228 = vmatpush3.bf16.msra.mxu1 %v2298_v6  ;;  %v2325_v25 = vld [vmem:[%s2670_s30 + $0x90] sm:$0xff]   ;;  %v2326_v28 = vld [vmem:[%s2670_s30 + $0x98] sm:$0xff]   ;;  %v2333_v31 = vld [vmem:[%s2670_s30 + $0xa0] sm:$0xff]  }
  0x69   : > { %2039 = vmatprep.subr.bf16.mxu0 %v2299_v7  ;;  %2221 = vmatprep.subr.bf16.mxu1 %v2299_v7  ;;  %v2332_v33 = vld [vmem:[%s2661_s26 + $0x150] ss:$12 sps:$4 sm:$0xff]   ;;  %v2334_v35 = vld [vmem:[%s2670_s30 + $0xa8] sm:$0xff]   ;;  %v2350_v46 = vld [vmem:[%s2661_s26 + $0x38] ss:$12 sps:$4 sm:$0xff]  }
  0x6a   : > { %v2337_v36 = vld [vmem:[%s2661_s26 + $0x16c] ss:$12 sps:$4 sm:$0xff]   ;;  %v2341_v37 = vld [vmem:[%s2670_s30 + $0xb0] sm:$0xff]   ;;  %v2348_v45 = vld [vmem:[%s2661_s26 + $0x7c] ss:$12 sps:$4 sm:$0xff]  }
  0x6b   : > { %v2339_v38 = vld [vmem:[%s2661_s26 + $0x48] ss:$12 sps:$4 sm:$0xff]   ;;  %v2343_v40 = vld [vmem:[%s2661_s26 + $0x64] ss:$12 sps:$4 sm:$0xff]   ;;  %v2342_v41 = vld [vmem:[%s2670_s30 + $0xb8] sm:$0xff]  }
  0x6c   : > { %2040 = vmatpush3.bf16.msra.mxu0 %v2300_v8  ;;  %2229 = vmatpush3.bf16.msra.mxu1 %v2300_v8  ;;  %v2340_v39 = vld [vmem:[%s2661_s26 + $0x168] ss:$12 sps:$4 sm:$0xff]   ;;  %v2346_v43 = vld [vmem:[%s2661_s26 + $0x60] ss:$12 sps:$4 sm:$0xff]   ;;  %v2351_v47 = vld [vmem:[%s2661_s26 + $0x78] ss:$12 sps:$4 sm:$0xff]  }
  0x6d   : > { %2041 = vmatprep.subr.bf16.mxu0 %v2301_v9  ;;  %2222 = vmatprep.subr.bf16.mxu1 %v2301_v9  ;;  %v2345_v42 = vld [vmem:[%s2661_s26 + $0x8] ss:$12 sps:$4 sm:$0xff]   ;;  %v2347_v44 = vld [vmem:[%s2661_s26 + $0x20] ss:$12 sps:$4 sm:$0xff]   ;;  %v2352_v48 = vld [vmem:[%s2661_s26 + $0x50] ss:$12 sps:$4 sm:$0xff]  }
  0x6e   : > { %v2353_v49 = vld [vmem:[%s2661_s26 + $0x94] ss:$12 sps:$4 sm:$0xff]   ;;  %v2356_v51 = vld [vmem:[%s2661_s26 + $0x90] ss:$12 sps:$4 sm:$0xff]   ;;  %v2358_v53 = vld [vmem:[%s2661_s26 + $0xac] ss:$12 sps:$4 sm:$0xff]  }
  0x6f   : > { %v2355_v50 = vld [vmem:[%s2661_s26 + $0x68] ss:$12 sps:$4 sm:$0xff]   ;;  %v2357_v52 = vld [vmem:[%s2661_s26 + $0x80] ss:$12 sps:$4 sm:$0xff]   ;;  %v2360_v54 = vld [vmem:[%s2661_s26 + $0x98] ss:$12 sps:$4 sm:$0xff]  }
  0x70   : > { %2042 = vmatpush3.bf16.msra.mxu0 %v2302_v10  ;;  %2230 = vmatpush3.bf16.msra.mxu1 %v2302_v10  ;;  %v2361_v55 = vld [vmem:[%s2661_s26 + $0xa8] ss:$12 sps:$4 sm:$0xff]   ;;  %v2362_v56 = vld [vmem:[%s2661_s26 + $0xb0] ss:$12 sps:$4 sm:$0xff]   ;;  %v2366_v59 = vld [vmem:[%s2661_s26 + $0xc0] ss:$12 sps:$4 sm:$0xff]  }
  0x71   : > { %2043 = vmatprep.subr.bf16.mxu0 %v2303_v11  ;;  %2223 = vmatprep.subr.bf16.mxu1 %v2303_v11  ;;  %v2363_v57 = vld [vmem:[%s2661_s26 + $0xc4] ss:$12 sps:$4 sm:$0xff]   ;;  %v2365_v58 = vld [vmem:[%s2661_s26 + $0xc8] ss:$12 sps:$4 sm:$0xff]   ;;  %v2367_v60 = vld [vmem:[%s2661_s26 + $0xe0] ss:$12 sps:$4 sm:$0xff]  }
  0x72   : > { %v2368_v61 = vld [vmem:[%s2661_s26 + $0xdc] ss:$12 sps:$4 sm:$0xff]   ;;  %v2370_v62 = vld [vmem:[%s2661_s26 + $0xf8] ss:$12 sps:$4 sm:$0xff]   ;;  %v2373_v1 = vld [vmem:[%s2661_s26 + $0xf4] ss:$12 sps:$4 sm:$0xff]  }
  0x73   : > { %v2371_v63 = vld [vmem:[%s2661_s26 + $0xd8] ss:$12 sps:$4 sm:$0xff]   ;;  %v2372_v0 = vld [vmem:[%s2661_s26 + $0x110] ss:$12 sps:$4 sm:$0xff]   ;;  %v2375_v2 = vld [vmem:[%s2661_s26 + $0x128] ss:$12 sps:$4 sm:$0xff]  }
  0x74   : > { %2044 = vmatpush3.bf16.msra.mxu0 %v2304_v12  ;;  %2231 = vmatpush3.bf16.msra.mxu1 %v2304_v12  ;;  %v2376_v3 = vld [vmem:[%s2661_s26 + $0xf0] ss:$12 sps:$4 sm:$0xff]   ;;  %v2377_v4 = vld [vmem:[%s2661_s26 + $0x140] ss:$12 sps:$4 sm:$0xff]   ;;  %v2380_v6 = vld [vmem:[%s2661_s26 + $0x158] ss:$12 sps:$4 sm:$0xff]  }
  0x75   : > { %2045 = vmatprep.subr.bf16.mxu0 %v2305_v13  ;;  %2224 = vmatprep.subr.bf16.mxu1 %v2305_v13  ;;  %v2378_v5 = vld [vmem:[%s2661_s26 + $0x10c] ss:$12 sps:$4 sm:$0xff]   ;;  %v2381_v7 = vld [vmem:[%s2661_s26 + $0x108] ss:$12 sps:$4 sm:$0xff]   ;;  %v2382_v8 = vld [vmem:[%s2661_s26 + $0x170] ss:$12 sps:$4 sm:$0xff]  }
  0x78   : > { %2046 = vmatpush3.bf16.msra.mxu0 %v2306_v14  ;;  %2232 = vmatpush3.bf16.msra.mxu1 %v2306_v14 }
  0x79   : > { %2047 = vmatprep.subr.bf16.mxu0 %v2307_v15  ;;  %2225 = vmatprep.subr.bf16.mxu1 %v2307_v15 }
  0x7c   : > { %2048 = vmatpush3.bf16.msra.mxu0 %v2308_v16  ;;  %2233 = vmatpush3.bf16.msra.mxu1 %v2308_v16 }
  0x7d   : > { %2049 = vmatprep.subr.bf16.mxu0 %v2309_v17  ;;  %2226 = vmatprep.subr.bf16.mxu1 %v2309_v17 }
  0x80   : > { %2050 = vmatpush3.bf16.msra.mxu0 %v2310_v18  ;;  %2234 = vmatpush3.bf16.msra.mxu1 %v2310_v18 }
  0x81   : > { %2171 = vmatprep.subr.bf16.mxu1 %v2317_v19 }
  0x83   : > { %1011 = vmatmul.mubr.bf16.vlgmr.msra.gmra.mrb[0].mxu0 %v2311_v20  ;;  %1107 = vmatmul.mubr.bf16.vlgmr.msra.gmra.mrb[0].mxu1 %v2314_v21 }
  0x84   : > { %2172 = vmatpush3.bf16.msra.mxu1 %v2317_v19  ;;  %1018 = vmatprep.mubr.bf16.mxu0 %v2319_v22 }
  0x85   : > { %2173 = vmatprep.subr.bf16.mxu1 %v2318_v24  ;;  %1114 = vmatprep.mubr.bf16.mxu1 %v2321_v23 }
  0x88   : > { %2174 = vmatpush3.bf16.msra.mxu1 %v2318_v24 }
  0x89   : > { %2175 = vmatprep.subr.bf16.mxu1 %v2325_v25 }
  0x8b   : > { %1019 = vmatmul.mubr.bf16.gmra.mrb[4].mxu0 %v2323_v26  ;;  %1115 = vmatmul.mubr.bf16.gmra.mrb[4].mxu1 %v2324_v27 }
  0x8c   : > { %2176 = vmatpush3.bf16.msra.mxu1 %v2325_v25  ;;  %1026 = vmatprep.mubr.bf16.mxu0 %v2327_v29 }
  0x8d   : > { %2177 = vmatprep.subr.bf16.mxu1 %v2326_v28  ;;  %1122 = vmatprep.mubr.bf16.mxu1 %v2329_v30 }
  0x90   : > { %2178 = vmatpush3.bf16.msra.mxu1 %v2326_v28 }
  0x91   : > { %2179 = vmatprep.subr.bf16.mxu1 %v2333_v31 }
  0x93   : > { %1027 = vmatmul.mubr.bf16.gmra.mrb[8].mxu0 %v2331_v32  ;;  %1123 = vmatmul.mubr.bf16.gmra.mrb[8].mxu1 %v2332_v33 }
  0x94   : > { %2180 = vmatpush3.bf16.msra.mxu1 %v2333_v31  ;;  %1034 = vmatprep.mubr.bf16.mxu0 %v2335_v34 }
  0x95   : > { %2181 = vmatprep.subr.bf16.mxu1 %v2334_v35  ;;  %1130 = vmatprep.mubr.bf16.mxu1 %v2337_v36 }
  0x98   : > { %2182 = vmatpush3.bf16.msra.mxu1 %v2334_v35 }
  0x99   : > { %2183 = vmatprep.subr.bf16.mxu1 %v2341_v37 }
  0x9b   : > { %1035 = vmatmul.mubr.bf16.gmra.mrb[12].mxu0 %v2339_v38  ;;  %1131 = vmatmul.mubr.bf16.gmra.mrb[12].mxu1 %v2340_v39 }
  0x9c   : > { %2184 = vmatpush3.bf16.msra.mxu1 %v2341_v37  ;;  %1042 = vmatprep.mubr.bf16.mxu0 %v2343_v40 }
  0x9d   : > { %2185 = vmatprep.subr.bf16.mxu1 %v2342_v41  ;;  %2187 = vmatprep.mubr.bf16.mxu1 %v2345_v42 }
  0xa0   : > { %2186 = vmatpush3.bf16.msra.mxu1 %v2342_v41 }
  0xa3   : > { %1043 = vmatmul.mubr.bf16.gmra.mrb[16].mxu0 %v2346_v43  ;;  %2188 = vmatmul.mubr.bf16.vlgmr.msra.gmra.mrb[16].mxu1 %v2347_v44 }
  0xa4   : > { %1050 = vmatprep.mubr.bf16.mxu0 %v2348_v45  ;;  %2191 = vmatprep.mubr.bf16.mxu1 %v2350_v46 }
  0xab   : > { %1051 = vmatmul.mubr.bf16.gmra.mrb[20].mxu0 %v2351_v47  ;;  %2192 = vmatmul.mubr.bf16.gmra.mrb[20].mxu1 %v2352_v48 }
  0xac   : > { %1058 = vmatprep.mubr.bf16.mxu0 %v2353_v49  ;;  %2195 = vmatprep.mubr.bf16.mxu1 %v2355_v50 }
  0xb3   : > { %1059 = vmatmul.mubr.bf16.gmra.mrb[24].mxu0 %v2356_v51  ;;  %2196 = vmatmul.mubr.bf16.gmra.mrb[24].mxu1 %v2357_v52 }
  0xb4   : > { %1066 = vmatprep.mubr.bf16.mxu0 %v2358_v53  ;;  %2199 = vmatprep.mubr.bf16.mxu1 %v2360_v54 }
  0xbb   : > { %1067 = vmatmul.mubr.bf16.gmra.mrb[28].mxu0 %v2361_v55  ;;  %2200 = vmatmul.mubr.bf16.gmra.mrb[28].mxu1 %v2362_v56 }
  0xbc   : > { %1074 = vmatprep.mubr.bf16.mxu0 %v2363_v57  ;;  %2203 = vmatprep.mubr.bf16.mxu1 %v2365_v58  ;;  %v432_v58 = vld [vmem:[#allocation2 + $0x10] sm:$0xff] }
  0xc3   : > { %1075 = vmatmul.mubr.bf16.gmra.mrb[32].mxu0 %v2366_v59  ;;  %2204 = vmatmul.mubr.bf16.gmra.mrb[32].mxu1 %v2367_v60 }
  0xc4   : > { %1082 = vmatprep.mubr.bf16.mxu0 %v2368_v61  ;;  %2207 = vmatprep.mubr.bf16.mxu1 %v2370_v62  ;;  %v430_v62 = vld [vmem:[#allocation2] sm:$0xff] }
  0xcb   : > { %1083 = vmatmul.mubr.bf16.gmra.mrb[36].mxu0 %v2371_v63  ;;  %2208 = vmatmul.mubr.bf16.gmra.mrb[36].mxu1 %v2372_v0 }
  0xcc   : > { %1090 = vmatprep.mubr.bf16.mxu0 %v2373_v1  ;;  %2211 = vmatprep.mubr.bf16.mxu1 %v2375_v2 }
  0xd3   : > { %1091 = vmatmul.mubr.bf16.gmra.mrb[40].mxu0 %v2376_v3  ;;  %2212 = vmatmul.mubr.bf16.gmra.mrb[40].mxu1 %v2377_v4  ;;  %v433_v3 = vld [vmem:[#allocation2 + $0x18] sm:$0xff] }
  0xd4   : > { %1098 = vmatprep.mubr.bf16.mxu0 %v2378_v5  ;;  %2215 = vmatprep.mubr.bf16.mxu1 %v2380_v6 }
  0xdb   : > { %1099 = vmatmul.mubr.bf16.gmra.mrb[44].mxu0 %v2381_v7  ;;  %2216 = vmatmul.mubr.bf16.gmra.mrb[44].mxu1 %v2382_v8  ;;  %v431_v8 = vld [vmem:[#allocation2 + $0x8] sm:$0xff] }
 0x156   : > { %v2051_v9 = vpop.f32.mrb[0].mxu0  ;;  %v2123_v10 = vpop.f32.mrb[0].mxu1 }
 0x157   : > { %v2052_v11 = vpop.f32.mrb[1].mxu0  ;;  %v2124_v12 = vpop.f32.mrb[1].mxu1 }
 0x158   : > { %v2053_v13 = vadd.f32 %v2052_v11, %v2051_v9  ;;  %v2742_v14 = vadd.f32 %v2124_v12, %v2123_v10  ;;  %v2054_v15 = vpop.f32.mrb[2].mxu0  ;;  %v2126_v16 = vpop.f32.mrb[2].mxu1 }
 0x159   : > { %v2055_v17 = vpop.f32.mrb[3].mxu0  ;;  %v2127_v18 = vpop.f32.mrb[3].mxu1 }
 0x15a   : > { %v2056_v19 = vadd.f32 %v2055_v17, %v2054_v15  ;;  %v2744_v20 = vadd.f32 %v2127_v18, %v2126_v16  ;;  %v436_v18 = vld [vmem:[#allocation2 + $0x30] sm:$0xff] }
 0x15e   : > { %v2057_v21 = vpop.f32.mrb[4].mxu0  ;;  %v2129_v22 = vpop.f32.mrb[4].mxu1 }
 0x15f   : > { %v2058_v23 = vpop.f32.mrb[5].mxu0  ;;  %v2130_v24 = vpop.f32.mrb[5].mxu1 }
 0x160   : > { %v2059_v25 = vadd.f32 %v2058_v23, %v2057_v21  ;;  %v2746_v26 = vadd.f32 %v2130_v24, %v2129_v22  ;;  %v2060_v27 = vpop.f32.mrb[6].mxu0  ;;  %v2132_v28 = vpop.f32.mrb[6].mxu1  ;;  %v434_v23 = vld [vmem:[#allocation2 + $0x20] sm:$0xff] }
 0x161   : > { %v2061_v29 = vpop.f32.mrb[7].mxu0  ;;  %v2133_v30 = vpop.f32.mrb[7].mxu1 }
 0x162   : > { %v2062_v31 = vadd.f32 %v2061_v29, %v2060_v27  ;;  %v2748_v32 = vadd.f32 %v2133_v30, %v2132_v28  ;;  %v437_v29 = vld [vmem:[#allocation2 + $0x38] sm:$0xff] }
 0x166   : > { %v2063_v33 = vpop.f32.mrb[8].mxu0  ;;  %v2135_v34 = vpop.f32.mrb[8].mxu1 }
 0x167   : > { %v2064_v35 = vpop.f32.mrb[9].mxu0  ;;  %v2136_v36 = vpop.f32.mrb[9].mxu1 }
 0x168   : > { %v2065_v37 = vadd.f32 %v2064_v35, %v2063_v33  ;;  %v2750_v38 = vadd.f32 %v2136_v36, %v2135_v34  ;;  %v2066_v39 = vpop.f32.mrb[10].mxu0  ;;  %v2138_v40 = vpop.f32.mrb[10].mxu1  ;;  %v435_v34 = vld [vmem:[#allocation2 + $0x28] sm:$0xff] }
 0x169   : > { %v2067_v41 = vpop.f32.mrb[11].mxu0  ;;  %v2139_v42 = vpop.f32.mrb[11].mxu1 }
 0x16a   : > { %v2068_v43 = vadd.f32 %v2067_v41, %v2066_v39  ;;  %v2752_v44 = vadd.f32 %v2139_v42, %v2138_v40 }
 0x16e   : > { %v2069_v45 = vpop.f32.mrb[12].mxu0  ;;  %v2141_v46 = vpop.f32.mrb[12].mxu1 }
 0x16f   : > { %v2070_v47 = vpop.f32.mrb[13].mxu0  ;;  %v2142_v48 = vpop.f32.mrb[13].mxu1 }
 0x170   : > { %v2071_v49 = vadd.f32 %v2070_v47, %v2069_v45  ;;  %v2754_v50 = vadd.f32 %v2142_v48, %v2141_v46  ;;  %v2072_v51 = vpop.f32.mrb[14].mxu0  ;;  %v2144_v52 = vpop.f32.mrb[14].mxu1  ;;  %v440_v46 = vld [vmem:[#allocation2 + $0x50] sm:$0xff] }
 0x171   : > { %v2073_v53 = vpop.f32.mrb[15].mxu0  ;;  %v2145_v54 = vpop.f32.mrb[15].mxu1 }
 0x172   : > { %v2074_v55 = vadd.f32 %v2073_v53, %v2072_v51  ;;  %v2756_v56 = vadd.f32 %v2145_v54, %v2144_v52 }
 0x176   : > { %v2075_v57 = vpop.f32.mrb[16].mxu0  ;;  %v2189_v59 = vpop.f32.mrb[16].mxu1 }
 0x177   : > { %v1182_v60 = vadd.f32 %v2189_v59, %v2059_v25  ;;  %v2076_v61 = vpop.f32.mrb[17].mxu0  ;;  %v1173_v63 = vpop.f32.mrb[17].mxu1 }
 0x178   : > { %v2077_v0 = vadd.f32 %v2076_v61, %v2075_v57  ;;  %v1174_v1 = vadd.f32 %v2053_v13, %v1173_v63  ;;  %v2078_v2 = vpop.f32.mrb[18].mxu0  ;;  %v2190_v4 = vpop.f32.mrb[18].mxu1 }
 0x179   : > { %v1302_v5 = vadd.f32 %v1182_v60, %v432_v58  ;;  %v1185_v6 = vadd.f32 %v2190_v4, %v2062_v31  ;;  %v2079_v7 = vpop.f32.mrb[19].mxu0  ;;  %v1176_v9 = vpop.f32.mrb[19].mxu1  ;;  %v439_v60 = vld [vmem:[#allocation2 + $0x48] sm:$0xff] }
 0x17a   : > { %v1300_v10 = vadd.f32 %v1174_v1, %v430_v62  ;;  %v2080_v11 = vadd.f32 %v2079_v7, %v2078_v2  ;;  %v1177_v12 = vadd.f32 %v2056_v19, %v1176_v9 }
 0x17b   : > { %1334 = vst [vmem:[#allocation2 + $0x10] sm:$0xff] %v1302_v5  ;;  %v1303_v15 = vadd.f32 %v1185_v6, %v433_v3  ;;  %v442_v6 = vld [vmem:[#allocation2 + $0x60] sm:$0xff] }
 0x17c   : > { %1332 = vst [vmem:[#allocation2] sm:$0xff] %v1300_v10  ;;  %v1301_v16 = vadd.f32 %v1177_v12, %v431_v8 }
 0x17d   : > { %1335 = vst [vmem:[#allocation2 + $0x18] sm:$0xff] %v1303_v15  ;;  %v444_v15 = vld [vmem:[#allocation2 + $0x70] sm:$0xff] }
 0x17e   : > { %1333 = vst [vmem:[#allocation2 + $0x8] sm:$0xff] %v1301_v16  ;;  %v2081_v17 = vpop.f32.mrb[20].mxu0  ;;  %v2193_v13 = vpop.f32.mrb[20].mxu1 }
 0x17f   : > { %v1198_v21 = vadd.f32 %v2193_v13, %v2071_v49  ;;  %v2082_v22 = vpop.f32.mrb[21].mxu0  ;;  %v1189_v24 = vpop.f32.mrb[21].mxu1  ;;  %v438_v49 = vld [vmem:[#allocation2 + $0x40] sm:$0xff] }
 0x180   : > { %v2083_v25 = vadd.f32 %v2082_v22, %v2081_v17  ;;  %v1190_v27 = vadd.f32 %v2065_v37, %v1189_v24  ;;  %v2084_v28 = vpop.f32.mrb[22].mxu0  ;;  %v2194_v30 = vpop.f32.mrb[22].mxu1  ;;  %v443_v17 = vld [vmem:[#allocation2 + $0x68] sm:$0xff] }
 0x181   : > { %v1306_v31 = vadd.f32 %v1198_v21, %v436_v18  ;;  %v1201_v19 = vadd.f32 %v2194_v30, %v2074_v55  ;;  %v2085_v33 = vpop.f32.mrb[23].mxu0  ;;  %v1192_v35 = vpop.f32.mrb[23].mxu1  ;;  %v441_v55 = vld [vmem:[#allocation2 + $0x58] sm:$0xff] }
 0x182   : > { %v1304_v36 = vadd.f32 %v1190_v27, %v434_v23  ;;  %v2086_v39 = vadd.f32 %v2085_v33, %v2084_v28  ;;  %v1193_v40 = vadd.f32 %v2068_v43, %v1192_v35  ;;  %v445_v23 = vld [vmem:[#allocation2 + $0x78] sm:$0xff] }
 0x183   : > { %1338 = vst [vmem:[#allocation2 + $0x30] sm:$0xff] %v1306_v31  ;;  %v1307_v41 = vadd.f32 %v1201_v19, %v437_v29 }
 0x184   : > { %1336 = vst [vmem:[#allocation2 + $0x20] sm:$0xff] %v1304_v36  ;;  %v1305_v42 = vadd.f32 %v1193_v40, %v435_v34  ;;  %v446_v36 = vld [vmem:[#allocation2 + $0x80] sm:$0xff] }
 0x185   : > { %1339 = vst [vmem:[#allocation2 + $0x38] sm:$0xff] %v1307_v41 }
 0x186   : > { %1337 = vst [vmem:[#allocation2 + $0x28] sm:$0xff] %v1305_v42  ;;  %v2087_v45 = vpop.f32.mrb[24].mxu0  ;;  %v2197_v37 = vpop.f32.mrb[24].mxu1 }
 0x187   : > { %v1214_v47 = vadd.f32 %v2197_v37, %v2083_v25  ;;  %v2088_v48 = vpop.f32.mrb[25].mxu0  ;;  %v1205_v51 = vpop.f32.mrb[25].mxu1 }
 0x188   : > { %v2089_v52 = vadd.f32 %v2088_v48, %v2087_v45  ;;  %v1206_v53 = vadd.f32 %v2077_v0, %v1205_v51  ;;  %v2090_v54 = vpop.f32.mrb[26].mxu0  ;;  %v2198_v57 = vpop.f32.mrb[26].mxu1  ;;  %v447_v45 = vld [vmem:[#allocation2 + $0x88] sm:$0xff] }
 0x189   : > { %v1310_v58 = vadd.f32 %v1214_v47, %v440_v46  ;;  %v1217_v43 = vadd.f32 %v2198_v57, %v2086_v39  ;;  %v2091_v59 = vpop.f32.mrb[27].mxu0  ;;  %v1208_v61 = vpop.f32.mrb[27].mxu1  ;;  %v448_v57 = vld [vmem:[#allocation2 + $0x90] sm:$0xff] }
 0x18a   : > { %v1308_v62 = vadd.f32 %v1206_v53, %v438_v49  ;;  %v2092_v63 = vadd.f32 %v2091_v59, %v2090_v54  ;;  %v1209_v1 = vadd.f32 %v2080_v11, %v1208_v61  ;;  %v449_v61 = vld [vmem:[#allocation2 + $0x98] sm:$0xff] }
 0x18b   : > { %1342 = vst [vmem:[#allocation2 + $0x50] sm:$0xff] %v1310_v58  ;;  %v1311_v2 = vadd.f32 %v1217_v43, %v441_v55 }
 0x18c   : > { %1340 = vst [vmem:[#allocation2 + $0x40] sm:$0xff] %v1308_v62  ;;  %v1309_v3 = vadd.f32 %v1209_v1, %v439_v60 }
 0x18d   : > { %1343 = vst [vmem:[#allocation2 + $0x58] sm:$0xff] %v1311_v2 }
 0x18e   : > { %1341 = vst [vmem:[#allocation2 + $0x48] sm:$0xff] %v1309_v3  ;;  %v2093_v4 = vpop.f32.mrb[28].mxu0  ;;  %v2201_v5 = vpop.f32.mrb[28].mxu1  ;;  %v456_v3 = vld [vmem:[#allocation2 + $0xd0] sm:$0xff] }
 0x18f   : > { %v2094_v0 = vpop.f32.mrb[29].mxu0  ;;  %v1221_v7 = vpop.f32.mrb[29].mxu1 }
 0x190   : > { %v2095_v8 = vadd.f32 %v2094_v0, %v2093_v4  ;;  %v1222_v9 = vadd.f32 %v2089_v52, %v1221_v7  ;;  %v2096_v10 = vpop.f32.mrb[30].mxu0  ;;  %v2202_v12 = vpop.f32.mrb[30].mxu1 }
 0x191   : > { %v2097_v16 = vpop.f32.mrb[31].mxu0  ;;  %v1224_v18 = vpop.f32.mrb[31].mxu1 }
 0x192   : > { %v1230_v11 = vadd.f32 %v2201_v5, %v2095_v8  ;;  %v1312_v13 = vadd.f32 %v1222_v9, %v442_v6  ;;  %v2098_v21 = vadd.f32 %v2097_v16, %v2096_v10  ;;  %v1225_v22 = vadd.f32 %v2092_v63, %v1224_v18  ;;  %v454_v6 = vld [vmem:[#allocation2 + $0xc0] sm:$0xff] }
 0x194   : > { %v1314_v24 = vadd.f32 %v1230_v11, %v444_v15  ;;  %1344 = vst [vmem:[#allocation2 + $0x60] sm:$0xff] %v1312_v13  ;;  %v1233_v25 = vadd.f32 %v2202_v12, %v2098_v21  ;;  %v1313_v27 = vadd.f32 %v1225_v22, %v443_v17  ;;  %v457_v12 = vld [vmem:[#allocation2 + $0xd8] sm:$0xff]  ;;  %v450_v17 = vld [vmem:[#allocation2 + $0xa0] sm:$0xff]  ;;  %v455_v13 = vld [vmem:[#allocation2 + $0xc8] sm:$0xff] }
 0x196   : > { %1346 = vst [vmem:[#allocation2 + $0x70] sm:$0xff] %v1314_v24  ;;  %v1315_v28 = vadd.f32 %v1233_v25, %v445_v23  ;;  %1345 = vst [vmem:[#allocation2 + $0x68] sm:$0xff] %v1313_v27  ;;  %v2099_v29 = vpop.f32.mrb[32].mxu0  ;;  %v2205_v30 = vpop.f32.mrb[32].mxu1  ;;  %v451_v27 = vld [vmem:[#allocation2 + $0xa8] sm:$0xff] }
 0x197   : > { %v2100_v31 = vpop.f32.mrb[33].mxu0  ;;  %v1237_v19 = vpop.f32.mrb[33].mxu1 }
 0x198   : > { %1347 = vst [vmem:[#allocation2 + $0x78] sm:$0xff] %v1315_v28  ;;  %v2101_v33 = vadd.f32 %v2100_v31, %v2099_v29  ;;  %v2102_v34 = vpop.f32.mrb[34].mxu0  ;;  %v2206_v35 = vpop.f32.mrb[34].mxu1  ;;  %v460_v31 = vld [vmem:[#allocation2 + $0xf0] sm:$0xff] }
 0x199   : > { %v2103_v39 = vpop.f32.mrb[35].mxu0  ;;  %v1240_v40 = vpop.f32.mrb[35].mxu1 }
 0x19a   : > { %v1238_v41 = vadd.f32 %v2101_v33, %v1237_v19  ;;  %v2104_v42 = vadd.f32 %v2103_v39, %v2102_v34 }
 0x19c   : > { %v1316_v46 = vadd.f32 %v1238_v41, %v446_v36  ;;  %v1241_v37 = vadd.f32 %v2104_v42, %v1240_v40  ;;  %v461_v41 = vld [vmem:[#allocation2 + $0xf8] sm:$0xff] }
 0x19e   : > { %1348 = vst [vmem:[#allocation2 + $0x80] sm:$0xff] %v1316_v46  ;;  %v1317_v47 = vadd.f32 %v1241_v37, %v447_v45  ;;  %v2105_v48 = vpop.f32.mrb[36].mxu0  ;;  %v2758_v49 = vpop.f32.mrb[36].mxu1  ;;  %v452_v46 = vld [vmem:[#allocation2 + $0xb0] sm:$0xff] }
 0x19f   : > { %v2106_v51 = vpop.f32.mrb[37].mxu0  ;;  %v1253_v52 = vpop.f32.mrb[37].mxu1 }
 0x1a0   : > { %1349 = vst [vmem:[#allocation2 + $0x88] sm:$0xff] %v1317_v47  ;;  %v2107_v53 = vadd.f32 %v2106_v51, %v2105_v48  ;;  %v2108_v54 = vpop.f32.mrb[38].mxu0  ;;  %v2760_v55 = vpop.f32.mrb[38].mxu1  ;;  %v459_v48 = vld [vmem:[#allocation2 + $0xe8] sm:$0xff] }
 0x1a1   : > { %v2109_v58 = vpop.f32.mrb[39].mxu0  ;;  %v1256_v43 = vpop.f32.mrb[39].mxu1 }
 0x1a2   : > { %v1246_v59 = vadd.f32 %v2205_v30, %v2107_v53  ;;  %v2110_v60 = vadd.f32 %v2109_v58, %v2108_v54  ;;  %v453_v58 = vld [vmem:[#allocation2 + $0xb8] sm:$0xff] }
 0x1a4   : > { %v1318_v62 = vadd.f32 %v1246_v59, %v448_v57  ;;  %v1249_v63 = vadd.f32 %v2206_v35, %v2110_v60  ;;  %v458_v35 = vld [vmem:[#allocation2 + $0xe0] sm:$0xff]  ;;  %v1369_v60 = vld [vmem:[#allocation2 + $0x8] sm:$0xff] (!%p1872_p12) }
 0x1a6   : > { %1350 = vst [vmem:[#allocation2 + $0x90] sm:$0xff] %v1318_v62  ;;  %v1319_v1 = vadd.f32 %v1249_v63, %v449_v61  ;;  %v2111_v2 = vpop.f32.mrb[40].mxu0  ;;  %v2213_v4 = vpop.f32.mrb[40].mxu1  ;;  %v1370_v62 = vld [vmem:[#allocation2 + $0x10] sm:$0xff] (!%p1872_p12)  ;;  %v1371_v63 = vld [vmem:[#allocation2 + $0x18] sm:$0xff] (!%p1872_p12) }
 0x1a7   : > { %v1278_v5 = vadd.f32 %v2213_v4, %v2746_v26  ;;  %v2112_v0 = vpop.f32.mrb[41].mxu0  ;;  %v1269_v7 = vpop.f32.mrb[41].mxu1  ;;  %v1373_v4 = vld [vmem:[#allocation2 + $0x28] sm:$0xff] (!%p1872_p12) }
 0x1a8   : > { %1351 = vst [vmem:[#allocation2 + $0x98] sm:$0xff] %v1319_v1  ;;  %v2113_v8 = vadd.f32 %v2112_v0, %v2111_v2  ;;  %v1270_v9 = vadd.f32 %v2742_v14, %v1269_v7  ;;  %v2114_v10 = vpop.f32.mrb[42].mxu0  ;;  %v2214_v15 = vpop.f32.mrb[42].mxu1  ;;  %v1372_v1 = vld [vmem:[#allocation2 + $0x20] sm:$0xff] (!%p1872_p12)  ;;  %v1374_v0 = vld [vmem:[#allocation2 + $0x30] sm:$0xff] (!%p1872_p12) }
 0x1a9   : > { %v1326_v16 = vadd.f32 %v1278_v5, %v456_v3  ;;  %v1281_v18 = vadd.f32 %v2214_v15, %v2748_v32  ;;  %v2115_v11 = vpop.f32.mrb[43].mxu0  ;;  %v1272_v21 = vpop.f32.mrb[43].mxu1  ;;  %v1377_v15 = vld [vmem:[#allocation2 + $0x48] sm:$0xff] (!%p1872_p12) }
 0x1aa   : > { %v1254_v22 = vadd.f32 %v2113_v8, %v1253_v52  ;;  %v1324_v23 = vadd.f32 %v1270_v9, %v454_v6  ;;  %v2116_v26 = vadd.f32 %v2115_v11, %v2114_v10  ;;  %v1273_v24 = vadd.f32 %v2744_v20, %v1272_v21  ;;  %v1375_v6 = vld [vmem:[#allocation2 + $0x38] sm:$0xff] (!%p1872_p12) }
 0x1ab   : > { %1358 = vst [vmem:[#allocation2 + $0xd0] sm:$0xff] %v1326_v16  ;;  %v1327_v25 = vadd.f32 %v1281_v18, %v457_v12  ;;  %v1376_v12 = vld [vmem:[#allocation2 + $0x40] sm:$0xff] (!%p1872_p12)  ;;  %v1378_v16 = vld [vmem:[#allocation2 + $0x50] sm:$0xff] (!%p1872_p12) }
 0x1ac   : > { %v1320_v28 = vadd.f32 %v1254_v22, %v450_v17  ;;  %1356 = vst [vmem:[#allocation2 + $0xc0] sm:$0xff] %v1324_v23  ;;  %v1257_v14 = vadd.f32 %v2116_v26, %v1256_v43  ;;  %v1325_v29 = vadd.f32 %v1273_v24, %v455_v13  ;;  %v1379_v13 = vld [vmem:[#allocation2 + $0x58] sm:$0xff] (!%p1872_p12)  ;;  %v1380_v22 = vld [vmem:[#allocation2 + $0x60] sm:$0xff] (!%p1872_p12)  ;;  %v1381_v23 = vld [vmem:[#allocation2 + $0x68] sm:$0xff] (!%p1872_p12) }
 0x1ad   : > { %1359 = vst [vmem:[#allocation2 + $0xd8] sm:$0xff] %v1327_v25 }
 0x1ae   : > { %1352 = vst [vmem:[#allocation2 + $0xa0] sm:$0xff] %v1320_v28  ;;  %v1321_v30 = vadd.f32 %v1257_v14, %v451_v27  ;;  %1357 = vst [vmem:[#allocation2 + $0xc8] sm:$0xff] %v1325_v29  ;;  %v2117_v32 = vpop.f32.mrb[44].mxu0  ;;  %v2217_v19 = vpop.f32.mrb[44].mxu1  ;;  %v1382_v28 = vld [vmem:[#allocation2 + $0x70] sm:$0xff] (!%p1872_p12)  ;;  %v1383_v14 = vld [vmem:[#allocation2 + $0x78] sm:$0xff] (!%p1872_p12) }
 0x1af   : > { %v1294_v33 = vadd.f32 %v2217_v19, %v2754_v50  ;;  %v2118_v34 = vpop.f32.mrb[45].mxu0  ;;  %v1285_v36 = vpop.f32.mrb[45].mxu1  ;;  %v1384_v29 = vld [vmem:[#allocation2 + $0x80] sm:$0xff] (!%p1872_p12) }
 0x1b0   : > { %1353 = vst [vmem:[#allocation2 + $0xa8] sm:$0xff] %v1321_v30  ;;  %v2119_v20 = vadd.f32 %v2118_v34, %v2117_v32  ;;  %v1286_v39 = vadd.f32 %v2750_v38, %v1285_v36  ;;  %v2120_v40 = vpop.f32.mrb[46].mxu0  ;;  %v2218_v42 = vpop.f32.mrb[46].mxu1  ;;  %v1386_v34 = vld [vmem:[#allocation2 + $0x90] sm:$0xff] (!%p1872_p12) }
 0x1b1   : > { %v1330_v45 = vadd.f32 %v1294_v33, %v460_v31  ;;  %v1297_v37 = vadd.f32 %v2218_v42, %v2756_v56  ;;  %v2121_v47 = vpop.f32.mrb[47].mxu0  ;;  %v1288_v51 = vpop.f32.mrb[47].mxu1  ;;  %v1385_v33 = vld [vmem:[#allocation2 + $0x88] sm:$0xff] (!%p1872_p12) }
 0x1b2   : > { %v1262_v52 = vadd.f32 %v2758_v49, %v2119_v20  ;;  %v1328_v50 = vadd.f32 %v1286_v39, %v458_v35  ;;  %v2122_v53 = vadd.f32 %v2121_v47, %v2120_v40  ;;  %v1289_v54 = vadd.f32 %v2752_v44, %v1288_v51  ;;  %1367 = sbr.rel (%p1872_p12) target bundleno = 453 (0x1c5), region = 66  ;;  %v1368_v49 = vld [vmem:[#allocation2] sm:$0xff] (!%p1872_p12)  ;;  %v1387_v35 = vld [vmem:[#allocation2 + $0x98] sm:$0xff] (!%p1872_p12) }
 0x1b3   : > { %1362 = vst [vmem:[#allocation2 + $0xf0] sm:$0xff] %v1330_v45  ;;  %v1331_v57 = vadd.f32 %v1297_v37, %v461_v41  ;;  %v2776_v44 = vld [vmem:[%s2849_s2] ss:$0 sm:$0xff] (!%p1872_p12) }
 0x1b4   : > { %v1322_v38 = vadd.f32 %v1262_v52, %v452_v46  ;;  %1360 = vst [vmem:[#allocation2 + $0xe0] sm:$0xff] %v1328_v50  ;;  %v1265_v43 = vadd.f32 %v2760_v55, %v2122_v53  ;;  %v1329_v59 = vadd.f32 %v1289_v54, %v459_v48  ;;  %v1407_v61 = vadd.f32 (!%p1872_p12), %v2776_v44, %v1368_v49  ;;  %v1392_v52 = vld [vmem:[#allocation2 + $0xc0] sm:$0xff] (!%p1872_p12) }
 0x1b5   : > { %1363 = vst [vmem:[#allocation2 + $0xf8] sm:$0xff] %v1331_v57  ;;  %v1408_v55 = vadd.f32 (!%p1872_p12), %v2776_v44, %v1369_v60  ;;  %v1409_v2 = vadd.f32 (!%p1872_p12), %v2776_v44, %v1370_v62  ;;  %v1410_v3 = vadd.f32 (!%p1872_p12), %v2776_v44, %v1371_v63  ;;  %v1411_v5 = vadd.f32 (!%p1872_p12), %v2776_v44, %v1372_v1  ;;  %v1388_v41 = vld [vmem:[#allocation2 + $0xa0] sm:$0xff] (!%p1872_p12)  ;;  %v1393_v50 = vld [vmem:[#allocation2 + $0xc8] sm:$0xff] (!%p1872_p12) }
 0x1b6   : > { %1354 = vst [vmem:[#allocation2 + $0xb0] sm:$0xff] %v1322_v38  ;;  %v1323_v56 = vadd.f32 %v1265_v43, %v453_v58  ;;  %1361 = vst [vmem:[#allocation2 + $0xe8] sm:$0xff] %v1329_v59  ;;  %v1412_v8 = vadd.f32 (!%p1872_p12), %v2776_v44, %v1373_v4  ;;  %v1413_v9 = vadd.f32 (!%p1872_p12), %v2776_v44, %v1374_v0  ;;  %v1394_v38 = vld [vmem:[#allocation2 + $0xd0] sm:$0xff] (!%p1872_p12)  ;;  %v1395_v43 = vld [vmem:[#allocation2 + $0xd8] sm:$0xff] (!%p1872_p12) }
 0x1b7   : > { %v1943_v7 = vpack.c.bf16 (!%p1872_p12), %v1408_v55, %v1407_v61  ;;  %v1414_v10 = vadd.f32 (!%p1872_p12), %v2776_v44, %v1375_v6  ;;  %v1948_v17 = vpack.c.bf16 (!%p1872_p12), %v1410_v3, %v1409_v2  ;;  %v1415_v18 = vadd.f32 (!%p1872_p12), %v2776_v44, %v1376_v12  ;;  %v1389_v42 = vld [vmem:[#allocation2 + $0xa8] sm:$0xff] (!%p1872_p12) }
 0x1b8   : > { %1355 = vst [vmem:[#allocation2 + $0xb8] sm:$0xff] %v1323_v56  ;;  %v1416_v11 = vadd.f32 (!%p1872_p12), %v2776_v44, %v1377_v15  ;;  %v1417_v21 = vadd.f32 (!%p1872_p12), %v2776_v44, %v1378_v16  ;;  %v1953_v26 = vpack.c.bf16 (!%p1872_p12), %v1412_v8, %v1411_v5  ;;  %v1418_v25 = vadd.f32 (!%p1872_p12), %v2776_v44, %v1379_v13 }
 0x1b9   : > { %1944 = vst [vmem:[%s2659_s24] sm:$0xff] %v1943_v7   ;;  %v1958_v24 = vpack.c.bf16 %v1414_v10, %v1413_v9  ;;  %v1419_v27 = vadd.f32 %v2776_v44, %v1380_v22  ;;  %2020 = vst [vmem:[%s2659_s24 + $0x8] sm:$0xff] %v1948_v17   ;;  %v1420_v32 = vadd.f32 %v2776_v44, %v1381_v23 }
 0x1ba   : > { %v1963_v30 = vpack.c.bf16 %v1416_v11, %v1415_v18  ;;  %v1421_v31 = vadd.f32 %v2776_v44, %v1382_v28  ;;  %v1422_v19 = vadd.f32 %v2776_v44, %v1383_v14  ;;  %2021 = vst [vmem:[%s2659_s24 + $0x10] sm:$0xff] %v1953_v26   ;;  %v1968_v36 = vpack.c.bf16 %v1418_v25, %v1417_v21  ;;  %v1398_v62 = vld [vmem:[#allocation2 + $0xf0] sm:$0xff] }
 0x1bb   : > { %2022 = vst [vmem:[%s2659_s24 + $0x18] sm:$0xff] %v1958_v24   ;;  %v1423_v20 = vadd.f32 %v2776_v44, %v1384_v29  ;;  %v1424_v39 = vadd.f32 %v2776_v44, %v1385_v33  ;;  %v1425_v40 = vadd.f32 %v2776_v44, %v1386_v34  ;;  %v1973_v46 = vpack.c.bf16 %v1420_v32, %v1419_v27  ;;  %v1396_v59 = vld [vmem:[#allocation2 + $0xe0] sm:$0xff] }
 0x1bc   : > { %2023 = vst [vmem:[%s2659_s24 + $0x20] sm:$0xff] %v1963_v30   ;;  %v1978_v37 = vpack.c.bf16 %v1422_v19, %v1421_v31  ;;  %v1426_v47 = vadd.f32 %v2776_v44, %v1387_v35  ;;  %v1427_v48 = vadd.f32 %v2776_v44, %v1388_v41  ;;  %2024 = vst [vmem:[%s2659_s24 + $0x28] sm:$0xff] %v1968_v36   ;;  %v1399_v63 = vld [vmem:[#allocation2 + $0xf8] sm:$0xff] }
 0x1bd   : > { %v1390_v45 = vld [vmem:[#allocation2 + $0xb0] sm:$0xff]  ;;  %v1983_v53 = vpack.c.bf16 %v1424_v39, %v1423_v20  ;;  %v1428_v54 = vadd.f32 %v2776_v44, %v1389_v42  ;;  %2025 = vst [vmem:[%s2659_s24 + $0x30] sm:$0xff] %v1973_v46   ;;  %v1431_v49 = vadd.f32 %v2776_v44, %v1392_v52  ;;  %v1432_v60 = vadd.f32 %v2776_v44, %v1393_v50  ;;  %v1397_v55 = vld [vmem:[#allocation2 + $0xe8] sm:$0xff] }
 0x1be   : > { %v1429_v57 = vadd.f32 %v2776_v44, %v1390_v45  ;;  %2026 = vst [vmem:[%s2659_s24 + $0x38] sm:$0xff] %v1978_v37   ;;  %v1988_v56 = vpack.c.bf16 %v1426_v47, %v1425_v40  ;;  %v1433_v61 = vadd.f32 %v2776_v44, %v1394_v38  ;;  %v1434_v3 = vadd.f32 %v2776_v44, %v1395_v43 }
 0x1bf   : > { %v1391_v51 = vld [vmem:[#allocation2 + $0xb8] sm:$0xff]  ;;  %2027 = vst [vmem:[%s2659_s24 + $0x40] sm:$0xff] %v1983_v53   ;;  %v1993_v1 = vpack.c.bf16 %v1428_v54, %v1427_v48  ;;  %v1435_v4 = vadd.f32 %v2776_v44, %v1396_v59  ;;  %v2003_v5 = vpack.c.bf16 %v1432_v60, %v1431_v49  ;;  %v1436_v0 = vadd.f32 %v2776_v44, %v1397_v55 }
 0x1c0   : > { %v1430_v58 = vadd.f32 %v2776_v44, %v1391_v51  ;;  %2028 = vst [vmem:[%s2659_s24 + $0x48] sm:$0xff] %v1988_v56   ;;  %v1437_v6 = vadd.f32 %v2776_v44, %v1398_v62  ;;  %v1438_v7 = vadd.f32 %v2776_v44, %v1399_v63  ;;  %v2008_v8 = vpack.c.bf16 %v1434_v3, %v1433_v61 }
 0x1c1   : > { %2029 = vst [vmem:[%s2659_s24 + $0x50] sm:$0xff] %v1993_v1   ;;  %2031 = vst [vmem:[%s2659_s24 + $0x60] sm:$0xff] %v2003_v5   ;;  %v2013_v9 = vpack.c.bf16 %v1436_v0, %v1435_v4 }
 0x1c2   : > { %v1998_v2 = vpack.c.bf16 %v1430_v58, %v1429_v57  ;;  %v2018_v10 = vpack.c.bf16 %v1438_v7, %v1437_v6  ;;  %2032 = vst [vmem:[%s2659_s24 + $0x68] sm:$0xff] %v2008_v8  }
 0x1c3   : > { %2033 = vst [vmem:[%s2659_s24 + $0x70] sm:$0xff] %v2013_v9  }
 0x1c4   : > { %2030 = vst [vmem:[%s2659_s24 + $0x58] sm:$0xff] %v1998_v2   ;;  %2034 = vst [vmem:[%s2659_s24 + $0x78] sm:$0xff] %v2018_v10  }
 0x1c5 PF: > { %s13_s18 = sadd.s32 1, %s2437_s18   ;;  %s2851_s12 = smov %s2417_s13 }
 0x1c6   : > { %p10_p13 = scmp.ge.s32.totalorder %s13_s18, 8   ;;  %s2852_s13 = smov %s2511_s25 }
 0x1c7   : > { %s2853_s14 = smov %s2429_s16  ;;  %s2854_s15 = smov %s2433_s17 }
 0x1c8   : > { %s2855_s16 = smov %s2858_s19  ;;  %s2856_s17 = smov %s2862_s20 }
 0x1c9   :  { %12 = sbr.rel (!%p10_p13) target bundleno = 4 (0x4), region = 114 }

// kernel: generator_forward.103
= control target key start
LH: loop header
LB: loop body
LE: loop exit
PB: predicated region body
PF: predicated region fallthrough
CT: control target
= control target key end

     0   :  { %s2697_s12 = smov 0   ;;  %s2699_s13 = smov 0   ;;  %s3078_s0 = inlined_call_operand.vmem [shape: bf16[512,3584], index: 0, kind: input, shape index: {}]   ;;  %s3079_s1 = inlined_call_operand.vmem [shape: bf16[3584,128], index: 1, kind: input, shape index: {}]   ;;  %s3080_s2 = inlined_call_operand.vmem [shape: f32[1,128], index: 2, kind: input, shape index: {}]   ;;  %s3081_s3 = inlined_call_operand.vmem [shape: bf16[512,128], index: 3, kind: output, shape index: {}]  }
   0x1   :  { %s2701_s14 = smov 0   ;;  %s2703_s15 = smov 0  }
   0x2   :  { %s2705_s16 = smov 0   ;;  %s2707_s17 = smov 0  }
   0x3   :  { %s2709_s18 = smov 0  }
   0x4 LB: > { %s25_s19 = sadd.s32 1, %s2666_s16  ;;  %s32_s20 = sadd.s32 1, %s2670_s17  ;;  %s2674_s18 = sphi %s2709_s18, %s13_s18   ;;  %s2670_s17 = sphi %s2707_s17, %s3087_s17   ;;  %s2666_s16 = sphi %s2705_s16, %s3086_s16   ;;  %s2662_s15 = sphi %s2703_s15, %s3085_s15   ;;  %s2658_s14 = sphi %s2701_s14, %s3084_s14   ;;  %s2654_s13 = sphi %s2699_s13, %s3083_s13   ;;  %s2650_s12 = sphi %s2697_s12, %s3082_s12  }
   0x5   : > { %p26_p0 = scmp.ge.s32.totalorder %s25_s19, 7  ;;  %p48_p1 = scmp.ne.s32.totalorder %s2654_s13, %s2650_s12 }
   0x6   : > { %p49_p2 = scmp.eq.s32.totalorder %s2674_s18, 0  ;;  %s41_s24 = sadd.s32 1, %s2654_s13 }
   0x7   : > { %s3089_s19 = smov (%p26_p0, %s25_s19), 0  ;;  %s3091_s20 = smov (!%p26_p0, %s32_s20), %s2670_s17 }
   0x8   : > { %p50_p3 = por %p49_p2, %p48_p1  ;;  %p34_p4 = scmp.ge.s32.totalorder %s3091_s20, 2 }
   0x9   : > { %s37_s21 = ssub.s32 %s2666_s16, %s3089_s19  ;;  %p1874_p6 = scmp.ge.s32.totalorder %s2674_s18, 14 }
   0xa   : > { %s3093_s20 = smov (%p34_p4, %s3091_s20), 0 }
   0xb   : > { %s36_s22 = ssub.s32 %s2670_s17, %s3093_s20  ;;  %167 = sbr.rel (%p1874_p6) target bundleno = 58 (0x3a), region = 24 }
   0xc   : > { %s38_s23 = sor.u32 %s37_s21, %s36_s22 }
   0xd   : > { %p39_p5 = scmp.eq.s32.totalorder %s38_s23, 0 }
   0xf   : > { %s2748_s25 = scalar_select %p39_p5, %s2654_s13, %s41_s24  }
  0x12   : > { %170 = sbr.rel (!%p50_p3) target bundleno = 58 (0x3a), region = 28  ;;  %s172_s26 = sand.u32 (%p50_p3), 1, %s2654_s13  }
  0x13   : > { %s1877_s27 = sshll.u32 (%p50_p3), %s2666_s16, 2  ;;  %s1875_s28 = sshll.u32 (%p50_p3), %s172_s26, 9 }
  0x14   : > { %s2370_s29 = smul.u32 (%p50_p3), 896, %s2670_s17  ;;  %s2762_s8 = scalar_lea.vmem (%p50_p3), [#allocation3], %s1875_s28 }
  0x16   : > { %s178_s30 = sadd.s32 (%p50_p3), %s2370_s29, %s1877_s27 }
  0x17   : > { %s1879_s4 = sshll.u32 (%p50_p3), %s178_s30, 2 }
  0x18   : > { %s2757_s7 = scalar_lea.vmem (%p50_p3), %s3078_s0, %s1879_s4 }
  0x19   : > { %v193_v0 = vld [vmem:[%s2757_s7] sm:$0xff]  ;;  %v195_v1 = vld [vmem:[%s2757_s7 + $0x8] sm:$0xff]  ;;  %v197_v2 = vld [vmem:[%s2757_s7 + $0x70] sm:$0xff] }
  0x1a   : > { %194 = vst [vmem:[%s2762_s8] sm:$0xff] %v193_v0  ;;  %196 = vst [vmem:[%s2762_s8 + $0x8] sm:$0xff] %v195_v1  ;;  %v199_v3 = vld [vmem:[%s2757_s7 + $0x78] sm:$0xff]  ;;  %v201_v4 = vld [vmem:[%s2757_s7 + $0xe0] sm:$0xff] }
  0x1b   : > { %198 = vst [vmem:[%s2762_s8 + $0x10] sm:$0xff] %v197_v2  ;;  %v203_v5 = vld [vmem:[%s2757_s7 + $0xe8] sm:$0xff]  ;;  %200 = vst [vmem:[%s2762_s8 + $0x18] sm:$0xff] %v199_v3  ;;  %v205_v6 = vld [vmem:[%s2757_s7 + $0x150] sm:$0xff] }
  0x1c   : > { %202 = vst [vmem:[%s2762_s8 + $0x20] sm:$0xff] %v201_v4  ;;  %204 = vst [vmem:[%s2762_s8 + $0x28] sm:$0xff] %v203_v5  ;;  %v207_v7 = vld [vmem:[%s2757_s7 + $0x158] sm:$0xff]  ;;  %v209_v8 = vld [vmem:[%s2757_s7 + $0x1c0] sm:$0xff] }
  0x1d   : > { %206 = vst [vmem:[%s2762_s8 + $0x30] sm:$0xff] %v205_v6  ;;  %208 = vst [vmem:[%s2762_s8 + $0x38] sm:$0xff] %v207_v7  ;;  %v211_v9 = vld [vmem:[%s2757_s7 + $0x1c8] sm:$0xff]  ;;  %v213_v10 = vld [vmem:[%s2757_s7 + $0x230] sm:$0xff] }
  0x1e   : > { %210 = vst [vmem:[%s2762_s8 + $0x40] sm:$0xff] %v209_v8  ;;  %v215_v11 = vld [vmem:[%s2757_s7 + $0x238] sm:$0xff]  ;;  %212 = vst [vmem:[%s2762_s8 + $0x48] sm:$0xff] %v211_v9  ;;  %v217_v12 = vld [vmem:[%s2757_s7 + $0x2a0] sm:$0xff] }
  0x1f   : > { %214 = vst [vmem:[%s2762_s8 + $0x50] sm:$0xff] %v213_v10  ;;  %216 = vst [vmem:[%s2762_s8 + $0x58] sm:$0xff] %v215_v11  ;;  %v219_v13 = vld [vmem:[%s2757_s7 + $0x2a8] sm:$0xff]  ;;  %v221_v14 = vld [vmem:[%s2757_s7 + $0x310] sm:$0xff] }
  0x20   : > { %218 = vst [vmem:[%s2762_s8 + $0x60] sm:$0xff] %v217_v12  ;;  %220 = vst [vmem:[%s2762_s8 + $0x68] sm:$0xff] %v219_v13  ;;  %v223_v15 = vld [vmem:[%s2757_s7 + $0x318] sm:$0xff]  ;;  %v225_v16 = vld [vmem:[%s2757_s7 + $0x380] sm:$0xff] }
  0x21   : > { %222 = vst [vmem:[%s2762_s8 + $0x70] sm:$0xff] %v221_v14  ;;  %v227_v17 = vld [vmem:[%s2757_s7 + $0x388] sm:$0xff]  ;;  %224 = vst [vmem:[%s2762_s8 + $0x78] sm:$0xff] %v223_v15  ;;  %v229_v18 = vld [vmem:[%s2757_s7 + $0x3f0] sm:$0xff] }
  0x22   : > { %226 = vst [vmem:[%s2762_s8 + $0x80] sm:$0xff] %v225_v16  ;;  %228 = vst [vmem:[%s2762_s8 + $0x88] sm:$0xff] %v227_v17  ;;  %v231_v19 = vld [vmem:[%s2757_s7 + $0x3f8] sm:$0xff]  ;;  %v233_v20 = vld [vmem:[%s2757_s7 + $0x460] sm:$0xff] }
  0x23   : > { %230 = vst [vmem:[%s2762_s8 + $0x90] sm:$0xff] %v229_v18  ;;  %232 = vst [vmem:[%s2762_s8 + $0x98] sm:$0xff] %v231_v19  ;;  %v235_v21 = vld [vmem:[%s2757_s7 + $0x468] sm:$0xff]  ;;  %v237_v22 = vld [vmem:[%s2757_s7 + $0x4d0] sm:$0xff] }
  0x24   : > { %234 = vst [vmem:[%s2762_s8 + $0xa0] sm:$0xff] %v233_v20  ;;  %v239_v23 = vld [vmem:[%s2757_s7 + $0x4d8] sm:$0xff]  ;;  %236 = vst [vmem:[%s2762_s8 + $0xa8] sm:$0xff] %v235_v21  ;;  %v241_v24 = vld [vmem:[%s2757_s7 + $0x540] sm:$0xff] }
  0x25   : > { %238 = vst [vmem:[%s2762_s8 + $0xb0] sm:$0xff] %v237_v22  ;;  %240 = vst [vmem:[%s2762_s8 + $0xb8] sm:$0xff] %v239_v23  ;;  %v243_v25 = vld [vmem:[%s2757_s7 + $0x548] sm:$0xff]  ;;  %v245_v26 = vld [vmem:[%s2757_s7 + $0x5b0] sm:$0xff] }
  0x26   : > { %242 = vst [vmem:[%s2762_s8 + $0xc0] sm:$0xff] %v241_v24  ;;  %244 = vst [vmem:[%s2762_s8 + $0xc8] sm:$0xff] %v243_v25  ;;  %v247_v27 = vld [vmem:[%s2757_s7 + $0x5b8] sm:$0xff]  ;;  %v249_v28 = vld [vmem:[%s2757_s7 + $0x620] sm:$0xff] }
  0x27   : > { %246 = vst [vmem:[%s2762_s8 + $0xd0] sm:$0xff] %v245_v26  ;;  %v251_v29 = vld [vmem:[%s2757_s7 + $0x628] sm:$0xff]  ;;  %248 = vst [vmem:[%s2762_s8 + $0xd8] sm:$0xff] %v247_v27  ;;  %v253_v30 = vld [vmem:[%s2757_s7 + $0x690] sm:$0xff] }
  0x28   : > { %250 = vst [vmem:[%s2762_s8 + $0xe0] sm:$0xff] %v249_v28  ;;  %252 = vst [vmem:[%s2762_s8 + $0xe8] sm:$0xff] %v251_v29  ;;  %v255_v31 = vld [vmem:[%s2757_s7 + $0x698] sm:$0xff]  ;;  %v257_v32 = vld [vmem:[%s2757_s7 + $0x700] sm:$0xff] }
  0x29   : > { %254 = vst [vmem:[%s2762_s8 + $0xf0] sm:$0xff] %v253_v30  ;;  %256 = vst [vmem:[%s2762_s8 + $0xf8] sm:$0xff] %v255_v31  ;;  %v259_v33 = vld [vmem:[%s2757_s7 + $0x708] sm:$0xff]  ;;  %v261_v34 = vld [vmem:[%s2757_s7 + $0x770] sm:$0xff] }
  0x2a   : > { %258 = vst [vmem:[%s2762_s8 + $0x100] sm:$0xff] %v257_v32  ;;  %v263_v35 = vld [vmem:[%s2757_s7 + $0x778] sm:$0xff]  ;;  %260 = vst [vmem:[%s2762_s8 + $0x108] sm:$0xff] %v259_v33  ;;  %v265_v36 = vld [vmem:[%s2757_s7 + $0x7e0] sm:$0xff] }
  0x2b   : > { %262 = vst [vmem:[%s2762_s8 + $0x110] sm:$0xff] %v261_v34  ;;  %264 = vst [vmem:[%s2762_s8 + $0x118] sm:$0xff] %v263_v35  ;;  %v267_v37 = vld [vmem:[%s2757_s7 + $0x7e8] sm:$0xff]  ;;  %v269_v38 = vld [vmem:[%s2757_s7 + $0x850] sm:$0xff] }
  0x2c   : > { %266 = vst [vmem:[%s2762_s8 + $0x120] sm:$0xff] %v265_v36  ;;  %268 = vst [vmem:[%s2762_s8 + $0x128] sm:$0xff] %v267_v37  ;;  %v271_v39 = vld [vmem:[%s2757_s7 + $0x858] sm:$0xff]  ;;  %v273_v40 = vld [vmem:[%s2757_s7 + $0x8c0] sm:$0xff] }
  0x2d   : > { %270 = vst [vmem:[%s2762_s8 + $0x130] sm:$0xff] %v269_v38  ;;  %v275_v41 = vld [vmem:[%s2757_s7 + $0x8c8] sm:$0xff]  ;;  %272 = vst [vmem:[%s2762_s8 + $0x138] sm:$0xff] %v271_v39  ;;  %v277_v42 = vld [vmem:[%s2757_s7 + $0x930] sm:$0xff] }
  0x2e   : > { %274 = vst [vmem:[%s2762_s8 + $0x140] sm:$0xff] %v273_v40  ;;  %276 = vst [vmem:[%s2762_s8 + $0x148] sm:$0xff] %v275_v41  ;;  %v279_v43 = vld [vmem:[%s2757_s7 + $0x938] sm:$0xff]  ;;  %v281_v44 = vld [vmem:[%s2757_s7 + $0x9a0] sm:$0xff] }
  0x2f   : > { %278 = vst [vmem:[%s2762_s8 + $0x150] sm:$0xff] %v277_v42  ;;  %280 = vst [vmem:[%s2762_s8 + $0x158] sm:$0xff] %v279_v43  ;;  %v283_v45 = vld [vmem:[%s2757_s7 + $0x9a8] sm:$0xff]  ;;  %v285_v46 = vld [vmem:[%s2757_s7 + $0xa10] sm:$0xff] }
  0x30   : > { %282 = vst [vmem:[%s2762_s8 + $0x160] sm:$0xff] %v281_v44  ;;  %v287_v47 = vld [vmem:[%s2757_s7 + $0xa18] sm:$0xff]  ;;  %284 = vst [vmem:[%s2762_s8 + $0x168] sm:$0xff] %v283_v45  ;;  %v289_v48 = vld [vmem:[%s2757_s7 + $0xa80] sm:$0xff] }
  0x31   : > { %286 = vst [vmem:[%s2762_s8 + $0x170] sm:$0xff] %v285_v46  ;;  %288 = vst [vmem:[%s2762_s8 + $0x178] sm:$0xff] %v287_v47  ;;  %v291_v49 = vld [vmem:[%s2757_s7 + $0xa88] sm:$0xff]  ;;  %v293_v50 = vld [vmem:[%s2757_s7 + $0xaf0] sm:$0xff] }
  0x32   : > { %290 = vst [vmem:[%s2762_s8 + $0x180] sm:$0xff] %v289_v48  ;;  %292 = vst [vmem:[%s2762_s8 + $0x188] sm:$0xff] %v291_v49  ;;  %v295_v51 = vld [vmem:[%s2757_s7 + $0xaf8] sm:$0xff]  ;;  %v297_v52 = vld [vmem:[%s2757_s7 + $0xb60] sm:$0xff] }
  0x33   : > { %294 = vst [vmem:[%s2762_s8 + $0x190] sm:$0xff] %v293_v50  ;;  %v299_v53 = vld [vmem:[%s2757_s7 + $0xb68] sm:$0xff]  ;;  %296 = vst [vmem:[%s2762_s8 + $0x198] sm:$0xff] %v295_v51  ;;  %v301_v54 = vld [vmem:[%s2757_s7 + $0xbd0] sm:$0xff] }
  0x34   : > { %298 = vst [vmem:[%s2762_s8 + $0x1a0] sm:$0xff] %v297_v52  ;;  %300 = vst [vmem:[%s2762_s8 + $0x1a8] sm:$0xff] %v299_v53  ;;  %v303_v55 = vld [vmem:[%s2757_s7 + $0xbd8] sm:$0xff]  ;;  %v305_v56 = vld [vmem:[%s2757_s7 + $0xc40] sm:$0xff] }
  0x35   : > { %302 = vst [vmem:[%s2762_s8 + $0x1b0] sm:$0xff] %v301_v54  ;;  %304 = vst [vmem:[%s2762_s8 + $0x1b8] sm:$0xff] %v303_v55  ;;  %v307_v57 = vld [vmem:[%s2757_s7 + $0xc48] sm:$0xff]  ;;  %v309_v58 = vld [vmem:[%s2757_s7 + $0xcb0] sm:$0xff] }
  0x36   : > { %306 = vst [vmem:[%s2762_s8 + $0x1c0] sm:$0xff] %v305_v56  ;;  %v311_v59 = vld [vmem:[%s2757_s7 + $0xcb8] sm:$0xff]  ;;  %308 = vst [vmem:[%s2762_s8 + $0x1c8] sm:$0xff] %v307_v57  ;;  %v313_v60 = vld [vmem:[%s2757_s7 + $0xd20] sm:$0xff] }
  0x37   : > { %310 = vst [vmem:[%s2762_s8 + $0x1d0] sm:$0xff] %v309_v58  ;;  %312 = vst [vmem:[%s2762_s8 + $0x1d8] sm:$0xff] %v311_v59  ;;  %v315_v61 = vld [vmem:[%s2757_s7 + $0xd28] sm:$0xff]  ;;  %v317_v62 = vld [vmem:[%s2757_s7 + $0xd90] sm:$0xff] }
  0x38   : > { %314 = vst [vmem:[%s2762_s8 + $0x1e0] sm:$0xff] %v313_v60  ;;  %316 = vst [vmem:[%s2762_s8 + $0x1e8] sm:$0xff] %v315_v61  ;;  %v319_v63 = vld [vmem:[%s2757_s7 + $0xd98] sm:$0xff] }
  0x39   : > { %318 = vst [vmem:[%s2762_s8 + $0x1f0] sm:$0xff] %v317_v62  ;;  %320 = vst [vmem:[%s2762_s8 + $0x1f8] sm:$0xff] %v319_v63 }
  0x3a PF: > { %p1880_p7 = scmp.ge.s32.totalorder %s2674_s18, 1  ;;  %p325_p8 = scmp.lt.s32.totalorder %s2674_s18, 15 }
  0x3c   : > { %p326_p9 = pnand %p1880_p7, %p325_p8 }
  0x3d   : > { %s332_s9 = sand.u32 (!%p326_p9), 1, %s2650_s12   ;;  %s1882_s10 = sshll.u32 (!%p326_p9), %s2662_s15, 5 }
  0x3e   : > { %329 = sbr.rel (%p326_p9) target bundleno = 493 (0x1ed), region = 51  ;;  %s1881_s11 = sshll.u32 (!%p326_p9), %s332_s9, 9 }
  0x3f   : > { %p375_p10 = scmp.lt.s32.totalorder (!%p326_p9), %s1882_s10, 63  ;;  %s2898_s26 = scalar_lea.vmem (!%p326_p9), [#allocation3], %s1881_s11 }
  0x40   : > { %p1884_p11 = scmp.ne.s32.totalorder (!%p326_p9), %s2658_s14, 0 }
  0x45   : > { %s3095_s10 = smov (!%p375_p10, %s1882_s10), 63  ;;  %387 = sbr.rel (%p1884_p11) target bundleno = 87 (0x57), region = 59 }
  0x46   : > { %s1883_s21 = sshll.u32 %s3095_s10, 2  ;;  %v2676_v0 = vmov (!%p1884_p11), 0.0  }
  0x47   : > { %s2896_s24 = scalar_lea.vmem %s3081_s3, %s1883_s21  ;;  %388 = vst [vmem:[#allocation2] sm:$0xff] (!%p1884_p11), %v2676_v0  ;;  %389 = vst [vmem:[#allocation2 + $0x8] sm:$0xff] (!%p1884_p11), %v2676_v0 }
  0x48   : > { %390 = vst [vmem:[#allocation2 + $0x10] sm:$0xff] (!%p1884_p11), %v2676_v0  ;;  %391 = vst [vmem:[#allocation2 + $0x18] sm:$0xff] (!%p1884_p11), %v2676_v0 }
  0x49   : > { %392 = vst [vmem:[#allocation2 + $0x20] sm:$0xff] (!%p1884_p11), %v2676_v0  ;;  %393 = vst [vmem:[#allocation2 + $0x28] sm:$0xff] (!%p1884_p11), %v2676_v0 }
  0x4a   : > { %394 = vst [vmem:[#allocation2 + $0x30] sm:$0xff] (!%p1884_p11), %v2676_v0  ;;  %395 = vst [vmem:[#allocation2 + $0x38] sm:$0xff] (!%p1884_p11), %v2676_v0 }
  0x4b   : > { %396 = vst [vmem:[#allocation2 + $0x40] sm:$0xff] (!%p1884_p11), %v2676_v0  ;;  %397 = vst [vmem:[#allocation2 + $0x48] sm:$0xff] (!%p1884_p11), %v2676_v0 }
  0x4c   : > { %398 = vst [vmem:[#allocation2 + $0x50] sm:$0xff] %v2676_v0  ;;  %399 = vst [vmem:[#allocation2 + $0x58] sm:$0xff] %v2676_v0 }
  0x4d   : > { %400 = vst [vmem:[#allocation2 + $0x60] sm:$0xff] %v2676_v0  ;;  %401 = vst [vmem:[#allocation2 + $0x68] sm:$0xff] %v2676_v0 }
  0x4e   : > { %402 = vst [vmem:[#allocation2 + $0x70] sm:$0xff] %v2676_v0  ;;  %403 = vst [vmem:[#allocation2 + $0x78] sm:$0xff] %v2676_v0 }
  0x4f   : > { %404 = vst [vmem:[#allocation2 + $0x80] sm:$0xff] %v2676_v0  ;;  %405 = vst [vmem:[#allocation2 + $0x88] sm:$0xff] %v2676_v0 }
  0x50   : > { %406 = vst [vmem:[#allocation2 + $0x90] sm:$0xff] %v2676_v0  ;;  %407 = vst [vmem:[#allocation2 + $0x98] sm:$0xff] %v2676_v0 }
  0x51   : > { %408 = vst [vmem:[#allocation2 + $0xa0] sm:$0xff] %v2676_v0  ;;  %409 = vst [vmem:[#allocation2 + $0xa8] sm:$0xff] %v2676_v0 }
  0x52   : > { %410 = vst [vmem:[#allocation2 + $0xb0] sm:$0xff] %v2676_v0  ;;  %411 = vst [vmem:[#allocation2 + $0xb8] sm:$0xff] %v2676_v0 }
  0x53   : > { %412 = vst [vmem:[#allocation2 + $0xc0] sm:$0xff] %v2676_v0  ;;  %413 = vst [vmem:[#allocation2 + $0xc8] sm:$0xff] %v2676_v0 }
  0x54   : > { %414 = vst [vmem:[#allocation2 + $0xd0] sm:$0xff] %v2676_v0  ;;  %415 = vst [vmem:[#allocation2 + $0xd8] sm:$0xff] %v2676_v0 }
  0x55   : > { %416 = vst [vmem:[#allocation2 + $0xe0] sm:$0xff] %v2676_v0  ;;  %417 = vst [vmem:[#allocation2 + $0xe8] sm:$0xff] %v2676_v0 }
  0x56   : > { %418 = vst [vmem:[#allocation2 + $0xf0] sm:$0xff] %v2676_v0  ;;  %419 = vst [vmem:[#allocation2 + $0xf8] sm:$0xff] %v2676_v0 }
  0x57 PF: > { %s1885_s12 = sshll.u32 %s2658_s14, 9  ;;  %v2462_v1 = vld [vmem:[%s2898_s26 + $0x4] ss:$16 sps:$4 sm:$0xff]   ;;  %v2465_v2 = vld [vmem:[%s2898_s26 + $0xc] ss:$16 sps:$4 sm:$0xff]   ;;  %p1983_p12 = scmp.ne.s32.totalorder %s2658_s14, 6 }
  0x58   : > { %s517_s15 = sshra.s32 %s1885_s12, 3  ;;  %1129 = vmatprep.mubr.bf16.mxu0 %v2462_v1  ;;  %1290 = vmatprep.mubr.bf16.mxu1 %v2465_v2  ;;  %v2460_v33 = vld [vmem:[%s2898_s26] ss:$16 sps:$4 sm:$0xff]   ;;  %v2463_v36 = vld [vmem:[%s2898_s26 + $0x8] ss:$16 sps:$4 sm:$0xff]  }
  0x59   : > { %s1886_s27 = sshll.u32 %s517_s15, 2  ;;  %v2466_v37 = vld [vmem:[%s2898_s26 + $0x24] ss:$16 sps:$4 sm:$0xff]   ;;  %v2468_v38 = vld [vmem:[%s2898_s26 + $0x2c] ss:$16 sps:$4 sm:$0xff]  }
  0x5a   : > { %s2907_s30 = scalar_lea.vmem %s3079_s1, %s1886_s27  ;;  %v2470_v39 = vld [vmem:[%s2898_s26 + $0x20] ss:$16 sps:$4 sm:$0xff]   ;;  %v2471_v40 = vld [vmem:[%s2898_s26 + $0x28] ss:$16 sps:$4 sm:$0xff]   ;;  %v2472_v41 = vld [vmem:[%s2898_s26 + $0x44] ss:$16 sps:$4 sm:$0xff]  }
  0x5b   : > { %v2428_v3 = vld [vmem:[%s2907_s30 + $0x40] sm:$0xff]   ;;  %v2432_v7 = vld [vmem:[%s2907_s30 + $0x48] sm:$0xff]   ;;  %v2436_v11 = vld [vmem:[%s2907_s30 + $0x50] sm:$0xff]  }
  0x5c   : > { %v2429_v4 = vld [vmem:[%s2907_s30 + $0xc0] sm:$0xff]   ;;  %2146 = vmatprep.subr.bf16.mxu0 %v2428_v3  ;;  %v2433_v8 = vld [vmem:[%s2907_s30 + $0xc8] sm:$0xff]   ;;  %v2437_v12 = vld [vmem:[%s2907_s30 + $0xd0] sm:$0xff]  }
  0x5d   : > { %v2430_v5 = vld [vmem:[%s2907_s30] sm:$0xff]   ;;  %2258 = vmatprep.subr.bf16.mxu1 %v2429_v4  ;;  %v2434_v9 = vld [vmem:[%s2907_s30 + $0x8] sm:$0xff]   ;;  %v2438_v13 = vld [vmem:[%s2907_s30 + $0x10] sm:$0xff]  }
  0x5e   : > { %v2431_v6 = vld [vmem:[%s2907_s30 + $0x80] sm:$0xff]   ;;  %2147 = vmatpush3.bf16.msra.mxu0 %v2430_v5  ;;  %v2435_v10 = vld [vmem:[%s2907_s30 + $0x88] sm:$0xff]   ;;  %v2439_v14 = vld [vmem:[%s2907_s30 + $0x90] sm:$0xff]  }
  0x5f   : > { %2259 = vmatpush3.bf16.msra.mxu1 %v2431_v6  ;;  %2148 = vmatprep.subr.bf16.mxu0 %v2432_v7  ;;  %v2440_v15 = vld [vmem:[%s2907_s30 + $0x58] sm:$0xff]   ;;  %v2444_v19 = vld [vmem:[%s2907_s30 + $0x60] sm:$0xff]   ;;  %v2448_v23 = vld [vmem:[%s2907_s30 + $0x68] sm:$0xff]  }
  0x60   : > { %2260 = vmatprep.subr.bf16.mxu1 %v2433_v8  ;;  %v2441_v16 = vld [vmem:[%s2907_s30 + $0xd8] sm:$0xff]   ;;  %v2445_v20 = vld [vmem:[%s2907_s30 + $0xe0] sm:$0xff]   ;;  %v2449_v24 = vld [vmem:[%s2907_s30 + $0xe8] sm:$0xff]  }
  0x61   : > { %v2442_v17 = vld [vmem:[%s2907_s30 + $0x18] sm:$0xff]   ;;  %v2446_v21 = vld [vmem:[%s2907_s30 + $0x20] sm:$0xff]   ;;  %v2450_v25 = vld [vmem:[%s2907_s30 + $0x28] sm:$0xff]  }
  0x62   : > { %2149 = vmatpush3.bf16.msra.mxu0 %v2434_v9  ;;  %v2443_v18 = vld [vmem:[%s2907_s30 + $0x98] sm:$0xff]   ;;  %v2447_v22 = vld [vmem:[%s2907_s30 + $0xa0] sm:$0xff]   ;;  %v2451_v26 = vld [vmem:[%s2907_s30 + $0xa8] sm:$0xff]  }
  0x63   : > { %2261 = vmatpush3.bf16.msra.mxu1 %v2435_v10  ;;  %2150 = vmatprep.subr.bf16.mxu0 %v2436_v11  ;;  %v2452_v27 = vld [vmem:[%s2907_s30 + $0x70] sm:$0xff]   ;;  %v2456_v31 = vld [vmem:[%s2907_s30 + $0x78] sm:$0xff]  }
  0x64   : > { %2262 = vmatprep.subr.bf16.mxu1 %v2437_v12  ;;  %v2453_v28 = vld [vmem:[%s2907_s30 + $0xf0] sm:$0xff]   ;;  %v2457_v32 = vld [vmem:[%s2907_s30 + $0xf8] sm:$0xff]  }
  0x65   : > { %v2454_v29 = vld [vmem:[%s2907_s30 + $0x30] sm:$0xff]   ;;  %v2458_v34 = vld [vmem:[%s2907_s30 + $0x38] sm:$0xff]  }
  0x66   : > { %2151 = vmatpush3.bf16.msra.mxu0 %v2438_v13  ;;  %v2455_v30 = vld [vmem:[%s2907_s30 + $0xb0] sm:$0xff]   ;;  %v2459_v35 = vld [vmem:[%s2907_s30 + $0xb8] sm:$0xff]  }
  0x67   : > { %2263 = vmatpush3.bf16.msra.mxu1 %v2439_v14  ;;  %2152 = vmatprep.subr.bf16.mxu0 %v2440_v15  ;;  %v2474_v42 = vld [vmem:[%s2898_s26 + $0x4c] ss:$16 sps:$4 sm:$0xff]   ;;  %v2476_v43 = vld [vmem:[%s2898_s26 + $0x40] ss:$16 sps:$4 sm:$0xff]   ;;  %v2477_v44 = vld [vmem:[%s2898_s26 + $0x48] ss:$16 sps:$4 sm:$0xff]  }
  0x68   : > { %2264 = vmatprep.subr.bf16.mxu1 %v2441_v16  ;;  %v2478_v45 = vld [vmem:[%s2898_s26 + $0x64] ss:$16 sps:$4 sm:$0xff]   ;;  %v2480_v46 = vld [vmem:[%s2898_s26 + $0x6c] ss:$16 sps:$4 sm:$0xff]   ;;  %v2482_v47 = vld [vmem:[%s2898_s26 + $0x60] ss:$16 sps:$4 sm:$0xff]  }
  0x69   : > { %v2483_v48 = vld [vmem:[%s2898_s26 + $0x68] ss:$16 sps:$4 sm:$0xff]   ;;  %v2484_v49 = vld [vmem:[%s2898_s26 + $0x84] ss:$16 sps:$4 sm:$0xff]   ;;  %v2486_v50 = vld [vmem:[%s2898_s26 + $0x8c] ss:$16 sps:$4 sm:$0xff]  }
  0x6a   : > { %2153 = vmatpush3.bf16.msra.mxu0 %v2442_v17  ;;  %v2488_v51 = vld [vmem:[%s2898_s26 + $0x80] ss:$16 sps:$4 sm:$0xff]   ;;  %v2489_v52 = vld [vmem:[%s2898_s26 + $0x88] ss:$16 sps:$4 sm:$0xff]   ;;  %v2490_v53 = vld [vmem:[%s2898_s26 + $0xa4] ss:$16 sps:$4 sm:$0xff]  }
  0x6b   : > { %2265 = vmatpush3.bf16.msra.mxu1 %v2443_v18  ;;  %2154 = vmatprep.subr.bf16.mxu0 %v2444_v19  ;;  %v2492_v54 = vld [vmem:[%s2898_s26 + $0xac] ss:$16 sps:$4 sm:$0xff]   ;;  %v2494_v55 = vld [vmem:[%s2898_s26 + $0xa0] ss:$16 sps:$4 sm:$0xff]   ;;  %v2495_v56 = vld [vmem:[%s2898_s26 + $0xa8] ss:$16 sps:$4 sm:$0xff]  }
  0x6c   : > { %2266 = vmatprep.subr.bf16.mxu1 %v2445_v20  ;;  %v2496_v57 = vld [vmem:[%s2898_s26 + $0xc4] ss:$16 sps:$4 sm:$0xff]   ;;  %v2498_v58 = vld [vmem:[%s2898_s26 + $0xcc] ss:$16 sps:$4 sm:$0xff]   ;;  %v2500_v59 = vld [vmem:[%s2898_s26 + $0xc0] ss:$16 sps:$4 sm:$0xff]  }
  0x6d   : > { %v2501_v60 = vld [vmem:[%s2898_s26 + $0xc8] ss:$16 sps:$4 sm:$0xff]   ;;  %v2502_v61 = vld [vmem:[%s2898_s26 + $0xe4] ss:$16 sps:$4 sm:$0xff]   ;;  %v2504_v62 = vld [vmem:[%s2898_s26 + $0xec] ss:$16 sps:$4 sm:$0xff]  }
  0x6e   : > { %2155 = vmatpush3.bf16.msra.mxu0 %v2446_v21  ;;  %v2506_v63 = vld [vmem:[%s2898_s26 + $0xe0] ss:$16 sps:$4 sm:$0xff]   ;;  %v2507_v0 = vld [vmem:[%s2898_s26 + $0xe8] ss:$16 sps:$4 sm:$0xff]   ;;  %v2508_v1 = vld [vmem:[%s2898_s26 + $0x104] ss:$16 sps:$4 sm:$0xff]  }
  0x6f   : > { %2267 = vmatpush3.bf16.msra.mxu1 %v2447_v22  ;;  %2156 = vmatprep.subr.bf16.mxu0 %v2448_v23  ;;  %v2510_v2 = vld [vmem:[%s2898_s26 + $0x10c] ss:$16 sps:$4 sm:$0xff]   ;;  %v2512_v3 = vld [vmem:[%s2898_s26 + $0x100] ss:$16 sps:$4 sm:$0xff]   ;;  %v2513_v4 = vld [vmem:[%s2898_s26 + $0x108] ss:$16 sps:$4 sm:$0xff]  }
  0x70   : > { %2268 = vmatprep.subr.bf16.mxu1 %v2449_v24  ;;  %v2514_v5 = vld [vmem:[%s2898_s26 + $0x124] ss:$16 sps:$4 sm:$0xff]   ;;  %v2516_v6 = vld [vmem:[%s2898_s26 + $0x12c] ss:$16 sps:$4 sm:$0xff]   ;;  %v2518_v7 = vld [vmem:[%s2898_s26 + $0x120] ss:$16 sps:$4 sm:$0xff]  }
  0x71   : > { %v2519_v8 = vld [vmem:[%s2898_s26 + $0x128] ss:$16 sps:$4 sm:$0xff]   ;;  %v2520_v9 = vld [vmem:[%s2898_s26 + $0x144] ss:$16 sps:$4 sm:$0xff]   ;;  %v2522_v10 = vld [vmem:[%s2898_s26 + $0x14c] ss:$16 sps:$4 sm:$0xff]  }
  0x72   : > { %2157 = vmatpush3.bf16.msra.mxu0 %v2450_v25  ;;  %v2524_v11 = vld [vmem:[%s2898_s26 + $0x140] ss:$16 sps:$4 sm:$0xff]   ;;  %v2525_v12 = vld [vmem:[%s2898_s26 + $0x148] ss:$16 sps:$4 sm:$0xff]   ;;  %v2526_v13 = vld [vmem:[%s2898_s26 + $0x164] ss:$16 sps:$4 sm:$0xff]  }
  0x73   : > { %2269 = vmatpush3.bf16.msra.mxu1 %v2451_v26  ;;  %2158 = vmatprep.subr.bf16.mxu0 %v2452_v27  ;;  %v2528_v14 = vld [vmem:[%s2898_s26 + $0x16c] ss:$16 sps:$4 sm:$0xff]   ;;  %v2530_v15 = vld [vmem:[%s2898_s26 + $0x160] ss:$16 sps:$4 sm:$0xff]   ;;  %v2531_v16 = vld [vmem:[%s2898_s26 + $0x168] ss:$16 sps:$4 sm:$0xff]  }
  0x74   : > { %2270 = vmatprep.subr.bf16.mxu1 %v2453_v28  ;;  %v2532_v17 = vld [vmem:[%s2898_s26 + $0x184] ss:$16 sps:$4 sm:$0xff]   ;;  %v2534_v18 = vld [vmem:[%s2898_s26 + $0x18c] ss:$16 sps:$4 sm:$0xff]   ;;  %v2536_v19 = vld [vmem:[%s2898_s26 + $0x180] ss:$16 sps:$4 sm:$0xff]  }
  0x75   : > { %v2537_v20 = vld [vmem:[%s2898_s26 + $0x188] ss:$16 sps:$4 sm:$0xff]   ;;  %v2538_v21 = vld [vmem:[%s2898_s26 + $0x1a4] ss:$16 sps:$4 sm:$0xff]   ;;  %v2540_v22 = vld [vmem:[%s2898_s26 + $0x1ac] ss:$16 sps:$4 sm:$0xff]  }
  0x76   : > { %2159 = vmatpush3.bf16.msra.mxu0 %v2454_v29  ;;  %v2542_v23 = vld [vmem:[%s2898_s26 + $0x1a0] ss:$16 sps:$4 sm:$0xff]   ;;  %v2543_v24 = vld [vmem:[%s2898_s26 + $0x1a8] ss:$16 sps:$4 sm:$0xff]   ;;  %v2544_v25 = vld [vmem:[%s2898_s26 + $0x1c4] ss:$16 sps:$4 sm:$0xff]  }
  0x77   : > { %2271 = vmatpush3.bf16.msra.mxu1 %v2455_v30  ;;  %2160 = vmatprep.subr.bf16.mxu0 %v2456_v31  ;;  %v2546_v26 = vld [vmem:[%s2898_s26 + $0x1cc] ss:$16 sps:$4 sm:$0xff]   ;;  %v2548_v27 = vld [vmem:[%s2898_s26 + $0x1c0] ss:$16 sps:$4 sm:$0xff]   ;;  %v2549_v28 = vld [vmem:[%s2898_s26 + $0x1c8] ss:$16 sps:$4 sm:$0xff]  }
  0x78   : > { %2272 = vmatprep.subr.bf16.mxu1 %v2457_v32  ;;  %v2550_v29 = vld [vmem:[%s2898_s26 + $0x1e4] ss:$16 sps:$4 sm:$0xff]   ;;  %v2552_v30 = vld [vmem:[%s2898_s26 + $0x1ec] ss:$16 sps:$4 sm:$0xff]   ;;  %v2554_v31 = vld [vmem:[%s2898_s26 + $0x1e0] ss:$16 sps:$4 sm:$0xff]  }
  0x79   : > { %v2555_v32 = vld [vmem:[%s2898_s26 + $0x1e8] ss:$16 sps:$4 sm:$0xff]  }
  0x7a   : > { %2161 = vmatpush3.bf16.msra.mxu0 %v2458_v34 }
  0x7b   : > { %2273 = vmatpush3.bf16.msra.mxu1 %v2459_v35 }
  0x7d   : > { %1130 = vmatmul.mubr.bf16.vlgmr.msra.gmra.mrb[0].mxu0 %v2460_v33 }
  0x7e   : > { %1291 = vmatmul.mubr.bf16.vlgmr.msra.gmra.mrb[0].mxu1 %v2463_v36  ;;  %1137 = vmatprep.mubr.bf16.mxu0 %v2466_v37 }
  0x7f   : > { %1298 = vmatprep.mubr.bf16.mxu1 %v2468_v38 }
  0x85   : > { %1138 = vmatmul.mubr.bf16.gmra.mrb[4].mxu0 %v2470_v39 }
  0x86   : > { %1299 = vmatmul.mubr.bf16.gmra.mrb[4].mxu1 %v2471_v40  ;;  %1145 = vmatprep.mubr.bf16.mxu0 %v2472_v41 }
  0x87   : > { %1306 = vmatprep.mubr.bf16.mxu1 %v2474_v42  ;;  %v421_v42 = vld [vmem:[#allocation2] sm:$0xff] }
  0x8d   : > { %1146 = vmatmul.mubr.bf16.gmra.mrb[8].mxu0 %v2476_v43 }
  0x8e   : > { %1307 = vmatmul.mubr.bf16.gmra.mrb[8].mxu1 %v2477_v44  ;;  %1153 = vmatprep.mubr.bf16.mxu0 %v2478_v45 }
  0x8f   : > { %1314 = vmatprep.mubr.bf16.mxu1 %v2480_v46 }
  0x95   : > { %1154 = vmatmul.mubr.bf16.gmra.mrb[12].mxu0 %v2482_v47  ;;  %v422_v47 = vld [vmem:[#allocation2 + $0x8] sm:$0xff] }
  0x96   : > { %1315 = vmatmul.mubr.bf16.gmra.mrb[12].mxu1 %v2483_v48  ;;  %1161 = vmatprep.mubr.bf16.mxu0 %v2484_v49 }
  0x97   : > { %1322 = vmatprep.mubr.bf16.mxu1 %v2486_v50 }
  0x9d   : > { %1162 = vmatmul.mubr.bf16.gmra.mrb[16].mxu0 %v2488_v51 }
  0x9e   : > { %1323 = vmatmul.mubr.bf16.gmra.mrb[16].mxu1 %v2489_v52  ;;  %1169 = vmatprep.mubr.bf16.mxu0 %v2490_v53 }
  0x9f   : > { %1330 = vmatprep.mubr.bf16.mxu1 %v2492_v54 }
  0xa5   : > { %1170 = vmatmul.mubr.bf16.gmra.mrb[20].mxu0 %v2494_v55 }
  0xa6   : > { %1331 = vmatmul.mubr.bf16.gmra.mrb[20].mxu1 %v2495_v56  ;;  %1177 = vmatprep.mubr.bf16.mxu0 %v2496_v57 }
  0xa7   : > { %1338 = vmatprep.mubr.bf16.mxu1 %v2498_v58 }
  0xad   : > { %1178 = vmatmul.mubr.bf16.gmra.mrb[24].mxu0 %v2500_v59 }
  0xae   : > { %1339 = vmatmul.mubr.bf16.gmra.mrb[24].mxu1 %v2501_v60  ;;  %1185 = vmatprep.mubr.bf16.mxu0 %v2502_v61  ;;  %v423_v60 = vld [vmem:[#allocation2 + $0x10] sm:$0xff] }
  0xaf   : > { %1346 = vmatprep.mubr.bf16.mxu1 %v2504_v62 }
  0xb5   : > { %1186 = vmatmul.mubr.bf16.gmra.mrb[28].mxu0 %v2506_v63 }
  0xb6   : > { %1347 = vmatmul.mubr.bf16.gmra.mrb[28].mxu1 %v2507_v0  ;;  %1193 = vmatprep.mubr.bf16.mxu0 %v2508_v1  ;;  %v424_v1 = vld [vmem:[#allocation2 + $0x18] sm:$0xff] }
  0xb7   : > { %1354 = vmatprep.mubr.bf16.mxu1 %v2510_v2 }
  0xbd   : > { %1194 = vmatmul.mubr.bf16.gmra.mrb[32].mxu0 %v2512_v3 }
  0xbe   : > { %1355 = vmatmul.mubr.bf16.gmra.mrb[32].mxu1 %v2513_v4  ;;  %1201 = vmatprep.mubr.bf16.mxu0 %v2514_v5 }
  0xbf   : > { %1362 = vmatprep.mubr.bf16.mxu1 %v2516_v6 }
  0xc5   : > { %1202 = vmatmul.mubr.bf16.gmra.mrb[36].mxu0 %v2518_v7 }
  0xc6   : > { %1363 = vmatmul.mubr.bf16.gmra.mrb[36].mxu1 %v2519_v8  ;;  %1209 = vmatprep.mubr.bf16.mxu0 %v2520_v9 }
  0xc7   : > { %1370 = vmatprep.mubr.bf16.mxu1 %v2522_v10 }
  0xcd   : > { %1210 = vmatmul.mubr.bf16.gmra.mrb[40].mxu0 %v2524_v11 }
  0xce   : > { %1371 = vmatmul.mubr.bf16.gmra.mrb[40].mxu1 %v2525_v12  ;;  %1217 = vmatprep.mubr.bf16.mxu0 %v2526_v13 }
  0xcf   : > { %1378 = vmatprep.mubr.bf16.mxu1 %v2528_v14  ;;  %v425_v14 = vld [vmem:[#allocation2 + $0x20] sm:$0xff] }
  0xd5   : > { %1218 = vmatmul.mubr.bf16.gmra.mrb[44].mxu0 %v2530_v15 }
  0xd6   : > { %1379 = vmatmul.mubr.bf16.gmra.mrb[44].mxu1 %v2531_v16  ;;  %1225 = vmatprep.mubr.bf16.mxu0 %v2532_v17 }
  0xd7   : > { %1386 = vmatprep.mubr.bf16.mxu1 %v2534_v18 }
  0xdd   : > { %1226 = vmatmul.mubr.bf16.gmra.mrb[48].mxu0 %v2536_v19  ;;  %v426_v19 = vld [vmem:[#allocation2 + $0x28] sm:$0xff] }
  0xde   : > { %1387 = vmatmul.mubr.bf16.gmra.mrb[48].mxu1 %v2537_v20  ;;  %1233 = vmatprep.mubr.bf16.mxu0 %v2538_v21 }
  0xdf   : > { %1394 = vmatprep.mubr.bf16.mxu1 %v2540_v22 }
  0xe5   : > { %1234 = vmatmul.mubr.bf16.gmra.mrb[52].mxu0 %v2542_v23 }
  0xe6   : > { %1395 = vmatmul.mubr.bf16.gmra.mrb[52].mxu1 %v2543_v24  ;;  %1241 = vmatprep.mubr.bf16.mxu0 %v2544_v25 }
  0xe7   : > { %1402 = vmatprep.mubr.bf16.mxu1 %v2546_v26 }
  0xed   : > { %1242 = vmatmul.mubr.bf16.gmra.mrb[56].mxu0 %v2548_v27 }
  0xee   : > { %1403 = vmatmul.mubr.bf16.gmra.mrb[56].mxu1 %v2549_v28  ;;  %1249 = vmatprep.mubr.bf16.mxu0 %v2550_v29 }
  0xef   : > { %1410 = vmatprep.mubr.bf16.mxu1 %v2552_v30 }
  0xf5   : > { %1250 = vmatmul.mubr.bf16.gmra.mrb[60].mxu0 %v2554_v31 }
  0xf6   : > { %1411 = vmatmul.mubr.bf16.gmra.mrb[60].mxu1 %v2555_v32  ;;  %v427_v32 = vld [vmem:[#allocation2 + $0x30] sm:$0xff] }
 0x150   : > { %v2162_v33 = vpop.f32.mrb[0].mxu0 }
 0x151   : > { %v2274_v34 = vpop.f32.mrb[0].mxu1  ;;  %v2163_v35 = vpop.f32.mrb[1].mxu0 }
 0x152   : > { %v2164_v36 = vadd.f32 %v2163_v35, %v2162_v33  ;;  %v2275_v37 = vpop.f32.mrb[1].mxu1  ;;  %v2165_v38 = vpop.f32.mrb[2].mxu0 }
 0x153   : > { %v2276_v39 = vadd.f32 %v2275_v37, %v2274_v34  ;;  %v2277_v40 = vpop.f32.mrb[2].mxu1  ;;  %v2166_v41 = vpop.f32.mrb[3].mxu0  ;;  %v428_v37 = vld [vmem:[#allocation2 + $0x38] sm:$0xff] }
 0x154   : > { %v2167_v43 = vadd.f32 %v2166_v41, %v2165_v38  ;;  %v2278_v44 = vpop.f32.mrb[3].mxu1 }
 0x155   : > { %v1293_v45 = vadd.f32 %v2276_v39, %v2164_v36  ;;  %v2279_v46 = vadd.f32 %v2278_v44, %v2277_v40 }
 0x157   : > { %v1419_v48 = vadd.f32 %v1293_v45, %v421_v42  ;;  %v1296_v49 = vadd.f32 %v2279_v46, %v2167_v43 }
 0x158   : > { %v2168_v50 = vpop.f32.mrb[4].mxu0 }
 0x159   : > { %1451 = vst [vmem:[#allocation2] sm:$0xff] %v1419_v48  ;;  %v1420_v51 = vadd.f32 %v1296_v49, %v422_v47  ;;  %v2280_v52 = vpop.f32.mrb[4].mxu1  ;;  %v2169_v53 = vpop.f32.mrb[5].mxu0 }
 0x15a   : > { %v2170_v54 = vadd.f32 %v2169_v53, %v2168_v50  ;;  %v2281_v55 = vpop.f32.mrb[5].mxu1  ;;  %v2171_v56 = vpop.f32.mrb[6].mxu0  ;;  %v429_v50 = vld [vmem:[#allocation2 + $0x40] sm:$0xff] }
 0x15b   : > { %1452 = vst [vmem:[#allocation2 + $0x8] sm:$0xff] %v1420_v51  ;;  %v2282_v57 = vadd.f32 %v2281_v55, %v2280_v52  ;;  %v2283_v58 = vpop.f32.mrb[6].mxu1  ;;  %v2172_v59 = vpop.f32.mrb[7].mxu0  ;;  %v430_v55 = vld [vmem:[#allocation2 + $0x48] sm:$0xff] }
 0x15c   : > { %v2173_v61 = vadd.f32 %v2172_v59, %v2171_v56  ;;  %v2284_v62 = vpop.f32.mrb[7].mxu1 }
 0x15d   : > { %v1301_v63 = vadd.f32 %v2282_v57, %v2170_v54  ;;  %v2285_v0 = vadd.f32 %v2284_v62, %v2283_v58 }
 0x15f   : > { %v1421_v2 = vadd.f32 %v1301_v63, %v423_v60  ;;  %v1304_v3 = vadd.f32 %v2285_v0, %v2173_v61 }
 0x160   : > { %v2174_v4 = vpop.f32.mrb[8].mxu0 }
 0x161   : > { %1453 = vst [vmem:[#allocation2 + $0x10] sm:$0xff] %v1421_v2  ;;  %v1422_v5 = vadd.f32 %v1304_v3, %v424_v1  ;;  %v2286_v6 = vpop.f32.mrb[8].mxu1  ;;  %v2175_v7 = vpop.f32.mrb[9].mxu0 }
 0x162   : > { %v2176_v8 = vadd.f32 %v2175_v7, %v2174_v4  ;;  %v2287_v9 = vpop.f32.mrb[9].mxu1  ;;  %v2177_v10 = vpop.f32.mrb[10].mxu0  ;;  %v431_v4 = vld [vmem:[#allocation2 + $0x50] sm:$0xff] }
 0x163   : > { %1454 = vst [vmem:[#allocation2 + $0x18] sm:$0xff] %v1422_v5  ;;  %v2288_v11 = vadd.f32 %v2287_v9, %v2286_v6  ;;  %v2289_v12 = vpop.f32.mrb[10].mxu1  ;;  %v2178_v13 = vpop.f32.mrb[11].mxu0  ;;  %v432_v9 = vld [vmem:[#allocation2 + $0x58] sm:$0xff] }
 0x164   : > { %v2179_v15 = vadd.f32 %v2178_v13, %v2177_v10  ;;  %v2290_v16 = vpop.f32.mrb[11].mxu1 }
 0x165   : > { %v1309_v17 = vadd.f32 %v2288_v11, %v2176_v8  ;;  %v2291_v18 = vadd.f32 %v2290_v16, %v2289_v12 }
 0x167   : > { %v1423_v20 = vadd.f32 %v1309_v17, %v425_v14  ;;  %v1312_v21 = vadd.f32 %v2291_v18, %v2179_v15 }
 0x168   : > { %v2180_v22 = vpop.f32.mrb[12].mxu0 }
 0x169   : > { %1455 = vst [vmem:[#allocation2 + $0x20] sm:$0xff] %v1423_v20  ;;  %v1424_v23 = vadd.f32 %v1312_v21, %v426_v19  ;;  %v2292_v24 = vpop.f32.mrb[12].mxu1  ;;  %v2181_v25 = vpop.f32.mrb[13].mxu0 }
 0x16a   : > { %v2182_v26 = vadd.f32 %v2181_v25, %v2180_v22  ;;  %v2293_v27 = vpop.f32.mrb[13].mxu1  ;;  %v2183_v28 = vpop.f32.mrb[14].mxu0  ;;  %v433_v22 = vld [vmem:[#allocation2 + $0x60] sm:$0xff] }
 0x16b   : > { %1456 = vst [vmem:[#allocation2 + $0x28] sm:$0xff] %v1424_v23  ;;  %v2294_v29 = vadd.f32 %v2293_v27, %v2292_v24  ;;  %v2295_v30 = vpop.f32.mrb[14].mxu1  ;;  %v2184_v31 = vpop.f32.mrb[15].mxu0  ;;  %v434_v27 = vld [vmem:[#allocation2 + $0x68] sm:$0xff] }
 0x16c   : > { %v2185_v33 = vadd.f32 %v2184_v31, %v2183_v28  ;;  %v2296_v34 = vpop.f32.mrb[15].mxu1 }
 0x16d   : > { %v1317_v35 = vadd.f32 %v2294_v29, %v2182_v26  ;;  %v2297_v36 = vadd.f32 %v2296_v34, %v2295_v30 }
 0x16f   : > { %v1425_v38 = vadd.f32 %v1317_v35, %v427_v32  ;;  %v1320_v39 = vadd.f32 %v2297_v36, %v2185_v33 }
 0x170   : > { %v2186_v40 = vpop.f32.mrb[16].mxu0 }
 0x171   : > { %1457 = vst [vmem:[#allocation2 + $0x30] sm:$0xff] %v1425_v38  ;;  %v1426_v41 = vadd.f32 %v1320_v39, %v428_v37  ;;  %v2298_v42 = vpop.f32.mrb[16].mxu1  ;;  %v2187_v43 = vpop.f32.mrb[17].mxu0 }
 0x172   : > { %v2188_v44 = vadd.f32 %v2187_v43, %v2186_v40  ;;  %v2299_v45 = vpop.f32.mrb[17].mxu1  ;;  %v2189_v46 = vpop.f32.mrb[18].mxu0  ;;  %v435_v40 = vld [vmem:[#allocation2 + $0x70] sm:$0xff] }
 0x173   : > { %1458 = vst [vmem:[#allocation2 + $0x38] sm:$0xff] %v1426_v41  ;;  %v2300_v47 = vadd.f32 %v2299_v45, %v2298_v42  ;;  %v2301_v48 = vpop.f32.mrb[18].mxu1  ;;  %v2190_v49 = vpop.f32.mrb[19].mxu0  ;;  %v436_v45 = vld [vmem:[#allocation2 + $0x78] sm:$0xff] }
 0x174   : > { %v2191_v51 = vadd.f32 %v2190_v49, %v2189_v46  ;;  %v2302_v52 = vpop.f32.mrb[19].mxu1 }
 0x175   : > { %v1325_v53 = vadd.f32 %v2300_v47, %v2188_v44  ;;  %v2303_v54 = vadd.f32 %v2302_v52, %v2301_v48 }
 0x177   : > { %v1427_v56 = vadd.f32 %v1325_v53, %v429_v50  ;;  %v1328_v57 = vadd.f32 %v2303_v54, %v2191_v51 }
 0x178   : > { %v2192_v58 = vpop.f32.mrb[20].mxu0 }
 0x179   : > { %1459 = vst [vmem:[#allocation2 + $0x40] sm:$0xff] %v1427_v56  ;;  %v1428_v59 = vadd.f32 %v1328_v57, %v430_v55  ;;  %v2304_v60 = vpop.f32.mrb[20].mxu1  ;;  %v2193_v61 = vpop.f32.mrb[21].mxu0 }
 0x17a   : > { %v2194_v62 = vadd.f32 %v2193_v61, %v2192_v58  ;;  %v2305_v63 = vpop.f32.mrb[21].mxu1  ;;  %v2195_v0 = vpop.f32.mrb[22].mxu0  ;;  %v437_v58 = vld [vmem:[#allocation2 + $0x80] sm:$0xff] }
 0x17b   : > { %1460 = vst [vmem:[#allocation2 + $0x48] sm:$0xff] %v1428_v59  ;;  %v2306_v1 = vadd.f32 %v2305_v63, %v2304_v60  ;;  %v2307_v2 = vpop.f32.mrb[22].mxu1  ;;  %v2196_v3 = vpop.f32.mrb[23].mxu0  ;;  %v438_v63 = vld [vmem:[#allocation2 + $0x88] sm:$0xff] }
 0x17c   : > { %v2197_v5 = vadd.f32 %v2196_v3, %v2195_v0  ;;  %v2308_v6 = vpop.f32.mrb[23].mxu1 }
 0x17d   : > { %v1333_v7 = vadd.f32 %v2306_v1, %v2194_v62  ;;  %v2309_v8 = vadd.f32 %v2308_v6, %v2307_v2 }
 0x17f   : > { %v1429_v10 = vadd.f32 %v1333_v7, %v431_v4  ;;  %v1336_v11 = vadd.f32 %v2309_v8, %v2197_v5 }
 0x180   : > { %v2198_v12 = vpop.f32.mrb[24].mxu0 }
 0x181   : > { %1461 = vst [vmem:[#allocation2 + $0x50] sm:$0xff] %v1429_v10  ;;  %v1430_v13 = vadd.f32 %v1336_v11, %v432_v9  ;;  %v2310_v14 = vpop.f32.mrb[24].mxu1  ;;  %v2199_v15 = vpop.f32.mrb[25].mxu0 }
 0x182   : > { %v2200_v16 = vadd.f32 %v2199_v15, %v2198_v12  ;;  %v2311_v17 = vpop.f32.mrb[25].mxu1  ;;  %v2201_v18 = vpop.f32.mrb[26].mxu0  ;;  %v439_v12 = vld [vmem:[#allocation2 + $0x90] sm:$0xff] }
 0x183   : > { %1462 = vst [vmem:[#allocation2 + $0x58] sm:$0xff] %v1430_v13  ;;  %v2312_v19 = vadd.f32 %v2311_v17, %v2310_v14  ;;  %v2313_v20 = vpop.f32.mrb[26].mxu1  ;;  %v2202_v21 = vpop.f32.mrb[27].mxu0  ;;  %v440_v17 = vld [vmem:[#allocation2 + $0x98] sm:$0xff] }
 0x184   : > { %v2203_v23 = vadd.f32 %v2202_v21, %v2201_v18  ;;  %v2314_v24 = vpop.f32.mrb[27].mxu1 }
 0x185   : > { %v1341_v25 = vadd.f32 %v2312_v19, %v2200_v16  ;;  %v2315_v26 = vadd.f32 %v2314_v24, %v2313_v20 }
 0x187   : > { %v1431_v28 = vadd.f32 %v1341_v25, %v433_v22  ;;  %v1344_v29 = vadd.f32 %v2315_v26, %v2203_v23 }
 0x188   : > { %v2204_v30 = vpop.f32.mrb[28].mxu0 }
 0x189   : > { %1463 = vst [vmem:[#allocation2 + $0x60] sm:$0xff] %v1431_v28  ;;  %v1432_v31 = vadd.f32 %v1344_v29, %v434_v27  ;;  %v2316_v32 = vpop.f32.mrb[28].mxu1  ;;  %v2205_v33 = vpop.f32.mrb[29].mxu0 }
 0x18a   : > { %v2206_v34 = vadd.f32 %v2205_v33, %v2204_v30  ;;  %v2317_v35 = vpop.f32.mrb[29].mxu1  ;;  %v2207_v36 = vpop.f32.mrb[30].mxu0  ;;  %v441_v30 = vld [vmem:[#allocation2 + $0xa0] sm:$0xff] }
 0x18b   : > { %1464 = vst [vmem:[#allocation2 + $0x68] sm:$0xff] %v1432_v31  ;;  %v2318_v37 = vadd.f32 %v2317_v35, %v2316_v32  ;;  %v2319_v38 = vpop.f32.mrb[30].mxu1  ;;  %v2208_v39 = vpop.f32.mrb[31].mxu0  ;;  %v442_v35 = vld [vmem:[#allocation2 + $0xa8] sm:$0xff] }
 0x18c   : > { %v2209_v41 = vadd.f32 %v2208_v39, %v2207_v36  ;;  %v2320_v42 = vpop.f32.mrb[31].mxu1 }
 0x18d   : > { %v1349_v43 = vadd.f32 %v2318_v37, %v2206_v34  ;;  %v2321_v44 = vadd.f32 %v2320_v42, %v2319_v38 }
 0x18f   : > { %v1433_v46 = vadd.f32 %v1349_v43, %v435_v40  ;;  %v1352_v47 = vadd.f32 %v2321_v44, %v2209_v41 }
 0x190   : > { %v2210_v48 = vpop.f32.mrb[32].mxu0 }
 0x191   : > { %1465 = vst [vmem:[#allocation2 + $0x70] sm:$0xff] %v1433_v46  ;;  %v1434_v49 = vadd.f32 %v1352_v47, %v436_v45  ;;  %v2322_v50 = vpop.f32.mrb[32].mxu1  ;;  %v2211_v51 = vpop.f32.mrb[33].mxu0 }
 0x192   : > { %v2212_v52 = vadd.f32 %v2211_v51, %v2210_v48  ;;  %v2323_v53 = vpop.f32.mrb[33].mxu1  ;;  %v2213_v54 = vpop.f32.mrb[34].mxu0  ;;  %v443_v48 = vld [vmem:[#allocation2 + $0xb0] sm:$0xff] }
 0x193   : > { %1466 = vst [vmem:[#allocation2 + $0x78] sm:$0xff] %v1434_v49  ;;  %v2324_v55 = vadd.f32 %v2323_v53, %v2322_v50  ;;  %v2325_v56 = vpop.f32.mrb[34].mxu1  ;;  %v2214_v57 = vpop.f32.mrb[35].mxu0  ;;  %v444_v53 = vld [vmem:[#allocation2 + $0xb8] sm:$0xff] }
 0x194   : > { %v2215_v59 = vadd.f32 %v2214_v57, %v2213_v54  ;;  %v2326_v60 = vpop.f32.mrb[35].mxu1 }
 0x195   : > { %v1357_v61 = vadd.f32 %v2324_v55, %v2212_v52  ;;  %v2327_v62 = vadd.f32 %v2326_v60, %v2325_v56 }
 0x197   : > { %v1435_v0 = vadd.f32 %v1357_v61, %v437_v58  ;;  %v1360_v1 = vadd.f32 %v2327_v62, %v2215_v59 }
 0x198   : > { %v2216_v2 = vpop.f32.mrb[36].mxu0 }
 0x199   : > { %1467 = vst [vmem:[#allocation2 + $0x80] sm:$0xff] %v1435_v0  ;;  %v1436_v3 = vadd.f32 %v1360_v1, %v438_v63  ;;  %v2328_v4 = vpop.f32.mrb[36].mxu1  ;;  %v2217_v5 = vpop.f32.mrb[37].mxu0 }
 0x19a   : > { %v2218_v6 = vadd.f32 %v2217_v5, %v2216_v2  ;;  %v2329_v7 = vpop.f32.mrb[37].mxu1  ;;  %v2219_v8 = vpop.f32.mrb[38].mxu0  ;;  %v445_v2 = vld [vmem:[#allocation2 + $0xc0] sm:$0xff] }
 0x19b   : > { %1468 = vst [vmem:[#allocation2 + $0x88] sm:$0xff] %v1436_v3  ;;  %v2330_v9 = vadd.f32 %v2329_v7, %v2328_v4  ;;  %v2331_v10 = vpop.f32.mrb[38].mxu1  ;;  %v2220_v11 = vpop.f32.mrb[39].mxu0  ;;  %v446_v7 = vld [vmem:[#allocation2 + $0xc8] sm:$0xff] }
 0x19c   : > { %v2221_v13 = vadd.f32 %v2220_v11, %v2219_v8  ;;  %v2332_v14 = vpop.f32.mrb[39].mxu1 }
 0x19d   : > { %v1365_v15 = vadd.f32 %v2330_v9, %v2218_v6  ;;  %v2333_v16 = vadd.f32 %v2332_v14, %v2331_v10 }
 0x19f   : > { %v1437_v18 = vadd.f32 %v1365_v15, %v439_v12  ;;  %v1368_v19 = vadd.f32 %v2333_v16, %v2221_v13 }
 0x1a0   : > { %v2222_v20 = vpop.f32.mrb[40].mxu0 }
 0x1a1   : > { %1469 = vst [vmem:[#allocation2 + $0x90] sm:$0xff] %v1437_v18  ;;  %v1438_v21 = vadd.f32 %v1368_v19, %v440_v17  ;;  %v2334_v22 = vpop.f32.mrb[40].mxu1  ;;  %v2223_v23 = vpop.f32.mrb[41].mxu0 }
 0x1a2   : > { %v2224_v24 = vadd.f32 %v2223_v23, %v2222_v20  ;;  %v2335_v25 = vpop.f32.mrb[41].mxu1  ;;  %v2225_v26 = vpop.f32.mrb[42].mxu0  ;;  %v447_v20 = vld [vmem:[#allocation2 + $0xd0] sm:$0xff] }
 0x1a3   : > { %1470 = vst [vmem:[#allocation2 + $0x98] sm:$0xff] %v1438_v21  ;;  %v2336_v27 = vadd.f32 %v2335_v25, %v2334_v22  ;;  %v2337_v28 = vpop.f32.mrb[42].mxu1  ;;  %v2226_v29 = vpop.f32.mrb[43].mxu0  ;;  %v448_v25 = vld [vmem:[#allocation2 + $0xd8] sm:$0xff] }
 0x1a4   : > { %v2227_v31 = vadd.f32 %v2226_v29, %v2225_v26  ;;  %v2338_v32 = vpop.f32.mrb[43].mxu1 }
 0x1a5   : > { %v1373_v33 = vadd.f32 %v2336_v27, %v2224_v24  ;;  %v2339_v34 = vadd.f32 %v2338_v32, %v2337_v28 }
 0x1a7   : > { %v1439_v36 = vadd.f32 %v1373_v33, %v441_v30  ;;  %v1376_v37 = vadd.f32 %v2339_v34, %v2227_v31 }
 0x1a8   : > { %v2228_v38 = vpop.f32.mrb[44].mxu0 }
 0x1a9   : > { %1471 = vst [vmem:[#allocation2 + $0xa0] sm:$0xff] %v1439_v36  ;;  %v1440_v39 = vadd.f32 %v1376_v37, %v442_v35  ;;  %v2340_v40 = vpop.f32.mrb[44].mxu1  ;;  %v2229_v41 = vpop.f32.mrb[45].mxu0 }
 0x1aa   : > { %v2230_v42 = vadd.f32 %v2229_v41, %v2228_v38  ;;  %v2341_v43 = vpop.f32.mrb[45].mxu1  ;;  %v2231_v44 = vpop.f32.mrb[46].mxu0  ;;  %v449_v38 = vld [vmem:[#allocation2 + $0xe0] sm:$0xff] }
 0x1ab   : > { %1472 = vst [vmem:[#allocation2 + $0xa8] sm:$0xff] %v1440_v39  ;;  %v2342_v45 = vadd.f32 %v2341_v43, %v2340_v40  ;;  %v2343_v46 = vpop.f32.mrb[46].mxu1  ;;  %v2232_v47 = vpop.f32.mrb[47].mxu0  ;;  %v450_v43 = vld [vmem:[#allocation2 + $0xe8] sm:$0xff] }
 0x1ac   : > { %v2233_v49 = vadd.f32 %v2232_v47, %v2231_v44  ;;  %v2344_v50 = vpop.f32.mrb[47].mxu1 }
 0x1ad   : > { %v1381_v51 = vadd.f32 %v2342_v45, %v2230_v42  ;;  %v2345_v52 = vadd.f32 %v2344_v50, %v2343_v46 }
 0x1af   : > { %v1441_v54 = vadd.f32 %v1381_v51, %v443_v48  ;;  %v1384_v55 = vadd.f32 %v2345_v52, %v2233_v49 }
 0x1b0   : > { %v2234_v56 = vpop.f32.mrb[48].mxu0 }
 0x1b1   : > { %1473 = vst [vmem:[#allocation2 + $0xb0] sm:$0xff] %v1441_v54  ;;  %v1442_v57 = vadd.f32 %v1384_v55, %v444_v53  ;;  %v2346_v58 = vpop.f32.mrb[48].mxu1  ;;  %v2235_v59 = vpop.f32.mrb[49].mxu0 }
 0x1b2   : > { %v2236_v60 = vadd.f32 %v2235_v59, %v2234_v56  ;;  %v2347_v61 = vpop.f32.mrb[49].mxu1  ;;  %v2237_v62 = vpop.f32.mrb[50].mxu0  ;;  %v451_v56 = vld [vmem:[#allocation2 + $0xf0] sm:$0xff] }
 0x1b3   : > { %1474 = vst [vmem:[#allocation2 + $0xb8] sm:$0xff] %v1442_v57  ;;  %v2348_v63 = vadd.f32 %v2347_v61, %v2346_v58  ;;  %v2349_v0 = vpop.f32.mrb[50].mxu1  ;;  %v2238_v1 = vpop.f32.mrb[51].mxu0  ;;  %v452_v61 = vld [vmem:[#allocation2 + $0xf8] sm:$0xff] }
 0x1b4   : > { %v2239_v3 = vadd.f32 %v2238_v1, %v2237_v62  ;;  %v2350_v4 = vpop.f32.mrb[51].mxu1  ;;  %v1487_v1 = vld [vmem:[#allocation2] sm:$0xff] (!%p1983_p12) }
 0x1b5   : > { %v1389_v5 = vadd.f32 %v2348_v63, %v2236_v60  ;;  %v2351_v6 = vadd.f32 %v2350_v4, %v2349_v0 }
 0x1b7   : > { %v1443_v8 = vadd.f32 %v1389_v5, %v445_v2  ;;  %v1392_v9 = vadd.f32 %v2351_v6, %v2239_v3  ;;  %v1488_v2 = vld [vmem:[#allocation2 + $0x8] sm:$0xff] (!%p1983_p12)  ;;  %v3007_v3 = vld [vmem:[%s3080_s2] ss:$0 sm:$0xff] (!%p1983_p12)  ;;  %v1489_v6 = vld [vmem:[#allocation2 + $0x10] sm:$0xff] (!%p1983_p12) }
 0x1b8   : > { %v2240_v10 = vpop.f32.mrb[52].mxu0  ;;  %v1526_v4 = vadd.f32 (!%p1983_p12), %v3007_v3, %v1487_v1  ;;  %v1527_v5 = vadd.f32 (!%p1983_p12), %v3007_v3, %v1488_v2 }
 0x1b9   : > { %1475 = vst [vmem:[#allocation2 + $0xc0] sm:$0xff] %v1443_v8  ;;  %v1444_v11 = vadd.f32 %v1392_v9, %v446_v7  ;;  %v2352_v12 = vpop.f32.mrb[52].mxu1  ;;  %v2241_v13 = vpop.f32.mrb[53].mxu0  ;;  %v1490_v7 = vld [vmem:[#allocation2 + $0x18] sm:$0xff] (!%p1983_p12)  ;;  %v1491_v8 = vld [vmem:[#allocation2 + $0x20] sm:$0xff] (!%p1983_p12)  ;;  %v1528_v9 = vadd.f32 (!%p1983_p12), %v3007_v3, %v1489_v6 }
 0x1ba   : > { %v2242_v14 = vadd.f32 %v2241_v13, %v2240_v10  ;;  %v2353_v15 = vpop.f32.mrb[53].mxu1  ;;  %v2243_v16 = vpop.f32.mrb[54].mxu0  ;;  %v1529_v10 = vadd.f32 (!%p1983_p12), %v3007_v3, %v1490_v7  ;;  %2556 = vtanh.f32 (!%p1983_p12), %v1526_v4  ;;  %v1530_v13 = vadd.f32 (!%p1983_p12), %v3007_v3, %v1491_v8 }
 0x1bb   : > { %1476 = vst [vmem:[#allocation2 + $0xc8] sm:$0xff] %v1444_v11  ;;  %v2354_v17 = vadd.f32 %v2353_v15, %v2352_v12  ;;  %v2355_v18 = vpop.f32.mrb[54].mxu1  ;;  %v2244_v19 = vpop.f32.mrb[55].mxu0  ;;  %v1492_v11 = vld [vmem:[#allocation2 + $0x28] sm:$0xff] (!%p1983_p12)  ;;  %v1493_v12 = vld [vmem:[#allocation2 + $0x30] sm:$0xff] (!%p1983_p12)  ;;  %2558 = vtanh.f32 (!%p1983_p12), %v1527_v5 }
 0x1bc   : > { %v2245_v21 = vadd.f32 %v2244_v19, %v2243_v16  ;;  %v2356_v22 = vpop.f32.mrb[55].mxu1  ;;  %v1531_v15 = vadd.f32 (!%p1983_p12), %v3007_v3, %v1492_v11  ;;  %v1495_v16 = vld [vmem:[#allocation2 + $0x40] sm:$0xff] (!%p1983_p12)  ;;  %2560 = vtanh.f32 (!%p1983_p12), %v1528_v9 }
 0x1bd   : > { %v1397_v23 = vadd.f32 %v2354_v17, %v2242_v14  ;;  %v2357_v24 = vadd.f32 %v2356_v22, %v2355_v18  ;;  %v1494_v14 = vld [vmem:[#allocation2 + $0x38] sm:$0xff] (!%p1983_p12)  ;;  %v1532_v17 = vadd.f32 (!%p1983_p12), %v3007_v3, %v1493_v12  ;;  %v1496_v18 = vld [vmem:[#allocation2 + $0x48] sm:$0xff] (!%p1983_p12)  ;;  %2562 = vtanh.f32 (!%p1983_p12), %v1529_v10 }
 0x1be   : > { %v1533_v19 = vadd.f32 (!%p1983_p12), %v3007_v3, %v1494_v14  ;;  %2564 = vtanh.f32 (!%p1983_p12), %v1530_v13  ;;  %v1498_v22 = vld [vmem:[#allocation2 + $0x58] sm:$0xff] (!%p1983_p12) }
 0x1bf   : > { %v1445_v26 = vadd.f32 %v1397_v23, %v447_v20  ;;  %v1400_v27 = vadd.f32 %v2357_v24, %v2245_v21  ;;  %v1497_v20 = vld [vmem:[#allocation2 + $0x50] sm:$0xff] (!%p1983_p12)  ;;  %v1534_v21 = vadd.f32 (!%p1983_p12), %v3007_v3, %v1495_v16  ;;  %2566 = vtanh.f32 (!%p1983_p12), %v1531_v15  ;;  %v1499_v24 = vld [vmem:[#allocation2 + $0x60] sm:$0xff] (!%p1983_p12) }
 0x1c0   : > { %v2246_v28 = vpop.f32.mrb[56].mxu0  ;;  %v1535_v23 = vadd.f32 (!%p1983_p12), %v3007_v3, %v1496_v18  ;;  %2568 = vtanh.f32 (!%p1983_p12), %v1532_v17 }
 0x1c1   : > { %1477 = vst [vmem:[#allocation2 + $0xd0] sm:$0xff] %v1445_v26  ;;  %v1446_v29 = vadd.f32 %v1400_v27, %v448_v25  ;;  %v2358_v30 = vpop.f32.mrb[56].mxu1  ;;  %v2247_v31 = vpop.f32.mrb[57].mxu0  ;;  %v1536_v25 = vadd.f32 (!%p1983_p12), %v3007_v3, %v1497_v20  ;;  %v1500_v26 = vld [vmem:[#allocation2 + $0x68] sm:$0xff] (!%p1983_p12)  ;;  %2570 = vtanh.f32 (!%p1983_p12), %v1533_v19  ;;  %v1537_v27 = vadd.f32 (!%p1983_p12), %v3007_v3, %v1498_v22 }
 0x1c2   : > { %v2248_v32 = vadd.f32 %v2247_v31, %v2246_v28  ;;  %v2359_v33 = vpop.f32.mrb[57].mxu1  ;;  %v2249_v34 = vpop.f32.mrb[58].mxu0  ;;  %v1501_v28 = vld [vmem:[#allocation2 + $0x70] sm:$0xff] (!%p1983_p12)  ;;  %2572 = vtanh.f32 (!%p1983_p12), %v1534_v21  ;;  %v1539_v31 = vadd.f32 (!%p1983_p12), %v3007_v3, %v1500_v26 }
 0x1c3   : > { %1478 = vst [vmem:[#allocation2 + $0xd8] sm:$0xff] %v1446_v29  ;;  %v2360_v35 = vadd.f32 %v2359_v33, %v2358_v30  ;;  %v2361_v36 = vpop.f32.mrb[58].mxu1  ;;  %v2250_v37 = vpop.f32.mrb[59].mxu0  ;;  %v1538_v29 = vadd.f32 (!%p1983_p12), %v3007_v3, %v1499_v24  ;;  %v1502_v30 = vld [vmem:[#allocation2 + $0x78] sm:$0xff] (!%p1983_p12)  ;;  %2574 = vtanh.f32 (!%p1983_p12), %v1535_v23 }
 0x1c4   : > { %v2251_v39 = vadd.f32 %v2250_v37, %v2249_v34  ;;  %v2362_v40 = vpop.f32.mrb[59].mxu1  ;;  %v2557_v33 = vpop.eup (!%p1983_p12), %2556  ;;  %2576 = vtanh.f32 (!%p1983_p12), %v1536_v25  ;;  %v1540_v34 = vadd.f32 (!%p1983_p12), %v3007_v3, %v1501_v28  ;;  %v1541_v37 = vadd.f32 (!%p1983_p12), %v3007_v3, %v1502_v30 }
 0x1c5   : > { %v1405_v41 = vadd.f32 %v2360_v35, %v2248_v32  ;;  %v2363_v42 = vadd.f32 %v2362_v40, %v2361_v36  ;;  %v1503_v32 = vld [vmem:[#allocation2 + $0x80] sm:$0xff] (!%p1983_p12)  ;;  %v1504_v35 = vld [vmem:[#allocation2 + $0x88] sm:$0xff] (!%p1983_p12)  ;;  %v2559_v36 = vpop.eup (!%p1983_p12), %2558  ;;  %2578 = vtanh.f32 (!%p1983_p12), %v1537_v27 }
 0x1c6   : > { %v2054_v40 = vpack.c.bf16 (!%p1983_p12), %v2559_v36, %v2557_v33  ;;  %2580 = vtanh.f32 (!%p1983_p12), %v1538_v29 }
 0x1c7   : > { %v1447_v44 = vadd.f32 %v1405_v41, %v449_v38  ;;  %v1408_v45 = vadd.f32 %v2363_v42, %v2251_v39  ;;  %v1505_v38 = vld [vmem:[#allocation2 + $0x90] sm:$0xff] (!%p1983_p12)  ;;  %v2561_v39 = vpop.eup (!%p1983_p12), %2560  ;;  %v1542_v41 = vadd.f32 (!%p1983_p12), %v3007_v3, %v1503_v32  ;;  %v1506_v42 = vld [vmem:[#allocation2 + $0x98] sm:$0xff] (!%p1983_p12)  ;;  %2582 = vtanh.f32 (!%p1983_p12), %v1539_v31 }
 0x1c8   : > { %v2252_v46 = vpop.f32.mrb[60].mxu0  ;;  %2055 = vst [vmem:[%s2896_s24] sm:$0xff] (!%p1983_p12), %v2054_v40   ;;  %2584 = vtanh.f32 (!%p1983_p12), %v1540_v34  ;;  %v1513_v2 = vld [vmem:[#allocation2 + $0xd0] sm:$0xff] (!%p1983_p12) }
 0x1c9   : > { %1479 = vst [vmem:[#allocation2 + $0xe0] sm:$0xff] %v1447_v44  ;;  %v1448_v47 = vadd.f32 %v1408_v45, %v450_v43  ;;  %v2364_v48 = vpop.f32.mrb[60].mxu1  ;;  %v2253_v49 = vpop.f32.mrb[61].mxu0  ;;  %v1543_v44 = vadd.f32 (!%p1983_p12), %v3007_v3, %v1504_v35  ;;  %v1507_v45 = vld [vmem:[#allocation2 + $0xa0] sm:$0xff] (!%p1983_p12)  ;;  %2586 = vtanh.f32 (!%p1983_p12), %v1541_v37  ;;  %v1552_v13 = vadd.f32 (!%p1983_p12), %v3007_v3, %v1513_v2 }
 0x1ca   : > { %v2254_v50 = vadd.f32 %v2253_v49, %v2252_v46  ;;  %v2365_v51 = vpop.f32.mrb[61].mxu1  ;;  %v2255_v52 = vpop.f32.mrb[62].mxu0  ;;  %v1508_v49 = vld [vmem:[#allocation2 + $0xa8] sm:$0xff] (!%p1983_p12)  ;;  %2588 = vtanh.f32 (!%p1983_p12), %v1542_v41  ;;  %v1514_v7 = vld [vmem:[#allocation2 + $0xd8] sm:$0xff] (!%p1983_p12) }
 0x1cb   : > { %1480 = vst [vmem:[#allocation2 + $0xe8] sm:$0xff] %v1448_v47  ;;  %v2366_v53 = vadd.f32 %v2365_v51, %v2364_v48  ;;  %v2367_v54 = vpop.f32.mrb[62].mxu1  ;;  %v2256_v55 = vpop.f32.mrb[63].mxu0  ;;  %v1544_v48 = vadd.f32 (!%p1983_p12), %v3007_v3, %v1505_v38  ;;  %v1545_v51 = vadd.f32 (!%p1983_p12), %v3007_v3, %v1506_v42  ;;  %2590 = vtanh.f32 (!%p1983_p12), %v1543_v44 }
 0x1cc   : > { %v2257_v57 = vadd.f32 %v2256_v55, %v2255_v52  ;;  %v2368_v58 = vpop.f32.mrb[63].mxu1  ;;  %v2563_v43 = vpop.eup (!%p1983_p12), %2562  ;;  %v1509_v52 = vld [vmem:[#allocation2 + $0xb0] sm:$0xff] (!%p1983_p12)  ;;  %v1546_v55 = vadd.f32 (!%p1983_p12), %v3007_v3, %v1507_v45  ;;  %v1553_v16 = vadd.f32 (!%p1983_p12), %v3007_v3, %v1514_v7 }
 0x1cd   : > { %v1413_v59 = vadd.f32 %v2366_v53, %v2254_v50  ;;  %v2369_v60 = vadd.f32 %v2368_v58, %v2367_v54  ;;  %1486 = sbr.rel (%p1983_p12) target bundleno = 493 (0x1ed), region = 63  ;;  %v2565_v46 = vpop.eup (!%p1983_p12), %2564  ;;  %v2059_v47 = vpack.c.bf16 (!%p1983_p12), %v2563_v43, %v2561_v39  ;;  %v1547_v58 = vadd.f32 (!%p1983_p12), %v3007_v3, %v1508_v49 }
 0x1ce   : > { %v2567_v50 = vpop.eup (!%p1983_p12), %2566  ;;  %2592 = vtanh.f32 (!%p1983_p12), %v1544_v48 }
 0x1cf   : > { %v1449_v62 = vadd.f32 %v1413_v59, %v451_v56  ;;  %v1416_v63 = vadd.f32 %v2369_v60, %v2257_v57  ;;  %v2569_v53 = vpop.eup (!%p1983_p12), %2568  ;;  %2131 = vst [vmem:[%s2896_s24 + $0x8] sm:$0xff] (!%p1983_p12), %v2059_v47   ;;  %v2064_v54 = vpack.c.bf16 (!%p1983_p12), %v2567_v50, %v2565_v46  ;;  %v1510_v56 = vld [vmem:[#allocation2 + $0xb8] sm:$0xff] (!%p1983_p12)  ;;  %v1511_v59 = vld [vmem:[#allocation2 + $0xc0] sm:$0xff] (!%p1983_p12)  ;;  %2594 = vtanh.f32 (!%p1983_p12), %v1545_v51 }
 0x1d0   : > { %v2571_v57 = vpop.eup (!%p1983_p12), %2570  ;;  %v1549_v1 = vadd.f32 (!%p1983_p12), %v3007_v3, %v1510_v56  ;;  %2596 = vtanh.f32 (!%p1983_p12), %v1546_v55  ;;  %v1550_v6 = vadd.f32 (!%p1983_p12), %v3007_v3, %v1511_v59  ;;  %v1515_v10 = vld [vmem:[#allocation2 + $0xe0] sm:$0xff] (!%p1983_p12) }
 0x1d1   : > { %1481 = vst [vmem:[#allocation2 + $0xf0] sm:$0xff] %v1449_v62  ;;  %v1450_v0 = vadd.f32 %v1416_v63, %v452_v61  ;;  %v2573_v60 = vpop.eup (!%p1983_p12), %2572  ;;  %2132 = vst [vmem:[%s2896_s24 + $0x10] sm:$0xff] (!%p1983_p12), %v2064_v54   ;;  %v2069_v61 = vpack.c.bf16 (!%p1983_p12), %v2571_v57, %v2569_v53  ;;  %v1548_v62 = vadd.f32 (!%p1983_p12), %v3007_v3, %v1509_v52  ;;  %v1512_v63 = vld [vmem:[#allocation2 + $0xc8] sm:$0xff] (!%p1983_p12)  ;;  %2598 = vtanh.f32 (!%p1983_p12), %v1547_v58 }
 0x1d2   : > { %v1551_v9 = vadd.f32 (!%p1983_p12), %v3007_v3, %v1512_v63  ;;  %v1516_v14 = vld [vmem:[#allocation2 + $0xe8] sm:$0xff] (!%p1983_p12)  ;;  %v1554_v20 = vadd.f32 (!%p1983_p12), %v3007_v3, %v1515_v10 }
 0x1d3   : > { %1482 = vst [vmem:[#allocation2 + $0xf8] sm:$0xff] %v1450_v0  ;;  %v2575_v0 = vpop.eup (!%p1983_p12), %2574  ;;  %2133 = vst [vmem:[%s2896_s24 + $0x18] sm:$0xff] (!%p1983_p12), %v2069_v61   ;;  %2600 = vtanh.f32 (!%p1983_p12), %v1548_v62  ;;  %v1555_v23 = vadd.f32 (!%p1983_p12), %v3007_v3, %v1516_v14 }
 0x1d4   : > { %v2577_v4 = vpop.eup %2576  ;;  %v2074_v5 = vpack.c.bf16 %v2575_v0, %v2573_v60  ;;  %2602 = vtanh.f32 %v1549_v1 }
 0x1d5   : > { %v2579_v8 = vpop.eup %2578  ;;  %2604 = vtanh.f32 %v1550_v6 }
 0x1d6   : > { %v2581_v11 = vpop.eup %2580  ;;  %2134 = vst [vmem:[%s2896_s24 + $0x20] sm:$0xff] %v2074_v5   ;;  %v2079_v12 = vpack.c.bf16 %v2579_v8, %v2577_v4  ;;  %2606 = vtanh.f32 %v1551_v9 }
 0x1d7   : > { %v2583_v15 = vpop.eup %2582  ;;  %2608 = vtanh.f32 %v1552_v13 }
 0x1d8   : > { %v1517_v17 = vld [vmem:[#allocation2 + $0xf0] sm:$0xff]  ;;  %v2585_v18 = vpop.eup %2584  ;;  %2135 = vst [vmem:[%s2896_s24 + $0x28] sm:$0xff] %v2079_v12   ;;  %v2084_v19 = vpack.c.bf16 %v2583_v15, %v2581_v11  ;;  %2610 = vtanh.f32 %v1553_v16 }
 0x1d9   : > { %v2587_v22 = vpop.eup %2586  ;;  %v1556_v26 = vadd.f32 %v3007_v3, %v1517_v17  ;;  %2612 = vtanh.f32 %v1554_v20 }
 0x1da   : > { %v1518_v21 = vld [vmem:[#allocation2 + $0xf8] sm:$0xff]  ;;  %v2589_v24 = vpop.eup %2588  ;;  %2136 = vst [vmem:[%s2896_s24 + $0x30] sm:$0xff] %v2084_v19   ;;  %v2089_v25 = vpack.c.bf16 %v2587_v22, %v2585_v18  ;;  %2614 = vtanh.f32 %v1555_v23 }
 0x1db   : > { %v2591_v27 = vpop.eup %2590  ;;  %v1557_v28 = vadd.f32 %v3007_v3, %v1518_v21  ;;  %2616 = vtanh.f32 %v1556_v26 }
 0x1dc   : > { %v2593_v29 = vpop.eup %2592  ;;  %2137 = vst [vmem:[%s2896_s24 + $0x38] sm:$0xff] %v2089_v25   ;;  %v2094_v30 = vpack.c.bf16 %v2591_v27, %v2589_v24 }
 0x1dd   : > { %v2595_v31 = vpop.eup %2594  ;;  %2618 = vtanh.f32 %v1557_v28 }
 0x1de   : > { %v2597_v32 = vpop.eup %2596  ;;  %2138 = vst [vmem:[%s2896_s24 + $0x40] sm:$0xff] %v2094_v30   ;;  %v2099_v33 = vpack.c.bf16 %v2595_v31, %v2593_v29 }
 0x1df   : > { %v2599_v34 = vpop.eup %2598 }
 0x1e0   : > { %v2601_v35 = vpop.eup %2600  ;;  %2139 = vst [vmem:[%s2896_s24 + $0x48] sm:$0xff] %v2099_v33   ;;  %v2104_v36 = vpack.c.bf16 %v2599_v34, %v2597_v32 }
 0x1e1   : > { %v2603_v3 = vpop.eup %2602 }
 0x1e2   : > { %v2605_v37 = vpop.eup %2604  ;;  %2140 = vst [vmem:[%s2896_s24 + $0x50] sm:$0xff] %v2104_v36   ;;  %v2109_v38 = vpack.c.bf16 %v2603_v3, %v2601_v35 }
 0x1e3   : > { %v2607_v39 = vpop.eup %2606 }
 0x1e4   : > { %v2609_v40 = vpop.eup %2608  ;;  %2141 = vst [vmem:[%s2896_s24 + $0x58] sm:$0xff] %v2109_v38   ;;  %v2114_v41 = vpack.c.bf16 %v2607_v39, %v2605_v37 }
 0x1e5   : > { %v2611_v42 = vpop.eup %2610 }
 0x1e6   : > { %v2613_v43 = vpop.eup %2612  ;;  %2142 = vst [vmem:[%s2896_s24 + $0x60] sm:$0xff] %v2114_v41   ;;  %v2119_v44 = vpack.c.bf16 %v2611_v42, %v2609_v40 }
 0x1e7   : > { %v2615_v45 = vpop.eup %2614 }
 0x1e8   : > { %v2617_v46 = vpop.eup %2616  ;;  %2143 = vst [vmem:[%s2896_s24 + $0x68] sm:$0xff] %v2119_v44   ;;  %v2124_v47 = vpack.c.bf16 %v2615_v45, %v2613_v43 }
 0x1e9   : > { %v2619_v48 = vpop.eup %2618 }
 0x1ea   : > { %2144 = vst [vmem:[%s2896_s24 + $0x70] sm:$0xff] %v2124_v47   ;;  %v2129_v49 = vpack.c.bf16 %v2619_v48, %v2617_v46 }
 0x1ec   : > { %2145 = vst [vmem:[%s2896_s24 + $0x78] sm:$0xff] %v2129_v49  }
 0x1ed PF: > { %s13_s18 = sadd.s32 1, %s2674_s18   ;;  %s3082_s12 = smov %s2654_s13 }
 0x1ee   : > { %p10_p13 = scmp.ge.s32.totalorder %s13_s18, 16   ;;  %s3083_s13 = smov %s2748_s25 }
 0x1ef   : > { %s3084_s14 = smov %s2666_s16  ;;  %s3085_s15 = smov %s2670_s17 }
 0x1f0   : > { %s3086_s16 = smov %s3089_s19  ;;  %s3087_s17 = smov %s3093_s20 }
 0x1f1   :  { %12 = sbr.rel (!%p10_p13) target bundleno = 4 (0x4), region = 105 }

</bundles_post_ra>
